<compile_context>
chip_gen: v7x
topology: tpu7x:2x2x1
jax: 0.10.0
libtpu: 0.0.40
codegen_flags: <defaults>
</compile_context>

<pallas_src>
import functools
import math

import jax
import jax.numpy as jnp
from jax import lax
from jax.experimental import pallas as pl
from jax.experimental.pallas import tpu as pltpu


# ----------------------------------------------------------------------------
# Tiling knobs (512 tiles fit comfortably in VMEM on v5e/v6e/v7x)
# ----------------------------------------------------------------------------

def _device_kind():
    try:
        return jax.devices()[0].device_kind.lower()
    except Exception:
        return ""

_IS_V7 = "v7" in _device_kind()
CORR_TILE = 512
MM_TILE = 512
UPS_TILE = 512
VMEM_LIMIT = (48 if _IS_V7 else 64) * 1024 * 1024


def _pick_tile(dim, pref, align, min_blocks=1):
    """Largest tile <= pref that divides dim and is a multiple of align.
    min_blocks>1 caps the tile so at least that many grid points exist (keeps both
    v7x TensorCores busy when B == 1).  Falls back to the full dim.
    # TODO(synk): for pathological HW with no aligned divisor, switch to a
    # pl.cdiv grid with masking instead of a full-dim block."""
    if min_blocks > 1 and dim >= min_blocks * align:
        pref = min(pref, dim // min_blocks)
    if dim <= pref:
        return dim
    t = (pref // align) * align
    while t >= align:
        if dim % t == 0:
            return t
        t -= align
    return dim


# ----------------------------------------------------------------------------
# Kernel 1: tiled matmul + bias (+ optional activation epilogue)
# ----------------------------------------------------------------------------

def _matmul_bias_kernel(x_ref, w_ref, b_ref, o_ref, *, activation):
    # x: (1, tm, K) bf16, w: (K, N) bf16, b: (1, N) f32 -> o: (1, tm, N) out_dtype
    o = jnp.dot(x_ref[0], w_ref[...], preferred_element_type=jnp.float32) + b_ref[...]
    if activation == "relu":
        o = jnp.maximum(o, 0.0)
    o_ref[0] = o.astype(o_ref.dtype)


def matmul_bias(x, w, b, *, out_dtype=jnp.float32, activation="none", tm_pref=MM_TILE):
    """x: (B, M, K) @ w: (K, N) + b: (N,) -> (B, M, N).  Channel-last, HW (=M)
    tiled across the grid, bf16 operands on the MXU with f32 accumulation."""
    B, M, K = x.shape
    N = w.shape[1]
    tm = _pick_tile(M, tm_pref, 16, min_blocks=(2 if B == 1 else 1))
    b2 = b.reshape(1, N).astype(jnp.float32)
    kern = functools.partial(_matmul_bias_kernel, activation=activation)
    return pl.pallas_call(
        kern,
        out_shape=jax.ShapeDtypeStruct((B, M, N), out_dtype),
        grid=(B, M // tm),
        in_specs=[
            pl.BlockSpec((1, tm, K), lambda bi, i: (bi, i, 0)),
            pl.BlockSpec((K, N), lambda bi, i: (0, 0)),
            pl.BlockSpec((1, N), lambda bi, i: (0, 0)),
        ],
        out_specs=pl.BlockSpec((1, tm, N), lambda bi, i: (bi, i, 0)),
        compiler_params=pltpu.CompilerParams(
            dimension_semantics=("parallel", "parallel"),
            vmem_limit_bytes=VMEM_LIMIT),
    )(x.astype(jnp.bfloat16), w.astype(jnp.bfloat16), b2)


# ----------------------------------------------------------------------------
# Kernel 2: all-pairs cost volume (PriOr_RAFT.corr)
# ----------------------------------------------------------------------------

def _corr_kernel(f1_ref, f2_ref, o_ref, *, inv_sqrt_dim):
    # f1: (1, tm, D), f2: (1, tn, D) bf16 -> o: (1, tm, tn) = f1 @ f2^T / sqrt(D)
    c = lax.dot_general(f1_ref[0], f2_ref[0], (((1,), (1,)), ((), ())),
                        preferred_element_type=jnp.float32)
    o_ref[0] = (c * inv_sqrt_dim).astype(o_ref.dtype)


def corr_pallas(fmap1, fmap2, out_dtype=jnp.bfloat16):
    """Exact semantics of PriOr_RAFT.corr on channel-last (B, HW, D) inputs.
    Tiled over both HW axes so the (HW, HW) volume never sits whole in VMEM."""
    B, HW, D = fmap1.shape
    tm = _pick_tile(HW, CORR_TILE, 16, min_blocks=(2 if B == 1 else 1))  # 16: bf16 sublane pack
    tn = _pick_tile(HW, CORR_TILE, 128)
    kern = functools.partial(_corr_kernel, inv_sqrt_dim=1.0 / math.sqrt(float(D)))
    return pl.pallas_call(
        kern,
        out_shape=jax.ShapeDtypeStruct((B, HW, HW), out_dtype),
        grid=(B, HW // tm, HW // tn),
        in_specs=[
            pl.BlockSpec((1, tm, D), lambda b, i, j: (b, i, 0)),
            pl.BlockSpec((1, tn, D), lambda b, i, j: (b, j, 0)),
        ],
        out_specs=pl.BlockSpec((1, tm, tn), lambda b, i, j: (b, i, j)),
        compiler_params=pltpu.CompilerParams(
            dimension_semantics=("parallel", "parallel", "parallel"),
            vmem_limit_bytes=VMEM_LIMIT),
    )(fmap1.astype(jnp.bfloat16), fmap2.astype(jnp.bfloat16))


# ----------------------------------------------------------------------------
# Kernel 3: fused groupwise_corr + radius-0 lookup + dynamic update-head channels
# ----------------------------------------------------------------------------

def _update_feat_kernel(f1_ref, w2_ref, flow_ref, base_ref, wdyn_ref, o_ref,
                        *, num_groups, inv_sqrt_dim):
    # bf16 inputs are upcast immediately; all VPU math stays in f32 (v5e-safe).
    f1 = f1_ref[0].astype(jnp.float32)            # (tq, C)
    wp = w2_ref[0].astype(jnp.float32)            # (tq, C)
    prod = f1 * wp
    cpg = prod.shape[-1] // num_groups
    wdyn = wdyn_ref[...]                          # (8, N) rows: corr, fx, fy, flaw0..3, pad
    flow = flow_ref[0]                            # (tq, 2) f32

    gsums = []
    total = None
    for g in range(num_groups):                   # VPU/XLU reduction, no MXU
        gs = jnp.sum(prod[:, g * cpg:(g + 1) * cpg], axis=-1, keepdims=True)  # (tq,1)
        gsums.append(gs)
        total = gs if total is None else total + gs

    # dyn @ W1_dyn as broadcast FMAs (no lane-dim concat of 1-wide columns),
    # added to the loop-invariant base and ReLU'd -> lane-dense bf16 output.
    acc = base_ref[0]                                          # (tq, N) f32
    acc = acc + (total * inv_sqrt_dim) * wdyn[0:1, :]          # radius-0 corr lookup channel
    acc = acc + flow[:, 0:1] * wdyn[1:2, :]
    acc = acc + flow[:, 1:2] * wdyn[2:3, :]
    inv_cpg = 1.0 / float(cpg)
    for g in range(num_groups):                                # groupwise_corr channels
        acc = acc + (gsums[g] * inv_cpg) * wdyn[3 + g:4 + g, :]
    o_ref[0] = jnp.maximum(acc, 0.0).astype(o_ref.dtype)


def update_feat_pallas(fmap1, warped2, flow, base, w_dyn, num_groups=4):
    """Fused: groupwise_corr(fmap1, warped2) + single-level radius-0 cost-volume
    lookup (= <fmap1, warp(fmap2)>/sqrt(C) by linearity of bilinear sampling) +
    projection of the 8 dynamic channels by W1_dyn + base add + ReLU.
    Returns the hidden activation h (B, HW, 128) in bf16."""
    B, HW, C = fmap1.shape
    assert C % num_groups == 0
    Kd, N = w_dyn.shape
    tq = _pick_tile(HW, MM_TILE, 16, min_blocks=(2 if B == 1 else 1))
    kern = functools.partial(_update_feat_kernel, num_groups=num_groups,
                             inv_sqrt_dim=1.0 / math.sqrt(float(C)))
    return pl.pallas_call(
        kern,
        out_shape=jax.ShapeDtypeStruct((B, HW, N), jnp.bfloat16),
        grid=(B, HW // tq),
        in_specs=[
            pl.BlockSpec((1, tq, C), lambda b, i: (b, i, 0)),
            pl.BlockSpec((1, tq, C), lambda b, i: (b, i, 0)),
            pl.BlockSpec((1, tq, 2), lambda b, i: (b, i, 0)),
            pl.BlockSpec((1, tq, N), lambda b, i: (b, i, 0)),
            pl.BlockSpec((Kd, N), lambda b, i: (0, 0)),
        ],
        out_specs=pl.BlockSpec((1, tq, N), lambda b, i: (b, i, 0)),
        compiler_params=pltpu.CompilerParams(
            dimension_semantics=("parallel", "parallel"),
            vmem_limit_bytes=VMEM_LIMIT),
    )(fmap1.astype(jnp.bfloat16), warped2.astype(jnp.bfloat16),
      flow.astype(jnp.float32), base.astype(jnp.float32),
      w_dyn.astype(jnp.float32))


# ----------------------------------------------------------------------------
# Kernel 4: update-head output, emitted channel-first (mask bf16, flow f32)
# ----------------------------------------------------------------------------

def _head_out_kernel(h_ref, w2t_ref, b_ref, mask_ref, flow_ref, *, mask_ch, flow_ch):
    # (N, K) @ (tm, K)^T -> (N, tm): channel-first output so the 576-channel mask
    # needs no XLA transpose before the upsample kernel; mask stored in bf16.
    o = lax.dot_general(w2t_ref[...], h_ref[0], (((1,), (1,)), ((), ())),
                        preferred_element_type=jnp.float32) + b_ref[...]
    mask_ref[0] = o[0:mask_ch, :].astype(mask_ref.dtype)
    flow_ref[0] = o[mask_ch:mask_ch + flow_ch, :]


def head_out_pallas(h, w2t, b2, mask_ch=576, flow_ch=2):
    """h: (B, HW, K) bf16; w2t: (N, K) with rows [mask(576), flow(2), pad];
    returns (mask (B,576,HW) bf16, flow_head (B,2,HW) f32)."""
    B, HW, K = h.shape
    N = w2t.shape[0]
    tm = _pick_tile(HW, MM_TILE, 128, min_blocks=(2 if B == 1 else 1))
    b2c = b2.reshape(N, 1).astype(jnp.float32)
    kern = functools.partial(_head_out_kernel, mask_ch=mask_ch, flow_ch=flow_ch)
    mask, flow_head = pl.pallas_call(
        kern,
        out_shape=(jax.ShapeDtypeStruct((B, mask_ch, HW), jnp.bfloat16),
                   jax.ShapeDtypeStruct((B, flow_ch, HW), jnp.float32)),
        grid=(B, HW // tm),
        in_specs=[
            pl.BlockSpec((1, tm, K), lambda b, i: (b, i, 0)),
            pl.BlockSpec((N, K), lambda b, i: (0, 0)),
            pl.BlockSpec((N, 1), lambda b, i: (0, 0)),
        ],
        out_specs=(pl.BlockSpec((1, mask_ch, tm), lambda b, i: (b, 0, i)),
                   pl.BlockSpec((1, flow_ch, tm), lambda b, i: (b, 0, i))),
        compiler_params=pltpu.CompilerParams(
            dimension_semantics=("parallel", "parallel"),
            vmem_limit_bytes=VMEM_LIMIT),
    )(h.astype(jnp.bfloat16), w2t.astype(jnp.bfloat16), b2c)
    return mask, flow_head


# ----------------------------------------------------------------------------
# Kernel 5: convex upsampling (PriOr_RAFT.upsample_flow)
# ----------------------------------------------------------------------------

def _upsample_kernel(mask_ref, nbr_ref, o_ref):
    # mask: (1, 9, 64, t) bf16; nbr: (1, 2, 9, t) f32; o: (1, 2, 64, t) f32
    m = mask_ref[0].astype(jnp.float32)                      # f32 math (v5e-safe)
    m = m - jnp.max(m, axis=0)
    e = jnp.exp(m)                                           # EUP
    inv = pl.reciprocal(jnp.sum(e, axis=0), approx=True)     # (64, t), EUP free slot
    for c in range(2):
        acc = e[0] * nbr_ref[0, c, 0:1, :]                   # (64,t) * (1,t)
        for k in range(1, 9):
            acc = acc + e[k] * nbr_ref[0, c, k:k + 1, :]
        o_ref[0, c] = acc * inv                              # normalize once per channel


def _unfold3x3(x):
    # (B, C, H, W) -> (B, C, 9, H, W), zero padding, taps in row-major order
    B, C, H, W = x.shape
    xp = jnp.pad(x, ((0, 0), (0, 0), (1, 1), (1, 1)))
    taps = []
    for di in range(3):
        for dj in range(3):
            taps.append(xp[:, :, di:di + H, dj:dj + W])
    return jnp.stack(taps, axis=2)


def upsample_flow_pallas(flow, mask_cf, H8, W8):
    """Exact semantics of PriOr_RAFT.upsample_flow.
    flow: (B, H8, W8, 2) f32; mask_cf: (B, 576, HW) bf16 channel-first (as emitted
    by head_out_pallas, so no transpose is needed here)."""
    B = flow.shape[0]
    HW = H8 * W8
    flow_chw = jnp.transpose(flow, (0, 3, 1, 2))                    # tiny (2 channels)
    nbr = _unfold3x3(8.0 * flow_chw).reshape(B, 2, 9, HW).astype(jnp.float32)
    m = mask_cf.reshape(B, 9, 64, HW)                               # free reshape
    t = _pick_tile(HW, UPS_TILE, 128, min_blocks=(2 if B == 1 else 1))
    out = pl.pallas_call(
        _upsample_kernel,
        out_shape=jax.ShapeDtypeStruct((B, 2, 64, HW), jnp.float32),
        grid=(B, HW // t),
        in_specs=[
            pl.BlockSpec((1, 9, 64, t), lambda b, j: (b, 0, 0, j)),
            pl.BlockSpec((1, 2, 9, t), lambda b, j: (b, 0, 0, j)),
        ],
        out_specs=pl.BlockSpec((1, 2, 64, t), lambda b, j: (b, 0, 0, j)),
        compiler_params=pltpu.CompilerParams(
            dimension_semantics=("parallel", "parallel"),
            vmem_limit_bytes=VMEM_LIMIT),
    )(m, nbr)
    out = out.reshape(B, 2, 8, 8, H8, W8)
    out = jnp.transpose(out, (0, 1, 4, 2, 5, 3)).reshape(B, 2, 8 * H8, 8 * W8)
    return out


# ----------------------------------------------------------------------------
# JAX glue (coords, bilinear feature warp)
# ----------------------------------------------------------------------------

def coords_grid(batch, ht, wd):
    y, x = jnp.meshgrid(jnp.arange(ht, dtype=jnp.float32),
                        jnp.arange(wd, dtype=jnp.float32), indexing="ij")
    coords = jnp.stack([x, y], axis=-1)                # (H, W, 2), [x, y] order
    return jnp.broadcast_to(coords[None], (batch, ht, wd, 2))


def bilinear_sample(feat, coords, H, W):
    """feat: (B, H*W, C) channel-last (bf16), row-major spatial; coords: (B, Nq, 2).
    Cyclic wrap in x, clamp in y.  Output in feat.dtype (bf16 -> halves the HBM
    round-trip of the warped features).
    # TODO(synk): exact cycle_bilinear_sampler edge rules not provided in source;
    # this per-row gather stays in XLA (a fully fused in-kernel DMA gather is a
    # further optimization)."""
    B, HW, C = feat.shape
    x = coords[..., 0]
    y = coords[..., 1]
    x0 = jnp.floor(x)
    y0 = jnp.floor(y)
    wx1 = x - x0
    wy1 = y - y0
    wx0 = 1.0 - wx1
    wy0 = 1.0 - wy1

    def gather(xi, yi):
        xi = jnp.mod(xi.astype(jnp.int32), W)
        yi = jnp.clip(yi.astype(jnp.int32), 0, H - 1)
        idx = yi * W + xi                              # (B, Nq)
        idx = jnp.broadcast_to(idx[..., None], (B, idx.shape[1], C))
        return jnp.take_along_axis(feat, idx, axis=1)  # (B, Nq, C)

    out = (gather(x0, y0) * (wx0 * wy0)[..., None]
           + gather(x0 + 1, y0) * (wx1 * wy0)[..., None]
           + gather(x0, y0 + 1) * (wx0 * wy1)[..., None]
           + gather(x0 + 1, y0 + 1) * (wx1 * wy1)[..., None])
    return out.astype(feat.dtype)


# ----------------------------------------------------------------------------
# Deterministic parameters (stand-ins for the unspecified sub-modules)
# ----------------------------------------------------------------------------

def init_params(key):
    ks = jax.random.split(key, 5)
    s = 0.02
    return {
        # TODO(synk): BasicEncoder (fnet/cnet) definitions not provided; replaced by
        # an 8x8-stride patch-embedding projection (192 = 3*8*8 -> 256).
        "fnet_w": s * jax.random.normal(ks[0], (192, 256), jnp.float32),
        "fnet_b": jnp.zeros((256,), jnp.float32),
        "cnet_w": s * jax.random.normal(ks[1], (192, 256), jnp.float32),
        "cnet_b": jnp.zeros((256,), jnp.float32),
        # TODO(synk): BasicUpdateBlock / BasicMultiUpdateBlock (GRU) not provided;
        # replaced by a 2-layer 1x1-conv head.  W1 is split: context part (256->128,
        # loop-invariant) and dynamic part (8->128: corr, flow_x, flow_y, 4x flaw, pad).
        "upd_w1_ctx": s * jax.random.normal(ks[2], (256, 128), jnp.float32),
        "upd_w1_dyn": s * jax.random.normal(ks[3], (8, 128), jnp.float32),
        "upd_b1": jnp.zeros((128,), jnp.float32),
        # W2 stored transposed (N, K), rows: mask(576), flow(2), pad(6) -> N = 584.
        "upd_w2t": s * jax.random.normal(ks[4], (584, 128), jnp.float32),
        "upd_b2": jnp.zeros((584,), jnp.float32),
    }


# ----------------------------------------------------------------------------
# Forward pass (branch A; the rotated branch B requires projection_prim_ortho)
# ----------------------------------------------------------------------------

def prior_raft_forward(params, image1, image2, iters=2):
    # TODO(synk): projection_prim_ortho rotation branch (B) not provided in source;
    # only the planar branch A of the forward is implemented here.
    image1 = 2.0 * (image1 / 255.0) - 1.0
    image2 = 2.0 * (image2 / 255.0) - 1.0
    B, _, H, W = image1.shape
    H8, W8 = H // 8, W // 8
    HW = H8 * W8
    hdim, cdim = 128, 128

    def patchify(img):
        x = img.reshape(B, 3, H8, 8, W8, 8)
        return jnp.transpose(x, (0, 2, 4, 1, 3, 5)).reshape(B, HW, 3 * 64)

    p1 = patchify(image1)
    p2 = patchify(image2)
    # Encoders (Pallas matmul kernels); feature maps emitted directly in bf16
    # since every downstream consumer (corr / fused corr+flaw) reads bf16.
    fmap1 = matmul_bias(p1, params["fnet_w"], params["fnet_b"], out_dtype=jnp.bfloat16)
    fmap2 = matmul_bias(p2, params["fnet_w"], params["fnet_b"], out_dtype=jnp.bfloat16)
    cnet = matmul_bias(p1, params["cnet_w"], params["cnet_b"], out_dtype=jnp.float32)

    net = jnp.tanh(cnet[..., :hdim])
    inp = jax.nn.relu(cnet[..., hdim:hdim + cdim])

    # Loop-invariant half of the update head's first 1x1 conv, computed once.
    ctx = jnp.concatenate([net, inp], axis=-1)                      # (B, HW, 256)
    base = matmul_bias(ctx, params["upd_w1_ctx"], params["upd_b1"],
                       out_dtype=jnp.float32)                       # (B, HW, 128)

    # initialize_flow (channel-last coords, (x, y) in the last dim)
    coords0 = coords_grid(B, H8, W8)
    coords1 = coords_grid(B, H8, W8)

    flow_predictions = []
    for _ in range(iters):
        flow = coords1 - coords0                                     # (B, H8, W8, 2)
        warped2 = bilinear_sample(fmap2, coords1.reshape(B, HW, 2), H8, W8)  # bf16

        # TODO(synk): DCCL multi-level radius-4 pyramid lookup not provided.
        # The radius-0/level-0 stand-in lookup of the all-pairs cost volume at
        # coords1 equals <fmap1[q], bilinear_warp(fmap2)[q]> / sqrt(D) by linearity
        # of bilinear sampling; it is FUSED with groupwise_corr and the dynamic
        # half of the update-head projection (no (B, HW, HW) volume per iteration).
        h = update_feat_pallas(fmap1, warped2, flow.reshape(B, HW, 2), base,
                               params["upd_w1_dyn"], num_groups=4)   # (B, HW, 128) bf16

        # Update head output, channel-first: mask (B,576,HW) bf16, flow head (B,2,HW)
        up_mask, flow_head = head_out_pallas(h, params["upd_w2t"], params["upd_b2"])
        delta_flow = 0.5 * jnp.tanh(flow_head)                       # (B, 2, HW)
        delta_flow = jnp.transpose(delta_flow, (0, 2, 1)).reshape(B, H8, W8, 2)

        coords1 = coords1 + delta_flow
        flow_down = coords1 - coords0
        flow_up = upsample_flow_pallas(flow_down, up_mask, H8, W8)   # (B, 2, 8*H8, 8*W8)
        flow_predictions.append(flow_up)

    return flow_predictions


# ----------------------------------------------------------------------------
# Main
# ----------------------------------------------------------------------------

if __name__ == "__main__":
    key = jax.random.PRNGKey(0)
    kp, k1, k2, k3, k4, k5, k6 = jax.random.split(key, 7)
    params = init_params(kp)

    B, C, H, W = 2, 3, 64, 64
    image1 = jax.random.uniform(k1, (B, C, H, W), jnp.float32, 0.0, 255.0)
    image2 = jax.random.uniform(k2, (B, C, H, W), jnp.float32, 0.0, 255.0)

    fwd = jax.jit(lambda p, a, b: prior_raft_forward(p, a, b, iters=2))
    preds = jax.block_until_ready(fwd(params, image1, image2))

    final = preds[-1]
    assert final.shape == (B, 2, H, W), final.shape
    assert bool(jnp.all(jnp.isfinite(final)))

    # Standalone check of the all-pairs cost-volume kernel (PriOr_RAFT.corr).
    HW, D = (H // 8) * (W // 8), 256
    f1 = jax.random.normal(k3, (B, HW, D), jnp.float32)
    f2 = jax.random.normal(k4, (B, HW, D), jnp.float32)
    cost = jax.block_until_ready(corr_pallas(f1, f2))
    assert cost.shape == (B, HW, HW)
    ref = jnp.einsum("bqd,bkd->bqk", f1, f2,
                     precision=lax.Precision.HIGHEST) / math.sqrt(float(D))
    assert bool(jnp.all(jnp.isfinite(cost)))
    assert float(jnp.max(jnp.abs(cost.astype(jnp.float32) - ref))) < 0.25  # bf16 tolerance

    # Check of the fused groupwise_corr + radius-0 lookup + dynamic-projection kernel.
    f1b = f1.astype(jnp.bfloat16)
    f2b = f2.astype(jnp.bfloat16)
    flow_t = 0.1 * jax.random.normal(k5, (B, HW, 2), jnp.float32)
    base_t = 0.1 * jax.random.normal(k6, (B, HW, 128), jnp.float32)
    h_k = jax.block_until_ready(
        update_feat_pallas(f1b, f2b, flow_t, base_t, params["upd_w1_dyn"], num_groups=4))
    prod = f1b.astype(jnp.float32) * f2b.astype(jnp.float32)
    gs = prod.reshape(B, HW, 4, D // 4).sum(-1)
    corr_feat = gs.sum(-1, keepdims=True) / math.sqrt(float(D))
    flaw = gs / float(D // 4)
    dyn = jnp.concatenate(
        [corr_feat, flow_t, flaw, jnp.zeros((B, HW, 1), jnp.float32)], axis=-1)
    h_ref = jax.nn.relu(base_t + jnp.einsum("bqk,kn->bqn", dyn, params["upd_w1_dyn"]))
    err = float(jnp.max(jnp.abs(h_k.astype(jnp.float32) - h_ref)))
    assert err < 0.1, err

    print("KERNEL_OK")
</pallas_src>

<mosaic_0001>
module attributes {stable_mosaic.version = 11 : i64} {
  func.func private @main(%arg0: i32) attributes {dimension_semantics = [#tpu.dimension_semantics<core_parallel>], iteration_bounds = array<i64: 2>, tpu.core_type = #tpu.core_type<sc_scalar_subcore>, window_params = []} {
    return
  }
}

module attributes {stable_mosaic.version = 11 : i64} {
  func.func private @main(%arg0: i32) attributes {dimension_semantics = [#tpu.dimension_semantics<core_parallel>], iteration_bounds = array<i64: 2>, tpu.core_type = #tpu.core_type<sc_scalar_subcore>, window_params = []} {
    return
  }
}

module attributes {stable_mosaic.version = 11 : i64} {
  func.func @_matmul_bias_kernel(%arg0: i32, %arg1: i32, %arg2: memref<1x64x192xbf16, #tpu.memory_space<vmem>>, %arg3: memref<192x256xbf16, #tpu.memory_space<vmem>>, %arg4: memref<1x256xf32, #tpu.memory_space<vmem>>, %arg5: memref<1x64x256xbf16, #tpu.memory_space<vmem>>) attributes {dimension_semantics = [#tpu.dimension_semantics<parallel>, #tpu.dimension_semantics<parallel>], iteration_bounds = array<i64: 2, 1>, scalar_prefetch = 0 : i64, scratch_operands = 0 : i64, tpu.core_type = #tpu.core_type<tc>, window_params = [{transform_indices = @transform_0, window_bounds = array<i64: 1, 64, 192>}, {pipeline_mode = #tpu.pipeline_mode<synchronous>, transform_indices = @transform_1, window_bounds = array<i64: 192, 256>}, {pipeline_mode = #tpu.pipeline_mode<synchronous>, transform_indices = @transform_2, window_bounds = array<i64: 1, 256>}, {transform_indices = @transform_3, window_bounds = array<i64: 1, 64, 256>}]} {
    %c0 = arith.constant 0 : index
    %c0_0 = arith.constant 0 : index
    %c0_1 = arith.constant 0 : index
    %0 = vector.load %arg2[%c0, %c0_0, %c0_1] : memref<1x64x192xbf16, #tpu.memory_space<vmem>>, vector<1x64x192xbf16>
    %1 = vector.shape_cast %0 : vector<1x64x192xbf16> to vector<64x192xbf16>
    %c0_2 = arith.constant 0 : index
    %c0_3 = arith.constant 0 : index
    %2 = vector.load %arg3[%c0_2, %c0_3] : memref<192x256xbf16, #tpu.memory_space<vmem>>, vector<192x256xbf16>
    %cst = arith.constant dense<0.000000e+00> : vector<64x256xf32>
    %3 = tpu.matmul %1, %2, %cst {dimension_numbers = #tpu.dot_dimension_numbers<[1], [0], [0], [1], [0, 0, 1, 1], [], []>} : vector<64x192xbf16>, vector<192x256xbf16>, vector<64x256xf32> -> vector<64x256xf32>
    %c0_4 = arith.constant 0 : index
    %c0_5 = arith.constant 0 : index
    %4 = vector.load %arg4[%c0_4, %c0_5] : memref<1x256xf32, #tpu.memory_space<vmem>>, vector<1x256xf32>
    %5 = vector.broadcast %4 : vector<1x256xf32> to vector<64x256xf32>
    %6 = arith.addf %3, %5 : vector<64x256xf32>
    %7 = arith.truncf %6 : vector<64x256xf32> to vector<64x256xbf16>
    %c0_6 = arith.constant 0 : index
    %c0_7 = arith.constant 0 : index
    %c0_8 = arith.constant 0 : index
    %8 = vector.load %arg5[%c0_6, %c0_7, %c0_8] : memref<1x64x256xbf16, #tpu.memory_space<vmem>>, vector<1x64x256xbf16>
    %9 = vector.shape_cast %8 : vector<1x64x256xbf16> to vector<64x256xbf16>
    %10 = vector.shape_cast %7 : vector<64x256xbf16> to vector<1x64x256xbf16>
    tpu.vector_store %arg5[%c0_6, %c0_7, %c0_8], %10 {strides = array<i32>} : memref<1x64x256xbf16, #tpu.memory_space<vmem>>, vector<1x64x256xbf16>,
    return
  }
  func.func @transform_0(%arg0: i32, %arg1: i32) -> (i32, i32, i32) {
    %c0_i32 = arith.constant 0 : i32
    %c0_i32_0 = arith.constant 0 : i32
    return %arg0, %arg1, %c0_i32 : i32, i32, i32
  }
  func.func @transform_1(%arg0: i32, %arg1: i32) -> (i32, i32) {
    %c0_i32 = arith.constant 0 : i32
    %c0_i32_0 = arith.constant 0 : i32
    %c0_i32_1 = arith.constant 0 : i32
    return %c0_i32, %c0_i32_0 : i32, i32
  }
  func.func @transform_2(%arg0: i32, %arg1: i32) -> (i32, i32) {
    %c0_i32 = arith.constant 0 : i32
    %c0_i32_0 = arith.constant 0 : i32
    %c0_i32_1 = arith.constant 0 : i32
    return %c0_i32, %c0_i32_0 : i32, i32
  }
  func.func @transform_3(%arg0: i32, %arg1: i32) -> (i32, i32, i32) {
    %c0_i32 = arith.constant 0 : i32
    %c0_i32_0 = arith.constant 0 : i32
    return %arg0, %arg1, %c0_i32 : i32, i32, i32
  }
}

module attributes {stable_mosaic.version = 11 : i64} {
  func.func @_matmul_bias_kernel(%arg0: i32, %arg1: i32, %arg2: memref<1x64x192xbf16, #tpu.memory_space<vmem>>, %arg3: memref<192x256xbf16, #tpu.memory_space<vmem>>, %arg4: memref<1x256xf32, #tpu.memory_space<vmem>>, %arg5: memref<1x64x256xf32, #tpu.memory_space<vmem>>) attributes {dimension_semantics = [#tpu.dimension_semantics<parallel>, #tpu.dimension_semantics<parallel>], iteration_bounds = array<i64: 2, 1>, scalar_prefetch = 0 : i64, scratch_operands = 0 : i64, tpu.core_type = #tpu.core_type<tc>, window_params = [{transform_indices = @transform_0, window_bounds = array<i64: 1, 64, 192>}, {pipeline_mode = #tpu.pipeline_mode<synchronous>, transform_indices = @transform_1, window_bounds = array<i64: 192, 256>}, {pipeline_mode = #tpu.pipeline_mode<synchronous>, transform_indices = @transform_2, window_bounds = array<i64: 1, 256>}, {transform_indices = @transform_3, window_bounds = array<i64: 1, 64, 256>}]} {
    %c0 = arith.constant 0 : index
    %c0_0 = arith.constant 0 : index
    %c0_1 = arith.constant 0 : index
    %0 = vector.load %arg2[%c0, %c0_0, %c0_1] : memref<1x64x192xbf16, #tpu.memory_space<vmem>>, vector<1x64x192xbf16>
    %1 = vector.shape_cast %0 : vector<1x64x192xbf16> to vector<64x192xbf16>
    %c0_2 = arith.constant 0 : index
    %c0_3 = arith.constant 0 : index
    %2 = vector.load %arg3[%c0_2, %c0_3] : memref<192x256xbf16, #tpu.memory_space<vmem>>, vector<192x256xbf16>
    %cst = arith.constant dense<0.000000e+00> : vector<64x256xf32>
    %3 = tpu.matmul %1, %2, %cst {dimension_numbers = #tpu.dot_dimension_numbers<[1], [0], [0], [1], [0, 0, 1, 1], [], []>} : vector<64x192xbf16>, vector<192x256xbf16>, vector<64x256xf32> -> vector<64x256xf32>
    %c0_4 = arith.constant 0 : index
    %c0_5 = arith.constant 0 : index
    %4 = vector.load %arg4[%c0_4, %c0_5] : memref<1x256xf32, #tpu.memory_space<vmem>>, vector<1x256xf32>
    %5 = vector.broadcast %4 : vector<1x256xf32> to vector<64x256xf32>
    %6 = arith.addf %3, %5 : vector<64x256xf32>
    %c0_6 = arith.constant 0 : index
    %c0_7 = arith.constant 0 : index
    %c0_8 = arith.constant 0 : index
    %7 = vector.load %arg5[%c0_6, %c0_7, %c0_8] : memref<1x64x256xf32, #tpu.memory_space<vmem>>, vector<1x64x256xf32>
    %8 = vector.shape_cast %7 : vector<1x64x256xf32> to vector<64x256xf32>
    %9 = vector.shape_cast %6 : vector<64x256xf32> to vector<1x64x256xf32>
    tpu.vector_store %arg5[%c0_6, %c0_7, %c0_8], %9 {strides = array<i32>} : memref<1x64x256xf32, #tpu.memory_space<vmem>>, vector<1x64x256xf32>,
    return
  }
  func.func @transform_0(%arg0: i32, %arg1: i32) -> (i32, i32, i32) {
    %c0_i32 = arith.constant 0 : i32
    %c0_i32_0 = arith.constant 0 : i32
    return %arg0, %arg1, %c0_i32 : i32, i32, i32
  }
  func.func @transform_1(%arg0: i32, %arg1: i32) -> (i32, i32) {
    %c0_i32 = arith.constant 0 : i32
    %c0_i32_0 = arith.constant 0 : i32
    %c0_i32_1 = arith.constant 0 : i32
    return %c0_i32, %c0_i32_0 : i32, i32
  }
  func.func @transform_2(%arg0: i32, %arg1: i32) -> (i32, i32) {
    %c0_i32 = arith.constant 0 : i32
    %c0_i32_0 = arith.constant 0 : i32
    %c0_i32_1 = arith.constant 0 : i32
    return %c0_i32, %c0_i32_0 : i32, i32
  }
  func.func @transform_3(%arg0: i32, %arg1: i32) -> (i32, i32, i32) {
    %c0_i32 = arith.constant 0 : i32
    %c0_i32_0 = arith.constant 0 : i32
    return %arg0, %arg1, %c0_i32 : i32, i32, i32
  }
}

module attributes {stable_mosaic.version = 11 : i64} {
  func.func @_matmul_bias_kernel(%arg0: i32, %arg1: i32, %arg2: memref<1x64x256xbf16, #tpu.memory_space<vmem>>, %arg3: memref<256x128xbf16, #tpu.memory_space<vmem>>, %arg4: memref<1x128xf32, #tpu.memory_space<vmem>>, %arg5: memref<1x64x128xf32, #tpu.memory_space<vmem>>) attributes {dimension_semantics = [#tpu.dimension_semantics<parallel>, #tpu.dimension_semantics<parallel>], iteration_bounds = array<i64: 2, 1>, scalar_prefetch = 0 : i64, scratch_operands = 0 : i64, tpu.core_type = #tpu.core_type<tc>, window_params = [{transform_indices = @transform_0, window_bounds = array<i64: 1, 64, 256>}, {pipeline_mode = #tpu.pipeline_mode<synchronous>, transform_indices = @transform_1, window_bounds = array<i64: 256, 128>}, {pipeline_mode = #tpu.pipeline_mode<synchronous>, transform_indices = @transform_2, window_bounds = array<i64: 1, 128>}, {transform_indices = @transform_3, window_bounds = array<i64: 1, 64, 128>}]} {
    %c0 = arith.constant 0 : index
    %c0_0 = arith.constant 0 : index
    %c0_1 = arith.constant 0 : index
    %0 = vector.load %arg2[%c0, %c0_0, %c0_1] : memref<1x64x256xbf16, #tpu.memory_space<vmem>>, vector<1x64x256xbf16>
    %1 = vector.shape_cast %0 : vector<1x64x256xbf16> to vector<64x256xbf16>
    %c0_2 = arith.constant 0 : index
    %c0_3 = arith.constant 0 : index
    %2 = vector.load %arg3[%c0_2, %c0_3] : memref<256x128xbf16, #tpu.memory_space<vmem>>, vector<256x128xbf16>
    %cst = arith.constant dense<0.000000e+00> : vector<64x128xf32>
    %3 = tpu.matmul %1, %2, %cst {dimension_numbers = #tpu.dot_dimension_numbers<[1], [0], [0], [1], [0, 0, 1, 1], [], []>} : vector<64x256xbf16>, vector<256x128xbf16>, vector<64x128xf32> -> vector<64x128xf32>
    %c0_4 = arith.constant 0 : index
    %c0_5 = arith.constant 0 : index
    %4 = vector.load %arg4[%c0_4, %c0_5] : memref<1x128xf32, #tpu.memory_space<vmem>>, vector<1x128xf32>
    %5 = vector.broadcast %4 : vector<1x128xf32> to vector<64x128xf32>
    %6 = arith.addf %3, %5 : vector<64x128xf32>
    %c0_6 = arith.constant 0 : index
    %c0_7 = arith.constant 0 : index
    %c0_8 = arith.constant 0 : index
    %7 = vector.load %arg5[%c0_6, %c0_7, %c0_8] : memref<1x64x128xf32, #tpu.memory_space<vmem>>, vector<1x64x128xf32>
    %8 = vector.shape_cast %7 : vector<1x64x128xf32> to vector<64x128xf32>
    %9 = vector.shape_cast %6 : vector<64x128xf32> to vector<1x64x128xf32>
    tpu.vector_store %arg5[%c0_6, %c0_7, %c0_8], %9 {strides = array<i32>} : memref<1x64x128xf32, #tpu.memory_space<vmem>>, vector<1x64x128xf32>,
    return
  }
  func.func @transform_0(%arg0: i32, %arg1: i32) -> (i32, i32, i32) {
    %c0_i32 = arith.constant 0 : i32
    %c0_i32_0 = arith.constant 0 : i32
    return %arg0, %arg1, %c0_i32 : i32, i32, i32
  }
  func.func @transform_1(%arg0: i32, %arg1: i32) -> (i32, i32) {
    %c0_i32 = arith.constant 0 : i32
    %c0_i32_0 = arith.constant 0 : i32
    %c0_i32_1 = arith.constant 0 : i32
    return %c0_i32, %c0_i32_0 : i32, i32
  }
  func.func @transform_2(%arg0: i32, %arg1: i32) -> (i32, i32) {
    %c0_i32 = arith.constant 0 : i32
    %c0_i32_0 = arith.constant 0 : i32
    %c0_i32_1 = arith.constant 0 : i32
    return %c0_i32, %c0_i32_0 : i32, i32
  }
  func.func @transform_3(%arg0: i32, %arg1: i32) -> (i32, i32, i32) {
    %c0_i32 = arith.constant 0 : i32
    %c0_i32_0 = arith.constant 0 : i32
    return %arg0, %arg1, %c0_i32 : i32, i32, i32
  }
}

module attributes {stable_mosaic.version = 11 : i64} {
  func.func @_update_feat_kernel(%arg0: i32, %arg1: i32, %arg2: memref<1x64x256xbf16, #tpu.memory_space<vmem>>, %arg3: memref<1x64x256xbf16, #tpu.memory_space<vmem>>, %arg4: memref<1x64x2xf32, #tpu.memory_space<vmem>>, %arg5: memref<1x64x128xf32, #tpu.memory_space<vmem>>, %arg6: memref<8x128xf32, #tpu.memory_space<vmem>>, %arg7: memref<1x64x128xbf16, #tpu.memory_space<vmem>>) attributes {dimension_semantics = [#tpu.dimension_semantics<parallel>, #tpu.dimension_semantics<parallel>], iteration_bounds = array<i64: 2, 1>, scalar_prefetch = 0 : i64, scratch_operands = 0 : i64, tpu.core_type = #tpu.core_type<tc>, window_params = [{transform_indices = @transform_0, window_bounds = array<i64: 1, 64, 256>}, {transform_indices = @transform_1, window_bounds = array<i64: 1, 64, 256>}, {transform_indices = @transform_2, window_bounds = array<i64: 1, 64, 2>}, {transform_indices = @transform_3, window_bounds = array<i64: 1, 64, 128>}, {pipeline_mode = #tpu.pipeline_mode<synchronous>, transform_indices = @transform_4, window_bounds = array<i64: 8, 128>}, {transform_indices = @transform_5, window_bounds = array<i64: 1, 64, 128>}]} {
    %c0 = arith.constant 0 : index
    %c0_0 = arith.constant 0 : index
    %c0_1 = arith.constant 0 : index
    %0 = vector.load %arg2[%c0, %c0_0, %c0_1] : memref<1x64x256xbf16, #tpu.memory_space<vmem>>, vector<1x64x256xbf16>
    %1 = vector.shape_cast %0 : vector<1x64x256xbf16> to vector<64x256xbf16>
    %2 = arith.extf %1 : vector<64x256xbf16> to vector<64x256xf32>
    %c0_2 = arith.constant 0 : index
    %c0_3 = arith.constant 0 : index
    %c0_4 = arith.constant 0 : index
    %3 = vector.load %arg3[%c0_2, %c0_3, %c0_4] : memref<1x64x256xbf16, #tpu.memory_space<vmem>>, vector<1x64x256xbf16>
    %4 = vector.shape_cast %3 : vector<1x64x256xbf16> to vector<64x256xbf16>
    %5 = arith.extf %4 : vector<64x256xbf16> to vector<64x256xf32>
    %6 = arith.mulf %2, %5 : vector<64x256xf32>
    %c0_5 = arith.constant 0 : index
    %c0_6 = arith.constant 0 : index
    %7 = vector.load %arg6[%c0_5, %c0_6] : memref<8x128xf32, #tpu.memory_space<vmem>>, vector<8x128xf32>
    %c0_7 = arith.constant 0 : index
    %c0_8 = arith.constant 0 : index
    %c0_9 = arith.constant 0 : index
    %8 = vector.load %arg4[%c0_7, %c0_8, %c0_9] : memref<1x64x2xf32, #tpu.memory_space<vmem>>, vector<1x64x2xf32>
    %9 = vector.shape_cast %8 : vector<1x64x2xf32> to vector<64x2xf32>
    %10 = vector.extract_strided_slice %6 {offsets = [0, 0], sizes = [64, 64], strides = [1, 1]} : vector<64x256xf32> to vector<64x64xf32>
    %cst = arith.constant dense<0.000000e+00> : vector<64xf32>
    %11 = vector.multi_reduction <add>, %10, %cst [1] : vector<64x64xf32> to vector<64xf32>
    %12 = vector.shape_cast %11 : vector<64xf32> to vector<64x1xf32>
    %13 = vector.extract_strided_slice %6 {offsets = [0, 64], sizes = [64, 64], strides = [1, 1]} : vector<64x256xf32> to vector<64x64xf32>
    %cst_10 = arith.constant dense<0.000000e+00> : vector<64xf32>
    %14 = vector.multi_reduction <add>, %13, %cst_10 [1] : vector<64x64xf32> to vector<64xf32>
    %15 = vector.shape_cast %14 : vector<64xf32> to vector<64x1xf32>
    %16 = arith.addf %12, %15 : vector<64x1xf32>
    %17 = vector.extract_strided_slice %6 {offsets = [0, 128], sizes = [64, 64], strides = [1, 1]} : vector<64x256xf32> to vector<64x64xf32>
    %cst_11 = arith.constant dense<0.000000e+00> : vector<64xf32>
    %18 = vector.multi_reduction <add>, %17, %cst_11 [1] : vector<64x64xf32> to vector<64xf32>
    %19 = vector.shape_cast %18 : vector<64xf32> to vector<64x1xf32>
    %20 = arith.addf %16, %19 : vector<64x1xf32>
    %21 = vector.extract_strided_slice %6 {offsets = [0, 192], sizes = [64, 64], strides = [1, 1]} : vector<64x256xf32> to vector<64x64xf32>
    %cst_12 = arith.constant dense<0.000000e+00> : vector<64xf32>
    %22 = vector.multi_reduction <add>, %21, %cst_12 [1] : vector<64x64xf32> to vector<64xf32>
    %23 = vector.shape_cast %22 : vector<64xf32> to vector<64x1xf32>
    %24 = arith.addf %20, %23 : vector<64x1xf32>
    %c0_13 = arith.constant 0 : index
    %c0_14 = arith.constant 0 : index
    %c0_15 = arith.constant 0 : index
    %25 = vector.load %arg5[%c0_13, %c0_14, %c0_15] : memref<1x64x128xf32, #tpu.memory_space<vmem>>, vector<1x64x128xf32>
    %26 = vector.shape_cast %25 : vector<1x64x128xf32> to vector<64x128xf32>
    %cst_16 = arith.constant 6.250000e-02 : f32
    %27 = vector.broadcast %cst_16 : f32 to vector<64x1xf32>
    %28 = arith.mulf %24, %27 : vector<64x1xf32>
    %29 = vector.extract_strided_slice %7 {offsets = [0, 0], sizes = [1, 128], strides = [1, 1]} : vector<8x128xf32> to vector<1x128xf32>
    %30 = vector.broadcast %28 : vector<64x1xf32> to vector<64x128xf32>
    %31 = vector.broadcast %29 : vector<1x128xf32> to vector<64x128xf32>
    %32 = arith.mulf %30, %31 : vector<64x128xf32>
    %33 = arith.addf %26, %32 : vector<64x128xf32>
    %34 = vector.extract_strided_slice %9 {offsets = [0, 0], sizes = [64, 1], strides = [1, 1]} : vector<64x2xf32> to vector<64x1xf32>
    %35 = vector.extract_strided_slice %7 {offsets = [1, 0], sizes = [1, 128], strides = [1, 1]} : vector<8x128xf32> to vector<1x128xf32>
    %36 = vector.broadcast %34 : vector<64x1xf32> to vector<64x128xf32>
    %37 = vector.broadcast %35 : vector<1x128xf32> to vector<64x128xf32>
    %38 = arith.mulf %36, %37 : vector<64x128xf32>
    %39 = arith.addf %33, %38 : vector<64x128xf32>
    %40 = vector.extract_strided_slice %9 {offsets = [0, 1], sizes = [64, 1], strides = [1, 1]} : vector<64x2xf32> to vector<64x1xf32>
    %41 = vector.extract_strided_slice %7 {offsets = [2, 0], sizes = [1, 128], strides = [1, 1]} : vector<8x128xf32> to vector<1x128xf32>
    %42 = vector.broadcast %40 : vector<64x1xf32> to vector<64x128xf32>
    %43 = vector.broadcast %41 : vector<1x128xf32> to vector<64x128xf32>
    %44 = arith.mulf %42, %43 : vector<64x128xf32>
    %45 = arith.addf %39, %44 : vector<64x128xf32>
    %cst_17 = arith.constant 1.562500e-02 : f32
    %46 = vector.broadcast %cst_17 : f32 to vector<64x1xf32>
    %47 = arith.mulf %12, %46 : vector<64x1xf32>
    %48 = vector.extract_strided_slice %7 {offsets = [3, 0], sizes = [1, 128], strides = [1, 1]} : vector<8x128xf32> to vector<1x128xf32>
    %49 = vector.broadcast %47 : vector<64x1xf32> to vector<64x128xf32>
    %50 = vector.broadcast %48 : vector<1x128xf32> to vector<64x128xf32>
    %51 = arith.mulf %49, %50 : vector<64x128xf32>
    %52 = arith.addf %45, %51 : vector<64x128xf32>
    %cst_18 = arith.constant 1.562500e-02 : f32
    %53 = vector.broadcast %cst_18 : f32 to vector<64x1xf32>
    %54 = arith.mulf %15, %53 : vector<64x1xf32>
    %55 = vector.extract_strided_slice %7 {offsets = [4, 0], sizes = [1, 128], strides = [1, 1]} : vector<8x128xf32> to vector<1x128xf32>
    %56 = vector.broadcast %54 : vector<64x1xf32> to vector<64x128xf32>
    %57 = vector.broadcast %55 : vector<1x128xf32> to vector<64x128xf32>
    %58 = arith.mulf %56, %57 : vector<64x128xf32>
    %59 = arith.addf %52, %58 : vector<64x128xf32>
    %cst_19 = arith.constant 1.562500e-02 : f32
    %60 = vector.broadcast %cst_19 : f32 to vector<64x1xf32>
    %61 = arith.mulf %19, %60 : vector<64x1xf32>
    %62 = vector.extract_strided_slice %7 {offsets = [5, 0], sizes = [1, 128], strides = [1, 1]} : vector<8x128xf32> to vector<1x128xf32>
    %63 = vector.broadcast %61 : vector<64x1xf32> to vector<64x128xf32>
    %64 = vector.broadcast %62 : vector<1x128xf32> to vector<64x128xf32>
    %65 = arith.mulf %63, %64 : vector<64x128xf32>
    %66 = arith.addf %59, %65 : vector<64x128xf32>
    %cst_20 = arith.constant 1.562500e-02 : f32
    %67 = vector.broadcast %cst_20 : f32 to vector<64x1xf32>
    %68 = arith.mulf %23, %67 : vector<64x1xf32>
    %69 = vector.extract_strided_slice %7 {offsets = [6, 0], sizes = [1, 128], strides = [1, 1]} : vector<8x128xf32> to vector<1x128xf32>
    %70 = vector.broadcast %68 : vector<64x1xf32> to vector<64x128xf32>
    %71 = vector.broadcast %69 : vector<1x128xf32> to vector<64x128xf32>
    %72 = arith.mulf %70, %71 : vector<64x128xf32>
    %73 = arith.addf %66, %72 : vector<64x128xf32>
    %cst_21 = arith.constant 0.000000e+00 : f32
    %74 = vector.broadcast %cst_21 : f32 to vector<64x128xf32>
    %75 = arith.maximumf %73, %74 : vector<64x128xf32>
    %76 = arith.truncf %75 : vector<64x128xf32> to vector<64x128xbf16>
    %c0_22 = arith.constant 0 : index
    %c0_23 = arith.constant 0 : index
    %c0_24 = arith.constant 0 : index
    %77 = vector.load %arg7[%c0_22, %c0_23, %c0_24] : memref<1x64x128xbf16, #tpu.memory_space<vmem>>, vector<1x64x128xbf16>
    %78 = vector.shape_cast %77 : vector<1x64x128xbf16> to vector<64x128xbf16>
    %79 = vector.shape_cast %76 : vector<64x128xbf16> to vector<1x64x128xbf16>
    tpu.vector_store %arg7[%c0_22, %c0_23, %c0_24], %79 {strides = array<i32>} : memref<1x64x128xbf16, #tpu.memory_space<vmem>>, vector<1x64x128xbf16>,
    return
  }
  func.func @transform_0(%arg0: i32, %arg1: i32) -> (i32, i32, i32) {
    %c0_i32 = arith.constant 0 : i32
    %c0_i32_0 = arith.constant 0 : i32
    return %arg0, %arg1, %c0_i32 : i32, i32, i32
  }
  func.func @transform_1(%arg0: i32, %arg1: i32) -> (i32, i32, i32) {
    %c0_i32 = arith.constant 0 : i32
    %c0_i32_0 = arith.constant 0 : i32
    return %arg0, %arg1, %c0_i32 : i32, i32, i32
  }
  func.func @transform_2(%arg0: i32, %arg1: i32) -> (i32, i32, i32) {
    %c0_i32 = arith.constant 0 : i32
    %c0_i32_0 = arith.constant 0 : i32
    return %arg0, %arg1, %c0_i32 : i32, i32, i32
  }
  func.func @transform_3(%arg0: i32, %arg1: i32) -> (i32, i32, i32) {
    %c0_i32 = arith.constant 0 : i32
    %c0_i32_0 = arith.constant 0 : i32
    return %arg0, %arg1, %c0_i32 : i32, i32, i32
  }
  func.func @transform_4(%arg0: i32, %arg1: i32) -> (i32, i32) {
    %c0_i32 = arith.constant 0 : i32
    %c0_i32_0 = arith.constant 0 : i32
    %c0_i32_1 = arith.constant 0 : i32
    return %c0_i32, %c0_i32_0 : i32, i32
  }
  func.func @transform_5(%arg0: i32, %arg1: i32) -> (i32, i32, i32) {
    %c0_i32 = arith.constant 0 : i32
    %c0_i32_0 = arith.constant 0 : i32
    return %arg0, %arg1, %c0_i32 : i32, i32, i32
  }
}

module attributes {stable_mosaic.version = 11 : i64} {
  func.func @_head_out_kernel(%arg0: i32, %arg1: i32, %arg2: memref<1x64x128xbf16, #tpu.memory_space<vmem>>, %arg3: memref<584x128xbf16, #tpu.memory_space<vmem>>, %arg4: memref<584x1xf32, #tpu.memory_space<vmem>>, %arg5: memref<1x576x64xbf16, #tpu.memory_space<vmem>>, %arg6: memref<1x2x64xf32, #tpu.memory_space<vmem>>) attributes {dimension_semantics = [#tpu.dimension_semantics<parallel>, #tpu.dimension_semantics<parallel>], iteration_bounds = array<i64: 2, 1>, scalar_prefetch = 0 : i64, scratch_operands = 0 : i64, tpu.core_type = #tpu.core_type<tc>, window_params = [{transform_indices = @transform_0, window_bounds = array<i64: 1, 64, 128>}, {pipeline_mode = #tpu.pipeline_mode<synchronous>, transform_indices = @transform_1, window_bounds = array<i64: 584, 128>}, {pipeline_mode = #tpu.pipeline_mode<synchronous>, transform_indices = @transform_2, window_bounds = array<i64: 584, 1>}, {transform_indices = @transform_3, window_bounds = array<i64: 1, 576, 64>}, {transform_indices = @transform_4, window_bounds = array<i64: 1, 2, 64>}]} {
    %c0 = arith.constant 0 : index
    %c0_0 = arith.constant 0 : index
    %0 = vector.load %arg3[%c0, %c0_0] : memref<584x128xbf16, #tpu.memory_space<vmem>>, vector<584x128xbf16>
    %c0_1 = arith.constant 0 : index
    %c0_2 = arith.constant 0 : index
    %c0_3 = arith.constant 0 : index
    %1 = vector.load %arg2[%c0_1, %c0_2, %c0_3] : memref<1x64x128xbf16, #tpu.memory_space<vmem>>, vector<1x64x128xbf16>
    %2 = vector.shape_cast %1 : vector<1x64x128xbf16> to vector<64x128xbf16>
    %cst = arith.constant dense<0.000000e+00> : vector<584x64xf32>
    %3 = tpu.matmul %0, %2, %cst {dimension_numbers = #tpu.dot_dimension_numbers<[1], [1], [0], [0], [0, 0, 1, 0], [], []>} : vector<584x128xbf16>, vector<64x128xbf16>, vector<584x64xf32> -> vector<584x64xf32>
    %c0_4 = arith.constant 0 : index
    %c0_5 = arith.constant 0 : index
    %4 = vector.load %arg4[%c0_4, %c0_5] : memref<584x1xf32, #tpu.memory_space<vmem>>, vector<584x1xf32>
    %5 = vector.broadcast %4 : vector<584x1xf32> to vector<584x64xf32>
    %6 = arith.addf %3, %5 : vector<584x64xf32>
    %7 = vector.extract_strided_slice %6 {offsets = [0, 0], sizes = [576, 64], strides = [1, 1]} : vector<584x64xf32> to vector<576x64xf32>
    %8 = arith.truncf %7 : vector<576x64xf32> to vector<576x64xbf16>
    %c0_6 = arith.constant 0 : index
    %c0_7 = arith.constant 0 : index
    %c0_8 = arith.constant 0 : index
    %9 = vector.load %arg5[%c0_6, %c0_7, %c0_8] : memref<1x576x64xbf16, #tpu.memory_space<vmem>>, vector<1x576x64xbf16>
    %10 = vector.shape_cast %9 : vector<1x576x64xbf16> to vector<576x64xbf16>
    %11 = vector.shape_cast %8 : vector<576x64xbf16> to vector<1x576x64xbf16>
    tpu.vector_store %arg5[%c0_6, %c0_7, %c0_8], %11 {strides = array<i32>} : memref<1x576x64xbf16, #tpu.memory_space<vmem>>, vector<1x576x64xbf16>,
    %12 = vector.extract_strided_slice %6 {offsets = [576, 0], sizes = [2, 64], strides = [1, 1]} : vector<584x64xf32> to vector<2x64xf32>
    %c0_9 = arith.constant 0 : index
    %c0_10 = arith.constant 0 : index
    %c0_11 = arith.constant 0 : index
    %13 = vector.load %arg6[%c0_9, %c0_10, %c0_11] : memref<1x2x64xf32, #tpu.memory_space<vmem>>, vector<1x2x64xf32>
    %14 = vector.shape_cast %13 : vector<1x2x64xf32> to vector<2x64xf32>
    %15 = vector.shape_cast %12 : vector<2x64xf32> to vector<1x2x64xf32>
    tpu.vector_store %arg6[%c0_9, %c0_10, %c0_11], %15 {strides = array<i32>} : memref<1x2x64xf32, #tpu.memory_space<vmem>>, vector<1x2x64xf32>,
    return
  }
  func.func @transform_0(%arg0: i32, %arg1: i32) -> (i32, i32, i32) {
    %c0_i32 = arith.constant 0 : i32
    %c0_i32_0 = arith.constant 0 : i32
    return %arg0, %arg1, %c0_i32 : i32, i32, i32
  }
  func.func @transform_1(%arg0: i32, %arg1: i32) -> (i32, i32) {
    %c0_i32 = arith.constant 0 : i32
    %c0_i32_0 = arith.constant 0 : i32
    %c0_i32_1 = arith.constant 0 : i32
    return %c0_i32, %c0_i32_0 : i32, i32
  }
  func.func @transform_2(%arg0: i32, %arg1: i32) -> (i32, i32) {
    %c0_i32 = arith.constant 0 : i32
    %c0_i32_0 = arith.constant 0 : i32
    %c0_i32_1 = arith.constant 0 : i32
    return %c0_i32, %c0_i32_0 : i32, i32
  }
  func.func @transform_3(%arg0: i32, %arg1: i32) -> (i32, i32, i32) {
    %c0_i32 = arith.constant 0 : i32
    %c0_i32_0 = arith.constant 0 : i32
    return %arg0, %c0_i32, %arg1 : i32, i32, i32
  }
  func.func @transform_4(%arg0: i32, %arg1: i32) -> (i32, i32, i32) {
    %c0_i32 = arith.constant 0 : i32
    %c0_i32_0 = arith.constant 0 : i32
    return %arg0, %c0_i32, %arg1 : i32, i32, i32
  }
}

module attributes {stable_mosaic.version = 11 : i64} {
  func.func @_upsample_kernel(%arg0: i32, %arg1: i32, %arg2: memref<1x9x64x64xbf16, #tpu.memory_space<vmem>>, %arg3: memref<1x2x9x64xf32, #tpu.memory_space<vmem>>, %arg4: memref<1x2x64x64xf32, #tpu.memory_space<vmem>>) attributes {dimension_semantics = [#tpu.dimension_semantics<parallel>, #tpu.dimension_semantics<parallel>], iteration_bounds = array<i64: 2, 1>, scalar_prefetch = 0 : i64, scratch_operands = 0 : i64, tpu.core_type = #tpu.core_type<tc>, window_params = [{transform_indices = @transform_0, window_bounds = array<i64: 1, 9, 64, 64>}, {transform_indices = @transform_1, window_bounds = array<i64: 1, 2, 9, 64>}, {transform_indices = @transform_2, window_bounds = array<i64: 1, 2, 64, 64>}]} {
    %c0 = arith.constant 0 : index
    %c0_0 = arith.constant 0 : index
    %c0_1 = arith.constant 0 : index
    %c0_2 = arith.constant 0 : index
    %0 = vector.load %arg2[%c0, %c0_0, %c0_1, %c0_2] : memref<1x9x64x64xbf16, #tpu.memory_space<vmem>>, vector<1x9x64x64xbf16>
    %1 = vector.shape_cast %0 : vector<1x9x64x64xbf16> to vector<9x64x64xbf16>
    %2 = arith.extf %1 : vector<9x64x64xbf16> to vector<9x64x64xf32>
    %cst = arith.constant dense<0xFF800000> : vector<64x64xf32>
    %3 = vector.multi_reduction <maximumf>, %2, %cst [0] : vector<9x64x64xf32> to vector<64x64xf32>
    %4 = vector.shape_cast %3 : vector<64x64xf32> to vector<1x64x64xf32>
    %5 = vector.broadcast %4 : vector<1x64x64xf32> to vector<9x64x64xf32>
    %6 = arith.subf %2, %5 : vector<9x64x64xf32>
    %7 = math.exp %6 : vector<9x64x64xf32>
    %cst_3 = arith.constant dense<0.000000e+00> : vector<64x64xf32>
    %8 = vector.multi_reduction <add>, %7, %cst_3 [0] : vector<9x64x64xf32> to vector<64x64xf32>
    %9 = tpu.reciprocal %8 {approx = true} : vector<64x64xf32> -> vector<64x64xf32>
    %10 = vector.extract_strided_slice %7 {offsets = [0, 0, 0], sizes = [1, 64, 64], strides = [1, 1, 1]} : vector<9x64x64xf32> to vector<1x64x64xf32>
    %11 = vector.shape_cast %10 : vector<1x64x64xf32> to vector<64x64xf32>
    %c0_4 = arith.constant 0 : index
    %c0_5 = arith.constant 0 : index
    %c0_6 = arith.constant 0 : index
    %c0_7 = arith.constant 0 : index
    %12 = vector.load %arg3[%c0_4, %c0_5, %c0_6, %c0_7] : memref<1x2x9x64xf32, #tpu.memory_space<vmem>>, vector<1x1x1x64xf32>
    %13 = vector.shape_cast %12 : vector<1x1x1x64xf32> to vector<1x64xf32>
    %14 = vector.broadcast %13 : vector<1x64xf32> to vector<64x64xf32>
    %15 = arith.mulf %11, %14 : vector<64x64xf32>
    %16 = vector.extract_strided_slice %7 {offsets = [1, 0, 0], sizes = [1, 64, 64], strides = [1, 1, 1]} : vector<9x64x64xf32> to vector<1x64x64xf32>
    %17 = vector.shape_cast %16 : vector<1x64x64xf32> to vector<64x64xf32>
    %c0_8 = arith.constant 0 : index
    %c0_9 = arith.constant 0 : index
    %c1 = arith.constant 1 : index
    %c0_10 = arith.constant 0 : index
    %18 = vector.load %arg3[%c0_8, %c0_9, %c1, %c0_10] : memref<1x2x9x64xf32, #tpu.memory_space<vmem>>, vector<1x1x1x64xf32>
    %19 = vector.shape_cast %18 : vector<1x1x1x64xf32> to vector<1x64xf32>
    %20 = vector.broadcast %19 : vector<1x64xf32> to vector<64x64xf32>
    %21 = arith.mulf %17, %20 : vector<64x64xf32>
    %22 = arith.addf %15, %21 : vector<64x64xf32>
    %23 = vector.extract_strided_slice %7 {offsets = [2, 0, 0], sizes = [1, 64, 64], strides = [1, 1, 1]} : vector<9x64x64xf32> to vector<1x64x64xf32>
    %24 = vector.shape_cast %23 : vector<1x64x64xf32> to vector<64x64xf32>
    %c0_11 = arith.constant 0 : index
    %c0_12 = arith.constant 0 : index
    %c2 = arith.constant 2 : index
    %c0_13 = arith.constant 0 : index
    %25 = vector.load %arg3[%c0_11, %c0_12, %c2, %c0_13] : memref<1x2x9x64xf32, #tpu.memory_space<vmem>>, vector<1x1x1x64xf32>
    %26 = vector.shape_cast %25 : vector<1x1x1x64xf32> to vector<1x64xf32>
    %27 = vector.broadcast %26 : vector<1x64xf32> to vector<64x64xf32>
    %28 = arith.mulf %24, %27 : vector<64x64xf32>
    %29 = arith.addf %22, %28 : vector<64x64xf32>
    %30 = vector.extract_strided_slice %7 {offsets = [3, 0, 0], sizes = [1, 64, 64], strides = [1, 1, 1]} : vector<9x64x64xf32> to vector<1x64x64xf32>
    %31 = vector.shape_cast %30 : vector<1x64x64xf32> to vector<64x64xf32>
    %c0_14 = arith.constant 0 : index
    %c0_15 = arith.constant 0 : index
    %c3 = arith.constant 3 : index
    %c0_16 = arith.constant 0 : index
    %32 = vector.load %arg3[%c0_14, %c0_15, %c3, %c0_16] : memref<1x2x9x64xf32, #tpu.memory_space<vmem>>, vector<1x1x1x64xf32>
    %33 = vector.shape_cast %32 : vector<1x1x1x64xf32> to vector<1x64xf32>
    %34 = vector.broadcast %33 : vector<1x64xf32> to vector<64x64xf32>
    %35 = arith.mulf %31, %34 : vector<64x64xf32>
    %36 = arith.addf %29, %35 : vector<64x64xf32>
    %37 = vector.extract_strided_slice %7 {offsets = [4, 0, 0], sizes = [1, 64, 64], strides = [1, 1, 1]} : vector<9x64x64xf32> to vector<1x64x64xf32>
    %38 = vector.shape_cast %37 : vector<1x64x64xf32> to vector<64x64xf32>
    %c0_17 = arith.constant 0 : index
    %c0_18 = arith.constant 0 : index
    %c4 = arith.constant 4 : index
    %c0_19 = arith.constant 0 : index
    %39 = vector.load %arg3[%c0_17, %c0_18, %c4, %c0_19] : memref<1x2x9x64xf32, #tpu.memory_space<vmem>>, vector<1x1x1x64xf32>
    %40 = vector.shape_cast %39 : vector<1x1x1x64xf32> to vector<1x64xf32>
    %41 = vector.broadcast %40 : vector<1x64xf32> to vector<64x64xf32>
    %42 = arith.mulf %38, %41 : vector<64x64xf32>
    %43 = arith.addf %36, %42 : vector<64x64xf32>
    %44 = vector.extract_strided_slice %7 {offsets = [5, 0, 0], sizes = [1, 64, 64], strides = [1, 1, 1]} : vector<9x64x64xf32> to vector<1x64x64xf32>
    %45 = vector.shape_cast %44 : vector<1x64x64xf32> to vector<64x64xf32>
    %c0_20 = arith.constant 0 : index
    %c0_21 = arith.constant 0 : index
    %c5 = arith.constant 5 : index
    %c0_22 = arith.constant 0 : index
    %46 = vector.load %arg3[%c0_20, %c0_21, %c5, %c0_22] : memref<1x2x9x64xf32, #tpu.memory_space<vmem>>, vector<1x1x1x64xf32>
    %47 = vector.shape_cast %46 : vector<1x1x1x64xf32> to vector<1x64xf32>
    %48 = vector.broadcast %47 : vector<1x64xf32> to vector<64x64xf32>
    %49 = arith.mulf %45, %48 : vector<64x64xf32>
    %50 = arith.addf %43, %49 : vector<64x64xf32>
    %51 = vector.extract_strided_slice %7 {offsets = [6, 0, 0], sizes = [1, 64, 64], strides = [1, 1, 1]} : vector<9x64x64xf32> to vector<1x64x64xf32>
    %52 = vector.shape_cast %51 : vector<1x64x64xf32> to vector<64x64xf32>
    %c0_23 = arith.constant 0 : index
    %c0_24 = arith.constant 0 : index
    %c6 = arith.constant 6 : index
    %c0_25 = arith.constant 0 : index
    %53 = vector.load %arg3[%c0_23, %c0_24, %c6, %c0_25] : memref<1x2x9x64xf32, #tpu.memory_space<vmem>>, vector<1x1x1x64xf32>
    %54 = vector.shape_cast %53 : vector<1x1x1x64xf32> to vector<1x64xf32>
    %55 = vector.broadcast %54 : vector<1x64xf32> to vector<64x64xf32>
    %56 = arith.mulf %52, %55 : vector<64x64xf32>
    %57 = arith.addf %50, %56 : vector<64x64xf32>
    %58 = vector.extract_strided_slice %7 {offsets = [7, 0, 0], sizes = [1, 64, 64], strides = [1, 1, 1]} : vector<9x64x64xf32> to vector<1x64x64xf32>
    %59 = vector.shape_cast %58 : vector<1x64x64xf32> to vector<64x64xf32>
    %c0_26 = arith.constant 0 : index
    %c0_27 = arith.constant 0 : index
    %c7 = arith.constant 7 : index
    %c0_28 = arith.constant 0 : index
    %60 = vector.load %arg3[%c0_26, %c0_27, %c7, %c0_28] : memref<1x2x9x64xf32, #tpu.memory_space<vmem>>, vector<1x1x1x64xf32>
    %61 = vector.shape_cast %60 : vector<1x1x1x64xf32> to vector<1x64xf32>
    %62 = vector.broadcast %61 : vector<1x64xf32> to vector<64x64xf32>
    %63 = arith.mulf %59, %62 : vector<64x64xf32>
    %64 = arith.addf %57, %63 : vector<64x64xf32>
    %65 = vector.extract_strided_slice %7 {offsets = [8, 0, 0], sizes = [1, 64, 64], strides = [1, 1, 1]} : vector<9x64x64xf32> to vector<1x64x64xf32>
    %66 = vector.shape_cast %65 : vector<1x64x64xf32> to vector<64x64xf32>
    %c0_29 = arith.constant 0 : index
    %c0_30 = arith.constant 0 : index
    %c8 = arith.constant 8 : index
    %c0_31 = arith.constant 0 : index
    %67 = vector.load %arg3[%c0_29, %c0_30, %c8, %c0_31] : memref<1x2x9x64xf32, #tpu.memory_space<vmem>>, vector<1x1x1x64xf32>
    %68 = vector.shape_cast %67 : vector<1x1x1x64xf32> to vector<1x64xf32>
    %69 = vector.broadcast %68 : vector<1x64xf32> to vector<64x64xf32>
    %70 = arith.mulf %66, %69 : vector<64x64xf32>
    %71 = arith.addf %64, %70 : vector<64x64xf32>
    %72 = arith.mulf %71, %9 : vector<64x64xf32>
    %c0_32 = arith.constant 0 : index
    %c0_33 = arith.constant 0 : index
    %c0_34 = arith.constant 0 : index
    %c0_35 = arith.constant 0 : index
    %73 = vector.load %arg4[%c0_32, %c0_33, %c0_34, %c0_35] : memref<1x2x64x64xf32, #tpu.memory_space<vmem>>, vector<1x1x64x64xf32>
    %74 = vector.shape_cast %73 : vector<1x1x64x64xf32> to vector<64x64xf32>
    %75 = vector.shape_cast %72 : vector<64x64xf32> to vector<1x1x64x64xf32>
    tpu.vector_store %arg4[%c0_32, %c0_33, %c0_34, %c0_35], %75 {strides = array<i32>} : memref<1x2x64x64xf32, #tpu.memory_space<vmem>>, vector<1x1x64x64xf32>,
    %76 = vector.extract_strided_slice %7 {offsets = [0, 0, 0], sizes = [1, 64, 64], strides = [1, 1, 1]} : vector<9x64x64xf32> to vector<1x64x64xf32>
    %77 = vector.shape_cast %76 : vector<1x64x64xf32> to vector<64x64xf32>
    %c0_36 = arith.constant 0 : index
    %c1_37 = arith.constant 1 : index
    %c0_38 = arith.constant 0 : index
    %c0_39 = arith.constant 0 : index
    %78 = vector.load %arg3[%c0_36, %c1_37, %c0_38, %c0_39] : memref<1x2x9x64xf32, #tpu.memory_space<vmem>>, vector<1x1x1x64xf32>
    %79 = vector.shape_cast %78 : vector<1x1x1x64xf32> to vector<1x64xf32>
    %80 = vector.broadcast %79 : vector<1x64xf32> to vector<64x64xf32>
    %81 = arith.mulf %77, %80 : vector<64x64xf32>
    %82 = vector.extract_strided_slice %7 {offsets = [1, 0, 0], sizes = [1, 64, 64], strides = [1, 1, 1]} : vector<9x64x64xf32> to vector<1x64x64xf32>
    %83 = vector.shape_cast %82 : vector<1x64x64xf32> to vector<64x64xf32>
    %c0_40 = arith.constant 0 : index
    %c1_41 = arith.constant 1 : index
    %c1_42 = arith.constant 1 : index
    %c0_43 = arith.constant 0 : index
    %84 = vector.load %arg3[%c0_40, %c1_41, %c1_42, %c0_43] : memref<1x2x9x64xf32, #tpu.memory_space<vmem>>, vector<1x1x1x64xf32>
    %85 = vector.shape_cast %84 : vector<1x1x1x64xf32> to vector<1x64xf32>
    %86 = vector.broadcast %85 : vector<1x64xf32> to vector<64x64xf32>
    %87 = arith.mulf %83, %86 : vector<64x64xf32>
    %88 = arith.addf %81, %87 : vector<64x64xf32>
    %89 = vector.extract_strided_slice %7 {offsets = [2, 0, 0], sizes = [1, 64, 64], strides = [1, 1, 1]} : vector<9x64x64xf32> to vector<1x64x64xf32>
    %90 = vector.shape_cast %89 : vector<1x64x64xf32> to vector<64x64xf32>
    %c0_44 = arith.constant 0 : index
    %c1_45 = arith.constant 1 : index
    %c2_46 = arith.constant 2 : index
    %c0_47 = arith.constant 0 : index
    %91 = vector.load %arg3[%c0_44, %c1_45, %c2_46, %c0_47] : memref<1x2x9x64xf32, #tpu.memory_space<vmem>>, vector<1x1x1x64xf32>
    %92 = vector.shape_cast %91 : vector<1x1x1x64xf32> to vector<1x64xf32>
    %93 = vector.broadcast %92 : vector<1x64xf32> to vector<64x64xf32>
    %94 = arith.mulf %90, %93 : vector<64x64xf32>
    %95 = arith.addf %88, %94 : vector<64x64xf32>
    %96 = vector.extract_strided_slice %7 {offsets = [3, 0, 0], sizes = [1, 64, 64], strides = [1, 1, 1]} : vector<9x64x64xf32> to vector<1x64x64xf32>
    %97 = vector.shape_cast %96 : vector<1x64x64xf32> to vector<64x64xf32>
    %c0_48 = arith.constant 0 : index
    %c1_49 = arith.constant 1 : index
    %c3_50 = arith.constant 3 : index
    %c0_51 = arith.constant 0 : index
    %98 = vector.load %arg3[%c0_48, %c1_49, %c3_50, %c0_51] : memref<1x2x9x64xf32, #tpu.memory_space<vmem>>, vector<1x1x1x64xf32>
    %99 = vector.shape_cast %98 : vector<1x1x1x64xf32> to vector<1x64xf32>
    %100 = vector.broadcast %99 : vector<1x64xf32> to vector<64x64xf32>
    %101 = arith.mulf %97, %100 : vector<64x64xf32>
    %102 = arith.addf %95, %101 : vector<64x64xf32>
    %103 = vector.extract_strided_slice %7 {offsets = [4, 0, 0], sizes = [1, 64, 64], strides = [1, 1, 1]} : vector<9x64x64xf32> to vector<1x64x64xf32>
    %104 = vector.shape_cast %103 : vector<1x64x64xf32> to vector<64x64xf32>
    %c0_52 = arith.constant 0 : index
    %c1_53 = arith.constant 1 : index
    %c4_54 = arith.constant 4 : index
    %c0_55 = arith.constant 0 : index
    %105 = vector.load %arg3[%c0_52, %c1_53, %c4_54, %c0_55] : memref<1x2x9x64xf32, #tpu.memory_space<vmem>>, vector<1x1x1x64xf32>
    %106 = vector.shape_cast %105 : vector<1x1x1x64xf32> to vector<1x64xf32>
    %107 = vector.broadcast %106 : vector<1x64xf32> to vector<64x64xf32>
    %108 = arith.mulf %104, %107 : vector<64x64xf32>
    %109 = arith.addf %102, %108 : vector<64x64xf32>
    %110 = vector.extract_strided_slice %7 {offsets = [5, 0, 0], sizes = [1, 64, 64], strides = [1, 1, 1]} : vector<9x64x64xf32> to vector<1x64x64xf32>
    %111 = vector.shape_cast %110 : vector<1x64x64xf32> to vector<64x64xf32>
    %c0_56 = arith.constant 0 : index
    %c1_57 = arith.constant 1 : index
    %c5_58 = arith.constant 5 : index
    %c0_59 = arith.constant 0 : index
    %112 = vector.load %arg3[%c0_56, %c1_57, %c5_58, %c0_59] : memref<1x2x9x64xf32, #tpu.memory_space<vmem>>, vector<1x1x1x64xf32>
    %113 = vector.shape_cast %112 : vector<1x1x1x64xf32> to vector<1x64xf32>
    %114 = vector.broadcast %113 : vector<1x64xf32> to vector<64x64xf32>
    %115 = arith.mulf %111, %114 : vector<64x64xf32>
    %116 = arith.addf %109, %115 : vector<64x64xf32>
    %117 = vector.extract_strided_slice %7 {offsets = [6, 0, 0], sizes = [1, 64, 64], strides = [1, 1, 1]} : vector<9x64x64xf32> to vector<1x64x64xf32>
    %118 = vector.shape_cast %117 : vector<1x64x64xf32> to vector<64x64xf32>
    %c0_60 = arith.constant 0 : index
    %c1_61 = arith.constant 1 : index
    %c6_62 = arith.constant 6 : index
    %c0_63 = arith.constant 0 : index
    %119 = vector.load %arg3[%c0_60, %c1_61, %c6_62, %c0_63] : memref<1x2x9x64xf32, #tpu.memory_space<vmem>>, vector<1x1x1x64xf32>
    %120 = vector.shape_cast %119 : vector<1x1x1x64xf32> to vector<1x64xf32>
    %121 = vector.broadcast %120 : vector<1x64xf32> to vector<64x64xf32>
    %122 = arith.mulf %118, %121 : vector<64x64xf32>
    %123 = arith.addf %116, %122 : vector<64x64xf32>
    %124 = vector.extract_strided_slice %7 {offsets = [7, 0, 0], sizes = [1, 64, 64], strides = [1, 1, 1]} : vector<9x64x64xf32> to vector<1x64x64xf32>
    %125 = vector.shape_cast %124 : vector<1x64x64xf32> to vector<64x64xf32>
    %c0_64 = arith.constant 0 : index
    %c1_65 = arith.constant 1 : index
    %c7_66 = arith.constant 7 : index
    %c0_67 = arith.constant 0 : index
    %126 = vector.load %arg3[%c0_64, %c1_65, %c7_66, %c0_67] : memref<1x2x9x64xf32, #tpu.memory_space<vmem>>, vector<1x1x1x64xf32>
    %127 = vector.shape_cast %126 : vector<1x1x1x64xf32> to vector<1x64xf32>
    %128 = vector.broadcast %127 : vector<1x64xf32> to vector<64x64xf32>
    %129 = arith.mulf %125, %128 : vector<64x64xf32>
    %130 = arith.addf %123, %129 : vector<64x64xf32>
    %131 = vector.extract_strided_slice %7 {offsets = [8, 0, 0], sizes = [1, 64, 64], strides = [1, 1, 1]} : vector<9x64x64xf32> to vector<1x64x64xf32>
    %132 = vector.shape_cast %131 : vector<1x64x64xf32> to vector<64x64xf32>
    %c0_68 = arith.constant 0 : index
    %c1_69 = arith.constant 1 : index
    %c8_70 = arith.constant 8 : index
    %c0_71 = arith.constant 0 : index
    %133 = vector.load %arg3[%c0_68, %c1_69, %c8_70, %c0_71] : memref<1x2x9x64xf32, #tpu.memory_space<vmem>>, vector<1x1x1x64xf32>
    %134 = vector.shape_cast %133 : vector<1x1x1x64xf32> to vector<1x64xf32>
    %135 = vector.broadcast %134 : vector<1x64xf32> to vector<64x64xf32>
    %136 = arith.mulf %132, %135 : vector<64x64xf32>
    %137 = arith.addf %130, %136 : vector<64x64xf32>
    %138 = arith.mulf %137, %9 : vector<64x64xf32>
    %c0_72 = arith.constant 0 : index
    %c1_73 = arith.constant 1 : index
    %c0_74 = arith.constant 0 : index
    %c0_75 = arith.constant 0 : index
    %139 = vector.load %arg4[%c0_72, %c1_73, %c0_74, %c0_75] : memref<1x2x64x64xf32, #tpu.memory_space<vmem>>, vector<1x1x64x64xf32>
    %140 = vector.shape_cast %139 : vector<1x1x64x64xf32> to vector<64x64xf32>
    %141 = vector.shape_cast %138 : vector<64x64xf32> to vector<1x1x64x64xf32>
    tpu.vector_store %arg4[%c0_72, %c1_73, %c0_74, %c0_75], %141 {strides = array<i32>} : memref<1x2x64x64xf32, #tpu.memory_space<vmem>>, vector<1x1x64x64xf32>,
    return
  }
  func.func @transform_0(%arg0: i32, %arg1: i32) -> (i32, i32, i32, i32) {
    %c0_i32 = arith.constant 0 : i32
    %c0_i32_0 = arith.constant 0 : i32
    %c0_i32_1 = arith.constant 0 : i32
    return %arg0, %c0_i32, %c0_i32_0, %arg1 : i32, i32, i32, i32
  }
  func.func @transform_1(%arg0: i32, %arg1: i32) -> (i32, i32, i32, i32) {
    %c0_i32 = arith.constant 0 : i32
    %c0_i32_0 = arith.constant 0 : i32
    %c0_i32_1 = arith.constant 0 : i32
    return %arg0, %c0_i32, %c0_i32_0, %arg1 : i32, i32, i32, i32
  }
  func.func @transform_2(%arg0: i32, %arg1: i32) -> (i32, i32, i32, i32) {
    %c0_i32 = arith.constant 0 : i32
    %c0_i32_0 = arith.constant 0 : i32
    %c0_i32_1 = arith.constant 0 : i32
    return %arg0, %c0_i32, %c0_i32_0, %arg1 : i32, i32, i32, i32
  }
}

</mosaic_0001>

<bundles_post_ra>
// kernel: _lambda_.12
= control target key start
LH: loop header
LB: loop body
LE: loop exit
PB: predicated region body
PF: predicated region fallthrough
CT: control target
= control target key end

     0   :  { %8 = vsyncpa [#allocation3], 0  ;;  %s1376_s0 = inlined_call_operand.hbm [shape: bf16[2,64,192], index: 0, kind: input, shape index: {}]   ;;  %s1377_s1 = inlined_call_operand.hbm [shape: bf16[192,256], index: 1, kind: input, shape index: {}]   ;;  %s1378_s2 = inlined_call_operand.hbm [shape: f32[1,256], index: 2, kind: input, shape index: {}]   ;;  %s1379_s3 = inlined_call_operand.hbm [shape: f32[2,64,256], index: 3, kind: output, shape index: {}]  }
   0x1   :  { %10 = vsyncpa [#allocation3 + $0x1], 0 }
   0x2   :  { %11 = vsyncpa [#allocation6], 0 }
   0x3   :  { %12 = vsyncpa [#allocation4], 0 }
   0x4   :  { %14 = vsyncpa [#allocation4 + $0x1], 0  ;;  %s1081_s12 = smov 0   ;;  %s1083_s13 = smov 0  }
   0x5   :  { %s1085_s14 = smov 0   ;;  %s1087_s15 = smov 0  }
   0x6   :  { %s1089_s16 = smov 0   ;;  %s1091_s17 = smov 0  }
   0x7 LB: > { %s663_s18 = sadd.s32 4294967295, %s1051_s17   ;;  %s664_s19 = sadd.s32 4294967294, %s1051_s17   ;;  %s1051_s17 = sphi %s1091_s17, %s20_s17   ;;  %s1047_s16 = sphi %s1089_s16, %s1401_s16   ;;  %s1043_s15 = sphi %s1087_s15, %s1400_s15   ;;  %s1039_s14 = sphi %s1085_s14, %s1399_s14   ;;  %s1035_s13 = sphi %s1083_s13, %s1398_s13   ;;  %s1031_s12 = sphi %s1081_s12, %s1397_s12  }
   0x8   : > { %p54_p0 = scmp.ne.s32.totalorder %s1035_s13, %s1031_s12  ;;  %p1115_p1 = scmp.eq.s32.totalorder %s663_s18, 0 }
   0x9   : > { %p1119_p2 = scmp.eq.s32.totalorder %s663_s18, 1  ;;  %p128_p3 = scmp.eq.s32.totalorder %s664_s19, 1 }
   0xa   : > { %s1384_s20 = scalar_select %p1115_p1, 1, 0 }
   0xb   : > { %p1125_p4 = por %p1115_p1, %p54_p0  ;;  %p665_p5 = scmp.ge.s32.totalorder %s1051_s17, 1 }
   0xc   : > { %p1130_p6 = por %p128_p3, %p54_p0  ;;  %p135_p7 = scmp.lt.s32.totalorder %s1051_s17, 3 }
   0xd   : > { %s1386_s22 = scalar_select %p1125_p4, 1, 0 }
   0xe   : > { %s1387_s23 = scalar_select %p1130_p6, 1, 0 }
   0xf   : > { %p1135_p8 = pnand %p665_p5, %p135_p7  ;;  %s1053_s25 = smov [#allocation5]  }
  0x10   : > { %s147_s26 = sshll.u32 %s1053_s25, 4  ;;  %s1054_s28 = smov [#allocation7]   ;;  %s1139_s26 = int_to_ptr.vmem [resolvable:$true] %s147_s26 }
  0x11   : > { %p756_p9 = pneg %p1135_p8  ;;  %s161_s29 = sshll.u32 %s1054_s28, 4  ;;  %s1150_s29 = int_to_ptr.vmem [resolvable:$true] %s161_s29 }
  0x12   : > { %s879_s5 = scalar_lea.hbm %s1377_s1, 3072 }
  0x13   : > { %p1146_p11 = pnand %p756_p9, %p1115_p1  ;;  %p880_p12 = scmp.ne.s32.totalorder %s1377_s1, %s879_s5 }
  0x14   : > { %p886_p5 = scmp.lt.u32.totalorder %s879_s5, %s1377_s1 }
  0x15   : > { %p881_p13 = pneg %p1146_p11 }
  0x17   : > { %p882_p0 = pnand %p881_p13, %p880_p12 }
  0x19   : > { %p883_p3 = pneg %p882_p0 }
  0x1b   : > { %p888_p7 = pnand %p886_p5, %p883_p3 }
  0x1d   : > { %891 = shalt.err (!%p888_p7)
}
  0x1e   : > { %s892_s10 = scalar_lea.vmem %s1139_s26, 3072  ;;  %p900_p1 = scmp.lt.s32.totalorder %s1139_s26, %s1139_s26 }
  0x1f   : > { %p893_p9 = scmp.ne.s32.totalorder %s1139_s26, %s892_s10  ;;  %p901_p12 = scmp.lt.s32.totalorder %s892_s10, %s892_s10 }
  0x21   : > { %p895_p10 = pnand %p893_p9, %p881_p13  ;;  %p902_p0 = por %p901_p12, %p900_p1 }
  0x23   : > { %p896_p6 = pneg %p895_p10 }
  0x25   : > { %p903_p4 = pnand %p902_p0, %p896_p6 }
  0x27   : > { %906 = shalt.err (!%p903_p4)
}
  0x28   : > { %s1055_s11 = smov 128   ;;  %s1056_s18 = smov 8  }
  0x29   : > { %759 = dma.hbm_to_vmem [thread:$0]  (!%p1146_p11), %s1377_s1, 3072, %s1139_s26, [#allocation6], %s1055_s11, %s1055_s11, %s1056_s18  }
  0x2a   : > { %s907_s4 = scalar_lea.hbm %s1378_s2, 32 }
  0x2b   : > { %p908_p1 = scmp.ne.s32.totalorder %s1378_s2, %s907_s4  ;;  %p914_p10 = scmp.lt.u32.totalorder %s907_s4, %s1378_s2 }
  0x2d   : > { %p910_p4 = pnand %p908_p1, %p881_p13 }
  0x2f   : > { %p911_p6 = pneg %p910_p4 }
  0x31   : > { %p916_p3 = pnand %p914_p10, %p911_p6 }
  0x33   : > { %919 = shalt.err (!%p916_p3)
}
  0x34   : > { %s920_s26 = scalar_lea.vmem %s1150_s29, 32  ;;  %p928_p12 = scmp.lt.s32.totalorder %s1150_s29, %s1150_s29 }
  0x35   : > { %p921_p5 = scmp.ne.s32.totalorder %s1150_s29, %s920_s26  ;;  %p929_p0 = scmp.lt.s32.totalorder %s920_s26, %s920_s26 }
  0x37   : > { %p923_p7 = pnand %p921_p5, %p881_p13  ;;  %p930_p1 = por %p929_p0, %p928_p12 }
  0x39   : > { %p924_p9 = pneg %p923_p7 }
  0x3b   : > { %p931_p4 = pnand %p930_p1, %p924_p9 }
  0x3d   : > { %934 = shalt.err (!%p931_p4)
}
  0x3e   : > { %762 = dma.hbm_to_vmem [thread:$0]  (!%p1146_p11), %s1378_s2, 32, %s1150_s29, [#allocation6]  }
  0x3f   : > { %s32_s19 = sadd.s32 1, %s1047_s16  ;;  %s41_s25 = sadd.s32 1, %s1039_s14 }
  0x40   : > { %p34_p13 = scmp.ge.s32.totalorder %s32_s19, 2  ;;  %p48_p6 = scmp.ne.s32.totalorder %s1039_s14, %s1035_s13 }
  0x41   : > { %p49_p10 = scmp.eq.s32.totalorder %s1051_s17, 0  ;;  %p773_p3 = scmp.lt.s32.totalorder %s1051_s17, 2 }
  0x42   : > { %s1403_s19 = smov (%p34_p13, %s32_s19), 0  ;;  %p1217_p7 = por %p1119_p2, %p48_p6 }
  0x43   : > { %p50_p5 = por %p49_p10, %p48_p6  ;;  %s36_s28 = ssub.s32 %s1047_s16, %s1403_s19 }
  0x44   : > { %s1390_s27 = scalar_select %p1217_p7, 1, 0 }
  0x45   : > { %s172_s30 = sand.u32 1, %s1039_s14   ;;  %p39_p9 = scmp.eq.s32.totalorder %s36_s28, 0 }
  0x46   : > { %s669_s29 = sshll.u32 %s172_s30, 6  ;;  %s718_s4 = sshll.u32 %s1047_s16, 10 }
  0x47   : > { %s1226_s5 = scalar_select %p39_p9, %s1039_s14, %s41_s25  }
  0x48   : > { %s1231_s8 = scalar_lea.hbm %s1376_s0, %s718_s4  ;;  %s176_s21 = scalar_lea.vmem [#allocation2], %s669_s29 }
  0x49   : > { %s186_s26 = sshll.u32 %s176_s21, 4  ;;  %p1235_p2 = pnand %p773_p3, %p50_p5  ;;  %s1239_s26 = int_to_ptr.vmem [resolvable:$true] %s186_s26 }
  0x4a   : > { %s1241_s10 = scalar_lea.sflag [#allocation3], %s172_s30  ;;  %s935_s25 = scalar_lea.hbm %s1231_s8, 1024 }
  0x4b   : > { %p936_p11 = scmp.ne.s32.totalorder %s1231_s8, %s935_s25  ;;  %p937_p12 = pneg %p1235_p2 }
  0x4c   : > { %s940_s4 = scalar_lea.hbm %s1376_s0, 2048  ;;  %p941_p4 = scmp.lt.u32.totalorder %s1231_s8, %s1376_s0 }
  0x4d   : > { %p938_p0 = pnand %p937_p12, %p936_p11  ;;  %p942_p13 = scmp.lt.u32.totalorder %s940_s4, %s935_s25 }
  0x4e   : > { %p944_p10 = scmp.lt.u32.totalorder %s935_s25, %s1231_s8 }
  0x4f   : > { %p939_p1 = pneg %p938_p0  ;;  %p943_p6 = por %p942_p13, %p941_p4 }
  0x51   : > { %p945_p3 = por %p944_p10, %p943_p6 }
  0x53   : > { %p946_p5 = pnand %p945_p3, %p939_p1 }
  0x55   : > { %949 = shalt.err (!%p946_p5)
}
  0x56   : > { %s950_s30 = scalar_lea.vmem %s1239_s26, 1024  ;;  %s1057_s21 = smov [#allocation2]  }
  0x57   : > { %p951_p9 = scmp.ne.s32.totalorder %s1239_s26, %s950_s30  ;;  %s955_s28 = sshll.u32 %s1057_s21, 4  ;;  %s956_s28 = int_to_ptr.vmem [resolvable:$false] %s955_s28 }
  0x58   : > { %s957_s29 = scalar_lea.vmem %s956_s28, 2048  ;;  %p958_p7 = scmp.lt.s32.totalorder %s1239_s26, %s956_s28 }
  0x59   : > { %p953_p11 = pnand %p951_p9, %p937_p12  ;;  %p959_p4 = scmp.lt.s32.totalorder %s957_s29, %s950_s30 }
  0x5b   : > { %p954_p0 = pneg %p953_p11  ;;  %p960_p13 = por %p959_p4, %p958_p7 }
  0x5d   : > { %p961_p6 = pnand %p960_p13, %p954_p0 }
  0x5f   : > { %964 = shalt.err (!%p961_p6)
}
  0x60   : > { %766 = dma.hbm_to_vmem [thread:$0]  (!%p1235_p2), %s1231_s8, 1024, %s1239_s26, %s1241_s10, %s1055_s11, %s1055_s11, %s1056_s18  }
  0x61   : > { %198 = sbr.rel (%p1135_p8) target bundleno = 397 (0x18d), region = 32  ;;  %s1275_s25 = sand.u32 (!%p1135_p8), 1, %s1035_s13  }
  0x62   : > { %s673_s4 = sshll.u32 (!%p1135_p8), %s1275_s25, 6  ;;  %s201_s6 = scalar_lea.sflag (!%p1135_p8), [#allocation3], %s1275_s25 }
  0x63   : > { %s1279_s7 = scalar_lea.vmem (!%p1135_p8), [#allocation2], %s673_s4  ;;  %p1392_p7 = scmp.ne.s32.totalorder (!%p1135_p8), %s1386_s22, 0 }
  0x68   : > { %1018 = dma.done.wait (%p1392_p7), %s201_s6, 1024  }
  0x69   : > { %1020 = vsyncadd (%p1392_p7), %s201_s6, 4294966272  ;;  %p1393_p2 = scmp.ne.s32.totalorder %s1384_s20, 0 }
  0x6b   : > { %1022 = dma.done.wait (%p1393_p2), [#allocation6], 3104  }
  0x6c   : > { %1024 = vsyncadd (%p1393_p2), [#allocation6], 4294964192  ;;  %v831_v0 = vld [vmem:[#allocation5 + $0x4] ss:$8 sps:$4 sm:$0xff]   ;;  %v833_v1 = vld [vmem:[#allocation5] ss:$8 sps:$4 sm:$0xff]   ;;  %v272_v32 = vlaneseq }
  0x6d   : > { %451 = vmatprep.subr.bf16.mxu0 %v831_v0  ;;  %720 = vmatprep.subr.bf16.mxu1 %v831_v0  ;;  %v834_v2 = vld [vmem:[#allocation5 + $0x14] ss:$8 sps:$4 sm:$0xff]   ;;  %v836_v3 = vld [vmem:[#allocation5 + $0x10] ss:$8 sps:$4 sm:$0xff]   ;;  %v837_v4 = vld [vmem:[#allocation5 + $0x24] ss:$8 sps:$4 sm:$0xff]  }
  0x6e   : > { %452 = vmatpush1.bf16.msra.mxu0 %v833_v1  ;;  %732 = vmatpush1.bf16.msra.mxu1 %v833_v1  ;;  %v839_v5 = vld [vmem:[#allocation5 + $0x20] ss:$8 sps:$4 sm:$0xff]   ;;  %v840_v6 = vld [vmem:[#allocation5 + $0x34] ss:$8 sps:$4 sm:$0xff]   ;;  %v842_v7 = vld [vmem:[#allocation5 + $0x30] ss:$8 sps:$4 sm:$0xff]  }
  0x6f   : > { %453 = vmatprep.subr.bf16.mxu0 %v834_v2  ;;  %721 = vmatprep.subr.bf16.mxu1 %v834_v2  ;;  %v843_v8 = vld [vmem:[#allocation5 + $0x44] ss:$8 sps:$4 sm:$0xff]   ;;  %v845_v9 = vld [vmem:[#allocation5 + $0x40] ss:$8 sps:$4 sm:$0xff]   ;;  %v846_v10 = vld [vmem:[#allocation5 + $0x54] ss:$8 sps:$4 sm:$0xff]  }
  0x70   : > { %v869_v11 = vld [vmem:[%s1279_s7 + $0x4] ss:$8 sps:$4 sm:$0xff]   ;;  %vm438_vm0 = vcmask 523264   ;;  %v848_v13 = vld [vmem:[#allocation5 + $0x50] ss:$8 sps:$4 sm:$0xff]   ;;  %v273_v33 = vshrl.u32 %v272_v32, 7 }
  0x71   : > { %v872_v12 = vld [vmem:[%s1279_s7 + $0x24] ss:$8 sps:$4 sm:$0xff]   ;;  %709 = vmatprep.mubr.msk.bf16.mxu0 %vm438_vm0, %v869_v11  ;;  %v851_v15 = vld [vmem:[#allocation5 + $0x60] ss:$8 sps:$4 sm:$0xff]   ;;  %v852_v16 = vld [vmem:[#allocation5 + $0x74] ss:$8 sps:$4 sm:$0xff]  }
  0x72   : > { %454 = vmatpush1.bf16.msra.mxu0 %v836_v3  ;;  %733 = vmatpush1.bf16.msra.mxu1 %v836_v3  ;;  %v849_v14 = vld [vmem:[#allocation5 + $0x64] ss:$8 sps:$4 sm:$0xff]   ;;  %v854_v17 = vld [vmem:[#allocation5 + $0x70] ss:$8 sps:$4 sm:$0xff]   ;;  %v857_v19 = vld [vmem:[#allocation5 + $0x80] ss:$8 sps:$4 sm:$0xff]  }
  0x73   : > { %455 = vmatprep.subr.bf16.mxu0 %v837_v4  ;;  %722 = vmatprep.subr.bf16.mxu1 %v837_v4  ;;  %v855_v18 = vld [vmem:[#allocation5 + $0x84] ss:$8 sps:$4 sm:$0xff]   ;;  %v858_v20 = vld [vmem:[#allocation5 + $0x94] ss:$8 sps:$4 sm:$0xff]   ;;  %v860_v21 = vld [vmem:[#allocation5 + $0x90] ss:$8 sps:$4 sm:$0xff]  }
  0x74   : > { %711 = vmatprep.mubr.msk.bf16.mxu1 %vm438_vm0, %v872_v12  ;;  %v861_v22 = vld [vmem:[#allocation5 + $0xa4] ss:$8 sps:$4 sm:$0xff]   ;;  %v863_v23 = vld [vmem:[#allocation5 + $0xa0] ss:$8 sps:$4 sm:$0xff]   ;;  %v864_v24 = vld [vmem:[#allocation5 + $0xb4] ss:$8 sps:$4 sm:$0xff]  }
  0x75   : > { %v866_v25 = vld [vmem:[#allocation5 + $0xb0] ss:$8 sps:$4 sm:$0xff]   ;;  %v867_v26 = vld [vmem:[%s1279_s7] ss:$8 sps:$4 sm:$0xff]   ;;  %v873_v28 = vld [vmem:[%s1279_s7 + $0x14] ss:$8 sps:$4 sm:$0xff]  }
  0x76   : > { %456 = vmatpush1.bf16.msra.mxu0 %v839_v5  ;;  %734 = vmatpush1.bf16.msra.mxu1 %v839_v5  ;;  %v870_v27 = vld [vmem:[%s1279_s7 + $0x20] ss:$8 sps:$4 sm:$0xff]   ;;  %v875_v29 = vld [vmem:[%s1279_s7 + $0x34] ss:$8 sps:$4 sm:$0xff]   ;;  %v877_v30 = vld [vmem:[%s1279_s7 + $0x10] ss:$8 sps:$4 sm:$0xff]  }
  0x77   : > { %457 = vmatprep.subr.bf16.mxu0 %v840_v6  ;;  %723 = vmatprep.subr.bf16.mxu1 %v840_v6  ;;  %v878_v31 = vld [vmem:[%s1279_s7 + $0x30] ss:$8 sps:$4 sm:$0xff]   ;;  %v274_v34 = vsub.s32 0, %v273_v33  ;;  %v270_v35 = vld [vmem:[#allocation7] sm:$0x3]  ;;  %v278_v36 = vsub.s32 1, %v273_v33 }
  0x78   : > { %s676_s20 = sshll.u32 %s1275_s25, 7  ;;  %s719_s24 = sshll.u32 %s1043_s15, 11 }
  0x79   : > { %v275_v37 = vrot.slane %v270_v35, %v274_v34  ;;  %v279_v38 = vrot.slane %v270_v35, %v278_v36  ;;  %s1302_s22 = scalar_lea.vmem [#allocation8], %s676_s20  ;;  %s1319_s8 = scalar_lea.hbm %s1379_s3, %s719_s24 }
  0x7a   : > { %458 = vmatpush1.bf16.msra.mxu0 %v842_v7  ;;  %735 = vmatpush1.bf16.msra.mxu1 %v842_v7  ;;  %s557_s11 = sshll.u32 %s1302_s22, 4  ;;  %s541_s26 = scalar_lea.sflag [#allocation4], %s1275_s25  ;;  %s1321_s11 = int_to_ptr.vmem [resolvable:$true] %s557_s11 }
  0x7b   : > { %459 = vmatprep.subr.bf16.mxu0 %v843_v8  ;;  %724 = vmatprep.subr.bf16.mxu1 %v843_v8  ;;  %s965_s9 = scalar_lea.vmem %s1321_s11, 2048  ;;  %p1394_p12 = scmp.ne.s32.totalorder %s1390_s27, 0 }
  0x7c   : > { %p966_p8 = scmp.ne.s32.totalorder %s1321_s11, %s965_s9  ;;  %s1058_s10 = smov [#allocation8]  }
  0x7d   : > { %s969_s30 = sshll.u32 %s1058_s10, 4  ;;  %s970_s30 = int_to_ptr.vmem [resolvable:$false] %s969_s30 }
  0x7e   : > { %460 = vmatpush1.bf16.msra.mxu0 %v845_v9  ;;  %736 = vmatpush1.bf16.msra.mxu1 %v845_v9  ;;  %p967_p1 = pnand %p966_p8, %p1394_p12  ;;  %s971_s21 = scalar_lea.vmem %s970_s30, 4096 }
  0x7f   : > { %461 = vmatprep.subr.bf16.mxu0 %v846_v10  ;;  %725 = vmatprep.subr.bf16.mxu1 %v846_v10  ;;  %p972_p3 = scmp.lt.s32.totalorder %s1321_s11, %s970_s30  ;;  %p973_p5 = scmp.lt.s32.totalorder %s971_s21, %s965_s9 }
  0x80   : > { %p968_p10 = pneg %p967_p1 }
  0x81   : > { %p974_p9 = por %p973_p5, %p972_p3 }
  0x82   : > { %462 = vmatpush1.bf16.msra.mxu0 %v848_v13  ;;  %737 = vmatpush1.bf16.msra.mxu1 %v848_v13 }
  0x83   : > { %463 = vmatprep.subr.bf16.mxu0 %v849_v14  ;;  %726 = vmatprep.subr.bf16.mxu1 %v849_v14  ;;  %p975_p11 = pnand %p974_p9, %p968_p10 }
  0x86   : > { %464 = vmatpush1.bf16.msra.mxu0 %v851_v15  ;;  %738 = vmatpush1.bf16.msra.mxu1 %v851_v15 }
  0x87   : > { %465 = vmatprep.subr.bf16.mxu0 %v852_v16  ;;  %727 = vmatprep.subr.bf16.mxu1 %v852_v16 }
  0x8a   : > { %466 = vmatpush1.bf16.msra.mxu0 %v854_v17  ;;  %739 = vmatpush1.bf16.msra.mxu1 %v854_v17 }
  0x8b   : > { %467 = vmatprep.subr.bf16.mxu0 %v855_v18  ;;  %728 = vmatprep.subr.bf16.mxu1 %v855_v18 }
  0x8e   : > { %468 = vmatpush1.bf16.msra.mxu0 %v857_v19  ;;  %740 = vmatpush1.bf16.msra.mxu1 %v857_v19 }
  0x8f   : > { %469 = vmatprep.subr.bf16.mxu0 %v858_v20  ;;  %729 = vmatprep.subr.bf16.mxu1 %v858_v20 }
  0x92   : > { %470 = vmatpush1.bf16.msra.mxu0 %v860_v21  ;;  %741 = vmatpush1.bf16.msra.mxu1 %v860_v21 }
  0x93   : > { %471 = vmatprep.subr.bf16.mxu0 %v861_v22  ;;  %730 = vmatprep.subr.bf16.mxu1 %v861_v22 }
  0x96   : > { %472 = vmatpush1.bf16.msra.mxu0 %v863_v23  ;;  %742 = vmatpush1.bf16.msra.mxu1 %v863_v23 }
  0x97   : > { %473 = vmatprep.subr.bf16.mxu0 %v864_v24  ;;  %731 = vmatprep.subr.bf16.mxu1 %v864_v24 }
  0x9a   : > { %474 = vmatpush1.bf16.msra.mxu0 %v866_v25  ;;  %743 = vmatpush1.bf16.msra.mxu1 %v866_v25 }
  0x9d   : > { %484 = vmatmul.mubr.bf16.vlgmr.msra.gmra.mrb[0].mxu0 %v867_v26  ;;  %504 = vmatmul.mubr.bf16.vlgmr.msra.gmra.mrb[0].mxu1 %v870_v27 }
  0x9e   : > { %710 = vmatprep.mubr.msk.bf16.mxu0 %vm438_vm0, %v873_v28  ;;  %712 = vmatprep.mubr.msk.bf16.mxu1 %vm438_vm0, %v875_v29 }
  0xa5   : > { %494 = vmatmul.mubr.bf16.gmra.mrb[4].mxu0 %v877_v30  ;;  %514 = vmatmul.mubr.bf16.gmra.mrb[4].mxu1 %v878_v31 }
 0x170   : > { %v485_v39 = vpop.f32.mrb[0].mxu0  ;;  %v505_v40 = vpop.f32.mrb[0].mxu1 }
 0x171   : > { %v486_v41 = vadd.f32 %v485_v39, %v275_v37  ;;  %v506_v42 = vadd.f32 %v505_v40, %v275_v37  ;;  %v487_v43 = vpop.f32.mrb[1].mxu0  ;;  %v507_v44 = vpop.f32.mrb[1].mxu1 }
 0x172   : > { %v488_v45 = vadd.f32 %v487_v43, %v279_v38  ;;  %v508_v46 = vadd.f32 %v507_v44, %v279_v38  ;;  %v489_v47 = vpop.f32.mrb[2].mxu0  ;;  %v509_v48 = vpop.f32.mrb[2].mxu1 }
 0x173   : > { %524 = vst [vmem:[%s1302_s22] sm:$0xff] %v486_v41  ;;  %532 = vst [vmem:[%s1302_s22 + $0x40] sm:$0xff] %v506_v42  ;;  %v490_v49 = vadd.f32 %v489_v47, %v275_v37  ;;  %v510_v50 = vadd.f32 %v509_v48, %v275_v37  ;;  %v491_v51 = vpop.f32.mrb[3].mxu0  ;;  %v511_v52 = vpop.f32.mrb[3].mxu1 }
 0x174   : > { %525 = vst [vmem:[%s1302_s22 + $0x8] sm:$0xff] %v488_v45  ;;  %533 = vst [vmem:[%s1302_s22 + $0x48] sm:$0xff] %v508_v46  ;;  %v492_v53 = vadd.f32 %v491_v51, %v279_v38  ;;  %v512_v54 = vadd.f32 %v511_v52, %v279_v38 }
 0x175   : > { %526 = vst [vmem:[%s1302_s22 + $0x10] sm:$0xff] %v490_v49  ;;  %534 = vst [vmem:[%s1302_s22 + $0x50] sm:$0xff] %v510_v50 }
 0x176   : > { %527 = vst [vmem:[%s1302_s22 + $0x18] sm:$0xff] %v492_v53  ;;  %535 = vst [vmem:[%s1302_s22 + $0x58] sm:$0xff] %v512_v54 }
 0x178   : > { %v495_v55 = vpop.f32.mrb[4].mxu0  ;;  %v515_v56 = vpop.f32.mrb[4].mxu1 }
 0x179   : > { %v496_v57 = vadd.f32 %v495_v55, %v275_v37  ;;  %v516_v58 = vadd.f32 %v515_v56, %v275_v37  ;;  %v497_v59 = vpop.f32.mrb[5].mxu0  ;;  %v517_v60 = vpop.f32.mrb[5].mxu1 }
 0x17a   : > { %v498_v61 = vadd.f32 %v497_v59, %v279_v38  ;;  %v518_v62 = vadd.f32 %v517_v60, %v279_v38  ;;  %v499_v63 = vpop.f32.mrb[6].mxu0  ;;  %v519_v0 = vpop.f32.mrb[6].mxu1 }
 0x17b   : > { %528 = vst [vmem:[%s1302_s22 + $0x20] sm:$0xff] %v496_v57  ;;  %536 = vst [vmem:[%s1302_s22 + $0x60] sm:$0xff] %v516_v58  ;;  %v500_v1 = vadd.f32 %v499_v63, %v275_v37  ;;  %v520_v2 = vadd.f32 %v519_v0, %v275_v37  ;;  %v501_v3 = vpop.f32.mrb[7].mxu0  ;;  %v521_v4 = vpop.f32.mrb[7].mxu1 }
 0x17c   : > { %529 = vst [vmem:[%s1302_s22 + $0x28] sm:$0xff] %v498_v61  ;;  %537 = vst [vmem:[%s1302_s22 + $0x68] sm:$0xff] %v518_v62  ;;  %v502_v5 = vadd.f32 %v501_v3, %v279_v38  ;;  %v522_v6 = vadd.f32 %v521_v4, %v279_v38 }
 0x17d   : > { %530 = vst [vmem:[%s1302_s22 + $0x30] sm:$0xff] %v500_v1  ;;  %538 = vst [vmem:[%s1302_s22 + $0x70] sm:$0xff] %v520_v2 }
 0x17e   : > { %531 = vst [vmem:[%s1302_s22 + $0x38] sm:$0xff] %v502_v5  ;;  %539 = vst [vmem:[%s1302_s22 + $0x78] sm:$0xff] %v522_v6 }
 0x17f   : > { %978 = shalt.err (!%p975_p11)
}
 0x180   : > { %s979_s28 = scalar_lea.hbm %s1319_s8, 2048  ;;  %s983_s6 = scalar_lea.hbm %s1379_s3, 4096 }
 0x181   : > { %p980_p0 = scmp.ne.s32.totalorder %s1319_s8, %s979_s28  ;;  %p984_p6 = scmp.lt.u32.totalorder %s1319_s8, %s1379_s3 }
 0x182   : > { %p985_p7 = scmp.lt.u32.totalorder %s983_s6, %s979_s28  ;;  %p987_p8 = scmp.lt.u32.totalorder %s979_s28, %s1319_s8 }
 0x183   : > { %p981_p4 = pnand %p980_p0, %p1394_p12 }
 0x184   : > { %p986_p2 = por %p985_p7, %p984_p6 }
 0x185   : > { %p982_p13 = pneg %p981_p4 }
 0x186   : > { %p988_p1 = por %p987_p8, %p986_p2 }
 0x188   : > { %p989_p10 = pnand %p988_p1, %p982_p13 }
 0x18a   : > { %992 = shalt.err (!%p989_p10)
}
 0x18b   : > { %s1059_s22 = smov 256   ;;  %s1060_s24 = smov 16  }
 0x18c   : > { %754 = dma.vmem_to_hbm [thread:$0]  (%p1394_p12), %s1321_s11, 2048, %s1319_s8, %s541_s26, %s1059_s22, %s1059_s22, %s1060_s24  }
 0x18d PF: > { %s572_s15 = sand.u32 1, %s1031_s12   ;;  %p1395_p3 = scmp.ne.s32.totalorder %s1387_s23, 0 }
 0x18e   : > { %p1396_p5 = scmp.ge.s32.totalorder %s1051_s17, 2  ;;  %s573_s18 = scalar_lea.sflag [#allocation4], %s572_s15 }
 0x190   : > { %p768_p9 = pnand %p1396_p5, %p1395_p3 }
 0x192   : > { %1026 = dma.done.wait (!%p768_p9), %s573_s18, 2048  }
 0x193   : > { %1028 = vsyncadd (!%p768_p9), %s573_s18, 4294965248  ;;  %s20_s17 = sadd.s32 1, %s1051_s17   ;;  %s1397_s12 = smov %s1035_s13 }
 0x194   : > { %p17_p11 = scmp.ge.s32.totalorder %s20_s17, 4   ;;  %s1398_s13 = smov %s1039_s14 }
 0x195   : > { %s1399_s14 = smov %s1226_s5  ;;  %s1400_s15 = smov %s1047_s16 }
 0x196   : > { %s1401_s16 = smov %s1403_s19  ;;  %19 = sbr.rel (!%p17_p11) target bundleno = 7 (0x7), region = 85 }
 0x19d   :  { %578 = vsyncpa [#allocation3], 1 }
 0x19e   :  { %580 = vsyncpa [#allocation3 + $0x1], 1 }
 0x19f   :  { %581 = vsyncpa [#allocation6], 1 }
 0x1a0   :  { %582 = vsyncpa [#allocation4], 1 }
 0x1a1   :  { %584 = vsyncpa [#allocation4 + $0x1], 1 }

// kernel: _lambda_.11
= control target key start
LH: loop header
LB: loop body
LE: loop exit
PB: predicated region body
PF: predicated region fallthrough
CT: control target
= control target key end

     0   :  { %8 = vsyncpa [#allocation3], 0  ;;  %s1427_s0 = inlined_call_operand.hbm [shape: bf16[2,64,192], index: 0, kind: input, shape index: {}]   ;;  %s1428_s1 = inlined_call_operand.hbm [shape: bf16[192,256], index: 1, kind: input, shape index: {}]   ;;  %s1429_s2 = inlined_call_operand.hbm [shape: f32[1,256], index: 2, kind: input, shape index: {}]   ;;  %s1430_s3 = inlined_call_operand.hbm [shape: bf16[2,64,256], index: 3, kind: output, shape index: {}]  }
   0x1   :  { %10 = vsyncpa [#allocation3 + $0x1], 0 }
   0x2   :  { %11 = vsyncpa [#allocation6], 0 }
   0x3   :  { %12 = vsyncpa [#allocation4], 0 }
   0x4   :  { %14 = vsyncpa [#allocation4 + $0x1], 0  ;;  %s1137_s12 = smov 0   ;;  %s1139_s13 = smov 0  }
   0x5   :  { %s1141_s14 = smov 0   ;;  %s1143_s15 = smov 0  }
   0x6   :  { %s1145_s16 = smov 0   ;;  %s1147_s17 = smov 0  }
   0x7 LB: > { %s703_s18 = sadd.s32 4294967295, %s1107_s17   ;;  %s704_s19 = sadd.s32 4294967294, %s1107_s17   ;;  %s1107_s17 = sphi %s1147_s17, %s20_s17   ;;  %s1103_s16 = sphi %s1145_s16, %s1452_s16   ;;  %s1099_s15 = sphi %s1143_s15, %s1451_s15   ;;  %s1095_s14 = sphi %s1141_s14, %s1450_s14   ;;  %s1091_s13 = sphi %s1139_s13, %s1449_s13   ;;  %s1087_s12 = sphi %s1137_s12, %s1448_s12  }
   0x8   : > { %p54_p0 = scmp.ne.s32.totalorder %s1091_s13, %s1087_s12  ;;  %p1171_p1 = scmp.eq.s32.totalorder %s703_s18, 0 }
   0x9   : > { %p1175_p2 = scmp.eq.s32.totalorder %s703_s18, 1  ;;  %p128_p3 = scmp.eq.s32.totalorder %s704_s19, 1 }
   0xa   : > { %s1435_s20 = scalar_select %p1171_p1, 1, 0 }
   0xb   : > { %p1181_p4 = por %p1171_p1, %p54_p0  ;;  %p705_p5 = scmp.ge.s32.totalorder %s1107_s17, 1 }
   0xc   : > { %p1186_p6 = por %p128_p3, %p54_p0  ;;  %p135_p7 = scmp.lt.s32.totalorder %s1107_s17, 3 }
   0xd   : > { %s1437_s22 = scalar_select %p1181_p4, 1, 0 }
   0xe   : > { %s1438_s23 = scalar_select %p1186_p6, 1, 0 }
   0xf   : > { %p1191_p8 = pnand %p705_p5, %p135_p7  ;;  %s1109_s25 = smov [#allocation5]  }
  0x10   : > { %s147_s26 = sshll.u32 %s1109_s25, 4  ;;  %s1110_s28 = smov [#allocation7]   ;;  %s1195_s26 = int_to_ptr.vmem [resolvable:$true] %s147_s26 }
  0x11   : > { %p812_p9 = pneg %p1191_p8  ;;  %s161_s29 = sshll.u32 %s1110_s28, 4  ;;  %s1206_s29 = int_to_ptr.vmem [resolvable:$true] %s161_s29 }
  0x12   : > { %s935_s5 = scalar_lea.hbm %s1428_s1, 3072 }
  0x13   : > { %p1202_p11 = pnand %p812_p9, %p1171_p1  ;;  %p936_p12 = scmp.ne.s32.totalorder %s1428_s1, %s935_s5 }
  0x14   : > { %p942_p5 = scmp.lt.u32.totalorder %s935_s5, %s1428_s1 }
  0x15   : > { %p937_p13 = pneg %p1202_p11 }
  0x17   : > { %p938_p0 = pnand %p937_p13, %p936_p12 }
  0x19   : > { %p939_p3 = pneg %p938_p0 }
  0x1b   : > { %p944_p7 = pnand %p942_p5, %p939_p3 }
  0x1d   : > { %947 = shalt.err (!%p944_p7)
}
  0x1e   : > { %s948_s10 = scalar_lea.vmem %s1195_s26, 3072  ;;  %p956_p1 = scmp.lt.s32.totalorder %s1195_s26, %s1195_s26 }
  0x1f   : > { %p949_p9 = scmp.ne.s32.totalorder %s1195_s26, %s948_s10  ;;  %p957_p12 = scmp.lt.s32.totalorder %s948_s10, %s948_s10 }
  0x21   : > { %p951_p10 = pnand %p949_p9, %p937_p13  ;;  %p958_p0 = por %p957_p12, %p956_p1 }
  0x23   : > { %p952_p6 = pneg %p951_p10 }
  0x25   : > { %p959_p4 = pnand %p958_p0, %p952_p6 }
  0x27   : > { %962 = shalt.err (!%p959_p4)
}
  0x28   : > { %s1111_s11 = smov 128   ;;  %s1112_s18 = smov 8  }
  0x29   : > { %815 = dma.hbm_to_vmem [thread:$0]  (!%p1202_p11), %s1428_s1, 3072, %s1195_s26, [#allocation6], %s1111_s11, %s1111_s11, %s1112_s18  }
  0x2a   : > { %s963_s4 = scalar_lea.hbm %s1429_s2, 32 }
  0x2b   : > { %p964_p1 = scmp.ne.s32.totalorder %s1429_s2, %s963_s4  ;;  %p970_p10 = scmp.lt.u32.totalorder %s963_s4, %s1429_s2 }
  0x2d   : > { %p966_p4 = pnand %p964_p1, %p937_p13 }
  0x2f   : > { %p967_p6 = pneg %p966_p4 }
  0x31   : > { %p972_p3 = pnand %p970_p10, %p967_p6 }
  0x33   : > { %975 = shalt.err (!%p972_p3)
}
  0x34   : > { %s976_s26 = scalar_lea.vmem %s1206_s29, 32  ;;  %p984_p12 = scmp.lt.s32.totalorder %s1206_s29, %s1206_s29 }
  0x35   : > { %p977_p5 = scmp.ne.s32.totalorder %s1206_s29, %s976_s26  ;;  %p985_p0 = scmp.lt.s32.totalorder %s976_s26, %s976_s26 }
  0x37   : > { %p979_p7 = pnand %p977_p5, %p937_p13  ;;  %p986_p1 = por %p985_p0, %p984_p12 }
  0x39   : > { %p980_p9 = pneg %p979_p7 }
  0x3b   : > { %p987_p4 = pnand %p986_p1, %p980_p9 }
  0x3d   : > { %990 = shalt.err (!%p987_p4)
}
  0x3e   : > { %818 = dma.hbm_to_vmem [thread:$0]  (!%p1202_p11), %s1429_s2, 32, %s1206_s29, [#allocation6]  }
  0x3f   : > { %s32_s19 = sadd.s32 1, %s1103_s16  ;;  %s41_s25 = sadd.s32 1, %s1095_s14 }
  0x40   : > { %p34_p13 = scmp.ge.s32.totalorder %s32_s19, 2  ;;  %p48_p6 = scmp.ne.s32.totalorder %s1095_s14, %s1091_s13 }
  0x41   : > { %p49_p10 = scmp.eq.s32.totalorder %s1107_s17, 0  ;;  %p829_p3 = scmp.lt.s32.totalorder %s1107_s17, 2 }
  0x42   : > { %s1454_s19 = smov (%p34_p13, %s32_s19), 0  ;;  %p1273_p7 = por %p1175_p2, %p48_p6 }
  0x43   : > { %p50_p5 = por %p49_p10, %p48_p6  ;;  %s36_s28 = ssub.s32 %s1103_s16, %s1454_s19 }
  0x44   : > { %s1441_s27 = scalar_select %p1273_p7, 1, 0 }
  0x45   : > { %s172_s30 = sand.u32 1, %s1095_s14   ;;  %p39_p9 = scmp.eq.s32.totalorder %s36_s28, 0 }
  0x46   : > { %s709_s29 = sshll.u32 %s172_s30, 6  ;;  %s766_s4 = sshll.u32 %s1103_s16, 10 }
  0x47   : > { %s1282_s5 = scalar_select %p39_p9, %s1095_s14, %s41_s25  }
  0x48   : > { %s1287_s8 = scalar_lea.hbm %s1427_s0, %s766_s4  ;;  %s176_s21 = scalar_lea.vmem [#allocation2], %s709_s29 }
  0x49   : > { %s186_s26 = sshll.u32 %s176_s21, 4  ;;  %p1291_p2 = pnand %p829_p3, %p50_p5  ;;  %s1295_s26 = int_to_ptr.vmem [resolvable:$true] %s186_s26 }
  0x4a   : > { %s1297_s10 = scalar_lea.sflag [#allocation3], %s172_s30  ;;  %s991_s25 = scalar_lea.hbm %s1287_s8, 1024 }
  0x4b   : > { %p992_p11 = scmp.ne.s32.totalorder %s1287_s8, %s991_s25  ;;  %p993_p12 = pneg %p1291_p2 }
  0x4c   : > { %s996_s4 = scalar_lea.hbm %s1427_s0, 2048  ;;  %p997_p4 = scmp.lt.u32.totalorder %s1287_s8, %s1427_s0 }
  0x4d   : > { %p994_p0 = pnand %p993_p12, %p992_p11  ;;  %p998_p13 = scmp.lt.u32.totalorder %s996_s4, %s991_s25 }
  0x4e   : > { %p1000_p10 = scmp.lt.u32.totalorder %s991_s25, %s1287_s8 }
  0x4f   : > { %p995_p1 = pneg %p994_p0  ;;  %p999_p6 = por %p998_p13, %p997_p4 }
  0x51   : > { %p1001_p3 = por %p1000_p10, %p999_p6 }
  0x53   : > { %p1002_p5 = pnand %p1001_p3, %p995_p1 }
  0x55   : > { %1005 = shalt.err (!%p1002_p5)
}
  0x56   : > { %s1006_s30 = scalar_lea.vmem %s1295_s26, 1024  ;;  %s1113_s21 = smov [#allocation2]  }
  0x57   : > { %p1007_p9 = scmp.ne.s32.totalorder %s1295_s26, %s1006_s30  ;;  %s1011_s28 = sshll.u32 %s1113_s21, 4  ;;  %s1012_s28 = int_to_ptr.vmem [resolvable:$false] %s1011_s28 }
  0x58   : > { %s1013_s29 = scalar_lea.vmem %s1012_s28, 2048  ;;  %p1014_p7 = scmp.lt.s32.totalorder %s1295_s26, %s1012_s28 }
  0x59   : > { %p1009_p11 = pnand %p1007_p9, %p993_p12  ;;  %p1015_p4 = scmp.lt.s32.totalorder %s1013_s29, %s1006_s30 }
  0x5b   : > { %p1010_p0 = pneg %p1009_p11  ;;  %p1016_p13 = por %p1015_p4, %p1014_p7 }
  0x5d   : > { %p1017_p6 = pnand %p1016_p13, %p1010_p0 }
  0x5f   : > { %1020 = shalt.err (!%p1017_p6)
}
  0x60   : > { %822 = dma.hbm_to_vmem [thread:$0]  (!%p1291_p2), %s1287_s8, 1024, %s1295_s26, %s1297_s10, %s1111_s11, %s1111_s11, %s1112_s18  }
  0x61   : > { %198 = sbr.rel (%p1191_p8) target bundleno = 399 (0x18f), region = 32  ;;  %s1331_s25 = sand.u32 (!%p1191_p8), 1, %s1091_s13  }
  0x62   : > { %s713_s4 = sshll.u32 (!%p1191_p8), %s1331_s25, 6  ;;  %s201_s6 = scalar_lea.sflag (!%p1191_p8), [#allocation3], %s1331_s25 }
  0x63   : > { %s1337_s9 = scalar_lea.vmem (!%p1191_p8), [#allocation2], %s713_s4  ;;  %p1443_p7 = scmp.ne.s32.totalorder (!%p1191_p8), %s1437_s22, 0 }
  0x68   : > { %1074 = dma.done.wait (%p1443_p7), %s201_s6, 1024  }
  0x69   : > { %1076 = vsyncadd (%p1443_p7), %s201_s6, 4294966272  ;;  %p1444_p2 = scmp.ne.s32.totalorder %s1435_s20, 0 }
  0x6b   : > { %1078 = dma.done.wait (%p1444_p2), [#allocation6], 3104  }
  0x6c   : > { %1080 = vsyncadd (%p1444_p2), [#allocation6], 4294964192  ;;  %v887_v0 = vld [vmem:[#allocation5 + $0x4] ss:$8 sps:$4 sm:$0xff]   ;;  %v889_v1 = vld [vmem:[#allocation5] ss:$8 sps:$4 sm:$0xff]   ;;  %v272_v32 = vlaneseq }
  0x6d   : > { %451 = vmatprep.subr.bf16.mxu0 %v887_v0  ;;  %776 = vmatprep.subr.bf16.mxu1 %v887_v0  ;;  %v890_v2 = vld [vmem:[#allocation5 + $0x14] ss:$8 sps:$4 sm:$0xff]   ;;  %v892_v3 = vld [vmem:[#allocation5 + $0x10] ss:$8 sps:$4 sm:$0xff]   ;;  %v893_v4 = vld [vmem:[#allocation5 + $0x24] ss:$8 sps:$4 sm:$0xff]  }
  0x6e   : > { %452 = vmatpush1.bf16.msra.mxu0 %v889_v1  ;;  %788 = vmatpush1.bf16.msra.mxu1 %v889_v1  ;;  %v895_v5 = vld [vmem:[#allocation5 + $0x20] ss:$8 sps:$4 sm:$0xff]   ;;  %v896_v6 = vld [vmem:[#allocation5 + $0x34] ss:$8 sps:$4 sm:$0xff]   ;;  %v898_v7 = vld [vmem:[#allocation5 + $0x30] ss:$8 sps:$4 sm:$0xff]  }
  0x6f   : > { %453 = vmatprep.subr.bf16.mxu0 %v890_v2  ;;  %777 = vmatprep.subr.bf16.mxu1 %v890_v2  ;;  %v899_v8 = vld [vmem:[#allocation5 + $0x44] ss:$8 sps:$4 sm:$0xff]   ;;  %v901_v9 = vld [vmem:[#allocation5 + $0x40] ss:$8 sps:$4 sm:$0xff]   ;;  %v902_v10 = vld [vmem:[#allocation5 + $0x54] ss:$8 sps:$4 sm:$0xff]  }
  0x70   : > { %v925_v11 = vld [vmem:[%s1337_s9 + $0x4] ss:$8 sps:$4 sm:$0xff]   ;;  %vm438_vm0 = vcmask 523264   ;;  %v904_v13 = vld [vmem:[#allocation5 + $0x50] ss:$8 sps:$4 sm:$0xff]   ;;  %v273_v33 = vshrl.u32 %v272_v32, 7 }
  0x71   : > { %v928_v12 = vld [vmem:[%s1337_s9 + $0x24] ss:$8 sps:$4 sm:$0xff]   ;;  %749 = vmatprep.mubr.msk.bf16.mxu0 %vm438_vm0, %v925_v11  ;;  %v907_v15 = vld [vmem:[#allocation5 + $0x60] ss:$8 sps:$4 sm:$0xff]   ;;  %v908_v16 = vld [vmem:[#allocation5 + $0x74] ss:$8 sps:$4 sm:$0xff]  }
  0x72   : > { %454 = vmatpush1.bf16.msra.mxu0 %v892_v3  ;;  %789 = vmatpush1.bf16.msra.mxu1 %v892_v3  ;;  %v905_v14 = vld [vmem:[#allocation5 + $0x64] ss:$8 sps:$4 sm:$0xff]   ;;  %v910_v17 = vld [vmem:[#allocation5 + $0x70] ss:$8 sps:$4 sm:$0xff]   ;;  %v913_v19 = vld [vmem:[#allocation5 + $0x80] ss:$8 sps:$4 sm:$0xff]  }
  0x73   : > { %455 = vmatprep.subr.bf16.mxu0 %v893_v4  ;;  %778 = vmatprep.subr.bf16.mxu1 %v893_v4  ;;  %v911_v18 = vld [vmem:[#allocation5 + $0x84] ss:$8 sps:$4 sm:$0xff]   ;;  %v914_v20 = vld [vmem:[#allocation5 + $0x94] ss:$8 sps:$4 sm:$0xff]   ;;  %v916_v21 = vld [vmem:[#allocation5 + $0x90] ss:$8 sps:$4 sm:$0xff]  }
  0x74   : > { %751 = vmatprep.mubr.msk.bf16.mxu1 %vm438_vm0, %v928_v12  ;;  %v917_v22 = vld [vmem:[#allocation5 + $0xa4] ss:$8 sps:$4 sm:$0xff]   ;;  %v919_v23 = vld [vmem:[#allocation5 + $0xa0] ss:$8 sps:$4 sm:$0xff]   ;;  %v920_v24 = vld [vmem:[#allocation5 + $0xb4] ss:$8 sps:$4 sm:$0xff]  }
  0x75   : > { %v922_v25 = vld [vmem:[#allocation5 + $0xb0] ss:$8 sps:$4 sm:$0xff]   ;;  %v923_v26 = vld [vmem:[%s1337_s9] ss:$8 sps:$4 sm:$0xff]   ;;  %v929_v28 = vld [vmem:[%s1337_s9 + $0x14] ss:$8 sps:$4 sm:$0xff]  }
  0x76   : > { %456 = vmatpush1.bf16.msra.mxu0 %v895_v5  ;;  %790 = vmatpush1.bf16.msra.mxu1 %v895_v5  ;;  %v926_v27 = vld [vmem:[%s1337_s9 + $0x20] ss:$8 sps:$4 sm:$0xff]   ;;  %v931_v29 = vld [vmem:[%s1337_s9 + $0x34] ss:$8 sps:$4 sm:$0xff]   ;;  %v933_v30 = vld [vmem:[%s1337_s9 + $0x10] ss:$8 sps:$4 sm:$0xff]  }
  0x77   : > { %457 = vmatprep.subr.bf16.mxu0 %v896_v6  ;;  %779 = vmatprep.subr.bf16.mxu1 %v896_v6  ;;  %v934_v31 = vld [vmem:[%s1337_s9 + $0x30] ss:$8 sps:$4 sm:$0xff]   ;;  %v274_v34 = vsub.s32 0, %v273_v33  ;;  %v270_v35 = vld [vmem:[#allocation7] sm:$0x3]  ;;  %v278_v36 = vsub.s32 1, %v273_v33 }
  0x78   : > { %s1361_s20 = scalar_lea.vmem [#allocation8], %s713_s4  ;;  %s775_s24 = sshll.u32 %s1099_s15, 10 }
  0x79   : > { %v275_v37 = vrot.slane %v270_v35, %v274_v34  ;;  %v279_v38 = vrot.slane %v270_v35, %v278_v36  ;;  %s597_s22 = sshll.u32 %s1361_s20, 4  ;;  %s1374_s8 = scalar_lea.hbm %s1430_s3, %s775_s24  ;;  %s1369_s22 = int_to_ptr.vmem [resolvable:$true] %s597_s22 }
  0x7a   : > { %458 = vmatpush1.bf16.msra.mxu0 %v898_v7  ;;  %791 = vmatpush1.bf16.msra.mxu1 %v898_v7  ;;  %s581_s15 = scalar_lea.sflag [#allocation4], %s1331_s25  ;;  %s1021_s26 = scalar_lea.vmem %s1369_s22, 1024 }
  0x7b   : > { %459 = vmatprep.subr.bf16.mxu0 %v899_v8  ;;  %780 = vmatprep.subr.bf16.mxu1 %v899_v8  ;;  %p1022_p8 = scmp.ne.s32.totalorder %s1369_s22, %s1021_s26  ;;  %p1445_p12 = scmp.ne.s32.totalorder %s1441_s27, 0 }
  0x7c   : > { %s1114_s10 = smov [#allocation8]  }
  0x7d   : > { %p1023_p1 = pnand %p1022_p8, %p1445_p12  ;;  %s1025_s7 = sshll.u32 %s1114_s10, 4  ;;  %s1026_s7 = int_to_ptr.vmem [resolvable:$false] %s1025_s7 }
  0x7e   : > { %460 = vmatpush1.bf16.msra.mxu0 %v901_v9  ;;  %792 = vmatpush1.bf16.msra.mxu1 %v901_v9  ;;  %s1027_s30 = scalar_lea.vmem %s1026_s7, 2048  ;;  %p1028_p3 = scmp.lt.s32.totalorder %s1369_s22, %s1026_s7 }
  0x7f   : > { %461 = vmatprep.subr.bf16.mxu0 %v902_v10  ;;  %781 = vmatprep.subr.bf16.mxu1 %v902_v10  ;;  %p1024_p10 = pneg %p1023_p1  ;;  %p1029_p5 = scmp.lt.s32.totalorder %s1027_s30, %s1021_s26 }
  0x81   : > { %p1030_p9 = por %p1029_p5, %p1028_p3 }
  0x82   : > { %462 = vmatpush1.bf16.msra.mxu0 %v904_v13  ;;  %793 = vmatpush1.bf16.msra.mxu1 %v904_v13 }
  0x83   : > { %463 = vmatprep.subr.bf16.mxu0 %v905_v14  ;;  %782 = vmatprep.subr.bf16.mxu1 %v905_v14  ;;  %p1031_p11 = pnand %p1030_p9, %p1024_p10 }
  0x86   : > { %464 = vmatpush1.bf16.msra.mxu0 %v907_v15  ;;  %794 = vmatpush1.bf16.msra.mxu1 %v907_v15 }
  0x87   : > { %465 = vmatprep.subr.bf16.mxu0 %v908_v16  ;;  %783 = vmatprep.subr.bf16.mxu1 %v908_v16 }
  0x8a   : > { %466 = vmatpush1.bf16.msra.mxu0 %v910_v17  ;;  %795 = vmatpush1.bf16.msra.mxu1 %v910_v17 }
  0x8b   : > { %467 = vmatprep.subr.bf16.mxu0 %v911_v18  ;;  %784 = vmatprep.subr.bf16.mxu1 %v911_v18 }
  0x8e   : > { %468 = vmatpush1.bf16.msra.mxu0 %v913_v19  ;;  %796 = vmatpush1.bf16.msra.mxu1 %v913_v19 }
  0x8f   : > { %469 = vmatprep.subr.bf16.mxu0 %v914_v20  ;;  %785 = vmatprep.subr.bf16.mxu1 %v914_v20 }
  0x92   : > { %470 = vmatpush1.bf16.msra.mxu0 %v916_v21  ;;  %797 = vmatpush1.bf16.msra.mxu1 %v916_v21 }
  0x93   : > { %471 = vmatprep.subr.bf16.mxu0 %v917_v22  ;;  %786 = vmatprep.subr.bf16.mxu1 %v917_v22 }
  0x96   : > { %472 = vmatpush1.bf16.msra.mxu0 %v919_v23  ;;  %798 = vmatpush1.bf16.msra.mxu1 %v919_v23 }
  0x97   : > { %473 = vmatprep.subr.bf16.mxu0 %v920_v24  ;;  %787 = vmatprep.subr.bf16.mxu1 %v920_v24 }
  0x9a   : > { %474 = vmatpush1.bf16.msra.mxu0 %v922_v25  ;;  %799 = vmatpush1.bf16.msra.mxu1 %v922_v25 }
  0x9d   : > { %484 = vmatmul.mubr.bf16.vlgmr.msra.gmra.mrb[0].mxu0 %v923_v26  ;;  %504 = vmatmul.mubr.bf16.vlgmr.msra.gmra.mrb[0].mxu1 %v926_v27 }
  0x9e   : > { %750 = vmatprep.mubr.msk.bf16.mxu0 %vm438_vm0, %v929_v28  ;;  %752 = vmatprep.mubr.msk.bf16.mxu1 %vm438_vm0, %v931_v29 }
  0xa5   : > { %494 = vmatmul.mubr.bf16.gmra.mrb[4].mxu0 %v933_v30  ;;  %514 = vmatmul.mubr.bf16.gmra.mrb[4].mxu1 %v934_v31 }
 0x170   : > { %v485_v39 = vpop.f32.mrb[0].mxu0  ;;  %v505_v40 = vpop.f32.mrb[0].mxu1 }
 0x171   : > { %v486_v41 = vadd.f32 %v485_v39, %v275_v37  ;;  %v506_v42 = vadd.f32 %v505_v40, %v275_v37  ;;  %v487_v43 = vpop.f32.mrb[1].mxu0  ;;  %v507_v44 = vpop.f32.mrb[1].mxu1 }
 0x172   : > { %v488_v45 = vadd.f32 %v487_v43, %v279_v38  ;;  %v508_v46 = vadd.f32 %v507_v44, %v279_v38  ;;  %v489_v47 = vpop.f32.mrb[2].mxu0  ;;  %v509_v48 = vpop.f32.mrb[2].mxu1 }
 0x173   : > { %v490_v49 = vadd.f32 %v489_v47, %v275_v37  ;;  %v510_v50 = vadd.f32 %v509_v48, %v275_v37  ;;  %v491_v51 = vpop.f32.mrb[3].mxu0  ;;  %v511_v52 = vpop.f32.mrb[3].mxu1 }
 0x174   : > { %v767_v53 = vpack.c.bf16 %v488_v45, %v486_v41  ;;  %v771_v54 = vpack.c.bf16 %v508_v46, %v506_v42  ;;  %v492_v55 = vadd.f32 %v491_v51, %v279_v38  ;;  %v512_v56 = vadd.f32 %v511_v52, %v279_v38 }
 0x176   : > { %572 = vst [vmem:[%s1361_s20] sm:$0xff] %v767_v53  ;;  %576 = vst [vmem:[%s1361_s20 + $0x20] sm:$0xff] %v771_v54  ;;  %v768_v57 = vpack.c.bf16 %v492_v55, %v490_v49  ;;  %v772_v58 = vpack.c.bf16 %v512_v56, %v510_v50 }
 0x178   : > { %573 = vst [vmem:[%s1361_s20 + $0x8] sm:$0xff] %v768_v57  ;;  %577 = vst [vmem:[%s1361_s20 + $0x28] sm:$0xff] %v772_v58  ;;  %v495_v59 = vpop.f32.mrb[4].mxu0  ;;  %v515_v60 = vpop.f32.mrb[4].mxu1 }
 0x179   : > { %v496_v61 = vadd.f32 %v495_v59, %v275_v37  ;;  %v516_v62 = vadd.f32 %v515_v60, %v275_v37  ;;  %v497_v63 = vpop.f32.mrb[5].mxu0  ;;  %v517_v0 = vpop.f32.mrb[5].mxu1 }
 0x17a   : > { %v498_v1 = vadd.f32 %v497_v63, %v279_v38  ;;  %v518_v2 = vadd.f32 %v517_v0, %v279_v38  ;;  %v499_v3 = vpop.f32.mrb[6].mxu0  ;;  %v519_v4 = vpop.f32.mrb[6].mxu1 }
 0x17b   : > { %v500_v5 = vadd.f32 %v499_v3, %v275_v37  ;;  %v520_v6 = vadd.f32 %v519_v4, %v275_v37  ;;  %v501_v7 = vpop.f32.mrb[7].mxu0  ;;  %v521_v8 = vpop.f32.mrb[7].mxu1 }
 0x17c   : > { %v769_v9 = vpack.c.bf16 %v498_v1, %v496_v61  ;;  %v773_v10 = vpack.c.bf16 %v518_v2, %v516_v62  ;;  %v502_v11 = vadd.f32 %v501_v7, %v279_v38  ;;  %v522_v12 = vadd.f32 %v521_v8, %v279_v38 }
 0x17e   : > { %574 = vst [vmem:[%s1361_s20 + $0x10] sm:$0xff] %v769_v9  ;;  %578 = vst [vmem:[%s1361_s20 + $0x30] sm:$0xff] %v773_v10  ;;  %v770_v13 = vpack.c.bf16 %v502_v11, %v500_v5  ;;  %v774_v14 = vpack.c.bf16 %v522_v12, %v520_v6 }
 0x180   : > { %575 = vst [vmem:[%s1361_s20 + $0x18] sm:$0xff] %v770_v13  ;;  %579 = vst [vmem:[%s1361_s20 + $0x38] sm:$0xff] %v774_v14 }
 0x181   : > { %1034 = shalt.err (!%p1031_p11)
}
 0x182   : > { %s1035_s21 = scalar_lea.hbm %s1374_s8, 1024  ;;  %s1039_s4 = scalar_lea.hbm %s1430_s3, 2048 }
 0x183   : > { %p1036_p0 = scmp.ne.s32.totalorder %s1374_s8, %s1035_s21  ;;  %p1040_p6 = scmp.lt.u32.totalorder %s1374_s8, %s1430_s3 }
 0x184   : > { %p1041_p7 = scmp.lt.u32.totalorder %s1039_s4, %s1035_s21  ;;  %p1043_p8 = scmp.lt.u32.totalorder %s1035_s21, %s1374_s8 }
 0x185   : > { %p1037_p4 = pnand %p1036_p0, %p1445_p12 }
 0x186   : > { %p1042_p2 = por %p1041_p7, %p1040_p6 }
 0x187   : > { %p1038_p13 = pneg %p1037_p4 }
 0x188   : > { %p1044_p1 = por %p1043_p8, %p1042_p2 }
 0x18a   : > { %p1045_p10 = pnand %p1044_p1, %p1038_p13 }
 0x18c   : > { %1048 = shalt.err (!%p1045_p10)
}
 0x18d   : > { %s1115_s20 = smov 128   ;;  %s1116_s24 = smov 8  }
 0x18e   : > { %810 = dma.vmem_to_hbm [thread:$0]  (%p1445_p12), %s1369_s22, 1024, %s1374_s8, %s581_s15, %s1115_s20, %s1115_s20, %s1116_s24  }
 0x18f PF: > { %s612_s11 = sand.u32 1, %s1087_s12   ;;  %p1446_p3 = scmp.ne.s32.totalorder %s1438_s23, 0 }
 0x190   : > { %p1447_p5 = scmp.ge.s32.totalorder %s1107_s17, 2  ;;  %s613_s18 = scalar_lea.sflag [#allocation4], %s612_s11 }
 0x192   : > { %p824_p9 = pnand %p1447_p5, %p1446_p3 }
 0x194   : > { %1082 = dma.done.wait (!%p824_p9), %s613_s18, 1024  }
 0x195   : > { %1084 = vsyncadd (!%p824_p9), %s613_s18, 4294966272  ;;  %s20_s17 = sadd.s32 1, %s1107_s17   ;;  %s1448_s12 = smov %s1091_s13 }
 0x196   : > { %p17_p11 = scmp.ge.s32.totalorder %s20_s17, 4   ;;  %s1449_s13 = smov %s1095_s14 }
 0x197   : > { %s1450_s14 = smov %s1282_s5  ;;  %s1451_s15 = smov %s1103_s16 }
 0x198   : > { %s1452_s16 = smov %s1454_s19  ;;  %19 = sbr.rel (!%p17_p11) target bundleno = 7 (0x7), region = 85 }
 0x19f   :  { %618 = vsyncpa [#allocation3], 1 }
 0x1a0   :  { %620 = vsyncpa [#allocation3 + $0x1], 1 }
 0x1a1   :  { %621 = vsyncpa [#allocation6], 1 }
 0x1a2   :  { %622 = vsyncpa [#allocation4], 1 }
 0x1a3   :  { %624 = vsyncpa [#allocation4 + $0x1], 1 }

// kernel: _lambda_.13
= control target key start
LH: loop header
LB: loop body
LE: loop exit
PB: predicated region body
PF: predicated region fallthrough
CT: control target
= control target key end

     0   :  { %8 = vsyncpa [#allocation3], 0  ;;  %s1309_s0 = inlined_call_operand.hbm [shape: bf16[2,64,256], index: 0, kind: input, shape index: {}]   ;;  %s1310_s1 = inlined_call_operand.hbm [shape: bf16[256,128], index: 1, kind: input, shape index: {}]   ;;  %s1311_s2 = inlined_call_operand.hbm [shape: f32[1,128], index: 2, kind: input, shape index: {}]   ;;  %s1312_s3 = inlined_call_operand.hbm [shape: f32[2,64,128], index: 3, kind: output, shape index: {}]  }
   0x1   :  { %10 = vsyncpa [#allocation3 + $0x1], 0 }
   0x2   :  { %11 = vsyncpa [#allocation6], 0 }
   0x3   :  { %12 = vsyncpa [#allocation4], 0 }
   0x4   :  { %14 = vsyncpa [#allocation4 + $0x1], 0  ;;  %s1039_s12 = smov 0   ;;  %s1041_s13 = smov 0  }
   0x5   :  { %s1043_s14 = smov 0   ;;  %s1045_s15 = smov 0  }
   0x6   :  { %s1047_s16 = smov 0   ;;  %s1049_s17 = smov 0  }
   0x7 LB: > { %s616_s18 = sadd.s32 4294967295, %s1007_s17   ;;  %s617_s19 = sadd.s32 4294967294, %s1007_s17   ;;  %s1007_s17 = sphi %s1049_s17, %s20_s17   ;;  %s1003_s16 = sphi %s1047_s16, %s1334_s16   ;;  %s999_s15 = sphi %s1045_s15, %s1333_s15   ;;  %s995_s14 = sphi %s1043_s14, %s1332_s14   ;;  %s991_s13 = sphi %s1041_s13, %s1331_s13   ;;  %s987_s12 = sphi %s1039_s12, %s1330_s12  }
   0x8   : > { %p54_p0 = scmp.ne.s32.totalorder %s991_s13, %s987_s12  ;;  %p1073_p1 = scmp.eq.s32.totalorder %s616_s18, 0 }
   0x9   : > { %p1077_p2 = scmp.eq.s32.totalorder %s616_s18, 1  ;;  %p128_p3 = scmp.eq.s32.totalorder %s617_s19, 1 }
   0xa   : > { %s1317_s20 = scalar_select %p1073_p1, 1, 0 }
   0xb   : > { %p1083_p4 = por %p1073_p1, %p54_p0  ;;  %p618_p5 = scmp.ge.s32.totalorder %s1007_s17, 1 }
   0xc   : > { %p1088_p6 = por %p128_p3, %p54_p0  ;;  %p135_p7 = scmp.lt.s32.totalorder %s1007_s17, 3 }
   0xd   : > { %s1319_s22 = scalar_select %p1083_p4, 1, 0 }
   0xe   : > { %s1320_s23 = scalar_select %p1088_p6, 1, 0 }
   0xf   : > { %p1093_p8 = pnand %p618_p5, %p135_p7  ;;  %s1009_s25 = smov [#allocation5]  }
  0x10   : > { %s147_s26 = sshll.u32 %s1009_s25, 4  ;;  %s1010_s28 = smov [#allocation7]   ;;  %s1097_s26 = int_to_ptr.vmem [resolvable:$true] %s147_s26 }
  0x11   : > { %p730_p9 = pneg %p1093_p8  ;;  %s161_s29 = sshll.u32 %s1010_s28, 4  ;;  %s1108_s29 = int_to_ptr.vmem [resolvable:$true] %s161_s29 }
  0x12   : > { %s835_s5 = scalar_lea.hbm %s1310_s1, 2048 }
  0x13   : > { %p1104_p11 = pnand %p730_p9, %p1073_p1  ;;  %p836_p12 = scmp.ne.s32.totalorder %s1310_s1, %s835_s5 }
  0x14   : > { %p842_p5 = scmp.lt.u32.totalorder %s835_s5, %s1310_s1 }
  0x15   : > { %p837_p13 = pneg %p1104_p11 }
  0x17   : > { %p838_p0 = pnand %p837_p13, %p836_p12 }
  0x19   : > { %p839_p3 = pneg %p838_p0 }
  0x1b   : > { %p844_p7 = pnand %p842_p5, %p839_p3 }
  0x1d   : > { %847 = shalt.err (!%p844_p7)
}
  0x1e   : > { %s848_s10 = scalar_lea.vmem %s1097_s26, 2048  ;;  %p856_p1 = scmp.lt.s32.totalorder %s1097_s26, %s1097_s26 }
  0x1f   : > { %p849_p9 = scmp.ne.s32.totalorder %s1097_s26, %s848_s10  ;;  %p857_p12 = scmp.lt.s32.totalorder %s848_s10, %s848_s10 }
  0x21   : > { %p851_p10 = pnand %p849_p9, %p837_p13  ;;  %p858_p0 = por %p857_p12, %p856_p1 }
  0x23   : > { %p852_p6 = pneg %p851_p10 }
  0x25   : > { %p859_p4 = pnand %p858_p0, %p852_p6 }
  0x27   : > { %862 = shalt.err (!%p859_p4)
}
  0x28   : > { %s1011_s11 = smov 64   ;;  %s1012_s18 = smov 4  }
  0x29   : > { %733 = dma.hbm_to_vmem [thread:$0]  (!%p1104_p11), %s1310_s1, 2048, %s1097_s26, [#allocation6], %s1011_s11, %s1011_s11, %s1012_s18  }
  0x2a   : > { %s863_s4 = scalar_lea.hbm %s1311_s2, 16 }
  0x2b   : > { %p864_p1 = scmp.ne.s32.totalorder %s1311_s2, %s863_s4  ;;  %p870_p10 = scmp.lt.u32.totalorder %s863_s4, %s1311_s2 }
  0x2d   : > { %p866_p4 = pnand %p864_p1, %p837_p13 }
  0x2f   : > { %p867_p6 = pneg %p866_p4 }
  0x31   : > { %p872_p3 = pnand %p870_p10, %p867_p6 }
  0x33   : > { %875 = shalt.err (!%p872_p3)
}
  0x34   : > { %s876_s26 = scalar_lea.vmem %s1108_s29, 16  ;;  %s883_s9 = scalar_lea.vmem %s1108_s29, 32 }
  0x35   : > { %p877_p5 = scmp.ne.s32.totalorder %s1108_s29, %s876_s26  ;;  %p884_p12 = scmp.lt.s32.totalorder %s1108_s29, %s1108_s29 }
  0x36   : > { %p885_p0 = scmp.lt.s32.totalorder %s883_s9, %s876_s26 }
  0x37   : > { %p879_p7 = pnand %p877_p5, %p837_p13 }
  0x38   : > { %p886_p1 = por %p885_p0, %p884_p12 }
  0x39   : > { %p880_p9 = pneg %p879_p7 }
  0x3b   : > { %p887_p4 = pnand %p886_p1, %p880_p9 }
  0x3d   : > { %890 = shalt.err (!%p887_p4)
}
  0x3e   : > { %736 = dma.hbm_to_vmem [thread:$0]  (!%p1104_p11), %s1311_s2, 16, %s1108_s29, [#allocation6]  }
  0x3f   : > { %s32_s18 = sadd.s32 1, %s1003_s16  ;;  %s41_s19 = sadd.s32 1, %s995_s14 }
  0x40   : > { %p34_p13 = scmp.ge.s32.totalorder %s32_s18, 2  ;;  %p48_p6 = scmp.ne.s32.totalorder %s995_s14, %s991_s13 }
  0x41   : > { %p49_p10 = scmp.eq.s32.totalorder %s1007_s17, 0  ;;  %p747_p3 = scmp.lt.s32.totalorder %s1007_s17, 2 }
  0x42   : > { %s1336_s18 = smov (%p34_p13, %s32_s18), 0  ;;  %p1173_p7 = por %p1077_p2, %p48_p6 }
  0x43   : > { %p50_p5 = por %p49_p10, %p48_p6  ;;  %s36_s25 = ssub.s32 %s1003_s16, %s1336_s18 }
  0x44   : > { %s1323_s27 = scalar_select %p1173_p7, 1, 0 }
  0x45   : > { %s172_s28 = sand.u32 1, %s995_s14   ;;  %p39_p9 = scmp.eq.s32.totalorder %s36_s25, 0 }
  0x46   : > { %s622_s29 = sshll.u32 %s172_s28, 6  ;;  %s660_s30 = sshll.u32 %s1003_s16, 10 }
  0x47   : > { %s1182_s4 = scalar_select %p39_p9, %s995_s14, %s41_s19  }
  0x48   : > { %s1187_s7 = scalar_lea.hbm %s1309_s0, %s660_s30  ;;  %s176_s21 = scalar_lea.vmem [#allocation2], %s622_s29 }
  0x49   : > { %s186_s8 = sshll.u32 %s176_s21, 4  ;;  %p1191_p2 = pnand %p747_p3, %p50_p5  ;;  %s1195_s8 = int_to_ptr.vmem [resolvable:$true] %s186_s8 }
  0x4a   : > { %s1197_s9 = scalar_lea.sflag [#allocation3], %s172_s28  ;;  %s891_s10 = scalar_lea.hbm %s1187_s7, 1024 }
  0x4b   : > { %p892_p11 = scmp.ne.s32.totalorder %s1187_s7, %s891_s10  ;;  %p893_p12 = pneg %p1191_p2 }
  0x4c   : > { %s896_s25 = scalar_lea.hbm %s1309_s0, 2048  ;;  %p897_p4 = scmp.lt.u32.totalorder %s1187_s7, %s1309_s0 }
  0x4d   : > { %p894_p0 = pnand %p893_p12, %p892_p11  ;;  %p898_p13 = scmp.lt.u32.totalorder %s896_s25, %s891_s10 }
  0x4e   : > { %p900_p10 = scmp.lt.u32.totalorder %s891_s10, %s1187_s7 }
  0x4f   : > { %p895_p1 = pneg %p894_p0  ;;  %p899_p6 = por %p898_p13, %p897_p4 }
  0x51   : > { %p901_p3 = por %p900_p10, %p899_p6 }
  0x53   : > { %p902_p5 = pnand %p901_p3, %p895_p1 }
  0x55   : > { %905 = shalt.err (!%p902_p5)
}
  0x56   : > { %s906_s28 = scalar_lea.vmem %s1195_s8, 1024  ;;  %s1013_s5 = smov [#allocation2]  }
  0x57   : > { %p907_p9 = scmp.ne.s32.totalorder %s1195_s8, %s906_s28  ;;  %s911_s6 = sshll.u32 %s1013_s5, 4  ;;  %s912_s6 = int_to_ptr.vmem [resolvable:$false] %s911_s6 }
  0x58   : > { %s913_s21 = scalar_lea.vmem %s912_s6, 2048  ;;  %p914_p7 = scmp.lt.s32.totalorder %s1195_s8, %s912_s6 }
  0x59   : > { %p909_p11 = pnand %p907_p9, %p893_p12  ;;  %p915_p4 = scmp.lt.s32.totalorder %s913_s21, %s906_s28 }
  0x5b   : > { %p910_p0 = pneg %p909_p11  ;;  %p916_p13 = por %p915_p4, %p914_p7 }
  0x5d   : > { %p917_p6 = pnand %p916_p13, %p910_p0 }
  0x5f   : > { %920 = shalt.err (!%p917_p6)
}
  0x60   : > { %s1014_s10 = smov 128   ;;  %s1015_s11 = smov 8  }
  0x61   : > { %740 = dma.hbm_to_vmem [thread:$0]  (!%p1191_p2), %s1187_s7, 1024, %s1195_s8, %s1197_s9, %s1014_s10, %s1014_s10, %s1015_s11  }
  0x62   : > { %198 = sbr.rel (%p1093_p8) target bundleno = 384 (0x180), region = 32  ;;  %s1228_s19 = sand.u32 (!%p1093_p8), 1, %s991_s13  }
  0x63   : > { %s626_s25 = sshll.u32 (!%p1093_p8), %s1228_s19, 6  ;;  %s201_s29 = scalar_lea.sflag (!%p1093_p8), [#allocation3], %s1228_s19 }
  0x64   : > { %s1234_s30 = scalar_lea.vmem (!%p1093_p8), [#allocation2], %s626_s25  ;;  %p1325_p7 = scmp.ne.s32.totalorder (!%p1093_p8), %s1319_s22, 0 }
  0x69   : > { %974 = dma.done.wait (%p1325_p7), %s201_s29, 1024  }
  0x6a   : > { %976 = vsyncadd (%p1325_p7), %s201_s29, 4294966272  ;;  %p1326_p2 = scmp.ne.s32.totalorder %s1317_s20, 0 }
  0x6c   : > { %978 = dma.done.wait (%p1326_p2), [#allocation6], 2064  }
  0x6d   : > { %980 = vsyncadd (%p1326_p2), [#allocation6], 4294965232  ;;  %v807_v0 = vld [vmem:[#allocation5 + $0x40] sm:$0xff]   ;;  %v809_v2 = vld [vmem:[#allocation5 + $0x48] sm:$0xff]   ;;  %s234_s20 = scalar_lea.vmem [#allocation8], %s626_s25  ;;  %s661_s24 = sshll.u32 %s999_s15, 10 }
  0x6e   : > { %v808_v1 = vld [vmem:[#allocation5] sm:$0xff]   ;;  %662 = vmatprep.subr.bf16.mxu0 %v807_v0  ;;  %702 = vmatprep.subr.bf16.mxu1 %v807_v0  ;;  %v810_v3 = vld [vmem:[#allocation5 + $0x8] sm:$0xff]   ;;  %v811_v4 = vld [vmem:[#allocation5 + $0x50] sm:$0xff]   ;;  %s510_s22 = sshll.u32 %s234_s20, 4  ;;  %s1260_s26 = scalar_lea.hbm %s1312_s3, %s661_s24  ;;  %s1255_s22 = int_to_ptr.vmem [resolvable:$true] %s510_s22 }
  0x6f   : > { %663 = vmatpush3.bf16.msra.mxu0 %v808_v1  ;;  %710 = vmatpush3.bf16.msra.mxu1 %v808_v1  ;;  %v812_v5 = vld [vmem:[#allocation5 + $0x10] sm:$0xff]   ;;  %v813_v6 = vld [vmem:[#allocation5 + $0x58] sm:$0xff]   ;;  %v815_v8 = vld [vmem:[#allocation5 + $0x60] sm:$0xff]   ;;  %s495_s15 = scalar_lea.sflag [#allocation4], %s1228_s19  ;;  %s921_s9 = scalar_lea.vmem %s1255_s22, 1024 }
  0x70   : > { %664 = vmatprep.subr.bf16.mxu0 %v809_v2  ;;  %703 = vmatprep.subr.bf16.mxu1 %v809_v2  ;;  %v814_v7 = vld [vmem:[#allocation5 + $0x18] sm:$0xff]   ;;  %v816_v9 = vld [vmem:[#allocation5 + $0x20] sm:$0xff]   ;;  %v817_v10 = vld [vmem:[#allocation5 + $0x68] sm:$0xff]   ;;  %p922_p8 = scmp.ne.s32.totalorder %s1255_s22, %s921_s9  ;;  %p1327_p12 = scmp.ne.s32.totalorder %s1323_s27, 0 }
  0x71   : > { %v825_v11 = vld [vmem:[%s1234_s30 + $0x4] ss:$8 sps:$4 sm:$0xff]   ;;  %v819_v14 = vld [vmem:[#allocation5 + $0x70] sm:$0xff]   ;;  %v821_v16 = vld [vmem:[#allocation5 + $0x78] sm:$0xff]   ;;  %s1016_s28 = smov [#allocation8]  }
  0x72   : > { %v828_v12 = vld [vmem:[%s1234_s30 + $0x24] ss:$8 sps:$4 sm:$0xff]   ;;  %453 = vmatprep.mubr.bf16.mxu0 %v825_v11  ;;  %v820_v15 = vld [vmem:[#allocation5 + $0x30] sm:$0xff]   ;;  %v822_v17 = vld [vmem:[#allocation5 + $0x38] sm:$0xff]   ;;  %p923_p1 = pnand %p922_p8, %p1327_p12  ;;  %s925_s5 = sshll.u32 %s1016_s28, 4  ;;  %s926_s5 = int_to_ptr.vmem [resolvable:$false] %s925_s5 }
  0x73   : > { %665 = vmatpush3.bf16.msra.mxu0 %v810_v3  ;;  %711 = vmatpush3.bf16.msra.mxu1 %v810_v3  ;;  %v818_v13 = vld [vmem:[#allocation5 + $0x28] sm:$0xff]   ;;  %v829_v20 = vld [vmem:[%s1234_s30 + $0x14] ss:$8 sps:$4 sm:$0xff]   ;;  %v833_v22 = vld [vmem:[%s1234_s30 + $0x10] ss:$8 sps:$4 sm:$0xff]   ;;  %s927_s6 = scalar_lea.vmem %s926_s5, 2048  ;;  %p928_p3 = scmp.lt.s32.totalorder %s1255_s22, %s926_s5 }
  0x74   : > { %666 = vmatprep.subr.bf16.mxu0 %v811_v4  ;;  %704 = vmatprep.subr.bf16.mxu1 %v811_v4  ;;  %v823_v18 = vld [vmem:[%s1234_s30] ss:$8 sps:$4 sm:$0xff]   ;;  %v831_v21 = vld [vmem:[%s1234_s30 + $0x34] ss:$8 sps:$4 sm:$0xff]   ;;  %v834_v23 = vld [vmem:[%s1234_s30 + $0x30] ss:$8 sps:$4 sm:$0xff]   ;;  %p924_p10 = pneg %p923_p1  ;;  %p929_p5 = scmp.lt.s32.totalorder %s927_s6, %s921_s9 }
  0x75   : > { %469 = vmatprep.mubr.bf16.mxu1 %v828_v12  ;;  %v826_v19 = vld [vmem:[%s1234_s30 + $0x20] ss:$8 sps:$4 sm:$0xff]  }
  0x76   : > { %v630_v26 = vld [vmem:[#allocation7] ss:$0 sm:$0xff]  ;;  %p930_p9 = por %p929_p5, %p928_p3 }
  0x77   : > { %667 = vmatpush3.bf16.msra.mxu0 %v812_v5  ;;  %712 = vmatpush3.bf16.msra.mxu1 %v812_v5 }
  0x78   : > { %668 = vmatprep.subr.bf16.mxu0 %v813_v6  ;;  %705 = vmatprep.subr.bf16.mxu1 %v813_v6  ;;  %p931_p11 = pnand %p930_p9, %p924_p10 }
  0x7b   : > { %669 = vmatpush3.bf16.msra.mxu0 %v814_v7  ;;  %713 = vmatpush3.bf16.msra.mxu1 %v814_v7 }
  0x7c   : > { %670 = vmatprep.subr.bf16.mxu0 %v815_v8  ;;  %706 = vmatprep.subr.bf16.mxu1 %v815_v8 }
  0x7f   : > { %671 = vmatpush3.bf16.msra.mxu0 %v816_v9  ;;  %714 = vmatpush3.bf16.msra.mxu1 %v816_v9 }
  0x80   : > { %672 = vmatprep.subr.bf16.mxu0 %v817_v10  ;;  %707 = vmatprep.subr.bf16.mxu1 %v817_v10 }
  0x83   : > { %673 = vmatpush3.bf16.msra.mxu0 %v818_v13  ;;  %715 = vmatpush3.bf16.msra.mxu1 %v818_v13 }
  0x84   : > { %674 = vmatprep.subr.bf16.mxu0 %v819_v14  ;;  %708 = vmatprep.subr.bf16.mxu1 %v819_v14 }
  0x87   : > { %675 = vmatpush3.bf16.msra.mxu0 %v820_v15  ;;  %716 = vmatpush3.bf16.msra.mxu1 %v820_v15 }
  0x88   : > { %676 = vmatprep.subr.bf16.mxu0 %v821_v16  ;;  %709 = vmatprep.subr.bf16.mxu1 %v821_v16 }
  0x8b   : > { %677 = vmatpush3.bf16.msra.mxu0 %v822_v17  ;;  %717 = vmatpush3.bf16.msra.mxu1 %v822_v17 }
  0x8e   : > { %454 = vmatmul.mubr.bf16.vlgmr.msra.gmra.mrb[0].mxu0 %v823_v18  ;;  %470 = vmatmul.mubr.bf16.vlgmr.msra.gmra.mrb[0].mxu1 %v826_v19 }
  0x8f   : > { %461 = vmatprep.mubr.bf16.mxu0 %v829_v20  ;;  %477 = vmatprep.mubr.bf16.mxu1 %v831_v21 }
  0x96   : > { %462 = vmatmul.mubr.bf16.gmra.mrb[4].mxu0 %v833_v22  ;;  %478 = vmatmul.mubr.bf16.gmra.mrb[4].mxu1 %v834_v23 }
 0x161   : > { %v678_v24 = vpop.f32.mrb[0].mxu0  ;;  %v690_v25 = vpop.f32.mrb[0].mxu1 }
 0x162   : > { %v679_v27 = vpop.f32.mrb[1].mxu0  ;;  %v691_v28 = vpop.f32.mrb[1].mxu1 }
 0x163   : > { %v680_v29 = vadd.f32 %v679_v27, %v678_v24  ;;  %v692_v30 = vadd.f32 %v691_v28, %v690_v25  ;;  %v681_v31 = vpop.f32.mrb[2].mxu0  ;;  %v693_v32 = vpop.f32.mrb[2].mxu1 }
 0x164   : > { %v682_v33 = vpop.f32.mrb[3].mxu0  ;;  %v694_v34 = vpop.f32.mrb[3].mxu1 }
 0x165   : > { %v456_v35 = vadd.f32 %v680_v29, %v630_v26  ;;  %v472_v36 = vadd.f32 %v692_v30, %v630_v26  ;;  %v683_v37 = vadd.f32 %v682_v33, %v681_v31  ;;  %v695_v38 = vadd.f32 %v694_v34, %v693_v32 }
 0x167   : > { %486 = vst [vmem:[%s234_s20] sm:$0xff] %v456_v35  ;;  %490 = vst [vmem:[%s234_s20 + $0x20] sm:$0xff] %v472_v36  ;;  %v459_v39 = vadd.f32 %v683_v37, %v630_v26  ;;  %v475_v40 = vadd.f32 %v695_v38, %v630_v26 }
 0x169   : > { %487 = vst [vmem:[%s234_s20 + $0x8] sm:$0xff] %v459_v39  ;;  %491 = vst [vmem:[%s234_s20 + $0x28] sm:$0xff] %v475_v40  ;;  %v684_v41 = vpop.f32.mrb[4].mxu0  ;;  %v696_v42 = vpop.f32.mrb[4].mxu1 }
 0x16a   : > { %v685_v43 = vpop.f32.mrb[5].mxu0  ;;  %v697_v44 = vpop.f32.mrb[5].mxu1 }
 0x16b   : > { %v686_v45 = vadd.f32 %v685_v43, %v684_v41  ;;  %v698_v46 = vadd.f32 %v697_v44, %v696_v42  ;;  %v687_v47 = vpop.f32.mrb[6].mxu0  ;;  %v699_v48 = vpop.f32.mrb[6].mxu1 }
 0x16c   : > { %v688_v49 = vpop.f32.mrb[7].mxu0  ;;  %v700_v50 = vpop.f32.mrb[7].mxu1 }
 0x16d   : > { %v464_v51 = vadd.f32 %v686_v45, %v630_v26  ;;  %v480_v52 = vadd.f32 %v698_v46, %v630_v26  ;;  %v689_v53 = vadd.f32 %v688_v49, %v687_v47  ;;  %v701_v54 = vadd.f32 %v700_v50, %v699_v48 }
 0x16f   : > { %488 = vst [vmem:[%s234_s20 + $0x10] sm:$0xff] %v464_v51  ;;  %492 = vst [vmem:[%s234_s20 + $0x30] sm:$0xff] %v480_v52  ;;  %v467_v55 = vadd.f32 %v689_v53, %v630_v26  ;;  %v483_v56 = vadd.f32 %v701_v54, %v630_v26 }
 0x171   : > { %489 = vst [vmem:[%s234_s20 + $0x18] sm:$0xff] %v467_v55  ;;  %493 = vst [vmem:[%s234_s20 + $0x38] sm:$0xff] %v483_v56 }
 0x172   : > { %934 = shalt.err (!%p931_p11)
}
 0x173   : > { %s935_s21 = scalar_lea.hbm %s1260_s26, 1024  ;;  %s939_s25 = scalar_lea.hbm %s1312_s3, 2048 }
 0x174   : > { %p936_p0 = scmp.ne.s32.totalorder %s1260_s26, %s935_s21  ;;  %p940_p6 = scmp.lt.u32.totalorder %s1260_s26, %s1312_s3 }
 0x175   : > { %p941_p7 = scmp.lt.u32.totalorder %s939_s25, %s935_s21  ;;  %p943_p8 = scmp.lt.u32.totalorder %s935_s21, %s1260_s26 }
 0x176   : > { %p937_p4 = pnand %p936_p0, %p1327_p12 }
 0x177   : > { %p942_p2 = por %p941_p7, %p940_p6 }
 0x178   : > { %p938_p13 = pneg %p937_p4 }
 0x179   : > { %p944_p1 = por %p943_p8, %p942_p2 }
 0x17b   : > { %p945_p10 = pnand %p944_p1, %p938_p13 }
 0x17d   : > { %948 = shalt.err (!%p945_p10)
}
 0x17e   : > { %s1017_s20 = smov 128   ;;  %s1018_s24 = smov 8  }
 0x17f   : > { %728 = dma.vmem_to_hbm [thread:$0]  (%p1327_p12), %s1255_s22, 1024, %s1260_s26, %s495_s15, %s1017_s20, %s1017_s20, %s1018_s24  }
 0x180 PF: > { %s525_s7 = sand.u32 1, %s987_s12   ;;  %p1328_p3 = scmp.ne.s32.totalorder %s1320_s23, 0 }
 0x181   : > { %p1329_p5 = scmp.ge.s32.totalorder %s1007_s17, 2  ;;  %s526_s8 = scalar_lea.sflag [#allocation4], %s525_s7 }
 0x183   : > { %p742_p9 = pnand %p1329_p5, %p1328_p3 }
 0x185   : > { %982 = dma.done.wait (!%p742_p9), %s526_s8, 1024  }
 0x186   : > { %984 = vsyncadd (!%p742_p9), %s526_s8, 4294966272  ;;  %s20_s17 = sadd.s32 1, %s1007_s17   ;;  %s1330_s12 = smov %s991_s13 }
 0x187   : > { %p17_p11 = scmp.ge.s32.totalorder %s20_s17, 4   ;;  %s1331_s13 = smov %s995_s14 }
 0x188   : > { %s1332_s14 = smov %s1182_s4  ;;  %s1333_s15 = smov %s1003_s16 }
 0x189   : > { %s1334_s16 = smov %s1336_s18  ;;  %19 = sbr.rel (!%p17_p11) target bundleno = 7 (0x7), region = 85 }
 0x190   :  { %531 = vsyncpa [#allocation3], 1 }
 0x191   :  { %533 = vsyncpa [#allocation3 + $0x1], 1 }
 0x192   :  { %534 = vsyncpa [#allocation6], 1 }
 0x193   :  { %535 = vsyncpa [#allocation4], 1 }
 0x194   :  { %537 = vsyncpa [#allocation4 + $0x1], 1 }

// kernel: _lambda_.14
= control target key start
LH: loop header
LB: loop body
LE: loop exit
PB: predicated region body
PF: predicated region fallthrough
CT: control target
= control target key end

     0   :  { %s2377_s0 = inlined_call_operand.hbm [shape: bf16[2,64,256], index: 0, kind: input, shape index: {}]   ;;  %s2378_s1 = inlined_call_operand.hbm [shape: bf16[2,64,256], index: 1, kind: input, shape index: {}]   ;;  %s2379_s2 = inlined_call_operand.hbm [shape: f32[2,64,2], index: 2, kind: input, shape index: {}]   ;;  %s2380_s3 = inlined_call_operand.hbm [shape: f32[2,64,128], index: 3, kind: input, shape index: {}]   ;;  %s2381_s4 = inlined_call_operand.hbm [shape: f32[8,128], index: 4, kind: input, shape index: {}]   ;;  %s2382_s5 = inlined_call_operand.hbm [shape: bf16[2,64,128], index: 5, kind: output, shape index: {}]  }
   0x1   :  { %2400 = sst [smem:[#allocation27_spill]] %s2377_s0 }
   0x2   :  { %2401 = sst [smem:[#allocation28_spill]] %s2378_s1 }
   0x3   :  { %2402 = sst [smem:[#allocation29_spill]] %s2381_s4 }
   0x4   :  { %10 = vsyncpa [#allocation3], 0 }
   0x5   :  { %12 = vsyncpa [#allocation3 + $0x1], 0 }
   0x6   :  { %13 = vsyncpa [#allocation6], 0 }
   0x7   :  { %15 = vsyncpa [#allocation6 + $0x1], 0 }
   0x8   :  { %16 = vsyncpa [#allocation9], 0 }
   0x9   :  { %18 = vsyncpa [#allocation9 + $0x1], 0 }
   0xa   :  { %19 = vsyncpa [#allocation4], 0 }
   0xb   :  { %21 = vsyncpa [#allocation4 + $0x1], 0  ;;  %s1619_s18 = smov 0   ;;  %s1621_s19 = smov 0  }
   0xc   :  { %s1623_s20 = smov 0   ;;  %s1625_s21 = smov 0  }
   0xd   :  { %s1627_s22 = smov 0   ;;  %s1629_s23 = smov 0  }
   0xe LB: > { %2403 = sst [smem:[#allocation17_spill]] %s1555_s18  ;;  %s1650_s24 = sadd.s32 4294967295, %s1575_s23   ;;  %s1575_s23 = sphi %s1629_s23, %s27_s23   ;;  %s1571_s22 = sphi %s1627_s22, %s2448_s22   ;;  %s1567_s21 = sphi %s1625_s21, %s2447_s21   ;;  %s1563_s20 = sphi %s1623_s20, %s2446_s20   ;;  %s1559_s19 = sphi %s1621_s19, %s2450_s19   ;;  %s1555_s18 = sphi %s1619_s18, %s2449_s18  }
   0xf   : > { %2404 = sst [smem:[#allocation18_spill]] %s1563_s20  ;;  %s1163_s25 = sadd.s32 4294967294, %s1575_s23  }
  0x10   : > { %2405 = sst [smem:[#allocation19_spill]] %s1571_s22  ;;  %p55_p0 = scmp.ne.s32.totalorder %s1563_s20, %s1559_s19 }
  0x11   : > { %p56_p1 = scmp.eq.s32.totalorder %s1575_s23, 0  ;;  %p61_p2 = scmp.ne.s32.totalorder %s1559_s19, %s1555_s18 }
  0x12   : > { %p2383_p3 = scmp.eq.s32.totalorder %s1650_s24, 0  ;;  %p192_p4 = scmp.eq.s32.totalorder %s1650_s24, 1 }
  0x13   : > { %p1661_p5 = por %p56_p1, %p55_p0  ;;  %p198_p6 = scmp.eq.s32.totalorder %s1163_s25, 1 }
  0x14   : > { %p1667_p7 = por %p2383_p3, %p61_p2  ;;  %p1671_p8 = por %p192_p4, %p55_p0 }
  0x15   : > { %p1675_p9 = por %p198_p6, %p61_p2  ;;  %p1164_p10 = scmp.ge.s32.totalorder %s1575_s23, 1 }
  0x16   : > { %s2407_s28 = scalar_select %p1667_p7, 1, 0 }
  0x17   : > { %s2408_s29 = scalar_select %p1671_p8, 1, 0 }
  0x18   : > { %s2409_s30 = scalar_select %p1675_p9, 1, 0 }
  0x19   : > { %p205_p11 = scmp.lt.s32.totalorder %s1575_s23, 3  ;;  %s1577_s7 = smov [#allocation10]  }
  0x1a   : > { %2410 = sst [smem:[#allocation20_spill]] %s2409_s30  ;;  %s218_s8 = sshll.u32 %s1577_s7, 4  ;;  %s219_s8 = int_to_ptr.vmem [resolvable:$true] %s218_s8 }
  0x1b   : > { %p1682_p13 = pnand %p1164_p10, %p205_p11  ;;  %p1271_p1 = scmp.lt.s32.totalorder %s1575_s23, 2 }
  0x1c   : > { %s39_s11 = sadd.s32 1, %s1571_s22  ;;  %s2388_s13 = sand.u32 1, %s1563_s20  }
  0x1d   : > { %s2411_s6 = scalar_select %p1682_p13, 1, 0 }
  0x1e   : > { %p1249_p0 = pneg %p1682_p13  ;;  %p1691_p4 = pnand %p1271_p1, %p1661_p5 }
  0x1f   : > { %p1702_p6 = scmp.ge.s32.totalorder %s39_s11, 2  ;;  %s2415_s4 = sld [smem:[#allocation29_spill]] }
  0x20   : > { %s2412_s9 = scalar_select %p1691_p4, 1, 0 }
  0x21   : > { %p1697_p2 = pnand %p1249_p0, %p2383_p3 }
  0x22   : > { %s2414_s12 = scalar_select %p1702_p6, 1, 0 }
  0x23   : > { %p1335_p10 = pneg %p1697_p2 }
  0x25   : > { %s1333_s16 = scalar_lea.hbm %s2415_s4, 128 }
  0x26   : > { %p1334_p5 = scmp.ne.s32.totalorder %s2415_s4, %s1333_s16  ;;  %p1340_p0 = scmp.lt.u32.totalorder %s1333_s16, %s2415_s4 }
  0x28   : > { %p1336_p11 = pnand %p1335_p10, %p1334_p5 }
  0x2a   : > { %p1337_p1 = pneg %p1336_p11 }
  0x2c   : > { %p1342_p12 = pnand %p1340_p0, %p1337_p1 }
  0x2e   : > { %1345 = shalt.err (!%p1342_p12)
}
  0x2f   : > { %s1346_s26 = scalar_lea.vmem %s219_s8, 128  ;;  %p1354_p7 = scmp.lt.s32.totalorder %s219_s8, %s219_s8 }
  0x30   : > { %p1347_p3 = scmp.ne.s32.totalorder %s219_s8, %s1346_s26  ;;  %p1355_p13 = scmp.lt.s32.totalorder %s1346_s26, %s1346_s26 }
  0x32   : > { %p1349_p9 = pnand %p1347_p3, %p1335_p10  ;;  %p1356_p4 = por %p1355_p13, %p1354_p7 }
  0x34   : > { %p1350_p8 = pneg %p1349_p9 }
  0x36   : > { %p1357_p6 = pnand %p1356_p4, %p1350_p8 }
  0x38   : > { %1360 = shalt.err (!%p1357_p6)
}
  0x39   : > { %1252 = dma.hbm_to_vmem [thread:$0]  (!%p1697_p2), %s2415_s4, 128, %s219_s8, [#allocation9]  }
  0x3a   : > { %p2416_p3 = scmp.ne.s32.totalorder %s2414_s12, 0  ;;  %s1729_s26 = sshll.u32 %s2388_s13, 6 }
  0x3b   : > { %s1732_s10 = sshll.u32 %s1571_s22, 10  ;;  %s2390_s17 = sand.u32 1, %s1575_s23  }
  0x3c   : > { %s2452_s11 = smov (%p2416_p3, %s39_s11), 0  ;;  %s2418_s25 = sadd.s32 1, %s1563_s20 }
  0x3d   : > { %2417 = sst [smem:[#allocation21_spill]] %s2452_s11  ;;  %s43_s16 = ssub.s32 %s1571_s22, %s2452_s11 }
  0x3e   : > { %p46_p7 = scmp.eq.s32.totalorder %s43_s16, 0  ;;  %s2420_s1 = sld [smem:[#allocation28_spill]] }
  0x3f   : > { %s257_s12 = scalar_lea.vmem [#allocation5], %s1729_s26  ;;  %s1753_s13 = scalar_lea.sflag [#allocation6], %s2390_s17 }
  0x40   : > { %s1740_s27 = scalar_select %p46_p7, %s1563_s20, %s2418_s25  }
  0x41   : > { %s267_s15 = sshll.u32 %s257_s12, 4  ;;  %p2421_p9 = scmp.ne.s32.totalorder %s2412_s9, 0  ;;  %s1749_s15 = int_to_ptr.vmem [resolvable:$true] %s267_s15 }
  0x42   : > { %2419 = sst [smem:[#allocation22_spill]] %s1740_s27 }
  0x43   : > { %p1759_p12 = pneg %p2421_p9 }
  0x44   : > { %s1746_s8 = scalar_lea.hbm %s2420_s1, %s1732_s10  ;;  %s1366_s12 = scalar_lea.hbm %s2420_s1, 2048 }
  0x45   : > { %s1361_s16 = scalar_lea.hbm %s1746_s8, 1024  ;;  %p1367_p2 = scmp.lt.u32.totalorder %s1746_s8, %s2420_s1 }
  0x46   : > { %p1362_p8 = scmp.ne.s32.totalorder %s1746_s8, %s1361_s16  ;;  %p1368_p6 = scmp.lt.u32.totalorder %s1366_s12, %s1361_s16 }
  0x47   : > { %p1370_p10 = scmp.lt.u32.totalorder %s1361_s16, %s1746_s8 }
  0x48   : > { %p1364_p13 = pnand %p1759_p12, %p1362_p8  ;;  %p1369_p5 = por %p1368_p6, %p1367_p2 }
  0x4a   : > { %p1365_p4 = pneg %p1364_p13  ;;  %p1371_p11 = por %p1370_p10, %p1369_p5 }
  0x4c   : > { %p1372_p1 = pnand %p1371_p11, %p1365_p4 }
  0x4e   : > { %1375 = shalt.err (!%p1372_p1)
}
  0x4f   : > { %s1376_s17 = scalar_lea.vmem %s1749_s15, 1024  ;;  %s1578_s7 = smov [#allocation5]  }
  0x50   : > { %p1377_p0 = scmp.ne.s32.totalorder %s1749_s15, %s1376_s17  ;;  %s1381_s14 = sshll.u32 %s1578_s7, 4  ;;  %s1382_s14 = int_to_ptr.vmem [resolvable:$false] %s1381_s14 }
  0x51   : > { %s1383_s4 = scalar_lea.vmem %s1382_s14, 2048  ;;  %p1384_p8 = scmp.lt.s32.totalorder %s1749_s15, %s1382_s14 }
  0x52   : > { %p1379_p3 = pnand %p1377_p0, %p1759_p12  ;;  %p1385_p13 = scmp.lt.s32.totalorder %s1383_s4, %s1376_s17 }
  0x54   : > { %p1380_p7 = pneg %p1379_p3  ;;  %p1386_p2 = por %p1385_p13, %p1384_p8 }
  0x56   : > { %p1387_p6 = pnand %p1386_p2, %p1380_p7 }
  0x58   : > { %1390 = shalt.err (!%p1387_p6)
}
  0x59   : > { %s2393_s11 = smov 128   ;;  %s2395_s16 = smov 8  }
  0x5a   : > { %1259 = dma.hbm_to_vmem [thread:$0]  (!%p2421_p9), %s1746_s8, 1024, %s1749_s15, %s1753_s13, %s2393_s11, %s2393_s11, %s2395_s16  }
  0x5b   : > { %s2423_s0 = sld [smem:[#allocation27_spill]]  ;;  %s233_s14 = scalar_lea.vmem [#allocation2], %s1729_s26 }
  0x5c   : > { %s243_s4 = sshll.u32 %s233_s14, 4  ;;  %s1799_s27 = scalar_lea.hbm %s2379_s2, %s1732_s10  ;;  %s1793_s4 = int_to_ptr.vmem [resolvable:$true] %s243_s4 }
  0x5d   : > { %s2424_s30 = sand.u32 1, %s1563_s20  }
  0x5e   : > { %s1803_s8 = scalar_lea.sflag [#allocation3], %s2424_s30 }
  0x61   : > { %s1790_s7 = scalar_lea.hbm %s2423_s0, %s1732_s10  ;;  %s1396_s11 = scalar_lea.hbm %s2423_s0, 2048 }
  0x62   : > { %s1391_s15 = scalar_lea.hbm %s1790_s7, 1024  ;;  %p1397_p11 = scmp.lt.u32.totalorder %s1790_s7, %s2423_s0 }
  0x63   : > { %p1392_p4 = scmp.ne.s32.totalorder %s1790_s7, %s1391_s15  ;;  %p1398_p1 = scmp.lt.u32.totalorder %s1396_s11, %s1391_s15 }
  0x64   : > { %p1400_p3 = scmp.lt.u32.totalorder %s1391_s15, %s1790_s7 }
  0x65   : > { %p1394_p5 = pnand %p1392_p4, %p1759_p12  ;;  %p1399_p0 = por %p1398_p1, %p1397_p11 }
  0x67   : > { %p1395_p10 = pneg %p1394_p5  ;;  %p1401_p7 = por %p1400_p3, %p1399_p0 }
  0x69   : > { %p1402_p8 = pnand %p1401_p7, %p1395_p10 }
  0x6b   : > { %1405 = shalt.err (!%p1402_p8)
}
  0x6c   : > { %s1406_s1 = scalar_lea.vmem %s1793_s4, 1024  ;;  %s1581_s22 = smov [#allocation2]  }
  0x6d   : > { %p1407_p13 = scmp.ne.s32.totalorder %s1793_s4, %s1406_s1  ;;  %s1411_s30 = sshll.u32 %s1581_s22, 4  ;;  %s1412_s30 = int_to_ptr.vmem [resolvable:$false] %s1411_s30 }
  0x6e   : > { %s1413_s16 = scalar_lea.vmem %s1412_s30, 2048  ;;  %p1414_p4 = scmp.lt.s32.totalorder %s1793_s4, %s1412_s30 }
  0x6f   : > { %p1409_p2 = pnand %p1407_p13, %p1759_p12  ;;  %p1415_p5 = scmp.lt.s32.totalorder %s1413_s16, %s1406_s1 }
  0x71   : > { %p1410_p6 = pneg %p1409_p2  ;;  %p1416_p11 = por %p1415_p5, %p1414_p4 }
  0x73   : > { %p1417_p1 = pnand %p1416_p11, %p1410_p6 }
  0x75   : > { %1420 = shalt.err (!%p1417_p1)
}
  0x76   : > { %s2425_s11 = smov 8   ;;  %s2426_s15 = smov 128  }
  0x77   : > { %1256 = dma.hbm_to_vmem [thread:$0]  (!%p2421_p9), %s1790_s7, 1024, %s1793_s4, %s1803_s8, %s2426_s15, %s2426_s15, %s2425_s11  }
  0x78   : > { %s281_s17 = scalar_lea.vmem [#allocation7], %s1729_s26  ;;  %s1837_s22 = scalar_lea.hbm %s2380_s3, %s1732_s10 }
  0x79   : > { %s290_s12 = sshll.u32 %s281_s17, 4  ;;  %s1421_s30 = scalar_lea.hbm %s1799_s27, 1024  ;;  %s1831_s12 = int_to_ptr.vmem [resolvable:$true] %s290_s12 }
  0x7a   : > { %p1422_p10 = scmp.ne.s32.totalorder %s1799_s27, %s1421_s30  ;;  %s1426_s20 = scalar_lea.hbm %s2379_s2, 2048 }
  0x7b   : > { %p1427_p7 = scmp.lt.u32.totalorder %s1799_s27, %s2379_s2  ;;  %p1428_p8 = scmp.lt.u32.totalorder %s1426_s20, %s1421_s30 }
  0x7c   : > { %p1424_p0 = pnand %p1422_p10, %p1759_p12  ;;  %p1430_p2 = scmp.lt.u32.totalorder %s1421_s30, %s1799_s27 }
  0x7d   : > { %p1429_p13 = por %p1428_p8, %p1427_p7 }
  0x7e   : > { %p1425_p3 = pneg %p1424_p0 }
  0x7f   : > { %p1431_p6 = por %p1430_p2, %p1429_p13 }
  0x81   : > { %p1432_p4 = pnand %p1431_p6, %p1425_p3 }
  0x83   : > { %1435 = shalt.err (!%p1432_p4)
}
  0x84   : > { %s1436_s10 = scalar_lea.vmem %s1831_s12, 1024  ;;  %s1582_s0 = smov [#allocation7]  }
  0x85   : > { %p1437_p5 = scmp.ne.s32.totalorder %s1831_s12, %s1436_s10  ;;  %s1441_s4 = sshll.u32 %s1582_s0, 4  ;;  %s1442_s4 = int_to_ptr.vmem [resolvable:$false] %s1441_s4 }
  0x86   : > { %s1443_s18 = scalar_lea.vmem %s1442_s4, 2048  ;;  %p1444_p10 = scmp.lt.s32.totalorder %s1831_s12, %s1442_s4 }
  0x87   : > { %p1439_p11 = pnand %p1437_p5, %p1759_p12  ;;  %p1445_p0 = scmp.lt.s32.totalorder %s1443_s18, %s1436_s10 }
  0x89   : > { %p1440_p1 = pneg %p1439_p11  ;;  %p1446_p7 = por %p1445_p0, %p1444_p10 }
  0x8b   : > { %p1447_p8 = pnand %p1446_p7, %p1440_p1 }
  0x8d   : > { %1450 = shalt.err (!%p1447_p8)
}
  0x8e   : > { %1262 = dma.hbm_to_vmem [thread:$0]  (!%p2421_p9), %s1799_s27, 1024, %s1831_s12, %s1753_s13, %s2426_s15, %s2426_s15, %s2425_s11  }
  0x8f   : > { %s304_s20 = scalar_lea.vmem [#allocation8], %s1729_s26  ;;  %s2427_s17 = sand.u32 1, %s1575_s23  }
  0x90   : > { %s313_s8 = sshll.u32 %s304_s20, 4  ;;  %s1869_s14 = scalar_lea.sflag [#allocation9], %s2427_s17  ;;  %s1865_s8 = int_to_ptr.vmem [resolvable:$true] %s313_s8 }
  0x91   : > { %s1451_s1 = scalar_lea.hbm %s1837_s22, 1024  ;;  %s1456_s7 = scalar_lea.hbm %s2380_s3, 2048 }
  0x92   : > { %p1452_p3 = scmp.ne.s32.totalorder %s1837_s22, %s1451_s1  ;;  %p1457_p6 = scmp.lt.u32.totalorder %s1837_s22, %s2380_s3 }
  0x93   : > { %p1458_p4 = scmp.lt.u32.totalorder %s1456_s7, %s1451_s1  ;;  %p1460_p11 = scmp.lt.u32.totalorder %s1451_s1, %s1837_s22 }
  0x94   : > { %p1454_p13 = pnand %p1452_p3, %p1759_p12 }
  0x95   : > { %p1459_p5 = por %p1458_p4, %p1457_p6 }
  0x96   : > { %p1455_p2 = pneg %p1454_p13 }
  0x97   : > { %p1461_p1 = por %p1460_p11, %p1459_p5 }
  0x99   : > { %p1462_p10 = pnand %p1461_p1, %p1455_p2 }
  0x9b   : > { %1465 = shalt.err (!%p1462_p10)
}
  0x9c   : > { %s1466_s13 = scalar_lea.vmem %s1865_s8, 1024  ;;  %s1583_s26 = smov [#allocation8]  }
  0x9d   : > { %p1467_p0 = scmp.ne.s32.totalorder %s1865_s8, %s1466_s13  ;;  %s1471_s27 = sshll.u32 %s1583_s26, 4  ;;  %s1472_s27 = int_to_ptr.vmem [resolvable:$false] %s1471_s27 }
  0x9e   : > { %s1473_s12 = scalar_lea.vmem %s1472_s27, 2048  ;;  %p1474_p3 = scmp.lt.s32.totalorder %s1865_s8, %s1472_s27 }
  0x9f   : > { %p1469_p7 = pnand %p1467_p0, %p1759_p12  ;;  %p1475_p13 = scmp.lt.s32.totalorder %s1473_s12, %s1466_s13 }
  0xa1   : > { %p1470_p8 = pneg %p1469_p7  ;;  %p1476_p6 = por %p1475_p13, %p1474_p3 }
  0xa3   : > { %p1477_p4 = pnand %p1476_p6, %p1470_p8 }
  0xa5   : > { %1480 = shalt.err (!%p1477_p4)
}
  0xa6   : > { %1265 = dma.hbm_to_vmem [thread:$0]  (!%p2421_p9), %s1837_s22, 1024, %s1865_s8, %s1869_s14, %s2426_s15, %s2426_s15, %s2425_s11  }
  0xa7   : > { %p2428_p12 = scmp.ne.s32.totalorder %s2411_s6, 0 }
  0xa9   : > { %325 = sbr.rel (%p2428_p12) target bundleno = 620 (0x26c), region = 40 }
  0xb0   : > { %s1899_s25 = sand.u32 1, %s1559_s19   ;;  %p2429_p2 = scmp.ne.s32.totalorder %s2407_s28, 0 }
  0xb1   : > { %s1180_s4 = sshll.u32 %s1899_s25, 6  ;;  %s328_s18 = scalar_lea.sflag [#allocation3], %s1899_s25 }
  0xb2   : > { %s1903_s20 = scalar_lea.vmem [#allocation2], %s1180_s4 }
  0xb3   : > { %1534 = dma.done.wait (%p2429_p2), %s328_s18, 1024  }
  0xb4   : > { %1536 = vsyncadd (%p2429_p2), %s328_s18, 4294966272  ;;  %s336_s9 = sand.u32 1, %s1650_s24   ;;  %s1910_s11 = scalar_lea.vmem [#allocation5], %s1180_s4 }
  0xb5   : > { %s337_s6 = scalar_lea.sflag [#allocation6], %s336_s9 }
  0xb6   : > { %1538 = dma.done.wait (%p2429_p2), %s337_s6, 2048  }
  0xb7   : > { %1540 = vsyncadd (%p2429_p2), %s337_s6, 4294965248  ;;  %s1916_s15 = scalar_lea.vmem [#allocation7], %s1180_s4  ;;  %s355_s22 = scalar_lea.sflag [#allocation9], %s336_s9 }
  0xb8   : > { %s1918_s8 = scalar_lea.vmem [#allocation8], %s1180_s4 }
  0xb9   : > { %1542 = dma.done.wait (%p2429_p2), %s355_s22, 1024  }
  0xba   : > { %1544 = vsyncadd (%p2429_p2), %s355_s22, 4294966272  ;;  %p2430_p9 = scmp.eq.s32.totalorder %s1650_s24, 0 }
  0xbc   : > { %1546 = dma.done.wait (%p2430_p9), [#allocation9], 128   ;;  %p2431_p5 = pmov %p2430_p9 }
  0xbd   : > { %v1929_v0 = vld [vmem:[%s1903_s20 + $0x10] sm:$0xff]  ;;  %v1935_v2 = vld [vmem:[%s1903_s20] sm:$0xff]  ;;  %v1943_v6 = vld [vmem:[%s1903_s20 + $0x18] sm:$0xff]  ;;  %vm482_vm0 = vcmask 523264   ;;  %s1584_s24 = smov 64   ;;  %s1185_s28 = sshll.u32 %s1899_s25, 5 }
  0xbe   : > { %1548 = vsyncadd (%p2431_p5), [#allocation9], 4294967168  ;;  %v1932_v1 = vld [vmem:[%s1910_s11 + $0x10] sm:$0xff]  ;;  %v421_v3 = vunpack.c.l.bf16 %v1929_v0  ;;  %v1940_v5 = vld [vmem:[%s1910_s11] sm:$0xff]  ;;  %v417_v8 = vunpack.c.l.bf16 %v1935_v2  ;;  %v423_v14 = vunpack.c.l.bf16 %v1943_v6  ;;  %v418_v50 = vunpack.c.h.bf16 %v1935_v2  ;;  %s2296_s17 = scalar_lea.vmem [#allocation11], %s1185_s28  ;;  %s1211_s14 = sshll.u32 %s1567_s21, 9 }
  0xbf   : > { %v445_v4 = vunpack.c.l.bf16 %v1932_v1  ;;  %v1946_v7 = vld [vmem:[%s1910_s11 + $0x18] sm:$0xff]  ;;  %v441_v9 = vunpack.c.l.bf16 %v1940_v5  ;;  %v410_v10 = vld [vmem:[%s1903_s20 + $0x8] sm:$0xff]  ;;  %v1959_v18 = vld [vmem:[%s1903_s20 + $0x20] sm:$0xff]  ;;  %v442_v51 = vunpack.c.h.bf16 %v1940_v5  ;;  %v422_v55 = vunpack.c.h.bf16 %v1929_v0  ;;  %s991_s1 = sshll.u32 %s2296_s17, 4  ;;  %s2323_s7 = scalar_lea.hbm %s2382_s5, %s1211_s14  ;;  %s2325_s1 = int_to_ptr.vmem [resolvable:$true] %s991_s1 }
  0xc0   : > { %v434_v11 = vld [vmem:[%s1910_s11 + $0x8] sm:$0xff]  ;;  %v447_v15 = vunpack.c.l.bf16 %v1946_v7  ;;  %v419_v16 = vunpack.c.l.bf16 %v410_v10  ;;  %v1962_v19 = vld [vmem:[%s1910_s11 + $0x20] sm:$0xff]  ;;  %v416_v24 = vld [vmem:[%s1903_s20 + $0x38] sm:$0xff]  ;;  %v425_v28 = vunpack.c.l.bf16 %v1959_v18  ;;  %v420_v48 = vunpack.c.h.bf16 %v410_v10  ;;  %s976_s10 = scalar_lea.sflag [#allocation4], %s1899_s25  ;;  %s1481_s0 = scalar_lea.vmem %s2325_s1, 512 }
  0xc1   : > { %v1953_v12 = vld [vmem:[%s1903_s20 + $0x28] sm:$0xff]  ;;  %v461_v13 = vmul.f32 %v445_v4, %v421_v3  ;;  %v457_v20 = vmul.f32 %v441_v9, %v417_v8  ;;  %v443_v21 = vunpack.c.l.bf16 %v434_v11  ;;  %v440_v25 = vld [vmem:[%s1910_s11 + $0x38] sm:$0xff]  ;;  %v449_v29 = vunpack.c.l.bf16 %v1962_v19  ;;  %v1971_v30 = vld [vmem:[%s1903_s20 + $0x30] sm:$0xff]  ;;  %p1482_p11 = scmp.ne.s32.totalorder %s2325_s1, %s1481_s0  ;;  %p2440_p1 = scmp.ne.s32.totalorder %s2408_s29, 0 }
  0xc2   : > { %v438_v17 = vld [vmem:[%s1910_s11 + $0x28] sm:$0xff]  ;;  %v427_v22 = vunpack.c.l.bf16 %v1953_v12  ;;  %v463_v27 = vmul.f32 %v447_v15, %v423_v14  ;;  %v1974_v31 = vld [vmem:[%s1910_s11 + $0x30] sm:$0xff]  ;;  %v431_v36 = vunpack.c.l.bf16 %v416_v24  ;;  %v455_v37 = vunpack.c.l.bf16 %v440_v25  ;;  %s1587_s21 = smov [#allocation11]  }
  0xc3   : > { %v451_v23 = vunpack.c.l.bf16 %v438_v17  ;;  %v489_v26 = vsel %vm482_vm0, %v461_v13, 0.0  ;;  %v483_v32 = vsel %vm482_vm0, %v457_v20, 0.0  ;;  %v459_v33 = vmul.f32 %v443_v21, %v419_v16  ;;  %p1483_p10 = pnand %p1482_p11, %p2440_p1  ;;  %s1485_s13 = sshll.u32 %s1587_s21, 4  ;;  %s1486_s13 = int_to_ptr.vmem [resolvable:$false] %s1485_s13 }
  0xc4   : > { %490 = vadd.xlane.f32.xlu1 %v489_v26  ;;  %484 = vadd.xlane.f32.xlu0 %v483_v32  ;;  %v492_v34 = vsel %vm482_vm0, %v463_v27, 0.0  ;;  %v465_v39 = vmul.f32 %v449_v29, %v425_v28  ;;  %v429_v40 = vunpack.c.l.bf16 %v1971_v30  ;;  %v453_v41 = vunpack.c.l.bf16 %v1974_v31  ;;  %s1487_s26 = scalar_lea.vmem %s1486_s13, 1024  ;;  %p1488_p7 = scmp.lt.s32.totalorder %s2325_s1, %s1486_s13 }
  0xc5   : > { %v467_v35 = vmul.f32 %v451_v23, %v427_v22  ;;  %v486_v38 = vsel %vm482_vm0, %v459_v33, 0.0  ;;  %v471_v43 = vmul.f32 %v455_v37, %v431_v36  ;;  %v444_v49 = vunpack.c.h.bf16 %v434_v11  ;;  %p1484_p0 = pneg %p1483_p10  ;;  %p1489_p8 = scmp.lt.s32.totalorder %s1487_s26, %s1481_s0 }
  0xc6   : > { %v495_v44 = vsel %vm482_vm0, %v465_v39, 0.0  ;;  %v469_v45 = vmul.f32 %v453_v41, %v429_v40  ;;  %v428_v53 = vunpack.c.h.bf16 %v1953_v12  ;;  %v452_v54 = vunpack.c.h.bf16 %v438_v17 }
  0xc7   : > { %v498_v42 = vsel %vm482_vm0, %v467_v35, 0.0  ;;  %v504_v46 = vsel %vm482_vm0, %v471_v43, 0.0  ;;  %v1994_v52 = vmul.f32 %v444_v49, %v420_v48  ;;  %v446_v56 = vunpack.c.h.bf16 %v1932_v1  ;;  %p1490_p3 = por %p1489_p8, %p1488_p7 }
  0xc8   : > { %493 = vadd.xlane.f32.xlu1 %v492_v34  ;;  %487 = vadd.xlane.f32.xlu0 %v486_v38  ;;  %v501_v47 = vsel %vm482_vm0, %v469_v45, 0.0  ;;  %v458_v57 = vmul.f32 %v442_v51, %v418_v50  ;;  %v468_v58 = vmul.f32 %v452_v54, %v428_v53  ;;  %v432_v59 = vunpack.c.h.bf16 %v416_v24 }
  0xc9   : > { %v456_v60 = vunpack.c.h.bf16 %v440_v25  ;;  %v2003_v61 = vmul.f32 %v446_v56, %v422_v55  ;;  %v424_v62 = vunpack.c.h.bf16 %v1943_v6  ;;  %v448_v63 = vunpack.c.h.bf16 %v1946_v7  ;;  %p1491_p13 = pnand %p1490_p3, %p1484_p0 }
  0xca   : > { %v426_v2 = vunpack.c.h.bf16 %v1959_v18  ;;  %v450_v3 = vunpack.c.h.bf16 %v1962_v19  ;;  %v430_v5 = vunpack.c.h.bf16 %v1971_v30  ;;  %v454_v6 = vunpack.c.h.bf16 %v1974_v31 }
  0xcb   : > { %v472_v0 = vmul.f32 %v456_v60, %v432_v59  ;;  %v464_v1 = vmul.f32 %v448_v63, %v424_v62  ;;  %v1585_v8 = vmov 0   ;;  %v571_v34 = vsel %vm482_vm0, %v458_v57, 0.0  ;;  %v477_v59 = vld [vmem:[%s1916_s15 + $0x18] sm:$0xff]  ;;  %v478_v60 = vld [vmem:[%s1916_s15 + $0x20] sm:$0xff]  ;;  %v479_v62 = vld [vmem:[%s1916_s15 + $0x28] sm:$0xff] }
  0xcc   : > { %499 = vadd.xlane.f32.xlu1 %v498_v42  ;;  %496 = vadd.xlane.f32.xlu0 %v495_v44  ;;  %v466_v4 = vmul.f32 %v450_v3, %v426_v2  ;;  %v470_v7 = vmul.f32 %v454_v6, %v430_v5  ;;  %v586_v36 = vsel %vm482_vm0, %v468_v58, 0.0  ;;  %v574_v37 = vsel %vm482_vm0, %v1994_v52, 0.0  ;;  %v480_v63 = vld [vmem:[%s1916_s15 + $0x30] sm:$0xff] }
  0xcd   : > { %1330 = vset.pattern.permute.xlu1 %v1585_v8  ;;  %1329 = vset.pattern.permute.xlu0 %v1585_v8  ;;  %v577_v40 = vsel %vm482_vm0, %v2003_v61, 0.0 }
  0xd0   : > { %505 = vadd.xlane.f32.xlu1 %v504_v46  ;;  %502 = vadd.xlane.f32.xlu0 %v501_v47  ;;  %v589_v47 = vsel %vm482_vm0, %v470_v7, 0.0 }
  0xe1   : > { %517 = vrot.lane.b32.xlu1 %v459_v33, %s1584_s24  ;;  %v580_v33 = vsel %vm482_vm0, %v464_v1, 0.0 }
  0xe5   : > { %519 = vrot.lane.b32.xlu1 %v461_v13, %s1584_s24 }
  0xe6   : > { %515 = vrot.lane.b32.xlu0 %v457_v20, %s1584_s24 }
  0xe9   : > { %521 = vrot.lane.b32.xlu1 %v463_v27, %s1584_s24 }
  0xea   : > { %523 = vrot.lane.b32.xlu0 %v465_v39, %s1584_s24  ;;  %v592_v39 = vsel %vm482_vm0, %v472_v0, 0.0 }
  0xed   : > { %525 = vrot.lane.b32.xlu1 %v467_v35, %s1584_s24 }
  0xee   : > { %527 = vrot.lane.b32.xlu0 %v469_v45, %s1584_s24 }
  0xf1   : > { %529 = vrot.lane.b32.xlu1 %v471_v43, %s1584_s24  ;;  %v583_v43 = vsel %vm482_vm0, %v466_v4, 0.0 }
  0xf2   : > { %613 = vrot.lane.b32.xlu0 %v1994_v52, %s1584_s24 }
  0xf5   : > { %611 = vrot.lane.b32.xlu1 %v458_v57, %s1584_s24  ;;  %v475_v57 = vld [vmem:[%s1916_s15 + $0x8] sm:$0xff] }
  0xf6   : > { %621 = vrot.lane.b32.xlu0 %v468_v58, %s1584_s24  ;;  %v476_v58 = vld [vmem:[%s1916_s15 + $0x10] sm:$0xff] }
  0xf9   : > { %615 = vrot.lane.b32.xlu1 %v2003_v61, %s1584_s24  ;;  %v474_v61 = vld [vmem:[%s1916_s15] sm:$0xff] }
  0xfa   : > { %625 = vrot.lane.b32.xlu0 %v472_v0, %s1584_s24  ;;  %v1586_v0 = vmov 1  }
  0xfd   : > { %617 = vrot.lane.b32.xlu1 %v464_v1, %s1584_s24  ;;  %v481_v1 = vld [vmem:[%s1916_s15 + $0x38] sm:$0xff] }
 0x101   : > { %619 = vrot.lane.b32.xlu1 %v466_v4, %s1584_s24 }
 0x105   : > { %623 = vrot.lane.b32.xlu1 %v470_v7, %s1584_s24 }
 0x151   : > { %v2018_v9 = vpop.xlane.xlu1 %490  ;;  %v2020_v10 = vpop.xlane.xlu0 %484 }
 0x155   : > { %v2022_v11 = vpop.xlane.xlu1 %493  ;;  %v2024_v12 = vpop.xlane.xlu0 %487 }
 0x159   : > { %v2026_v13 = vpop.xlane.xlu1 %499  ;;  %v2028_v14 = vpop.xlane.xlu0 %496 }
 0x15d   : > { %v2030_v15 = vpop.xlane.xlu1 %505  ;;  %v2032_v16 = vpop.xlane.xlu0 %502 }
 0x161   : > { %v518_v17 = vpop.permute.xlu1 %517  ;;  %v516_v18 = vpop.permute.xlu0 %515 }
 0x162   : > { %v542_v19 = vsel %vm482_vm0, %v518_v17, 0.0  ;;  %v539_v20 = vsel %vm482_vm0, %v516_v18, 0.0 }
 0x163   : > { %543 = vadd.xlane.f32.xlu1 %v542_v19  ;;  %540 = vadd.xlane.f32.xlu0 %v539_v20 }
 0x165   : > { %v520_v21 = vpop.permute.xlu1 %519  ;;  %v524_v23 = vpop.permute.xlu0 %523 }
 0x166   : > { %v545_v22 = vsel %vm482_vm0, %v520_v21, 0.0  ;;  %v551_v27 = vsel %vm482_vm0, %v524_v23, 0.0 }
 0x167   : > { %546 = vadd.xlane.f32.xlu0 %v545_v22 }
 0x169   : > { %v522_v24 = vpop.permute.xlu1 %521  ;;  %v528_v29 = vpop.permute.xlu0 %527 }
 0x16a   : > { %v548_v25 = vsel %vm482_vm0, %v522_v24, 0.0  ;;  %v557_v31 = vsel %vm482_vm0, %v528_v29, 0.0 }
 0x16b   : > { %549 = vadd.xlane.f32.xlu0 %v548_v25 }
 0x16d   : > { %v526_v26 = vpop.permute.xlu1 %525  ;;  %v614_v41 = vpop.permute.xlu0 %613 }
 0x16e   : > { %v554_v28 = vsel %vm482_vm0, %v526_v26, 0.0  ;;  %v638_v42 = vsel %vm482_vm0, %v614_v41, 0.0  ;;  %v815_v41 = vmul.f32 0.015625, %v2020_v10 }
 0x16f   : > { %555 = vadd.xlane.f32.xlu1 %v554_v28  ;;  %552 = vadd.xlane.f32.xlu0 %v551_v27  ;;  %v683_v28 = vlaneseq }
 0x171   : > { %v530_v30 = vpop.permute.xlu1 %529  ;;  %v622_v45 = vpop.permute.xlu0 %621 }
 0x172   : > { %v560_v32 = vsel %vm482_vm0, %v530_v30, 0.0  ;;  %v650_v48 = vsel %vm482_vm0, %v622_v45, 0.0  ;;  %v816_v45 = vmul.f32 0.015625, %v2024_v12 }
 0x173   : > { %561 = vadd.xlane.f32.xlu1 %v560_v32  ;;  %558 = vadd.xlane.f32.xlu0 %v557_v31  ;;  %v684_v31 = vshrl.u32 %v683_v28, 7 }
 0x175   : > { %v612_v35 = vpop.permute.xlu1 %611  ;;  %v626_v49 = vpop.permute.xlu0 %625 }
 0x176   : > { %v635_v50 = vsel %vm482_vm0, %v612_v35, 0.0  ;;  %v656_v51 = vsel %vm482_vm0, %v626_v49, 0.0  ;;  %v473_v35 = vld [vmem:[#allocation10] sm:$0xff] }
 0x177   : > { %581 = vadd.xlane.f32.xlu1 %v580_v33  ;;  %572 = vadd.xlane.f32.xlu0 %v571_v34  ;;  %v825_v34 = vsub.s32 3, %v684_v31 }
 0x179   : > { %v616_v38 = vpop.permute.xlu1 %615 }
 0x17a   : > { %v641_v53 = vsel %vm482_vm0, %v616_v38, 0.0  ;;  %v853_v38 = vsub.s32 4, %v684_v31 }
 0x17b   : > { %587 = vadd.xlane.f32.xlu1 %v586_v36  ;;  %575 = vadd.xlane.f32.xlu0 %v574_v37 }
 0x17d   : > { %v618_v44 = vpop.permute.xlu1 %617 }
 0x17e   : > { %v644_v46 = vsel %vm482_vm0, %v618_v44, 0.0  ;;  %v818_v44 = vmul.f32 0.015625, %v2022_v11 }
 0x17f   : > { %593 = vadd.xlane.f32.xlu1 %v592_v39  ;;  %578 = vadd.xlane.f32.xlu0 %v577_v40  ;;  %v826_v39 = vrot.slane %v473_v35, %v825_v34  ;;  %v817_v40 = vmul.f32 0.015625, %v2018_v9 }
 0x181   : > { %v620_v52 = vpop.permute.xlu1 %619 }
 0x182   : > { %v647_v54 = vsel %vm482_vm0, %v620_v52, 0.0  ;;  %v2122_v52 = vrot.slane %v473_v35, %v853_v38 }
 0x183   : > { %639 = vadd.xlane.f32.xlu1 %v638_v42  ;;  %584 = vadd.xlane.f32.xlu0 %v583_v43 }
 0x185   : > { %v624_v55 = vpop.permute.xlu1 %623 }
 0x186   : > { %v653_v56 = vsel %vm482_vm0, %v624_v55, 0.0  ;;  %v821_v55 = vmul.f32 0.015625, %v2032_v16 }
 0x187   : > { %645 = vadd.xlane.f32.xlu1 %v644_v46  ;;  %590 = vadd.xlane.f32.xlu0 %v589_v47  ;;  %v820_v47 = vmul.f32 0.015625, %v2026_v13 }
 0x18b   : > { %651 = vadd.xlane.f32.xlu1 %v650_v48  ;;  %636 = vadd.xlane.f32.xlu0 %v635_v50  ;;  %v685_v48 = vsub.s32 0, %v684_v31  ;;  %v819_v50 = vmul.f32 0.015625, %v2028_v14 }
 0x18d   : > { %v2141_v28 = vmul.f32 %v826_v39, %v819_v50 }
 0x18f   : > { %657 = vadd.xlane.f32.xlu1 %v656_v51  ;;  %642 = vadd.xlane.f32.xlu0 %v641_v53  ;;  %v822_v51 = vmul.f32 0.015625, %v2030_v15  ;;  %v2124_v53 = vmul.f32 %v826_v39, %v817_v40  ;;  %v2145_v40 = vmul.f32 %v826_v39, %v821_v55 }
 0x191   : > { %v2143_v34 = vmul.f32 %v826_v39, %v822_v51 }
 0x193   : > { %648 = vadd.xlane.f32.xlu0 %v647_v54  ;;  %v2126_v54 = vmul.f32 %v826_v39, %v815_v41  ;;  %2433 = vst [vmem:[#allocation24_spill] sm:$0xff] %v2143_v34 }
 0x197   : > { %654 = vadd.xlane.f32.xlu0 %v653_v56  ;;  %v2129_v56 = vmul.f32 %v826_v39, %v818_v44 }
 0x1a0   : > { %710 = vperm.xlu1 %1330, %v475_v57  }
 0x1a4   : > { %715 = vperm.xlu1 %1330, %v476_v58  }
 0x1a8   : > { %720 = vperm.xlu1 %1330, %v477_v59  }
 0x1ac   : > { %725 = vperm.xlu1 %1330, %v478_v60  }
 0x1ad   : > { %705 = vperm.xlu0 %1329, %v474_v61  }
 0x1b0   : > { %730 = vperm.xlu1 %1330, %v479_v62  }
 0x1b1   : > { %1332 = vset.pattern.permute.xlu0 %v1586_v0 }
 0x1b2   : > { %768 = vperm.xlu0 %1332, %v475_v57   ;;  %v2131_v57 = vmul.f32 %v826_v39, %v816_v45 }
 0x1b4   : > { %735 = vperm.xlu1 %1330, %v480_v63  }
 0x1b6   : > { %780 = vperm.xlu0 %1332, %v478_v60  }
 0x1b8   : > { %740 = vperm.xlu1 %1330, %v481_v1  }
 0x1ba   : > { %788 = vperm.xlu0 %1332, %v480_v63  }
 0x1bc   : > { %1331 = vset.pattern.permute.xlu1 %v1586_v0 }
 0x1bd   : > { %764 = vperm.xlu1 %1331, %v474_v61   ;;  %v2135_v61 = vmul.f32 %v826_v39, %v820_v47 }
 0x1c1   : > { %772 = vperm.xlu1 %1331, %v476_v58   ;;  %v881_v58 = vsub.s32 5, %v684_v31 }
 0x1c3   : > { %v2154_v47 = vrot.slane %v473_v35, %v881_v58  ;;  %v668_v58 = vld [vmem:[%s1918_s8 + $0x8] sm:$0xff] }
 0x1c5   : > { %776 = vperm.xlu1 %1331, %v477_v59   ;;  %v909_v59 = vsub.s32 6, %v684_v31 }
 0x1c9   : > { %784 = vperm.xlu1 %1331, %v479_v62   ;;  %v2137_v62 = vrot.slane %v473_v35, %v685_v48  ;;  %v2156_v48 = vrot.slane %v473_v35, %v909_v59 }
 0x1cd   : > { %792 = vperm.xlu1 %1331, %v481_v1   ;;  %v797_v1 = vsub.s32 2, %v684_v31 }
 0x1cf   : > { %v2163_v50 = vrot.slane %v473_v35, %v797_v1 }
 0x1f0   : > { %v541_v2 = vpop.xlane.xlu0 %540  ;;  %v544_v4 = vpop.xlane.xlu1 %543 }
 0x1f1   : > { %v564_v37 = vadd.f32 %v544_v4, %v2024_v12  ;;  %v745_v12 = vsub.s32 1, %v684_v31  ;;  %v843_v38 = vmul.f32 0.015625, %v541_v2  ;;  %v563_v41 = vadd.f32 %v541_v2, %v2020_v10 }
 0x1f3   : > { %v2149_v44 = vrot.slane %v473_v35, %v745_v12 }
 0x1f4   : > { %v2068_v3 = vpop.xlane.xlu0 %546 }
 0x1f5   : > { %v565_v59 = vadd.f32 %v2068_v3, %v2018_v9 }
 0x1f8   : > { %v2070_v5 = vpop.xlane.xlu0 %549 }
 0x1f9   : > { %v846_v45 = vmul.f32 0.015625, %v2070_v5  ;;  %v566_v1 = vadd.f32 %v2070_v5, %v2022_v11 }
 0x1fc   : > { %v2072_v6 = vpop.xlane.xlu1 %555  ;;  %v2074_v7 = vpop.xlane.xlu0 %552 }
 0x1fd   : > { %v567_v31 = vadd.f32 %v2074_v7, %v2028_v14  ;;  %v848_v39 = vmul.f32 0.015625, %v2072_v6  ;;  %v2169_v14 = vmul.f32 %v2122_v52, %v843_v38  ;;  %v847_v55 = vmul.f32 0.015625, %v2074_v7 }
 0x1fe   : > { %v568_v9 = vadd.f32 %v2072_v6, %v2026_v13 }
 0x1ff   : > { %v2198_v11 = vmul.f32 %v2122_v52, %v847_v55 }
 0x200   : > { %v2076_v8 = vpop.xlane.xlu1 %561  ;;  %v2078_v17 = vpop.xlane.xlu0 %558 }
 0x201   : > { %v569_v7 = vadd.f32 %v2078_v17, %v2032_v16  ;;  %v850_v5 = vmul.f32 0.015625, %v2076_v8  ;;  %v849_v16 = vmul.f32 0.015625, %v2078_v17 }
 0x204   : > { %v2080_v18 = vpop.xlane.xlu1 %581  ;;  %v2082_v19 = vpop.xlane.xlu0 %572 }
 0x205   : > { %v595_v10 = vadd.f32 %v2082_v19, %v563_v41 }
 0x208   : > { %v2084_v20 = vpop.xlane.xlu1 %587  ;;  %v2086_v21 = vpop.xlane.xlu0 %575 }
 0x209   : > { %v596_v42 = vadd.f32 %v2086_v21, %v564_v37  ;;  %v844_v37 = vmul.f32 0.015625, %v544_v4  ;;  %v600_v17 = vadd.f32 %v2084_v20, %v568_v9 }
 0x20b   : > { %v2166_v51 = vmul.f32 %v2122_v52, %v844_v37  ;;  %v2184_v37 = vmul.f32 %v2122_v52, %v846_v45 }
 0x20c   : > { %v2088_v22 = vpop.xlane.xlu1 %593  ;;  %v2090_v23 = vpop.xlane.xlu0 %578 }
 0x210   : > { %v2092_v24 = vpop.xlane.xlu1 %639  ;;  %v2094_v25 = vpop.xlane.xlu0 %584 }
 0x211   : > { %v660_v49 = vadd.f32 %v2092_v24, %v596_v42  ;;  %v845_v42 = vmul.f32 0.015625, %v2068_v3  ;;  %v599_v12 = vadd.f32 %v2094_v25, %v567_v31  ;;  %v2194_v3 = vmul.f32 %v2122_v52, %v848_v39 }
 0x212   : > { %v598_v39 = vadd.f32 %v2080_v18, %v566_v1 }
 0x213   : > { %v676_v63 = vmul.f32 0.0625, %v660_v49  ;;  %v2177_v41 = vmul.f32 %v2122_v52, %v845_v42  ;;  %2434 = vst [vmem:[#allocation25_spill] sm:$0xff] %v2194_v3  ;;  %v871_v3 = vmul.f32 0.015625, %v2082_v19 }
 0x214   : > { %v2096_v26 = vpop.xlane.xlu1 %645  ;;  %v2098_v27 = vpop.xlane.xlu0 %590 }
 0x215   : > { %v688_v2 = vmul.f32 %v2137_v62, %v676_v63  ;;  %v601_v45 = vadd.f32 %v2098_v27, %v569_v7  ;;  %v662_v1 = vadd.f32 %v2096_v26, %v598_v39 }
 0x217   : > { %v696_v42 = vadd.f32 %v688_v2, %v668_v58  ;;  %v874_v2 = vmul.f32 0.015625, %v2080_v18  ;;  %v873_v18 = vmul.f32 0.015625, %v2090_v23 }
 0x218   : > { %v2100_v29 = vpop.xlane.xlu1 %651  ;;  %v2102_v30 = vpop.xlane.xlu0 %636 }
 0x219   : > { %v659_v35 = vadd.f32 %v2102_v30, %v595_v10  ;;  %v664_v19 = vadd.f32 %v2100_v29, %v600_v17  ;;  %v2240_v39 = vmul.f32 %v2154_v47, %v873_v18  ;;  %v669_v17 = vld [vmem:[%s1918_s8 + $0x10] sm:$0xff] }
 0x21c   : > { %v2104_v32 = vpop.xlane.xlu1 %657  ;;  %v2106_v33 = vpop.xlane.xlu0 %642 }
 0x220   : > { %v711_v36 = vpop.permute.xlu1 %710  ;;  %v2112_v43 = vpop.xlane.xlu0 %648 }
 0x221   : > { %v748_v63 = vmul.f32 %v2149_v44, %v711_v36  ;;  %v663_v38 = vadd.f32 %v2112_v43, %v599_v12  ;;  %v597_v36 = vadd.f32 %v2090_v23, %v565_v59  ;;  %v675_v12 = vmul.f32 0.0625, %v659_v35 }
 0x222   : > { %v872_v35 = vmul.f32 0.015625, %v2086_v21 }
 0x223   : > { %v661_v34 = vadd.f32 %v2106_v33, %v597_v36  ;;  %v756_v13 = vadd.f32 %v748_v63, %v696_v42  ;;  %v679_v58 = vmul.f32 0.0625, %v663_v38  ;;  %v570_v63 = vadd.f32 %v2076_v8, %v2030_v15 }
 0x224   : > { %v2116_v46 = vpop.permute.xlu1 %715  ;;  %v2139_v0 = vpop.xlane.xlu0 %654  ;;  %v2214_v36 = vmul.f32 %v2122_v52, %v850_v5  ;;  %v2219_v38 = vmul.f32 %v2122_v52, %v849_v16  ;;  %v687_v9 = vmul.f32 %v2137_v62, %v675_v12  ;;  %v667_v5 = vld [vmem:[%s1918_s8] sm:$0xff]  ;;  %v883_v52 = vmul.f32 %v2154_v47, %v871_v3 }
 0x225   : > { %2432 = vst [vmem:[#allocation23_spill] sm:$0xff] %v2139_v0  ;;  %v665_v55 = vadd.f32 %v2139_v0, %v601_v45  ;;  %v677_v21 = vmul.f32 0.0625, %v661_v34  ;;  %v2224_v45 = vmul.f32 %v2154_v47, %v874_v2  ;;  %v691_v15 = vmul.f32 %v2137_v62, %v679_v58  ;;  %v671_v12 = vld [vmem:[%s1918_s8 + $0x20] sm:$0xff] }
 0x226   : > { %2435 = vst [vmem:[#allocation26_spill] sm:$0xff] %v2214_v36  ;;  %v2233_v16 = vmul.f32 0.015625, %v2084_v20  ;;  %v884_v34 = vmul.f32 %v2154_v47, %v872_v35  ;;  %v678_v2 = vmul.f32 0.0625, %v662_v1  ;;  %v900_v3 = vmul.f32 0.015625, %v2092_v24 }
 0x227   : > { %v681_v8 = vmul.f32 0.0625, %v665_v55  ;;  %v680_v58 = vmul.f32 0.0625, %v664_v19  ;;  %v689_v20 = vmul.f32 %v2137_v62, %v677_v21  ;;  %v695_v55 = vadd.f32 %v687_v9, %v667_v5  ;;  %v673_v19 = vld [vmem:[%s1918_s8 + $0x30] sm:$0xff] }
 0x228   : > { %v2133_v60 = vpop.permute.xlu1 %720  ;;  %v875_v1 = vmul.f32 0.015625, %v2094_v25  ;;  %v690_v21 = vmul.f32 %v2137_v62, %v678_v2  ;;  %v899_v25 = vmul.f32 0.015625, %v2102_v30  ;;  %v912_v30 = vmul.f32 %v2156_v48, %v900_v3 }
 0x229   : > { %v693_v35 = vmul.f32 %v2137_v62, %v681_v8  ;;  %v697_v5 = vadd.f32 %v689_v20, %v669_v17 }
 0x22c   : > { %v2158_v4 = vpop.permute.xlu1 %725  ;;  %v706_v49 = vpop.permute.xlu0 %705 }
 0x230   : > { %v2189_v31 = vpop.permute.xlu1 %730 }
 0x231   : > { %v769_v10 = vpop.permute.xlu0 %768 }
 0x232   : > { %v800_v6 = vmul.f32 %v2163_v50, %v769_v10 }
 0x234   : > { %v736_v59 = vpop.permute.xlu1 %735  ;;  %v808_v7 = vadd.f32 %v800_v6, %v756_v13  ;;  %v747_v13 = vmul.f32 %v2149_v44, %v706_v49  ;;  %v602_v6 = vadd.f32 %v2088_v22, %v570_v63  ;;  %v699_v49 = vadd.f32 %v691_v15, %v671_v12 }
 0x235   : > { %v781_v42 = vpop.permute.xlu0 %780  ;;  %v753_v8 = vmul.f32 %v2149_v44, %v736_v59 }
 0x236   : > { %v836_v23 = vadd.f32 %v2131_v57, %v808_v7  ;;  %v751_v57 = vmul.f32 %v2149_v44, %v2158_v4  ;;  %v803_v63 = vmul.f32 %v2163_v50, %v781_v42  ;;  %v749_v4 = vmul.f32 %v2149_v44, %v2116_v46 }
 0x237   : > { %v755_v24 = vadd.f32 %v747_v13, %v695_v55  ;;  %v666_v15 = vadd.f32 %v2104_v32, %v602_v6  ;;  %v692_v42 = vmul.f32 %v2137_v62, %v680_v58  ;;  %v701_v13 = vadd.f32 %v693_v35, %v673_v19 }
 0x238   : > { %v2229_v10 = vpop.permute.xlu1 %740  ;;  %v864_v7 = vadd.f32 %v2166_v51, %v836_v23  ;;  %v759_v51 = vadd.f32 %v751_v57, %v699_v49  ;;  %v670_v23 = vld [vmem:[%s1918_s8 + $0x18] sm:$0xff]  ;;  %v757_v2 = vadd.f32 %v749_v4, %v697_v5  ;;  %v750_v6 = vmul.f32 %v2149_v44, %v2133_v60  ;;  %v672_v57 = vld [vmem:[%s1918_s8 + $0x28] sm:$0xff] }
 0x239   : > { %v789_v36 = vpop.permute.xlu0 %788  ;;  %v682_v20 = vmul.f32 0.0625, %v666_v15  ;;  %v698_v17 = vadd.f32 %v690_v21, %v670_v23  ;;  %v761_v49 = vadd.f32 %v753_v8, %v701_v13  ;;  %v700_v60 = vadd.f32 %v692_v42, %v672_v57  ;;  %v674_v8 = vld [vmem:[%s1918_s8 + $0x38] sm:$0xff] }
 0x23a   : > { %v892_v12 = vadd.f32 %v884_v34, %v864_v7  ;;  %v811_v55 = vadd.f32 %v803_v63, %v759_v51  ;;  %v911_v34 = vmul.f32 %v2156_v48, %v899_v25  ;;  %v887_v21 = vmul.f32 %v2154_v47, %v875_v1 }
 0x23b   : > { %v758_v3 = vadd.f32 %v750_v6, %v698_v17  ;;  %v901_v15 = vmul.f32 0.015625, %v2106_v33  ;;  %v754_v5 = vmul.f32 %v2149_v44, %v2229_v10  ;;  %v903_v13 = vmul.f32 0.015625, %v2112_v43 }
 0x23c   : > { %v765_v18 = vpop.permute.xlu1 %764  ;;  %v920_v63 = vadd.f32 %v912_v30, %v892_v12  ;;  %v2436_v30 = vld [vmem:[#allocation23_spill] sm:$0xff] }
 0x23d   : > { %v799_v9 = vmul.f32 %v2163_v50, %v765_v18  ;;  %v805_v18 = vmul.f32 %v2163_v50, %v789_v36  ;;  %v752_v36 = vmul.f32 %v2149_v44, %v2189_v31  ;;  %v902_v31 = vmul.f32 0.015625, %v2096_v26 }
 0x23f   : > { %v807_v46 = vadd.f32 %v799_v9, %v755_v24  ;;  %v760_v51 = vadd.f32 %v752_v36, %v700_v60  ;;  %v914_v12 = vmul.f32 %v2156_v48, %v902_v31  ;;  %v2438_v60 = vld [vmem:[#allocation24_spill] sm:$0xff] }
 0x240   : > { %v773_v0 = vpop.permute.xlu1 %772 }
 0x241   : > { %v835_v59 = vadd.f32 %v2126_v54, %v807_v46  ;;  %v801_v58 = vmul.f32 %v2163_v50, %v773_v0  ;;  %v839_v54 = vadd.f32 %v2141_v28, %v811_v55  ;;  %v813_v0 = vadd.f32 %v805_v18, %v761_v49  ;;  %v2437_v49 = vld [vmem:[#allocation25_spill] sm:$0xff] }
 0x242   : > { %v913_v55 = vmul.f32 %v2156_v48, %v901_v15  ;;  %v904_v18 = vmul.f32 0.015625, %v2100_v29  ;;  %v878_v29 = vmul.f32 0.015625, %v2088_v22 }
 0x243   : > { %v863_v35 = vadd.f32 %v2169_v14, %v835_v59  ;;  %v809_v7 = vadd.f32 %v801_v58, %v757_v2  ;;  %v694_v14 = vmul.f32 %v2137_v62, %v682_v20  ;;  %v841_v1 = vadd.f32 %v2145_v40, %v813_v0 }
 0x244   : > { %v777_v4 = vpop.permute.xlu1 %776  ;;  %v905_v20 = vmul.f32 0.015625, %v2436_v30 }
 0x245   : > { %v891_v24 = vadd.f32 %v883_v52, %v863_v35  ;;  %v837_v19 = vadd.f32 %v2124_v53, %v809_v7  ;;  %v802_v9 = vmul.f32 %v2163_v50, %v777_v4  ;;  %v928_v52 = vmax.f32 %v920_v63, 0.0 }
 0x246   : > { %v867_v53 = vadd.f32 %v2198_v11, %v839_v54  ;;  %v702_v11 = vadd.f32 %v694_v14, %v674_v8  ;;  %v890_v54 = vmul.f32 %v2154_v47, %v878_v29  ;;  %v917_v0 = vmul.f32 %v2156_v48, %v905_v20 }
 0x247   : > { %v919_v28 = vadd.f32 %v911_v34, %v891_v24  ;;  %v865_v42 = vadd.f32 %v2177_v41, %v837_v19  ;;  %v810_v25 = vadd.f32 %v802_v9, %v758_v3  ;;  %v877_v41 = vmul.f32 0.015625, %v2098_v27  ;;  %v2439_v24 = vld [vmem:[#allocation26_spill] sm:$0xff] }
 0x248   : > { %v785_v26 = vpop.permute.xlu1 %784  ;;  %v762_v2 = vadd.f32 %v754_v5, %v702_v11 }
 0x249   : > { %v927_v23 = vmax.f32 %v919_v28, 0.0  ;;  %v893_v62 = vadd.f32 %v2240_v39, %v865_v42  ;;  %v838_v33 = vadd.f32 %v2129_v56, %v810_v25  ;;  %v804_v46 = vmul.f32 %v2163_v50, %v785_v26 }
 0x24a   : > { %v895_v39 = vadd.f32 %v887_v21, %v867_v53  ;;  %v869_v56 = vadd.f32 %v2219_v38, %v841_v1  ;;  %v889_v58 = vmul.f32 %v2154_v47, %v877_v41  ;;  %v915_v38 = vmul.f32 %v2156_v48, %v903_v13 }
 0x24b   : > { %v1215_v44 = vpack.c.bf16 %v928_v52, %v927_v23  ;;  %v866_v40 = vadd.f32 %v2184_v37, %v838_v33  ;;  %v812_v10 = vadd.f32 %v804_v46, %v760_v51  ;;  %v921_v27 = vadd.f32 %v913_v55, %v893_v62 }
 0x24c   : > { %v793_v6 = vpop.permute.xlu1 %792  ;;  %v888_v37 = vmul.f32 %v2154_v47, %v2233_v16  ;;  %v897_v35 = vadd.f32 %v889_v58, %v869_v56 }
 0x24d   : > { %1216 = vst [vmem:[%s2296_s17] sm:$0xff] %v1215_v44   ;;  %v894_v43 = vadd.f32 %v2224_v45, %v866_v40  ;;  %v840_v57 = vadd.f32 %v2135_v61, %v812_v10  ;;  %v806_v59 = vmul.f32 %v2163_v50, %v793_v6  ;;  %v916_v45 = vmul.f32 %v2156_v48, %v904_v18 }
 0x24e   : > { %v906_v61 = vmul.f32 0.015625, %v2104_v32  ;;  %v923_v50 = vadd.f32 %v915_v38, %v895_v39  ;;  %v929_v16 = vmax.f32 %v921_v27, 0.0  ;;  %v925_v21 = vadd.f32 %v917_v0, %v897_v35 }
 0x24f   : > { %v922_v17 = vadd.f32 %v914_v12, %v894_v43  ;;  %v868_v34 = vadd.f32 %v2437_v49, %v840_v57  ;;  %v814_v36 = vadd.f32 %v806_v59, %v762_v2 }
 0x250   : > { %v918_v32 = vmul.f32 %v2156_v48, %v906_v61  ;;  %v931_v9 = vmax.f32 %v923_v50, 0.0  ;;  %v933_v47 = vmax.f32 %v925_v21, 0.0 }
 0x251   : > { %v930_v7 = vmax.f32 %v922_v17, 0.0  ;;  %v896_v22 = vadd.f32 %v888_v37, %v868_v34  ;;  %v842_v63 = vadd.f32 %v2438_v60, %v814_v36 }
 0x253   : > { %v1220_v4 = vpack.c.bf16 %v930_v7, %v929_v16  ;;  %v924_v3 = vadd.f32 %v916_v45, %v896_v22  ;;  %v870_v19 = vadd.f32 %v2439_v24, %v842_v63 }
 0x255   : > { %1232 = vst [vmem:[%s2296_s17 + $0x8] sm:$0xff] %v1220_v4   ;;  %v932_v31 = vmax.f32 %v924_v3, 0.0  ;;  %v898_v14 = vadd.f32 %v890_v54, %v870_v19 }
 0x257   : > { %v1225_v15 = vpack.c.bf16 %v932_v31, %v931_v9  ;;  %v926_v51 = vadd.f32 %v918_v32, %v898_v14 }
 0x259   : > { %1233 = vst [vmem:[%s2296_s17 + $0x10] sm:$0xff] %v1225_v15   ;;  %v934_v8 = vmax.f32 %v926_v51, 0.0 }
 0x25b   : > { %v1230_v48 = vpack.c.bf16 %v934_v8, %v933_v47 }
 0x25d   : > { %1234 = vst [vmem:[%s2296_s17 + $0x18] sm:$0xff] %v1230_v48  }
 0x25e   : > { %1494 = shalt.err (!%p1491_p13)
}
 0x25f   : > { %s1495_s27 = scalar_lea.hbm %s2323_s7, 512  ;;  %s1499_s18 = scalar_lea.hbm %s2382_s5, 1024 }
 0x260   : > { %p1496_p6 = scmp.ne.s32.totalorder %s2323_s7, %s1495_s27  ;;  %p1500_p2 = scmp.lt.u32.totalorder %s2323_s7, %s2382_s5 }
 0x261   : > { %p1501_p9 = scmp.lt.u32.totalorder %s1499_s18, %s1495_s27  ;;  %p1503_p11 = scmp.lt.u32.totalorder %s1495_s27, %s2323_s7 }
 0x262   : > { %p1497_p4 = pnand %p1496_p6, %p2440_p1 }
 0x263   : > { %p1502_p5 = por %p1501_p9, %p1500_p2 }
 0x264   : > { %p1498_p12 = pneg %p1497_p4 }
 0x265   : > { %p1504_p10 = por %p1503_p11, %p1502_p5 }
 0x267   : > { %p1505_p0 = pnand %p1504_p10, %p1498_p12 }
 0x269   : > { %1508 = shalt.err (!%p1505_p0)
}
 0x26a   : > { %s1588_s6 = smov 4  }
 0x26b   : > { %1247 = dma.vmem_to_hbm [thread:$0]  (%p2440_p1), %s2325_s1, 512, %s2323_s7, %s976_s10, %s1584_s24, %s1584_s24, %s1588_s6  }
 0x26c PF: > { %s2441_s11 = sld [smem:[#allocation17_spill]]  ;;  %s2442_s15 = sld [smem:[#allocation20_spill]] }
 0x26d   : > { %p2444_p8 = scmp.ge.s32.totalorder %s1575_s23, 2 }
 0x272   : > { %s1006_s22 = sand.u32 1, %s2441_s11   ;;  %p2443_p7 = scmp.ne.s32.totalorder %s2442_s15, 0 }
 0x273   : > { %s1007_s8 = scalar_lea.sflag [#allocation4], %s1006_s22 }
 0x274   : > { %p1267_p3 = pnand %p2444_p8, %p2443_p7 }
 0x276   : > { %1550 = dma.done.wait (!%p1267_p3), %s1007_s8, 512  }
 0x277   : > { %1552 = vsyncadd (!%p1267_p3), %s1007_s8, 4294966784  ;;  %s27_s23 = sadd.s32 1, %s1575_s23   ;;  %s2445_s29 = sld [smem:[#allocation18_spill]] }
 0x278   : > { %p24_p13 = scmp.ge.s32.totalorder %s27_s23, 4   ;;  %s2446_s20 = sld [smem:[#allocation22_spill]] }
 0x279   : > { %s2447_s21 = sld [smem:[#allocation19_spill]]  ;;  %s2448_s22 = sld [smem:[#allocation21_spill]] }
 0x27a   : > { %s2449_s18 = smov %s1559_s19  ;;  %26 = sbr.rel (!%p24_p13) target bundleno = 14 (0xe), region = 126 }
 0x27d   : > { %s2450_s19 = smov %s2445_s29 }
 0x281   :  { %1012 = vsyncpa [#allocation3], 1 }
 0x282   :  { %1014 = vsyncpa [#allocation3 + $0x1], 1 }
 0x283   :  { %1015 = vsyncpa [#allocation6], 1 }
 0x284   :  { %1017 = vsyncpa [#allocation6 + $0x1], 1 }
 0x285   :  { %1018 = vsyncpa [#allocation9], 1 }
 0x286   :  { %1020 = vsyncpa [#allocation9 + $0x1], 1 }
 0x287   :  { %1021 = vsyncpa [#allocation4], 1 }
 0x288   :  { %1023 = vsyncpa [#allocation4 + $0x1], 1 }

// kernel: _lambda_.15
= control target key start
LH: loop header
LB: loop body
LE: loop exit
PB: predicated region body
PF: predicated region fallthrough
CT: control target
= control target key end

     0   :  { %10 = vsyncpa [#allocation3], 0  ;;  %s3343_s0 = inlined_call_operand.hbm [shape: bf16[2,64,128], index: 0, kind: input, shape index: {}]   ;;  %s3344_s1 = inlined_call_operand.hbm [shape: bf16[584,128], index: 1, kind: input, shape index: {}]   ;;  %s3345_s2 = inlined_call_operand.hbm [shape: f32[584,1], index: 2, kind: input, shape index: {}]   ;;  %s3346_s3 = inlined_call_operand.hbm [shape: bf16[2,576,64], index: 3, kind: output, shape index: {0}]   ;;  %s3347_s4 = inlined_call_operand.hbm [shape: f32[2,2,64], index: 4, kind: output, shape index: {1}]  }
   0x1   :  { %12 = vsyncpa [#allocation3 + $0x1], 0 }
   0x2   :  { %13 = vsyncpa [#allocation6], 0 }
   0x3   :  { %14 = vsyncpa [#allocation4], 0 }
   0x4   :  { %16 = vsyncpa [#allocation4 + $0x1], 0 }
   0x5   :  { %17 = vsyncpa [#allocation10], 0 }
   0x6   :  { %19 = vsyncpa [#allocation10 + $0x1], 0  ;;  %s2701_s15 = smov 0   ;;  %s2703_s16 = smov 0  }
   0x7   :  { %s2705_s17 = smov 0   ;;  %s2707_s18 = smov 0  }
   0x8   :  { %s2709_s19 = smov 0   ;;  %s2711_s20 = smov 0  }
   0x9 LB: > { %s1904_s21 = sadd.s32 4294967295, %s2660_s20   ;;  %s1905_s22 = sadd.s32 4294967294, %s2660_s20   ;;  %s2660_s20 = sphi %s2711_s20, %s25_s20   ;;  %s2656_s19 = sphi %s2709_s19, %s3369_s19   ;;  %s2652_s18 = sphi %s2707_s18, %s3368_s18   ;;  %s2648_s17 = sphi %s2705_s17, %s3367_s17   ;;  %s2644_s16 = sphi %s2703_s16, %s3366_s16   ;;  %s2640_s15 = sphi %s2701_s15, %s3365_s15  }
   0xa   : > { %p59_p0 = scmp.ne.s32.totalorder %s2644_s16, %s2640_s15  ;;  %p2735_p1 = scmp.eq.s32.totalorder %s1904_s21, 0 }
   0xb   : > { %p2739_p2 = scmp.eq.s32.totalorder %s1904_s21, 1  ;;  %p133_p3 = scmp.eq.s32.totalorder %s1905_s22, 1 }
   0xc   : > { %s3352_s23 = scalar_select %p2735_p1, 1, 0 }
   0xd   : > { %p2745_p4 = por %p2735_p1, %p59_p0  ;;  %p1906_p5 = scmp.ge.s32.totalorder %s2660_s20, 1 }
   0xe   : > { %p2750_p6 = por %p133_p3, %p59_p0  ;;  %p168_p7 = scmp.lt.s32.totalorder %s2660_s20, 3 }
   0xf   : > { %s3354_s25 = scalar_select %p2745_p4, 1, 0 }
  0x10   : > { %s3355_s26 = scalar_select %p2750_p6, 1, 0 }
  0x11   : > { %p2755_p8 = pnand %p1906_p5, %p168_p7  ;;  %s2662_s28 = smov [#allocation5]  }
  0x12   : > { %s180_s29 = sshll.u32 %s2662_s28, 4  ;;  %s2663_s5 = smov [#allocation7]   ;;  %s2759_s29 = int_to_ptr.vmem [resolvable:$true] %s180_s29 }
  0x13   : > { %p2330_p9 = pneg %p2755_p8  ;;  %s193_s6 = sshll.u32 %s2663_s5, 4  ;;  %s2770_s6 = int_to_ptr.vmem [resolvable:$true] %s193_s6 }
  0x14   : > { %s2456_s9 = scalar_lea.hbm %s3344_s1, 4672 }
  0x15   : > { %p2766_p11 = pnand %p2330_p9, %p2735_p1  ;;  %p2457_p12 = scmp.ne.s32.totalorder %s3344_s1, %s2456_s9 }
  0x16   : > { %p2463_p5 = scmp.lt.u32.totalorder %s2456_s9, %s3344_s1 }
  0x17   : > { %p2458_p13 = pneg %p2766_p11 }
  0x19   : > { %p2459_p0 = pnand %p2458_p13, %p2457_p12 }
  0x1b   : > { %p2460_p3 = pneg %p2459_p0 }
  0x1d   : > { %p2465_p7 = pnand %p2463_p5, %p2460_p3 }
  0x1f   : > { %2468 = shalt.err (!%p2465_p7)
}
  0x20   : > { %s2469_s14 = scalar_lea.vmem %s2759_s29, 4672  ;;  %p2477_p1 = scmp.lt.s32.totalorder %s2759_s29, %s2759_s29 }
  0x21   : > { %p2470_p9 = scmp.ne.s32.totalorder %s2759_s29, %s2469_s14  ;;  %p2478_p12 = scmp.lt.s32.totalorder %s2469_s14, %s2469_s14 }
  0x23   : > { %p2472_p10 = pnand %p2470_p9, %p2458_p13  ;;  %p2479_p0 = por %p2478_p12, %p2477_p1 }
  0x25   : > { %p2473_p6 = pneg %p2472_p10 }
  0x27   : > { %p2480_p4 = pnand %p2479_p0, %p2473_p6 }
  0x29   : > { %2483 = shalt.err (!%p2480_p4)
}
  0x2a   : > { %s2664_s21 = smov 64   ;;  %s2665_s22 = smov 4  }
  0x2b   : > { %2333 = dma.hbm_to_vmem [thread:$0]  (!%p2766_p11), %s3344_s1, 4672, %s2759_s29, [#allocation6], %s2664_s21, %s2664_s21, %s2665_s22  }
  0x2c   : > { %s2484_s9 = scalar_lea.hbm %s3345_s2, 9344 }
  0x2d   : > { %p2485_p1 = scmp.ne.s32.totalorder %s3345_s2, %s2484_s9  ;;  %p2491_p10 = scmp.lt.u32.totalorder %s2484_s9, %s3345_s2 }
  0x2f   : > { %p2487_p4 = pnand %p2485_p1, %p2458_p13 }
  0x31   : > { %p2488_p6 = pneg %p2487_p4 }
  0x33   : > { %p2493_p3 = pnand %p2491_p10, %p2488_p6 }
  0x35   : > { %2496 = shalt.err (!%p2493_p3)
}
  0x36   : > { %s2497_s29 = scalar_lea.vmem %s2770_s6, 9344  ;;  %p2505_p12 = scmp.lt.s32.totalorder %s2770_s6, %s2770_s6 }
  0x37   : > { %p2498_p5 = scmp.ne.s32.totalorder %s2770_s6, %s2497_s29  ;;  %p2506_p0 = scmp.lt.s32.totalorder %s2497_s29, %s2497_s29 }
  0x39   : > { %p2500_p7 = pnand %p2498_p5, %p2458_p13  ;;  %p2507_p1 = por %p2506_p0, %p2505_p12 }
  0x3b   : > { %p2501_p9 = pneg %p2500_p7 }
  0x3d   : > { %p2508_p4 = pnand %p2507_p1, %p2501_p9 }
  0x3f   : > { %2511 = shalt.err (!%p2508_p4)
}
  0x40   : > { %s2666_s14 = smov 128   ;;  %s2667_s28 = smov 8  }
  0x41   : > { %2336 = dma.hbm_to_vmem [thread:$0]  (!%p2766_p11), %s3345_s2, 9344, %s2770_s6, [#allocation6], %s2666_s14, %s2666_s14, %s2667_s28  }
  0x42   : > { %s37_s8 = sadd.s32 1, %s2656_s19  ;;  %s46_s9 = sadd.s32 1, %s2648_s17 }
  0x43   : > { %p39_p13 = scmp.ge.s32.totalorder %s37_s8, 2  ;;  %p53_p6 = scmp.ne.s32.totalorder %s2648_s17, %s2644_s16 }
  0x44   : > { %p54_p10 = scmp.eq.s32.totalorder %s2660_s20, 0  ;;  %p2350_p3 = scmp.lt.s32.totalorder %s2660_s20, 2 }
  0x45   : > { %s3371_s8 = smov (%p39_p13, %s37_s8), 0  ;;  %p2837_p7 = por %p2739_p2, %p53_p6 }
  0x46   : > { %p55_p5 = por %p54_p10, %p53_p6  ;;  %s41_s30 = ssub.s32 %s2656_s19, %s3371_s8 }
  0x47   : > { %s3358_s10 = scalar_select %p2837_p7, 1, 0 }
  0x48   : > { %s207_s11 = sand.u32 1, %s2648_s17   ;;  %p44_p9 = scmp.eq.s32.totalorder %s41_s30, 0 }
  0x49   : > { %s1910_s6 = sshll.u32 %s207_s11, 5  ;;  %s2036_s12 = sshll.u32 %s2656_s19, 9 }
  0x4a   : > { %s2846_s13 = scalar_select %p44_p9, %s2648_s17, %s46_s9  }
  0x4b   : > { %s2851_s28 = scalar_lea.hbm %s3343_s0, %s2036_s12  ;;  %s211_s24 = scalar_lea.vmem [#allocation2], %s1910_s6 }
  0x4c   : > { %s220_s5 = sshll.u32 %s211_s24, 4  ;;  %p2855_p2 = pnand %p2350_p3, %p55_p5  ;;  %s2859_s5 = int_to_ptr.vmem [resolvable:$true] %s220_s5 }
  0x4d   : > { %s2861_s9 = scalar_lea.sflag [#allocation3], %s207_s11  ;;  %s2512_s30 = scalar_lea.hbm %s2851_s28, 512 }
  0x4e   : > { %p2513_p11 = scmp.ne.s32.totalorder %s2851_s28, %s2512_s30  ;;  %p2514_p12 = pneg %p2855_p2 }
  0x4f   : > { %s2517_s29 = scalar_lea.hbm %s3343_s0, 1024  ;;  %p2518_p4 = scmp.lt.u32.totalorder %s2851_s28, %s3343_s0 }
  0x50   : > { %p2515_p0 = pnand %p2514_p12, %p2513_p11  ;;  %p2519_p13 = scmp.lt.u32.totalorder %s2517_s29, %s2512_s30 }
  0x51   : > { %p2521_p10 = scmp.lt.u32.totalorder %s2512_s30, %s2851_s28 }
  0x52   : > { %p2516_p1 = pneg %p2515_p0  ;;  %p2520_p6 = por %p2519_p13, %p2518_p4 }
  0x54   : > { %p2522_p3 = por %p2521_p10, %p2520_p6 }
  0x56   : > { %p2523_p5 = pnand %p2522_p3, %p2516_p1 }
  0x58   : > { %2526 = shalt.err (!%p2523_p5)
}
  0x59   : > { %s2527_s11 = scalar_lea.vmem %s2859_s5, 512  ;;  %s2668_s6 = smov [#allocation2]  }
  0x5a   : > { %p2528_p9 = scmp.ne.s32.totalorder %s2859_s5, %s2527_s11  ;;  %s2532_s12 = sshll.u32 %s2668_s6, 4  ;;  %s2533_s12 = int_to_ptr.vmem [resolvable:$false] %s2532_s12 }
  0x5b   : > { %s2534_s14 = scalar_lea.vmem %s2533_s12, 1024  ;;  %p2535_p7 = scmp.lt.s32.totalorder %s2859_s5, %s2533_s12 }
  0x5c   : > { %p2530_p11 = pnand %p2528_p9, %p2514_p12  ;;  %p2536_p4 = scmp.lt.s32.totalorder %s2534_s14, %s2527_s11 }
  0x5e   : > { %p2531_p0 = pneg %p2530_p11  ;;  %p2537_p13 = por %p2536_p4, %p2535_p7 }
  0x60   : > { %p2538_p6 = pnand %p2537_p13, %p2531_p0 }
  0x62   : > { %2541 = shalt.err (!%p2538_p6)
}
  0x63   : > { %2340 = dma.hbm_to_vmem [thread:$0]  (!%p2855_p2), %s2851_s28, 512, %s2859_s5, %s2861_s9, %s2664_s21, %s2664_s21, %s2665_s22  }
  0x64   : > { %232 = sbr.rel (%p2755_p8) target bundleno = 538 (0x21a), region = 32  ;;  %s2895_s30 = sand.u32 (!%p2755_p8), 1, %s2644_s16  }
  0x65   : > { %s1914_s29 = sshll.u32 (!%p2755_p8), %s2895_s30, 5  ;;  %s235_s24 = scalar_lea.sflag (!%p2755_p8), [#allocation3], %s2895_s30 }
  0x66   : > { %s2899_s11 = scalar_lea.vmem (!%p2755_p8), [#allocation2], %s1914_s29  ;;  %p3360_p7 = scmp.ne.s32.totalorder (!%p2755_p8), %s3354_s25, 0 }
  0x6b   : > { %2623 = dma.done.wait (%p3360_p7), %s235_s24, 512  }
  0x6c   : > { %2625 = vsyncadd (%p3360_p7), %s235_s24, 4294966784  ;;  %p3361_p2 = scmp.ne.s32.totalorder %s3352_s23, 0 }
  0x6e   : > { %2627 = dma.done.wait (%p3361_p2), [#allocation6], 14016  }
  0x6f   : > { %2629 = vsyncadd (%p3361_p2), [#allocation6], 4294953280  ;;  %v2669_v0 = vmov 0   ;;  %v2670_v1 = vmov 0.0   ;;  %vm2671_vm0 = vmmov 0   ;;  %v361_v2 = vld [vmem:[#allocation7 + $0x10] sm:$0xff] }
  0x70   : > { %2414 = vset.pattern.permute.xlu1 %v2669_v0  ;;  %2413 = vset.pattern.permute.xlu0 %v2669_v0  ;;  %v359_v3 = vld [vmem:[#allocation7] sm:$0xff]  ;;  %v362_v5 = vld [vmem:[#allocation7 + $0x18] sm:$0xff]  ;;  %v360_v6 = vld [vmem:[#allocation7 + $0x8] sm:$0xff]  ;;  %s2314_s23 = smul.u32 288, %s2895_s30  ;;  %vm1657_vm1 = vcmask 519168   ;;  %s1917_s27 = sshll.u32 %s2895_s30, 1 }
  0x71   : > { %2150 = vmatprep.subr.bf16.mxu0 %v2670_v1  ;;  %2306 = vmatprep.subr.bf16.mxu1 %v2670_v1  ;;  %v2415_v4 = vld [vmem:[%s2899_s11] sm:$0xff]   ;;  %v364_v7 = vld [vmem:[#allocation7 + $0x28] sm:$0xff]  ;;  %v365_v11 = vld [vmem:[#allocation7 + $0x30] sm:$0xff]  ;;  %s2033_s21 = sshll.u32 %s2652_s18, 5  ;;  %s275_s22 = scalar_lea.vmem [#allocation9], %s1917_s27  ;;  %vm1730_vm2 = vcmask 517120  }
  0x72   : > { %2158 = vmatprep.mubr.msk.bf16.mxu0 %vm2671_vm0, %v2670_v1  ;;  %2234 = vmatprep.mubr.msk.bf16.mxu1 %vm2671_vm0, %v2670_v1  ;;  %v363_v8 = vld [vmem:[#allocation7 + $0x20] sm:$0xff]  ;;  %v366_v10 = vld [vmem:[#allocation7 + $0x38] sm:$0xff]  ;;  %v368_v12 = vld [vmem:[#allocation7 + $0x48] sm:$0xff]  ;;  %s3074_s25 = scalar_lea.vmem [#allocation8], %s2314_s23  ;;  %s1769_s28 = sshll.u32 %s275_s22, 4  ;;  %s3252_s28 = int_to_ptr.vmem [resolvable:$true] %s1769_s28 }
  0x73   : > { %444 = vperm.xlu1 %2414, %v361_v2   ;;  %434 = vperm.xlu0 %2413, %v359_v3   ;;  %v2416_v9 = vld [vmem:[%s2899_s11 + $0x8] sm:$0xff]   ;;  %v2417_v14 = vld [vmem:[%s2899_s11 + $0x10] sm:$0xff]   ;;  %v370_v15 = vld [vmem:[#allocation7 + $0x58] sm:$0xff]  ;;  %s3250_s9 = scalar_lea.hbm %s3347_s4, %s2033_s21  ;;  %s1738_s6 = scalar_lea.sflag [#allocation10], %s2895_s30 }
  0x74   : > { %2151 = vmatpush3.bf16.xpose.msra.mxu0 %v2415_v4  ;;  %2310 = vmatpush3.bf16.xpose.msra.mxu1 %v2415_v4  ;;  %v367_v13 = vld [vmem:[#allocation7 + $0x40] sm:$0xff]  ;;  %v369_v16 = vld [vmem:[#allocation7 + $0x50] sm:$0xff]  ;;  %v372_v17 = vld [vmem:[#allocation7 + $0x68] sm:$0xff]  ;;  %s2542_s12 = scalar_lea.vmem %s3252_s28, 32  ;;  %p3362_p12 = scmp.ne.s32.totalorder %s3358_s10, 0 }
  0x75   : > { %2152 = vmatprep.subr.bf16.mxu0 %v2670_v1  ;;  %2307 = vmatprep.subr.bf16.mxu1 %v2670_v1  ;;  %v371_v18 = vld [vmem:[#allocation7 + $0x60] sm:$0xff]  ;;  %v2418_v19 = vld [vmem:[%s2899_s11 + $0x18] sm:$0xff]   ;;  %v376_v22 = vld [vmem:[#allocation7 + $0x88] sm:$0xff]  ;;  %p2543_p8 = scmp.ne.s32.totalorder %s3252_s28, %s2542_s12  ;;  %s2672_s14 = smov [#allocation9]  }
  0x76   : > { %v374_v20 = vld [vmem:[#allocation7 + $0x78] sm:$0xff]  ;;  %v373_v21 = vld [vmem:[#allocation7 + $0x70] sm:$0xff]  ;;  %v375_v23 = vld [vmem:[#allocation7 + $0x80] sm:$0xff]  ;;  %s2546_s29 = sshll.u32 %s2672_s14, 4  ;;  %s2547_s29 = int_to_ptr.vmem [resolvable:$false] %s2546_s29 }
  0x77   : > { %449 = vperm.xlu1 %2414, %v362_v5   ;;  %439 = vperm.xlu0 %2413, %v360_v6   ;;  %v2419_v24 = vld [vmem:[#allocation5] sm:$0xff]   ;;  %v2420_v25 = vld [vmem:[#allocation5 + $0x98] sm:$0xff]   ;;  %v380_v28 = vld [vmem:[#allocation7 + $0xa8] sm:$0xff]  ;;  %p2544_p1 = pnand %p2543_p8, %p3362_p12  ;;  %s2548_s24 = scalar_lea.vmem %s2547_s29, 64 }
  0x78   : > { %v378_v26 = vld [vmem:[#allocation7 + $0x98] sm:$0xff]  ;;  %v377_v27 = vld [vmem:[#allocation7 + $0x90] sm:$0xff]  ;;  %v379_v29 = vld [vmem:[#allocation7 + $0xa0] sm:$0xff]  ;;  %p2549_p3 = scmp.lt.s32.totalorder %s3252_s28, %s2547_s29  ;;  %p2550_p5 = scmp.lt.s32.totalorder %s2548_s24, %s2542_s12 }
  0x79   : > { %v2421_v30 = vld [vmem:[#allocation5 + $0x8] sm:$0xff]   ;;  %v2422_v31 = vld [vmem:[#allocation5 + $0xa0] sm:$0xff]   ;;  %v381_v33 = vld [vmem:[#allocation7 + $0xb0] sm:$0xff]  ;;  %p2545_p10 = pneg %p2544_p1 }
  0x7a   : > { %v382_v32 = vld [vmem:[#allocation7 + $0xb8] sm:$0xff]  ;;  %v384_v34 = vld [vmem:[#allocation7 + $0xc8] sm:$0xff]  ;;  %v383_v35 = vld [vmem:[#allocation7 + $0xc0] sm:$0xff]  ;;  %p2551_p9 = por %p2550_p5, %p2549_p3 }
  0x7b   : > { %459 = vperm.xlu1 %2414, %v364_v7   ;;  %454 = vperm.xlu0 %2413, %v363_v8   ;;  %v2423_v36 = vld [vmem:[#allocation5 + $0x10] sm:$0xff]   ;;  %v2424_v37 = vld [vmem:[#allocation5 + $0xa8] sm:$0xff]   ;;  %v386_v38 = vld [vmem:[#allocation7 + $0xd8] sm:$0xff] }
  0x7c   : > { %2153 = vmatpush3.bf16.xpose.msra.mxu0 %v2416_v9  ;;  %2311 = vmatpush3.bf16.xpose.msra.mxu1 %v2416_v9  ;;  %v385_v39 = vld [vmem:[#allocation7 + $0xd0] sm:$0xff]  ;;  %v388_v40 = vld [vmem:[#allocation7 + $0xe8] sm:$0xff]  ;;  %v387_v41 = vld [vmem:[#allocation7 + $0xe0] sm:$0xff]  ;;  %p2552_p11 = pnand %p2551_p9, %p2545_p10 }
  0x7d   : > { %2154 = vmatprep.subr.bf16.mxu0 %v2670_v1  ;;  %2308 = vmatprep.subr.bf16.mxu1 %v2670_v1  ;;  %v2425_v42 = vld [vmem:[#allocation5 + $0x18] sm:$0xff]   ;;  %v2426_v43 = vld [vmem:[#allocation5 + $0xb0] sm:$0xff]   ;;  %v391_v47 = vld [vmem:[#allocation7 + $0x100] sm:$0xff] }
  0x7e   : > { %v390_v44 = vld [vmem:[#allocation7 + $0xf8] sm:$0xff]  ;;  %v389_v45 = vld [vmem:[#allocation7 + $0xf0] sm:$0xff]  ;;  %v392_v46 = vld [vmem:[#allocation7 + $0x108] sm:$0xff] }
  0x7f   : > { %469 = vperm.xlu1 %2414, %v366_v10   ;;  %464 = vperm.xlu0 %2413, %v365_v11   ;;  %v2427_v48 = vld [vmem:[#allocation5 + $0x20] sm:$0xff]   ;;  %v2428_v49 = vld [vmem:[#allocation5 + $0xb8] sm:$0xff]   ;;  %v396_v52 = vld [vmem:[#allocation7 + $0x128] sm:$0xff] }
  0x80   : > { %v394_v50 = vld [vmem:[#allocation7 + $0x118] sm:$0xff]  ;;  %v393_v51 = vld [vmem:[#allocation7 + $0x110] sm:$0xff]  ;;  %v395_v53 = vld [vmem:[#allocation7 + $0x120] sm:$0xff] }
  0x81   : > { %v2429_v54 = vld [vmem:[#allocation5 + $0x28] sm:$0xff]   ;;  %v2430_v55 = vld [vmem:[#allocation5 + $0xc0] sm:$0xff]   ;;  %v397_v57 = vld [vmem:[#allocation7 + $0x130] sm:$0xff] }
  0x82   : > { %v398_v56 = vld [vmem:[#allocation7 + $0x138] sm:$0xff]  ;;  %v400_v58 = vld [vmem:[#allocation7 + $0x148] sm:$0xff]  ;;  %v399_v59 = vld [vmem:[#allocation7 + $0x140] sm:$0xff] }
  0x83   : > { %479 = vperm.xlu1 %2414, %v368_v12   ;;  %474 = vperm.xlu0 %2413, %v367_v13   ;;  %v2431_v60 = vld [vmem:[#allocation5 + $0x30] sm:$0xff]   ;;  %v2432_v61 = vld [vmem:[#allocation5 + $0xc8] sm:$0xff]   ;;  %v402_v62 = vld [vmem:[#allocation7 + $0x158] sm:$0xff] }
  0x84   : > { %2155 = vmatpush3.bf16.xpose.msra.mxu0 %v2417_v14  ;;  %2312 = vmatpush3.bf16.xpose.msra.mxu1 %v2417_v14  ;;  %v401_v63 = vld [vmem:[#allocation7 + $0x150] sm:$0xff]  ;;  %v404_v0 = vld [vmem:[#allocation7 + $0x168] sm:$0xff]  ;;  %v403_v2 = vld [vmem:[#allocation7 + $0x160] sm:$0xff] }
  0x85   : > { %2156 = vmatprep.subr.bf16.mxu0 %v2670_v1  ;;  %2309 = vmatprep.subr.bf16.mxu1 %v2670_v1  ;;  %v2433_v3 = vld [vmem:[#allocation5 + $0x38] sm:$0xff]   ;;  %v2434_v4 = vld [vmem:[#allocation5 + $0xd0] sm:$0xff]   ;;  %v407_v8 = vld [vmem:[#allocation7 + $0x180] sm:$0xff] }
  0x86   : > { %v406_v5 = vld [vmem:[#allocation7 + $0x178] sm:$0xff]  ;;  %v405_v6 = vld [vmem:[#allocation7 + $0x170] sm:$0xff]  ;;  %v408_v7 = vld [vmem:[#allocation7 + $0x188] sm:$0xff] }
  0x87   : > { %489 = vperm.xlu1 %2414, %v370_v15   ;;  %484 = vperm.xlu0 %2413, %v369_v16   ;;  %v2435_v9 = vld [vmem:[#allocation5 + $0x40] sm:$0xff]   ;;  %v2436_v10 = vld [vmem:[#allocation5 + $0xd8] sm:$0xff]   ;;  %v412_v13 = vld [vmem:[#allocation7 + $0x1a8] sm:$0xff] }
  0x88   : > { %v410_v11 = vld [vmem:[#allocation7 + $0x198] sm:$0xff]  ;;  %v409_v12 = vld [vmem:[#allocation7 + $0x190] sm:$0xff]  ;;  %v411_v14 = vld [vmem:[#allocation7 + $0x1a0] sm:$0xff] }
  0x89   : > { %v2437_v15 = vld [vmem:[#allocation5 + $0x48] sm:$0xff]   ;;  %v2438_v16 = vld [vmem:[#allocation5 + $0xe0] sm:$0xff]  }
  0x8b   : > { %499 = vperm.xlu1 %2414, %v372_v17   ;;  %494 = vperm.xlu0 %2413, %v371_v18   ;;  %v414_v17 = vld [vmem:[#allocation7 + $0x1b8] sm:$0xff]  ;;  %v413_v18 = vld [vmem:[#allocation7 + $0x1b0] sm:$0xff] }
  0x8c   : > { %2157 = vmatpush3.bf16.xpose.msra.mxu0 %v2418_v19  ;;  %2313 = vmatpush3.bf16.xpose.msra.mxu1 %v2418_v19  ;;  %v416_v19 = vld [vmem:[#allocation7 + $0x1c8] sm:$0xff] }
  0x8f   : > { %509 = vperm.xlu1 %2414, %v374_v20   ;;  %504 = vperm.xlu0 %2413, %v373_v21   ;;  %v415_v20 = vld [vmem:[#allocation7 + $0x1c0] sm:$0xff]  ;;  %v2439_v21 = vld [vmem:[#allocation5 + $0x50] sm:$0xff]  }
  0x93   : > { %519 = vperm.xlu1 %2414, %v376_v22   ;;  %514 = vperm.xlu0 %2413, %v375_v23   ;;  %v2440_v22 = vld [vmem:[#allocation5 + $0xe8] sm:$0xff]   ;;  %v418_v23 = vld [vmem:[#allocation7 + $0x1d8] sm:$0xff] }
  0x94   : > { %2159 = vmatmul.mubr.bf16.vlgmr.msra.gmra.mrb[0].mxu0 %v2419_v24  ;;  %2235 = vmatmul.mubr.bf16.vlgmr.msra.gmra.mrb[0].mxu1 %v2420_v25  ;;  %v417_v24 = vld [vmem:[#allocation7 + $0x1d0] sm:$0xff]  ;;  %v420_v25 = vld [vmem:[#allocation7 + $0x1e8] sm:$0xff] }
  0x95   : > { %2162 = vmatprep.mubr.msk.bf16.mxu0 %vm2671_vm0, %v2670_v1  ;;  %2238 = vmatprep.mubr.msk.bf16.mxu1 %vm2671_vm0, %v2670_v1 }
  0x97   : > { %529 = vperm.xlu1 %2414, %v378_v26   ;;  %524 = vperm.xlu0 %2413, %v377_v27   ;;  %v419_v26 = vld [vmem:[#allocation7 + $0x1e0] sm:$0xff]  ;;  %v2441_v27 = vld [vmem:[#allocation5 + $0x58] sm:$0xff]  }
  0x9b   : > { %539 = vperm.xlu1 %2414, %v380_v28   ;;  %534 = vperm.xlu0 %2413, %v379_v29   ;;  %v2442_v28 = vld [vmem:[#allocation5 + $0xf0] sm:$0xff]   ;;  %v422_v29 = vld [vmem:[#allocation7 + $0x1f8] sm:$0xff] }
  0x9c   : > { %2163 = vmatmul.mubr.bf16.gmra.mrb[4].mxu0 %v2421_v30  ;;  %2239 = vmatmul.mubr.bf16.gmra.mrb[4].mxu1 %v2422_v31  ;;  %v421_v30 = vld [vmem:[#allocation7 + $0x1f0] sm:$0xff]  ;;  %v424_v31 = vld [vmem:[#allocation7 + $0x208] sm:$0xff] }
  0x9d   : > { %2166 = vmatprep.mubr.msk.bf16.mxu0 %vm2671_vm0, %v2670_v1  ;;  %2242 = vmatprep.mubr.msk.bf16.mxu1 %vm2671_vm0, %v2670_v1 }
  0x9f   : > { %549 = vperm.xlu1 %2414, %v382_v32   ;;  %544 = vperm.xlu0 %2413, %v381_v33   ;;  %v423_v32 = vld [vmem:[#allocation7 + $0x200] sm:$0xff] }
  0xa0   : > { %v2443_v33 = vld [vmem:[#allocation5 + $0x60] sm:$0xff]  }
  0xa3   : > { %559 = vperm.xlu1 %2414, %v384_v34   ;;  %554 = vperm.xlu0 %2413, %v383_v35   ;;  %v2444_v34 = vld [vmem:[#allocation5 + $0xf8] sm:$0xff]  }
  0xa4   : > { %2167 = vmatmul.mubr.bf16.gmra.mrb[8].mxu0 %v2423_v36  ;;  %2243 = vmatmul.mubr.bf16.gmra.mrb[8].mxu1 %v2424_v37  ;;  %v426_v37 = vld [vmem:[#allocation7 + $0x218] sm:$0xff] }
  0xa5   : > { %2170 = vmatprep.mubr.msk.bf16.mxu0 %vm2671_vm0, %v2670_v1  ;;  %2246 = vmatprep.mubr.msk.bf16.mxu1 %vm2671_vm0, %v2670_v1 }
  0xa7   : > { %569 = vperm.xlu1 %2414, %v386_v38   ;;  %564 = vperm.xlu0 %2413, %v385_v39   ;;  %v425_v38 = vld [vmem:[#allocation7 + $0x210] sm:$0xff]  ;;  %v428_v39 = vld [vmem:[#allocation7 + $0x228] sm:$0xff] }
  0xab   : > { %579 = vperm.xlu1 %2414, %v388_v40   ;;  %574 = vperm.xlu0 %2413, %v387_v41   ;;  %v427_v40 = vld [vmem:[#allocation7 + $0x220] sm:$0xff] }
  0xac   : > { %2171 = vmatmul.mubr.bf16.gmra.mrb[12].mxu0 %v2425_v42  ;;  %2247 = vmatmul.mubr.bf16.gmra.mrb[12].mxu1 %v2426_v43  ;;  %v2445_v41 = vld [vmem:[#allocation5 + $0x68] sm:$0xff]   ;;  %v2446_v42 = vld [vmem:[#allocation5 + $0x100] sm:$0xff]  }
  0xad   : > { %2174 = vmatprep.mubr.msk.bf16.mxu0 %vm2671_vm0, %v2670_v1  ;;  %2250 = vmatprep.mubr.msk.bf16.mxu1 %vm2671_vm0, %v2670_v1 }
  0xaf   : > { %589 = vperm.xlu1 %2414, %v390_v44   ;;  %584 = vperm.xlu0 %2413, %v389_v45   ;;  %v430_v45 = vld [vmem:[#allocation7 + $0x238] sm:$0xff] }
  0xb3   : > { %599 = vperm.xlu1 %2414, %v392_v46   ;;  %594 = vperm.xlu0 %2413, %v391_v47   ;;  %v429_v46 = vld [vmem:[#allocation7 + $0x230] sm:$0xff] }
  0xb4   : > { %2175 = vmatmul.mubr.bf16.gmra.mrb[16].mxu0 %v2427_v48  ;;  %2251 = vmatmul.mubr.bf16.gmra.mrb[16].mxu1 %v2428_v49  ;;  %v431_v49 = vld [vmem:[#allocation7 + $0x240] sm:$0xff] }
  0xb5   : > { %2178 = vmatprep.mubr.msk.bf16.mxu0 %vm2671_vm0, %v2670_v1  ;;  %2254 = vmatprep.mubr.msk.bf16.mxu1 %vm2671_vm0, %v2670_v1 }
  0xb7   : > { %609 = vperm.xlu1 %2414, %v394_v50   ;;  %604 = vperm.xlu0 %2413, %v393_v51   ;;  %v2447_v50 = vld [vmem:[#allocation5 + $0x70] sm:$0xff]   ;;  %v2448_v51 = vld [vmem:[#allocation5 + $0x108] sm:$0xff]  }
  0xbb   : > { %619 = vperm.xlu1 %2414, %v396_v52   ;;  %614 = vperm.xlu0 %2413, %v395_v53  }
  0xbc   : > { %2179 = vmatmul.mubr.bf16.gmra.mrb[20].mxu0 %v2429_v54  ;;  %2255 = vmatmul.mubr.bf16.gmra.mrb[20].mxu1 %v2430_v55  ;;  %v2449_v54 = vld [vmem:[#allocation5 + $0x78] sm:$0xff]   ;;  %v2450_v55 = vld [vmem:[#allocation5 + $0x110] sm:$0xff]  }
  0xbd   : > { %2182 = vmatprep.mubr.msk.bf16.mxu0 %vm2671_vm0, %v2670_v1  ;;  %2258 = vmatprep.mubr.msk.bf16.mxu1 %vm2671_vm0, %v2670_v1 }
  0xbf   : > { %629 = vperm.xlu1 %2414, %v398_v56   ;;  %624 = vperm.xlu0 %2413, %v397_v57  }
  0xc3   : > { %639 = vperm.xlu1 %2414, %v400_v58   ;;  %634 = vperm.xlu0 %2413, %v399_v59   ;;  %v2451_v58 = vld [vmem:[#allocation5 + $0x80] sm:$0xff]   ;;  %v2452_v59 = vld [vmem:[#allocation5 + $0x118] sm:$0xff]  }
  0xc4   : > { %2183 = vmatmul.mubr.bf16.gmra.mrb[24].mxu0 %v2431_v60  ;;  %2259 = vmatmul.mubr.bf16.gmra.mrb[24].mxu1 %v2432_v61 }
  0xc5   : > { %2186 = vmatprep.mubr.msk.bf16.mxu0 %vm2671_vm0, %v2670_v1  ;;  %2262 = vmatprep.mubr.msk.bf16.mxu1 %vm2671_vm0, %v2670_v1 }
  0xc7   : > { %649 = vperm.xlu1 %2414, %v402_v62   ;;  %644 = vperm.xlu0 %2413, %v401_v63  }
  0xcb   : > { %659 = vperm.xlu1 %2414, %v404_v0   ;;  %654 = vperm.xlu0 %2413, %v403_v2   ;;  %v2453_v0 = vld [vmem:[#allocation5 + $0x88] sm:$0xff]   ;;  %v2454_v2 = vld [vmem:[#allocation5 + $0x120] ss:$0 sps:$4 sm:$0xff]  }
  0xcc   : > { %2187 = vmatmul.mubr.bf16.gmra.mrb[28].mxu0 %v2433_v3  ;;  %2263 = vmatmul.mubr.bf16.gmra.mrb[28].mxu1 %v2434_v4 }
  0xcd   : > { %2190 = vmatprep.mubr.msk.bf16.mxu0 %vm2671_vm0, %v2670_v1  ;;  %2266 = vmatprep.mubr.msk.bf16.mxu1 %vm2671_vm0, %v2670_v1 }
  0xcf   : > { %669 = vperm.xlu1 %2414, %v406_v5   ;;  %664 = vperm.xlu0 %2413, %v405_v6   ;;  %v2455_v5 = vld [vmem:[#allocation5 + $0x90] sm:$0xff]  }
  0xd3   : > { %679 = vperm.xlu1 %2414, %v408_v7   ;;  %674 = vperm.xlu0 %2413, %v407_v8  }
  0xd4   : > { %2191 = vmatmul.mubr.bf16.gmra.mrb[32].mxu0 %v2435_v9  ;;  %2267 = vmatmul.mubr.bf16.gmra.mrb[32].mxu1 %v2436_v10 }
  0xd5   : > { %2194 = vmatprep.mubr.msk.bf16.mxu0 %vm2671_vm0, %v2670_v1  ;;  %2270 = vmatprep.mubr.msk.bf16.mxu1 %vm2671_vm0, %v2670_v1 }
  0xd7   : > { %689 = vperm.xlu1 %2414, %v410_v11   ;;  %684 = vperm.xlu0 %2413, %v409_v12  }
  0xdb   : > { %699 = vperm.xlu1 %2414, %v412_v13   ;;  %694 = vperm.xlu0 %2413, %v411_v14  }
  0xdc   : > { %2195 = vmatmul.mubr.bf16.gmra.mrb[36].mxu0 %v2437_v15  ;;  %2271 = vmatmul.mubr.bf16.gmra.mrb[36].mxu1 %v2438_v16 }
  0xdd   : > { %2198 = vmatprep.mubr.msk.bf16.mxu0 %vm2671_vm0, %v2670_v1  ;;  %2274 = vmatprep.mubr.msk.bf16.mxu1 %vm2671_vm0, %v2670_v1 }
  0xdf   : > { %709 = vperm.xlu1 %2414, %v414_v17   ;;  %704 = vperm.xlu0 %2413, %v413_v18  }
  0xe3   : > { %719 = vperm.xlu1 %2414, %v416_v19   ;;  %714 = vperm.xlu0 %2413, %v415_v20  }
  0xe4   : > { %2199 = vmatmul.mubr.bf16.gmra.mrb[40].mxu0 %v2439_v21  ;;  %2275 = vmatmul.mubr.bf16.gmra.mrb[40].mxu1 %v2440_v22 }
  0xe5   : > { %2202 = vmatprep.mubr.msk.bf16.mxu0 %vm2671_vm0, %v2670_v1  ;;  %2278 = vmatprep.mubr.msk.bf16.mxu1 %vm2671_vm0, %v2670_v1 }
  0xe7   : > { %729 = vperm.xlu1 %2414, %v418_v23   ;;  %724 = vperm.xlu0 %2413, %v417_v24  }
  0xeb   : > { %739 = vperm.xlu1 %2414, %v420_v25   ;;  %734 = vperm.xlu0 %2413, %v419_v26  }
  0xec   : > { %2203 = vmatmul.mubr.bf16.gmra.mrb[44].mxu0 %v2441_v27  ;;  %2279 = vmatmul.mubr.bf16.gmra.mrb[44].mxu1 %v2442_v28 }
  0xed   : > { %2206 = vmatprep.mubr.msk.bf16.mxu0 %vm2671_vm0, %v2670_v1  ;;  %2282 = vmatprep.mubr.msk.bf16.mxu1 %vm2671_vm0, %v2670_v1 }
  0xef   : > { %749 = vperm.xlu1 %2414, %v422_v29   ;;  %744 = vperm.xlu0 %2413, %v421_v30  }
  0xf2   : > { %v2973_v35 = vpop.permute.xlu1 %444  ;;  %v2975_v36 = vpop.permute.xlu0 %434 }
  0xf3   : > { %759 = vperm.xlu1 %2414, %v424_v31   ;;  %754 = vperm.xlu0 %2413, %v423_v32  }
  0xf4   : > { %2207 = vmatmul.mubr.bf16.gmra.mrb[48].mxu0 %v2443_v33  ;;  %2283 = vmatmul.mubr.bf16.gmra.mrb[48].mxu1 %v2444_v34 }
  0xf5   : > { %2210 = vmatprep.mubr.msk.bf16.mxu0 %vm2671_vm0, %v2670_v1  ;;  %2286 = vmatprep.mubr.msk.bf16.mxu1 %vm2671_vm0, %v2670_v1 }
  0xf6   : > { %v2981_v43 = vpop.permute.xlu1 %449  ;;  %v2983_v44 = vpop.permute.xlu0 %439 }
  0xf7   : > { %769 = vperm.xlu1 %2414, %v426_v37   ;;  %764 = vperm.xlu0 %2413, %v425_v38  }
  0xfa   : > { %v2989_v47 = vpop.permute.xlu1 %459  ;;  %v2991_v48 = vpop.permute.xlu0 %454 }
  0xfb   : > { %779 = vperm.xlu1 %2414, %v428_v39   ;;  %774 = vperm.xlu0 %2413, %v427_v40  }
  0xfc   : > { %2211 = vmatmul.mubr.bf16.gmra.mrb[52].mxu0 %v2445_v41  ;;  %2287 = vmatmul.mubr.bf16.gmra.mrb[52].mxu1 %v2446_v42 }
  0xfd   : > { %2214 = vmatprep.mubr.msk.bf16.mxu0 %vm2671_vm0, %v2670_v1  ;;  %2290 = vmatprep.mubr.msk.bf16.mxu1 %vm2671_vm0, %v2670_v1 }
  0xfe   : > { %v2997_v52 = vpop.permute.xlu1 %469  ;;  %v2999_v53 = vpop.permute.xlu0 %464 }
  0xff   : > { %789 = vperm.xlu1 %2414, %v430_v45   ;;  %784 = vperm.xlu0 %2413, %v429_v46  }
 0x102   : > { %v3001_v56 = vpop.permute.xlu1 %479  ;;  %v3003_v57 = vpop.permute.xlu0 %474 }
 0x103   : > { %794 = vperm.xlu0 %2413, %v431_v49  }
 0x104   : > { %2215 = vmatmul.mubr.bf16.gmra.mrb[56].mxu0 %v2447_v50  ;;  %2291 = vmatmul.mubr.bf16.gmra.mrb[56].mxu1 %v2448_v51 }
 0x105   : > { %2218 = vmatprep.mubr.msk.bf16.mxu0 %vm2671_vm0, %v2670_v1  ;;  %2294 = vmatprep.mubr.msk.bf16.mxu1 %vm2671_vm0, %v2670_v1 }
 0x106   : > { %v3009_v60 = vpop.permute.xlu1 %489  ;;  %v3011_v61 = vpop.permute.xlu0 %484 }
 0x10a   : > { %v3017_v62 = vpop.permute.xlu1 %499  ;;  %v3019_v63 = vpop.permute.xlu0 %494 }
 0x10c   : > { %2219 = vmatmul.mubr.bf16.gmra.mrb[60].mxu0 %v2449_v54  ;;  %2295 = vmatmul.mubr.bf16.gmra.mrb[60].mxu1 %v2450_v55 }
 0x10d   : > { %2222 = vmatprep.mubr.msk.bf16.mxu0 %vm2671_vm0, %v2670_v1  ;;  %2298 = vmatprep.mubr.msk.bf16.mxu1 %vm2671_vm0, %v2670_v1 }
 0x10e   : > { %v3023_v3 = vpop.permute.xlu1 %509  ;;  %v3025_v4 = vpop.permute.xlu0 %504 }
 0x112   : > { %v3027_v6 = vpop.permute.xlu1 %519  ;;  %v3029_v7 = vpop.permute.xlu0 %514 }
 0x114   : > { %2223 = vmatmul.mubr.bf16.gmra.mrb[64].mxu0 %v2451_v58  ;;  %2299 = vmatmul.mubr.bf16.gmra.mrb[64].mxu1 %v2452_v59 }
 0x115   : > { %2226 = vmatprep.mubr.msk.bf16.mxu0 %vm2671_vm0, %v2670_v1  ;;  %2302 = vmatprep.mubr.msk.bf16.mxu1 %vm2671_vm0, %v2670_v1 }
 0x116   : > { %v3031_v8 = vpop.permute.xlu1 %529  ;;  %v3033_v9 = vpop.permute.xlu0 %524 }
 0x11a   : > { %v3035_v10 = vpop.permute.xlu1 %539  ;;  %v3037_v11 = vpop.permute.xlu0 %534 }
 0x11c   : > { %2227 = vmatmul.mubr.bf16.gmra.mrb[68].mxu0 %v2453_v0  ;;  %2303 = vmatmul.mubr.bf16.gmra.mrb[68].mxu1 %v2454_v2 }
 0x11d   : > { %2230 = vmatprep.mubr.msk.bf16.mxu0 %vm2671_vm0, %v2670_v1 }
 0x11e   : > { %v3039_v12 = vpop.permute.xlu1 %549  ;;  %v3041_v1 = vpop.permute.xlu0 %544 }
 0x122   : > { %v3043_v13 = vpop.permute.xlu1 %559  ;;  %v3045_v14 = vpop.permute.xlu0 %554 }
 0x124   : > { %2231 = vmatmul.mubr.bf16.gmra.mrb[72].mxu0 %v2455_v5 }
 0x126   : > { %v3047_v15 = vpop.permute.xlu1 %569  ;;  %v3049_v16 = vpop.permute.xlu0 %564 }
 0x12a   : > { %v3051_v17 = vpop.permute.xlu1 %579  ;;  %v3053_v18 = vpop.permute.xlu0 %574 }
 0x12e   : > { %v3055_v19 = vpop.permute.xlu1 %589  ;;  %v3057_v20 = vpop.permute.xlu0 %584 }
 0x132   : > { %v3059_v21 = vpop.permute.xlu1 %599  ;;  %v3061_v22 = vpop.permute.xlu0 %594 }
 0x136   : > { %v3063_v23 = vpop.permute.xlu1 %609  ;;  %v3065_v24 = vpop.permute.xlu0 %604 }
 0x13a   : > { %v3067_v25 = vpop.permute.xlu1 %619  ;;  %v3069_v26 = vpop.permute.xlu0 %614 }
 0x13e   : > { %v630_v27 = vpop.permute.xlu1 %629  ;;  %v625_v28 = vpop.permute.xlu0 %624 }
 0x142   : > { %v640_v50 = vpop.permute.xlu1 %639  ;;  %v635_v51 = vpop.permute.xlu0 %634 }
 0x167   : > { %v1075_v29 = vpop.f32.mrb[0].mxu0  ;;  %v1227_v30 = vpop.f32.mrb[0].mxu1 }
 0x168   : > { %v1076_v31 = vadd.f32 %v1075_v29, %v2975_v36  ;;  %v2160_v32 = vpop.f32.mrb[1].mxu0  ;;  %v1228_v33 = vadd.f32 %v1227_v30, %v625_v28  ;;  %v2236_v34 = vpop.f32.mrb[1].mxu1 }
 0x169   : > { %v1078_v37 = vpop.f32.mrb[2].mxu0  ;;  %v1230_v38 = vpop.f32.mrb[2].mxu1 }
 0x16a   : > { %v2037_v39 = vpack.c.bf16 %v1076_v31, %v1076_v31  ;;  %v1079_v40 = vadd.f32 %v1078_v37, %v2983_v44  ;;  %v2075_v41 = vpack.c.bf16 %v1228_v33, %v1228_v33  ;;  %v1231_v42 = vadd.f32 %v1230_v38, %v630_v27  ;;  %v2161_v45 = vpop.f32.mrb[3].mxu0  ;;  %v2237_v46 = vpop.f32.mrb[3].mxu1 }
 0x16b   : > { %v650_v34 = vpop.permute.xlu1 %649  ;;  %v645_v37 = vpop.permute.xlu0 %644 }
 0x16c   : > { %1658 = vst.msk [vmem:[%s3074_s25] sm:$0xf] %vm1657_vm1, %v2037_v39  ;;  %v2038_v36 = vpack.c.bf16 %v1079_v40, %v1079_v40  ;;  %1696 = vst.msk [vmem:[%s3074_s25 + $0x98] sm:$0xf] %vm1657_vm1, %v2075_v41  ;;  %v2076_v49 = vpack.c.bf16 %v1231_v42, %v1231_v42 }
 0x16e   : > { %1659 = vst.msk [vmem:[%s3074_s25 + $0x4] sm:$0xf] %vm1657_vm1, %v2038_v36  ;;  %1697 = vst.msk [vmem:[%s3074_s25 + $0x9c] sm:$0xf] %vm1657_vm1, %v2076_v49 }
 0x16f   : > { %v1083_v44 = vpop.f32.mrb[4].mxu0  ;;  %v1235_v54 = vpop.f32.mrb[4].mxu1 }
 0x170   : > { %v1084_v55 = vadd.f32 %v1083_v44, %v2973_v35  ;;  %v1236_v58 = vadd.f32 %v1235_v54, %v635_v51  ;;  %v2164_v59 = vpop.f32.mrb[5].mxu0  ;;  %v2240_v0 = vpop.f32.mrb[5].mxu1 }
 0x171   : > { %v1086_v2 = vpop.f32.mrb[6].mxu0  ;;  %v1238_v5 = vpop.f32.mrb[6].mxu1 }
 0x172   : > { %v2039_v27 = vpack.c.bf16 %v1084_v55, %v1084_v55  ;;  %v2077_v28 = vpack.c.bf16 %v1236_v58, %v1236_v58  ;;  %v1087_v29 = vadd.f32 %v1086_v2, %v2981_v43  ;;  %v1239_v30 = vadd.f32 %v1238_v5, %v640_v50  ;;  %v2165_v31 = vpop.f32.mrb[7].mxu0  ;;  %v2241_v32 = vpop.f32.mrb[7].mxu1 }
 0x173   : > { %v660_v58 = vpop.permute.xlu1 %659  ;;  %v655_v59 = vpop.permute.xlu0 %654 }
 0x174   : > { %1660 = vst.msk [vmem:[%s3074_s25 + $0x8] sm:$0xf] %vm1657_vm1, %v2039_v27  ;;  %1698 = vst.msk [vmem:[%s3074_s25 + $0xa0] sm:$0xf] %vm1657_vm1, %v2077_v28  ;;  %v2040_v33 = vpack.c.bf16 %v1087_v29, %v1087_v29  ;;  %v2078_v35 = vpack.c.bf16 %v1239_v30, %v1239_v30 }
 0x176   : > { %1661 = vst.msk [vmem:[%s3074_s25 + $0xc] sm:$0xf] %vm1657_vm1, %v2040_v33  ;;  %1699 = vst.msk [vmem:[%s3074_s25 + $0xa4] sm:$0xf] %vm1657_vm1, %v2078_v35 }
 0x177   : > { %v1091_v38 = vpop.f32.mrb[8].mxu0  ;;  %v1243_v39 = vpop.f32.mrb[8].mxu1 }
 0x178   : > { %v1092_v43 = vadd.f32 %v1091_v38, %v2991_v48  ;;  %v1244_v40 = vadd.f32 %v1243_v39, %v645_v37  ;;  %v2168_v41 = vpop.f32.mrb[9].mxu0  ;;  %v2244_v42 = vpop.f32.mrb[9].mxu1 }
 0x179   : > { %v1094_v45 = vpop.f32.mrb[10].mxu0  ;;  %v1246_v46 = vpop.f32.mrb[10].mxu1 }
 0x17a   : > { %v2041_v36 = vpack.c.bf16 %v1092_v43, %v1092_v43  ;;  %v2079_v49 = vpack.c.bf16 %v1244_v40, %v1244_v40  ;;  %v1095_v50 = vadd.f32 %v1094_v45, %v2989_v47  ;;  %v1247_v51 = vadd.f32 %v1246_v46, %v650_v34  ;;  %v2169_v44 = vpop.f32.mrb[11].mxu0  ;;  %v2245_v54 = vpop.f32.mrb[11].mxu1 }
 0x17b   : > { %v670_v39 = vpop.permute.xlu1 %669  ;;  %v665_v43 = vpop.permute.xlu0 %664 }
 0x17c   : > { %1662 = vst.msk [vmem:[%s3074_s25 + $0x10] sm:$0xf] %vm1657_vm1, %v2041_v36  ;;  %1700 = vst.msk [vmem:[%s3074_s25 + $0xa8] sm:$0xf] %vm1657_vm1, %v2079_v49  ;;  %v2042_v55 = vpack.c.bf16 %v1095_v50, %v1095_v50  ;;  %v2080_v48 = vpack.c.bf16 %v1247_v51, %v1247_v51 }
 0x17e   : > { %1663 = vst.msk [vmem:[%s3074_s25 + $0x14] sm:$0xf] %vm1657_vm1, %v2042_v55  ;;  %1701 = vst.msk [vmem:[%s3074_s25 + $0xac] sm:$0xf] %vm1657_vm1, %v2080_v48 }
 0x17f   : > { %v1099_v0 = vpop.f32.mrb[12].mxu0  ;;  %v1251_v2 = vpop.f32.mrb[12].mxu1 }
 0x180   : > { %v1100_v47 = vadd.f32 %v1099_v0, %v2999_v53  ;;  %v1252_v5 = vadd.f32 %v1251_v2, %v655_v59  ;;  %v2172_v27 = vpop.f32.mrb[13].mxu0  ;;  %v2248_v28 = vpop.f32.mrb[13].mxu1 }
 0x181   : > { %v1102_v29 = vpop.f32.mrb[14].mxu0  ;;  %v1254_v30 = vpop.f32.mrb[14].mxu1 }
 0x182   : > { %v2043_v31 = vpack.c.bf16 %v1100_v47, %v1100_v47  ;;  %v2081_v32 = vpack.c.bf16 %v1252_v5, %v1252_v5  ;;  %v1103_v33 = vadd.f32 %v1102_v29, %v2997_v52  ;;  %v1255_v35 = vadd.f32 %v1254_v30, %v660_v58  ;;  %v2173_v34 = vpop.f32.mrb[15].mxu0  ;;  %v2249_v37 = vpop.f32.mrb[15].mxu1 }
 0x183   : > { %v680_v59 = vpop.permute.xlu1 %679  ;;  %v675_v0 = vpop.permute.xlu0 %674 }
 0x184   : > { %1664 = vst.msk [vmem:[%s3074_s25 + $0x18] sm:$0xf] %vm1657_vm1, %v2043_v31  ;;  %1702 = vst.msk [vmem:[%s3074_s25 + $0xb0] sm:$0xf] %vm1657_vm1, %v2081_v32  ;;  %v2044_v38 = vpack.c.bf16 %v1103_v33, %v1103_v33  ;;  %v2082_v53 = vpack.c.bf16 %v1255_v35, %v1255_v35 }
 0x186   : > { %1665 = vst.msk [vmem:[%s3074_s25 + $0x1c] sm:$0xf] %vm1657_vm1, %v2044_v38  ;;  %1703 = vst.msk [vmem:[%s3074_s25 + $0xb4] sm:$0xf] %vm1657_vm1, %v2082_v53 }
 0x187   : > { %v1107_v40 = vpop.f32.mrb[16].mxu0  ;;  %v1259_v41 = vpop.f32.mrb[16].mxu1 }
 0x188   : > { %v1108_v52 = vadd.f32 %v1107_v40, %v3003_v57  ;;  %v1260_v42 = vadd.f32 %v1259_v41, %v665_v43  ;;  %v2176_v45 = vpop.f32.mrb[17].mxu0  ;;  %v2252_v46 = vpop.f32.mrb[17].mxu1 }
 0x189   : > { %v1110_v36 = vpop.f32.mrb[18].mxu0  ;;  %v1262_v49 = vpop.f32.mrb[18].mxu1 }
 0x18a   : > { %v2045_v50 = vpack.c.bf16 %v1108_v52, %v1108_v52  ;;  %v2083_v51 = vpack.c.bf16 %v1260_v42, %v1260_v42  ;;  %v1111_v44 = vadd.f32 %v1110_v36, %v3001_v56  ;;  %v1263_v54 = vadd.f32 %v1262_v49, %v670_v39  ;;  %v2177_v55 = vpop.f32.mrb[19].mxu0  ;;  %v2253_v48 = vpop.f32.mrb[19].mxu1 }
 0x18b   : > { %v690_v53 = vpop.permute.xlu1 %689  ;;  %v685_v39 = vpop.permute.xlu0 %684 }
 0x18c   : > { %1666 = vst.msk [vmem:[%s3074_s25 + $0x20] sm:$0xf] %vm1657_vm1, %v2045_v50  ;;  %1704 = vst.msk [vmem:[%s3074_s25 + $0xb8] sm:$0xf] %vm1657_vm1, %v2083_v51  ;;  %v2046_v58 = vpack.c.bf16 %v1111_v44, %v1111_v44  ;;  %v2084_v57 = vpack.c.bf16 %v1263_v54, %v1263_v54 }
 0x18e   : > { %1667 = vst.msk [vmem:[%s3074_s25 + $0x24] sm:$0xf] %vm1657_vm1, %v2046_v58  ;;  %1705 = vst.msk [vmem:[%s3074_s25 + $0xbc] sm:$0xf] %vm1657_vm1, %v2084_v57 }
 0x18f   : > { %v1115_v2 = vpop.f32.mrb[20].mxu0  ;;  %v1267_v47 = vpop.f32.mrb[20].mxu1 }
 0x190   : > { %v1116_v56 = vadd.f32 %v1115_v2, %v3011_v61  ;;  %v1268_v5 = vadd.f32 %v1267_v47, %v675_v0  ;;  %v2180_v27 = vpop.f32.mrb[21].mxu0  ;;  %v2256_v28 = vpop.f32.mrb[21].mxu1 }
 0x191   : > { %v1118_v29 = vpop.f32.mrb[22].mxu0  ;;  %v1270_v30 = vpop.f32.mrb[22].mxu1 }
 0x192   : > { %v2047_v31 = vpack.c.bf16 %v1116_v56, %v1116_v56  ;;  %v2085_v32 = vpack.c.bf16 %v1268_v5, %v1268_v5  ;;  %v1119_v33 = vadd.f32 %v1118_v29, %v3009_v60  ;;  %v1271_v35 = vadd.f32 %v1270_v30, %v680_v59  ;;  %v2181_v34 = vpop.f32.mrb[23].mxu0  ;;  %v2257_v37 = vpop.f32.mrb[23].mxu1 }
 0x193   : > { %v700_v48 = vpop.permute.xlu1 %699  ;;  %v695_v58 = vpop.permute.xlu0 %694 }
 0x194   : > { %1668 = vst.msk [vmem:[%s3074_s25 + $0x28] sm:$0xf] %vm1657_vm1, %v2047_v31  ;;  %1706 = vst.msk [vmem:[%s3074_s25 + $0xc0] sm:$0xf] %vm1657_vm1, %v2085_v32  ;;  %v2048_v38 = vpack.c.bf16 %v1119_v33, %v1119_v33  ;;  %v2086_v61 = vpack.c.bf16 %v1271_v35, %v1271_v35 }
 0x196   : > { %1669 = vst.msk [vmem:[%s3074_s25 + $0x2c] sm:$0xf] %vm1657_vm1, %v2048_v38  ;;  %1707 = vst.msk [vmem:[%s3074_s25 + $0xc4] sm:$0xf] %vm1657_vm1, %v2086_v61 }
 0x197   : > { %v1123_v43 = vpop.f32.mrb[24].mxu0  ;;  %v1275_v40 = vpop.f32.mrb[24].mxu1 }
 0x198   : > { %v1124_v60 = vadd.f32 %v1123_v43, %v3019_v63  ;;  %v1276_v41 = vadd.f32 %v1275_v40, %v685_v39  ;;  %v2184_v52 = vpop.f32.mrb[25].mxu0  ;;  %v2260_v42 = vpop.f32.mrb[25].mxu1 }
 0x199   : > { %v1126_v45 = vpop.f32.mrb[26].mxu0  ;;  %v1278_v46 = vpop.f32.mrb[26].mxu1 }
 0x19a   : > { %v2049_v36 = vpack.c.bf16 %v1124_v60, %v1124_v60  ;;  %v2087_v49 = vpack.c.bf16 %v1276_v41, %v1276_v41  ;;  %v1127_v50 = vadd.f32 %v1126_v45, %v3017_v62  ;;  %v1279_v51 = vadd.f32 %v1278_v46, %v690_v53  ;;  %v2185_v44 = vpop.f32.mrb[27].mxu0  ;;  %v2261_v54 = vpop.f32.mrb[27].mxu1 }
 0x19b   : > { %v710_v35 = vpop.permute.xlu1 %709  ;;  %v705_v34 = vpop.permute.xlu0 %704 }
 0x19c   : > { %1670 = vst.msk [vmem:[%s3074_s25 + $0x30] sm:$0xf] %vm1657_vm1, %v2049_v36  ;;  %1708 = vst.msk [vmem:[%s3074_s25 + $0xc8] sm:$0xf] %vm1657_vm1, %v2087_v49  ;;  %v2050_v55 = vpack.c.bf16 %v1127_v50, %v1127_v50  ;;  %v2088_v63 = vpack.c.bf16 %v1279_v51, %v1279_v51 }
 0x19e   : > { %1671 = vst.msk [vmem:[%s3074_s25 + $0x34] sm:$0xf] %vm1657_vm1, %v2050_v55  ;;  %1709 = vst.msk [vmem:[%s3074_s25 + $0xcc] sm:$0xf] %vm1657_vm1, %v2088_v63 }
 0x19f   : > { %v1131_v57 = vpop.f32.mrb[28].mxu0  ;;  %v1283_v59 = vpop.f32.mrb[28].mxu1 }
 0x1a0   : > { %v1132_v62 = vadd.f32 %v1131_v57, %v3025_v4  ;;  %v1284_v0 = vadd.f32 %v1283_v59, %v695_v58  ;;  %v2188_v2 = vpop.f32.mrb[29].mxu0  ;;  %v2264_v47 = vpop.f32.mrb[29].mxu1 }
 0x1a1   : > { %v1134_v56 = vpop.f32.mrb[30].mxu0  ;;  %v1286_v5 = vpop.f32.mrb[30].mxu1 }
 0x1a2   : > { %v2051_v27 = vpack.c.bf16 %v1132_v62, %v1132_v62  ;;  %v2089_v28 = vpack.c.bf16 %v1284_v0, %v1284_v0  ;;  %v1135_v29 = vadd.f32 %v1134_v56, %v3023_v3  ;;  %v1287_v30 = vadd.f32 %v1286_v5, %v700_v48  ;;  %v2189_v31 = vpop.f32.mrb[31].mxu0  ;;  %v2265_v32 = vpop.f32.mrb[31].mxu1 }
 0x1a3   : > { %v720_v49 = vpop.permute.xlu1 %719  ;;  %v715_v50 = vpop.permute.xlu0 %714 }
 0x1a4   : > { %1672 = vst.msk [vmem:[%s3074_s25 + $0x38] sm:$0xf] %vm1657_vm1, %v2051_v27  ;;  %1710 = vst.msk [vmem:[%s3074_s25 + $0xd0] sm:$0xf] %vm1657_vm1, %v2089_v28  ;;  %v2052_v33 = vpack.c.bf16 %v1135_v29, %v1135_v29  ;;  %v2090_v4 = vpack.c.bf16 %v1287_v30, %v1287_v30 }
 0x1a6   : > { %1673 = vst.msk [vmem:[%s3074_s25 + $0x3c] sm:$0xf] %vm1657_vm1, %v2052_v33  ;;  %1711 = vst.msk [vmem:[%s3074_s25 + $0xd4] sm:$0xf] %vm1657_vm1, %v2090_v4 }
 0x1a7   : > { %v1139_v37 = vpop.f32.mrb[32].mxu0  ;;  %v1291_v38 = vpop.f32.mrb[32].mxu1 }
 0x1a8   : > { %v1140_v3 = vadd.f32 %v1139_v37, %v3029_v7  ;;  %v1292_v61 = vadd.f32 %v1291_v38, %v705_v34  ;;  %v2192_v53 = vpop.f32.mrb[33].mxu0  ;;  %v2268_v39 = vpop.f32.mrb[33].mxu1 }
 0x1a9   : > { %v1142_v43 = vpop.f32.mrb[34].mxu0  ;;  %v1294_v40 = vpop.f32.mrb[34].mxu1 }
 0x1aa   : > { %v2053_v60 = vpack.c.bf16 %v1140_v3, %v1140_v3  ;;  %v2091_v41 = vpack.c.bf16 %v1292_v61, %v1292_v61  ;;  %v1143_v52 = vadd.f32 %v1142_v43, %v3027_v6  ;;  %v1295_v42 = vadd.f32 %v1294_v40, %v710_v35  ;;  %v2193_v45 = vpop.f32.mrb[35].mxu0  ;;  %v2269_v46 = vpop.f32.mrb[35].mxu1 }
 0x1ab   : > { %v730_v5 = vpop.permute.xlu1 %729  ;;  %v725_v27 = vpop.permute.xlu0 %724 }
 0x1ac   : > { %1674 = vst.msk [vmem:[%s3074_s25 + $0x40] sm:$0xf] %vm1657_vm1, %v2053_v60  ;;  %1712 = vst.msk [vmem:[%s3074_s25 + $0xd8] sm:$0xf] %vm1657_vm1, %v2091_v41  ;;  %v2054_v36 = vpack.c.bf16 %v1143_v52, %v1143_v52  ;;  %v2092_v7 = vpack.c.bf16 %v1295_v42, %v1295_v42 }
 0x1ae   : > { %1675 = vst.msk [vmem:[%s3074_s25 + $0x44] sm:$0xf] %vm1657_vm1, %v2054_v36  ;;  %1713 = vst.msk [vmem:[%s3074_s25 + $0xdc] sm:$0xf] %vm1657_vm1, %v2092_v7 }
 0x1af   : > { %v1147_v51 = vpop.f32.mrb[36].mxu0  ;;  %v1299_v44 = vpop.f32.mrb[36].mxu1 }
 0x1b0   : > { %v1148_v6 = vadd.f32 %v1147_v51, %v3033_v9  ;;  %v1300_v54 = vadd.f32 %v1299_v44, %v715_v50  ;;  %v2196_v55 = vpop.f32.mrb[37].mxu0  ;;  %v2272_v63 = vpop.f32.mrb[37].mxu1 }
 0x1b1   : > { %v1150_v48 = vpop.f32.mrb[38].mxu0  ;;  %v1302_v58 = vpop.f32.mrb[38].mxu1 }
 0x1b2   : > { %v2055_v57 = vpack.c.bf16 %v1148_v6, %v1148_v6  ;;  %v2093_v59 = vpack.c.bf16 %v1300_v54, %v1300_v54  ;;  %v1151_v62 = vadd.f32 %v1150_v48, %v3031_v8  ;;  %v1303_v0 = vadd.f32 %v1302_v58, %v720_v49  ;;  %v2197_v2 = vpop.f32.mrb[39].mxu0  ;;  %v2273_v47 = vpop.f32.mrb[39].mxu1 }
 0x1b3   : > { %v740_v39 = vpop.permute.xlu1 %739  ;;  %v735_v43 = vpop.permute.xlu0 %734 }
 0x1b4   : > { %1676 = vst.msk [vmem:[%s3074_s25 + $0x48] sm:$0xf] %vm1657_vm1, %v2055_v57  ;;  %1714 = vst.msk [vmem:[%s3074_s25 + $0xe0] sm:$0xf] %vm1657_vm1, %v2093_v59  ;;  %v2056_v56 = vpack.c.bf16 %v1151_v62, %v1151_v62  ;;  %v2094_v9 = vpack.c.bf16 %v1303_v0, %v1303_v0 }
 0x1b6   : > { %1677 = vst.msk [vmem:[%s3074_s25 + $0x4c] sm:$0xf] %vm1657_vm1, %v2056_v56  ;;  %1715 = vst.msk [vmem:[%s3074_s25 + $0xe4] sm:$0xf] %vm1657_vm1, %v2094_v9 }
 0x1b7   : > { %v1155_v28 = vpop.f32.mrb[40].mxu0  ;;  %v1307_v29 = vpop.f32.mrb[40].mxu1 }
 0x1b8   : > { %v1156_v8 = vadd.f32 %v1155_v28, %v3037_v11  ;;  %v1308_v30 = vadd.f32 %v1307_v29, %v725_v27  ;;  %v2200_v31 = vpop.f32.mrb[41].mxu0  ;;  %v2276_v32 = vpop.f32.mrb[41].mxu1 }
 0x1b9   : > { %v1158_v33 = vpop.f32.mrb[42].mxu0  ;;  %v1310_v4 = vpop.f32.mrb[42].mxu1 }
 0x1ba   : > { %v2057_v35 = vpack.c.bf16 %v1156_v8, %v1156_v8  ;;  %v2095_v34 = vpack.c.bf16 %v1308_v30, %v1308_v30  ;;  %v1159_v37 = vadd.f32 %v1158_v33, %v3035_v10  ;;  %v1311_v38 = vadd.f32 %v1310_v4, %v730_v5  ;;  %v2201_v3 = vpop.f32.mrb[43].mxu0  ;;  %v2277_v61 = vpop.f32.mrb[43].mxu1 }
 0x1bb   : > { %v750_v54 = vpop.permute.xlu1 %749  ;;  %v745_v55 = vpop.permute.xlu0 %744 }
 0x1bc   : > { %1678 = vst.msk [vmem:[%s3074_s25 + $0x50] sm:$0xf] %vm1657_vm1, %v2057_v35  ;;  %1716 = vst.msk [vmem:[%s3074_s25 + $0xe8] sm:$0xf] %vm1657_vm1, %v2095_v34  ;;  %v2058_v53 = vpack.c.bf16 %v1159_v37, %v1159_v37  ;;  %v2096_v11 = vpack.c.bf16 %v1311_v38, %v1311_v38 }
 0x1be   : > { %1679 = vst.msk [vmem:[%s3074_s25 + $0x54] sm:$0xf] %vm1657_vm1, %v2058_v53  ;;  %1717 = vst.msk [vmem:[%s3074_s25 + $0xec] sm:$0xf] %vm1657_vm1, %v2096_v11 }
 0x1bf   : > { %v1163_v40 = vpop.f32.mrb[44].mxu0  ;;  %v1315_v60 = vpop.f32.mrb[44].mxu1 }
 0x1c0   : > { %v1164_v10 = vadd.f32 %v1163_v40, %v3041_v1  ;;  %v1316_v41 = vadd.f32 %v1315_v60, %v735_v43  ;;  %v2204_v52 = vpop.f32.mrb[45].mxu0  ;;  %v2280_v42 = vpop.f32.mrb[45].mxu1 }
 0x1c1   : > { %v1166_v45 = vpop.f32.mrb[46].mxu0  ;;  %v1318_v46 = vpop.f32.mrb[46].mxu1 }
 0x1c2   : > { %v2059_v36 = vpack.c.bf16 %v1164_v10, %v1164_v10  ;;  %v2097_v7 = vpack.c.bf16 %v1316_v41, %v1316_v41  ;;  %v1167_v49 = vadd.f32 %v1166_v45, %v3039_v12  ;;  %v1319_v50 = vadd.f32 %v1318_v46, %v740_v39  ;;  %v2205_v51 = vpop.f32.mrb[47].mxu0  ;;  %v2281_v44 = vpop.f32.mrb[47].mxu1 }
 0x1c3   : > { %v760_v29 = vpop.permute.xlu1 %759  ;;  %v755_v8 = vpop.permute.xlu0 %754 }
 0x1c4   : > { %1680 = vst.msk [vmem:[%s3074_s25 + $0x58] sm:$0xf] %vm1657_vm1, %v2059_v36  ;;  %1718 = vst.msk [vmem:[%s3074_s25 + $0xf0] sm:$0xf] %vm1657_vm1, %v2097_v7  ;;  %v2060_v6 = vpack.c.bf16 %v1167_v49, %v1167_v49  ;;  %v2098_v1 = vpack.c.bf16 %v1319_v50, %v1319_v50 }
 0x1c6   : > { %1681 = vst.msk [vmem:[%s3074_s25 + $0x5c] sm:$0xf] %vm1657_vm1, %v2060_v6  ;;  %1719 = vst.msk [vmem:[%s3074_s25 + $0xf4] sm:$0xf] %vm1657_vm1, %v2098_v1 }
 0x1c7   : > { %v1171_v63 = vpop.f32.mrb[48].mxu0  ;;  %v1323_v48 = vpop.f32.mrb[48].mxu1 }
 0x1c8   : > { %v1172_v12 = vadd.f32 %v1171_v63, %v3045_v14  ;;  %v1324_v58 = vadd.f32 %v1323_v48, %v745_v55  ;;  %v2208_v57 = vpop.f32.mrb[49].mxu0  ;;  %v2284_v59 = vpop.f32.mrb[49].mxu1 }
 0x1c9   : > { %v1174_v62 = vpop.f32.mrb[50].mxu0  ;;  %v1326_v0 = vpop.f32.mrb[50].mxu1 }
 0x1ca   : > { %v2061_v2 = vpack.c.bf16 %v1172_v12, %v1172_v12  ;;  %v2099_v47 = vpack.c.bf16 %v1324_v58, %v1324_v58  ;;  %v1175_v56 = vadd.f32 %v1174_v62, %v3043_v13  ;;  %v1327_v9 = vadd.f32 %v1326_v0, %v750_v54  ;;  %v2209_v5 = vpop.f32.mrb[51].mxu0  ;;  %v2285_v27 = vpop.f32.mrb[51].mxu1 }
 0x1cb   : > { %v770_v43 = vpop.permute.xlu1 %769  ;;  %v765_v40 = vpop.permute.xlu0 %764 }
 0x1cc   : > { %1682 = vst.msk [vmem:[%s3074_s25 + $0x60] sm:$0xf] %vm1657_vm1, %v2061_v2  ;;  %1720 = vst.msk [vmem:[%s3074_s25 + $0xf8] sm:$0xf] %vm1657_vm1, %v2099_v47  ;;  %v2062_v28 = vpack.c.bf16 %v1175_v56, %v1175_v56  ;;  %v2100_v14 = vpack.c.bf16 %v1327_v9, %v1327_v9 }
 0x1ce   : > { %1683 = vst.msk [vmem:[%s3074_s25 + $0x64] sm:$0xf] %vm1657_vm1, %v2062_v28  ;;  %1721 = vst.msk [vmem:[%s3074_s25 + $0xfc] sm:$0xf] %vm1657_vm1, %v2100_v14 }
 0x1cf   : > { %v1179_v30 = vpop.f32.mrb[52].mxu0  ;;  %v1331_v31 = vpop.f32.mrb[52].mxu1 }
 0x1d0   : > { %v1180_v13 = vadd.f32 %v1179_v30, %v3049_v16  ;;  %v1332_v32 = vadd.f32 %v1331_v31, %v755_v8  ;;  %v2212_v33 = vpop.f32.mrb[53].mxu0  ;;  %v2288_v4 = vpop.f32.mrb[53].mxu1 }
 0x1d1   : > { %v1182_v35 = vpop.f32.mrb[54].mxu0  ;;  %v1334_v34 = vpop.f32.mrb[54].mxu1 }
 0x1d2   : > { %v2063_v37 = vpack.c.bf16 %v1180_v13, %v1180_v13  ;;  %v2101_v38 = vpack.c.bf16 %v1332_v32, %v1332_v32  ;;  %v1183_v3 = vadd.f32 %v1182_v35, %v3047_v15  ;;  %v1335_v61 = vadd.f32 %v1334_v34, %v760_v29  ;;  %v2213_v53 = vpop.f32.mrb[55].mxu0  ;;  %v2289_v11 = vpop.f32.mrb[55].mxu1 }
 0x1d3   : > { %v780_v1 = vpop.permute.xlu1 %779  ;;  %v775_v54 = vpop.permute.xlu0 %774 }
 0x1d4   : > { %1684 = vst.msk [vmem:[%s3074_s25 + $0x68] sm:$0xf] %vm1657_vm1, %v2063_v37  ;;  %1722 = vst.msk [vmem:[%s3074_s25 + $0x100] sm:$0xf] %vm1657_vm1, %v2101_v38  ;;  %v2064_v39 = vpack.c.bf16 %v1183_v3, %v1183_v3  ;;  %v2102_v16 = vpack.c.bf16 %v1335_v61, %v1335_v61 }
 0x1d6   : > { %1685 = vst.msk [vmem:[%s3074_s25 + $0x6c] sm:$0xf] %vm1657_vm1, %v2064_v39  ;;  %1723 = vst.msk [vmem:[%s3074_s25 + $0x104] sm:$0xf] %vm1657_vm1, %v2102_v16 }
 0x1d7   : > { %v1187_v60 = vpop.f32.mrb[56].mxu0  ;;  %v1339_v10 = vpop.f32.mrb[56].mxu1 }
 0x1d8   : > { %v1188_v15 = vadd.f32 %v1187_v60, %v3053_v18  ;;  %v1340_v41 = vadd.f32 %v1339_v10, %v765_v40  ;;  %v2216_v52 = vpop.f32.mrb[57].mxu0  ;;  %v2292_v42 = vpop.f32.mrb[57].mxu1 }
 0x1d9   : > { %v1190_v45 = vpop.f32.mrb[58].mxu0  ;;  %v1342_v46 = vpop.f32.mrb[58].mxu1 }
 0x1da   : > { %v2065_v36 = vpack.c.bf16 %v1188_v15, %v1188_v15  ;;  %v2103_v7 = vpack.c.bf16 %v1340_v41, %v1340_v41  ;;  %v1191_v49 = vadd.f32 %v1190_v45, %v3051_v17  ;;  %v1343_v50 = vadd.f32 %v1342_v46, %v770_v43  ;;  %v2217_v51 = vpop.f32.mrb[59].mxu0  ;;  %v2293_v44 = vpop.f32.mrb[59].mxu1 }
 0x1db   : > { %v790_v27 = vpop.permute.xlu1 %789  ;;  %v785_v28 = vpop.permute.xlu0 %784 }
 0x1dc   : > { %1686 = vst.msk [vmem:[%s3074_s25 + $0x70] sm:$0xf] %vm1657_vm1, %v2065_v36  ;;  %1724 = vst.msk [vmem:[%s3074_s25 + $0x108] sm:$0xf] %vm1657_vm1, %v2103_v7  ;;  %v2066_v6 = vpack.c.bf16 %v1191_v49, %v1191_v49  ;;  %v2104_v18 = vpack.c.bf16 %v1343_v50, %v1343_v50 }
 0x1de   : > { %1687 = vst.msk [vmem:[%s3074_s25 + $0x74] sm:$0xf] %vm1657_vm1, %v2066_v6  ;;  %1725 = vst.msk [vmem:[%s3074_s25 + $0x10c] sm:$0xf] %vm1657_vm1, %v2104_v18 }
 0x1df   : > { %v1195_v55 = vpop.f32.mrb[60].mxu0  ;;  %v1347_v63 = vpop.f32.mrb[60].mxu1 }
 0x1e0   : > { %v1196_v17 = vadd.f32 %v1195_v55, %v3057_v20  ;;  %v1348_v48 = vadd.f32 %v1347_v63, %v775_v54  ;;  %v2220_v12 = vpop.f32.mrb[61].mxu0  ;;  %v2296_v58 = vpop.f32.mrb[61].mxu1 }
 0x1e1   : > { %v1198_v57 = vpop.f32.mrb[62].mxu0  ;;  %v1350_v59 = vpop.f32.mrb[62].mxu1 }
 0x1e2   : > { %v2067_v62 = vpack.c.bf16 %v1196_v17, %v1196_v17  ;;  %v2105_v0 = vpack.c.bf16 %v1348_v48, %v1348_v48  ;;  %v1199_v2 = vadd.f32 %v1198_v57, %v3055_v19  ;;  %v1351_v47 = vadd.f32 %v1350_v59, %v780_v1  ;;  %v2221_v56 = vpop.f32.mrb[63].mxu0  ;;  %v2297_v9 = vpop.f32.mrb[63].mxu1 }
 0x1e3   : > { %v795_v61 = vpop.permute.xlu0 %794 }
 0x1e4   : > { %1688 = vst.msk [vmem:[%s3074_s25 + $0x78] sm:$0xf] %vm1657_vm1, %v2067_v62  ;;  %1726 = vst.msk [vmem:[%s3074_s25 + $0x110] sm:$0xf] %vm1657_vm1, %v2105_v0  ;;  %v2068_v20 = vpack.c.bf16 %v1199_v2, %v1199_v2  ;;  %v2106_v5 = vpack.c.bf16 %v1351_v47, %v1351_v47 }
 0x1e6   : > { %1689 = vst.msk [vmem:[%s3074_s25 + $0x7c] sm:$0xf] %vm1657_vm1, %v2068_v20  ;;  %1727 = vst.msk [vmem:[%s3074_s25 + $0x114] sm:$0xf] %vm1657_vm1, %v2106_v5 }
 0x1e7   : > { %v1203_v14 = vpop.f32.mrb[64].mxu0  ;;  %v1355_v19 = vpop.f32.mrb[64].mxu1 }
 0x1e8   : > { %v1204_v29 = vadd.f32 %v1203_v14, %v3061_v22  ;;  %v1356_v8 = vadd.f32 %v1355_v19, %v785_v28  ;;  %v2224_v30 = vpop.f32.mrb[65].mxu0  ;;  %v2300_v31 = vpop.f32.mrb[65].mxu1 }
 0x1e9   : > { %v1206_v13 = vpop.f32.mrb[66].mxu0  ;;  %v1358_v32 = vpop.f32.mrb[66].mxu1 }
 0x1ea   : > { %v2069_v33 = vpack.c.bf16 %v1204_v29, %v1204_v29  ;;  %v2107_v4 = vpack.c.bf16 %v1356_v8, %v1356_v8  ;;  %v1207_v35 = vadd.f32 %v1206_v13, %v3059_v21  ;;  %v1359_v34 = vadd.f32 %v1358_v32, %v790_v27  ;;  %v2225_v37 = vpop.f32.mrb[67].mxu0  ;;  %v2301_v38 = vpop.f32.mrb[67].mxu1 }
 0x1ec   : > { %1690 = vst.msk [vmem:[%s3074_s25 + $0x80] sm:$0xf] %vm1657_vm1, %v2069_v33  ;;  %1728 = vst.msk [vmem:[%s3074_s25 + $0x118] sm:$0xf] %vm1657_vm1, %v2107_v4  ;;  %v2070_v22 = vpack.c.bf16 %v1207_v35, %v1207_v35  ;;  %v2108_v3 = vpack.c.bf16 %v1359_v34, %v1359_v34 }
 0x1ee   : > { %1691 = vst.msk [vmem:[%s3074_s25 + $0x84] sm:$0xf] %vm1657_vm1, %v2070_v22  ;;  %1729 = vst.msk [vmem:[%s3074_s25 + $0x11c] sm:$0xf] %vm1657_vm1, %v2108_v3 }
 0x1ef   : > { %v1211_v53 = vpop.f32.mrb[68].mxu0  ;;  %v1363_v21 = vpop.f32.mrb[68].mxu1 }
 0x1f0   : > { %v1212_v11 = vadd.f32 %v1211_v53, %v3065_v24  ;;  %v1364_v39 = vadd.f32 %v1363_v21, %v795_v61  ;;  %v2228_v16 = vpop.f32.mrb[69].mxu0  ;;  %v2304_v43 = vpop.f32.mrb[69].mxu1 }
 0x1f1   : > { %v1214_v40 = vpop.f32.mrb[70].mxu0  ;;  %v1366_v60 = vpop.f32.mrb[70].mxu1 }
 0x1f2   : > { %v2071_v10 = vpack.c.bf16 %v1212_v11, %v1212_v11  ;;  %v1215_v15 = vadd.f32 %v1214_v40, %v3063_v23  ;;  %v2229_v24 = vpop.f32.mrb[71].mxu0  ;;  %v2305_v41 = vpop.f32.mrb[71].mxu1  ;;  %1731 = vst.msk [vmem:[%s275_s22] sm:$0x3] %vm1730_vm2, %v1364_v39 }
 0x1f3   : > { %2555 = shalt.err (!%p2552_p11)
}
 0x1f4   : > { %s2556_s11 = scalar_lea.hbm %s3250_s9, 32  ;;  %s2560_s21 = scalar_lea.hbm %s3347_s4, 64 }
 0x1f5   : > { %p2557_p0 = scmp.ne.s32.totalorder %s3250_s9, %s2556_s11  ;;  %p2561_p6 = scmp.lt.u32.totalorder %s3250_s9, %s3347_s4 }
 0x1f6   : > { %p2562_p7 = scmp.lt.u32.totalorder %s2560_s21, %s2556_s11  ;;  %p2564_p8 = scmp.lt.u32.totalorder %s2556_s11, %s3250_s9 }
 0x1f7   : > { %p2558_p4 = pnand %p2557_p0, %p3362_p12 }
 0x1f8   : > { %p2563_p2 = por %p2562_p7, %p2561_p6 }
 0x1f9   : > { %p2559_p13 = pneg %p2558_p4 }
 0x1fa   : > { %p2565_p1 = por %p2564_p8, %p2563_p2 }
 0x1fc   : > { %p2566_p10 = pnand %p2565_p1, %p2559_p13 }
 0x1fe   : > { %2569 = shalt.err (!%p2566_p10)
}
 0x1ff   : > { %2327 = dma.vmem_to_hbm [thread:$0]  (%p3362_p12), %s3252_s28, 32, %s3250_s9, %s1738_s6   ;;  %1692 = vst.msk [vmem:[%s3074_s25 + $0x88] sm:$0xf] %vm1657_vm1, %v2071_v10  ;;  %v2072_v23 = vpack.c.bf16 %v1215_v15, %v1215_v15  ;;  %v1219_v52 = vpop.f32.mrb[72].mxu0 }
 0x200   : > { %s2315_s7 = smul.u32 4608, %s2652_s18  ;;  %v1220_v42 = vadd.f32 %v1219_v52, %v3069_v26  ;;  %v2232_v45 = vpop.f32.mrb[73].mxu0  ;;  %s1752_s12 = sshll.u32 %s3074_s25, 4  ;;  %s3290_s12 = int_to_ptr.vmem [resolvable:$true] %s1752_s12 }
 0x201   : > { %1693 = vst.msk [vmem:[%s3074_s25 + $0x8c] sm:$0xf] %vm1657_vm1, %v2072_v23  ;;  %v1222_v46 = vpop.f32.mrb[74].mxu0  ;;  %s1733_s18 = scalar_lea.sflag [#allocation4], %s2895_s30  ;;  %s2570_s14 = scalar_lea.vmem %s3290_s12, 4608 }
 0x202   : > { %v2073_v36 = vpack.c.bf16 %v1220_v42, %v1220_v42  ;;  %v1223_v7 = vadd.f32 %v1222_v46, %v3067_v25  ;;  %v2233_v49 = vpop.f32.mrb[75].mxu0  ;;  %s3288_s6 = scalar_lea.hbm %s3346_s3, %s2315_s7  ;;  %p2571_p3 = scmp.ne.s32.totalorder %s3290_s12, %s2570_s14 }
 0x203   : > { %s2673_s29 = smov [#allocation8]  }
 0x204   : > { %1694 = vst.msk [vmem:[%s3074_s25 + $0x90] sm:$0xf] %vm1657_vm1, %v2073_v36  ;;  %v2074_v26 = vpack.c.bf16 %v1223_v7, %v1223_v7  ;;  %p2572_p5 = pnand %p2571_p3, %p3362_p12  ;;  %s2574_s24 = sshll.u32 %s2673_s29, 4  ;;  %s2575_s24 = int_to_ptr.vmem [resolvable:$false] %s2574_s24 }
 0x205   : > { %s2576_s11 = scalar_lea.vmem %s2575_s24, 9216  ;;  %p2577_p11 = scmp.lt.s32.totalorder %s3290_s12, %s2575_s24 }
 0x206   : > { %1695 = vst.msk [vmem:[%s3074_s25 + $0x94] sm:$0xf] %vm1657_vm1, %v2074_v26  ;;  %p2573_p9 = pneg %p2572_p5  ;;  %p2578_p0 = scmp.lt.s32.totalorder %s2576_s11, %s2570_s14 }
 0x208   : > { %p2579_p4 = por %p2578_p0, %p2577_p11 }
 0x20a   : > { %p2580_p13 = pnand %p2579_p4, %p2573_p9 }
 0x20c   : > { %2583 = shalt.err (!%p2580_p13)
}
 0x20d   : > { %s2584_s25 = scalar_lea.hbm %s3288_s6, 4608  ;;  %s2588_s21 = scalar_lea.hbm %s3346_s3, 9216 }
 0x20e   : > { %p2585_p6 = scmp.ne.s32.totalorder %s3288_s6, %s2584_s25  ;;  %p2589_p8 = scmp.lt.u32.totalorder %s3288_s6, %s3346_s3 }
 0x20f   : > { %p2590_p1 = scmp.lt.u32.totalorder %s2588_s21, %s2584_s25  ;;  %p2592_p3 = scmp.lt.u32.totalorder %s2584_s25, %s3288_s6 }
 0x210   : > { %p2586_p7 = pnand %p2585_p6, %p3362_p12 }
 0x211   : > { %p2591_p10 = por %p2590_p1, %p2589_p8 }
 0x212   : > { %p2587_p2 = pneg %p2586_p7 }
 0x213   : > { %p2593_p5 = por %p2592_p3, %p2591_p10 }
 0x215   : > { %p2594_p9 = pnand %p2593_p5, %p2587_p2 }
 0x217   : > { %2597 = shalt.err (!%p2594_p9)
}
 0x218   : > { %s2674_s7 = smov 64   ;;  %s2675_s28 = smov 4  }
 0x219   : > { %2326 = dma.vmem_to_hbm [thread:$0]  (%p3362_p12), %s3290_s12, 4608, %s3288_s6, %s1733_s18, %s2674_s7, %s2674_s7, %s2675_s28  }
 0x21a PF: > { %s1781_s9 = sand.u32 1, %s2640_s15   ;;  %p3363_p11 = scmp.ne.s32.totalorder %s3355_s26, 0 }
 0x21b   : > { %p3364_p0 = scmp.ge.s32.totalorder %s2660_s20, 2  ;;  %s1782_s14 = scalar_lea.sflag [#allocation4], %s1781_s9 }
 0x21d   : > { %p2342_p4 = pnand %p3364_p0, %p3363_p11 }
 0x21f   : > { %2631 = dma.done.wait (!%p2342_p4), %s1782_s14, 4608  }
 0x220   : > { %2633 = vsyncadd (!%p2342_p4), %s1782_s14, 4294962688  ;;  %s1791_s29 = scalar_lea.sflag [#allocation10], %s1781_s9 }
 0x221   : > { %2635 = dma.done.wait (!%p2342_p4), %s1791_s29, 32  }
 0x222   : > { %2637 = vsyncadd (!%p2342_p4), %s1791_s29, 4294967264  ;;  %s25_s20 = sadd.s32 1, %s2660_s20   ;;  %s3365_s15 = smov %s2644_s16 }
 0x223   : > { %p22_p13 = scmp.ge.s32.totalorder %s25_s20, 4   ;;  %s3366_s16 = smov %s2648_s17 }
 0x224   : > { %s3367_s17 = smov %s2846_s13  ;;  %s3368_s18 = smov %s2656_s19 }
 0x225   : > { %s3369_s19 = smov %s3371_s8  ;;  %24 = sbr.rel (!%p22_p13) target bundleno = 9 (0x9), region = 102 }
 0x22c   :  { %1796 = vsyncpa [#allocation3], 1 }
 0x22d   :  { %1798 = vsyncpa [#allocation3 + $0x1], 1 }
 0x22e   :  { %1799 = vsyncpa [#allocation6], 1 }
 0x22f   :  { %1800 = vsyncpa [#allocation4], 1 }
 0x230   :  { %1802 = vsyncpa [#allocation4 + $0x1], 1 }
 0x231   :  { %1803 = vsyncpa [#allocation10], 1 }
 0x232   :  { %1805 = vsyncpa [#allocation10 + $0x1], 1 }

// kernel: _lambda_.19
= control target key start
LH: loop header
LB: loop body
LE: loop exit
PB: predicated region body
PF: predicated region fallthrough
CT: control target
= control target key end

     0   :  { %7 = vsyncpa [#allocation3], 0  ;;  %s3603_s0 = inlined_call_operand.hbm [shape: bf16[2,9,64,64], index: 0, kind: input, shape index: {}]   ;;  %s3604_s1 = inlined_call_operand.hbm [shape: f32[2,2,9,64], index: 1, kind: input, shape index: {}]   ;;  %s3605_s2 = inlined_call_operand.hbm [shape: f32[2,2,64,64], index: 2, kind: output, shape index: {}]  }
   0x1   :  { %9 = vsyncpa [#allocation3 + $0x1], 0 }
   0x2   :  { %10 = vsyncpa [#allocation6], 0 }
   0x3   :  { %12 = vsyncpa [#allocation6 + $0x1], 0 }
   0x4   :  { %13 = vsyncpa [#allocation4], 0 }
   0x5   :  { %15 = vsyncpa [#allocation4 + $0x1], 0  ;;  %s2033_s9 = smov 0   ;;  %s2035_s10 = smov 0  }
   0x6   :  { %s2037_s11 = smov 0   ;;  %s2039_s12 = smov 0  }
   0x7   :  { %s2041_s13 = smov 0   ;;  %s2043_s14 = smov 0  }
   0x8 LB: > { %s1384_s15 = sadd.s32 4294967295, %s2007_s14   ;;  %s1385_s16 = sadd.s32 4294967294, %s2007_s14   ;;  %s2007_s14 = sphi %s2043_s14, %s21_s14   ;;  %s2003_s13 = sphi %s2041_s13, %s3882_s13   ;;  %s1999_s12 = sphi %s2039_s12, %s3881_s12   ;;  %s1995_s11 = sphi %s2037_s11, %s3880_s11   ;;  %s1991_s10 = sphi %s2035_s10, %s3879_s10   ;;  %s1987_s9 = sphi %s2033_s9, %s3878_s9  }
   0x9   : > { %s33_s17 = sadd.s32 1, %s2003_s13  ;;  %s42_s18 = sadd.s32 1, %s1995_s11 }
   0xa   : > { %p35_p0 = scmp.ge.s32.totalorder %s33_s17, 2  ;;  %p49_p1 = scmp.ne.s32.totalorder %s1995_s11, %s1991_s10 }
   0xb   : > { %p50_p2 = scmp.eq.s32.totalorder %s2007_s14, 0  ;;  %p55_p3 = scmp.ne.s32.totalorder %s1991_s10, %s1987_s9 }
   0xc   : > { %s3884_s17 = smov (%p35_p0, %s33_s17), 0  ;;  %p56_p5 = scmp.eq.s32.totalorder %s1384_s15, 0 }
   0xd   : > { %p2074_p4 = por %p50_p2, %p49_p1  ;;  %s37_s20 = ssub.s32 %s2003_s13, %s3884_s17 }
   0xe   : > { %p109_p6 = scmp.eq.s32.totalorder %s1384_s15, 1  ;;  %p40_p7 = scmp.eq.s32.totalorder %s37_s20, 0 }
   0xf   : > { %p2080_p8 = por %p56_p5, %p55_p3  ;;  %p115_p10 = scmp.eq.s32.totalorder %s1385_s16, 1 }
  0x10   : > { %p2084_p9 = por %p109_p6, %p49_p1  ;;  %p1636_p13 = scmp.lt.s32.totalorder %s2007_s14, 2 }
  0x11   : > { %s3695_s21 = scalar_select %p2080_p8, 1, 0 }
  0x12   : > { %s3696_s22 = scalar_select %p2084_p9, 1, 0 }
  0x13   : > { %s2089_s23 = scalar_select %p40_p7, %s1995_s11, %s42_s18  }
  0x14   : > { %p2091_p11 = por %p115_p10, %p55_p3  ;;  %s2098_s25 = sand.u32 1, %s1995_s11  }
  0x15   : > { %s1616_s26 = smul.u32 288, %s2098_s25  ;;  %p2104_p0 = pnand %p1636_p13, %p2074_p4 }
  0x16   : > { %s3697_s24 = scalar_select %p2091_p11, 1, 0 }
  0x17   : > { %s1617_s27 = smul.u32 4608, %s2003_s13  ;;  %s139_s4 = scalar_lea.vmem [#allocation2], %s1616_s26 }
  0x18   : > { %s147_s5 = sshll.u32 %s139_s4, 4  ;;  %s136_s6 = scalar_lea.sflag [#allocation3], %s2098_s25  ;;  %s2113_s5 = int_to_ptr.vmem [resolvable:$true] %s147_s5 }
  0x19   : > { %s2111_s3 = scalar_lea.hbm %s3603_s0, %s1617_s27  ;;  %p1863_p3 = pneg %p2104_p0 }
  0x1a   : > { %s1861_s7 = scalar_lea.hbm %s2111_s3, 4608  ;;  %s1866_s16 = scalar_lea.hbm %s3603_s0, 9216 }
  0x1b   : > { %p1862_p2 = scmp.ne.s32.totalorder %s2111_s3, %s1861_s7  ;;  %p1867_p6 = scmp.lt.u32.totalorder %s2111_s3, %s3603_s0 }
  0x1c   : > { %p1868_p7 = scmp.lt.u32.totalorder %s1866_s16, %s1861_s7  ;;  %p1870_p13 = scmp.lt.u32.totalorder %s1861_s7, %s2111_s3 }
  0x1d   : > { %p1864_p4 = pnand %p1863_p3, %p1862_p2 }
  0x1e   : > { %p1869_p10 = por %p1868_p7, %p1867_p6 }
  0x1f   : > { %p1865_p5 = pneg %p1864_p4 }
  0x20   : > { %p1871_p12 = por %p1870_p13, %p1869_p10 }
  0x22   : > { %p1872_p1 = pnand %p1871_p12, %p1865_p5 }
  0x24   : > { %1875 = shalt.err (!%p1872_p1)
}
  0x25   : > { %s1876_s20 = scalar_lea.vmem %s2113_s5, 4608  ;;  %s2009_s26 = smov [#allocation2]  }
  0x26   : > { %p1877_p2 = scmp.ne.s32.totalorder %s2113_s5, %s1876_s20  ;;  %s1881_s27 = sshll.u32 %s2009_s26, 4  ;;  %s1882_s27 = int_to_ptr.vmem [resolvable:$false] %s1881_s27 }
  0x27   : > { %s1883_s29 = scalar_lea.vmem %s1882_s27, 9216  ;;  %p1884_p9 = scmp.lt.s32.totalorder %s2113_s5, %s1882_s27 }
  0x28   : > { %p1879_p4 = pnand %p1877_p2, %p1863_p3  ;;  %p1885_p6 = scmp.lt.s32.totalorder %s1883_s29, %s1876_s20 }
  0x2a   : > { %p1880_p11 = pneg %p1879_p4  ;;  %p1886_p7 = por %p1885_p6, %p1884_p9 }
  0x2c   : > { %p1887_p10 = pnand %p1886_p7, %p1880_p11 }
  0x2e   : > { %1890 = shalt.err (!%p1887_p10)
}
  0x2f   : > { %s2010_s30 = smov 64   ;;  %s2011_s4 = smov 4  }
  0x30   : > { %1628 = dma.hbm_to_vmem [thread:$0]  (!%p2104_p0), %s2111_s3, 4608, %s2113_s5, %s136_s6, %s2010_s30, %s2010_s30, %s2011_s4  }
  0x31   : > { %p177_p12 = scmp.lt.s32.totalorder %s2007_s14, 3  ;;  %s1389_s7 = sshll.u32 %s2098_s25, 5 }
  0x32   : > { %s1435_s8 = sshll.u32 %s2003_s13, 9  ;;  %p3699_p9 = scmp.ge.s32.totalorder %s2007_s14, 1 }
  0x33   : > { %s2156_s19 = scalar_lea.hbm %s3604_s1, %s1435_s8  ;;  %s161_s20 = scalar_lea.vmem [#allocation5], %s1389_s7 }
  0x34   : > { %p2149_p11 = pnand %p3699_p9, %p177_p12  ;;  %s169_s26 = sshll.u32 %s161_s20, 4  ;;  %s2158_s26 = int_to_ptr.vmem [resolvable:$true] %s169_s26 }
  0x35   : > { %s158_s3 = scalar_lea.sflag [#allocation6], %s2098_s25  ;;  %s1891_s5 = scalar_lea.hbm %s2156_s19, 512 }
  0x36   : > { %p1892_p1 = scmp.ne.s32.totalorder %s2156_s19, %s1891_s5  ;;  %s1896_s29 = scalar_lea.hbm %s3604_s1, 1024 }
  0x37   : > { %p1897_p2 = scmp.lt.u32.totalorder %s2156_s19, %s3604_s1  ;;  %p1898_p4 = scmp.lt.u32.totalorder %s1896_s29, %s1891_s5 }
  0x38   : > { %p1894_p5 = pnand %p1892_p1, %p1863_p3  ;;  %p1900_p7 = scmp.lt.u32.totalorder %s1891_s5, %s2156_s19 }
  0x39   : > { %p1899_p6 = por %p1898_p4, %p1897_p2 }
  0x3a   : > { %p1895_p13 = pneg %p1894_p5 }
  0x3b   : > { %p1901_p10 = por %p1900_p7, %p1899_p6 }
  0x3d   : > { %p1902_p12 = pnand %p1901_p10, %p1895_p13 }
  0x3f   : > { %1905 = shalt.err (!%p1902_p12)
}
  0x40   : > { %s1906_s7 = scalar_lea.vmem %s2158_s26, 512  ;;  %s2012_s8 = smov [#allocation5]  }
  0x41   : > { %p1907_p9 = scmp.ne.s32.totalorder %s2158_s26, %s1906_s7  ;;  %s1911_s16 = sshll.u32 %s2012_s8, 4  ;;  %s1912_s16 = int_to_ptr.vmem [resolvable:$false] %s1911_s16 }
  0x42   : > { %s1913_s18 = scalar_lea.vmem %s1912_s16, 1024  ;;  %p1914_p8 = scmp.lt.s32.totalorder %s2158_s26, %s1912_s16 }
  0x43   : > { %p1909_p1 = pnand %p1907_p9, %p1863_p3  ;;  %p1915_p2 = scmp.lt.s32.totalorder %s1913_s18, %s1906_s7 }
  0x45   : > { %p1910_p5 = pneg %p1909_p1  ;;  %p1916_p4 = por %p1915_p2, %p1914_p8 }
  0x47   : > { %p1917_p6 = pnand %p1916_p4, %p1910_p5 }
  0x49   : > { %1920 = shalt.err (!%p1917_p6)
}
  0x4a   : > { %s2013_s20 = smov 128   ;;  %s2014_s5 = smov 8  }
  0x4b   : > { %1631 = dma.hbm_to_vmem [thread:$0]  (!%p2104_p0), %s2156_s19, 512, %s2158_s26, %s158_s3, %s2013_s20, %s2013_s20, %s2014_s5  }
  0x4c   : > { %181 = sbr.rel (%p2149_p11) target bundleno = 345 (0x159), region = 28 }
  0x53   : > { %s2189_s6 = sand.u32 1, %s1991_s10   ;;  %p3701_p8 = scmp.ne.s32.totalorder %s3695_s21, 0 }
  0x54   : > { %s1618_s27 = smul.u32 288, %s2189_s6  ;;  %s184_s29 = scalar_lea.sflag [#allocation3], %s2189_s6 }
  0x56   : > { %s2193_s30 = scalar_lea.vmem [#allocation2], %s1618_s27 }
  0x57   : > { %1974 = dma.done.wait (%p3701_p8), %s184_s29, 4608  }
  0x58   : > { %1976 = vsyncadd (%p3701_p8), %s184_s29, 4294962688  ;;  %s1393_s25 = sshll.u32 %s2189_s6, 5  ;;  %s193_s28 = scalar_lea.sflag [#allocation6], %s2189_s6 }
  0x59   : > { %s2201_s15 = scalar_lea.vmem [#allocation5], %s1393_s25 }
  0x5a   : > { %1978 = dma.done.wait (%p3701_p8), %s193_s28, 512  }
  0x5b   : > { %1980 = vsyncadd (%p3701_p8), %s193_s28, 4294966784  ;;  %v2208_v0 = vld [vmem:[%s2193_s30] sm:$0xff]   ;;  %vm366_vm0 = vcmask 523264   ;;  %v2274_v34 = vld [vmem:[%s2193_s30 + $0x8] sm:$0xff]   ;;  %s1394_s21 = sshll.u32 %s2189_s6, 7  ;;  %s1436_s26 = sshll.u32 %s1999_s12, 11 }
  0x5c   : > { %v2211_v1 = vld [vmem:[%s2193_s30 + $0x20] sm:$0xff]   ;;  %v1439_v3 = vunpack.c.l.bf16 %v2208_v0  ;;  %v1440_v18 = vunpack.c.h.bf16 %v2208_v0  ;;  %v2289_v39 = vld [vmem:[%s2193_s30 + $0x28] sm:$0xff]   ;;  %v3616_v56 = vunpack.c.l.bf16 %v2274_v34  ;;  %s2676_s19 = scalar_lea.vmem [#allocation7], %s1394_s21  ;;  %s3550_s8 = scalar_lea.hbm %s3605_s2, %s1436_s26 }
  0x5d   : > { %v2214_v2 = vld [vmem:[%s2193_s30 + $0x40] sm:$0xff]   ;;  %v1455_v4 = vunpack.c.l.bf16 %v2211_v1  ;;  %v1456_v22 = vunpack.c.h.bf16 %v2211_v1  ;;  %v2292_v40 = vld [vmem:[%s2193_s30 + $0x48] sm:$0xff]   ;;  %v3615_v57 = vunpack.c.l.bf16 %v2289_v39  ;;  %s1274_s3 = sshll.u32 %s2676_s19, 4  ;;  %s1260_s16 = scalar_lea.sflag [#allocation4], %s2189_s6  ;;  %s3552_s3 = int_to_ptr.vmem [resolvable:$true] %s1274_s3 }
  0x5e   : > { %v1471_v5 = vunpack.c.l.bf16 %v2214_v2  ;;  %v2220_v6 = vld [vmem:[%s2193_s30 + $0x60] sm:$0xff]   ;;  %v367_v17 = vsel %vm366_vm0, %v1439_v3, -inf  ;;  %v1472_v27 = vunpack.c.h.bf16 %v2214_v2  ;;  %v384_v36 = vsel %vm366_vm0, %v1440_v18, -inf  ;;  %v2297_v45 = vld [vmem:[%s2193_s30 + $0x68] sm:$0xff]   ;;  %s1921_s18 = scalar_lea.vmem %s3552_s3, 2048  ;;  %p3875_p3 = scmp.ne.s32.totalorder %s3696_s22, 0 }
  0x5f   : > { %v2223_v7 = vld [vmem:[%s2193_s30 + $0x80] sm:$0xff]   ;;  %v1487_v9 = vunpack.c.l.bf16 %v2220_v6  ;;  %v368_v20 = vsel %vm366_vm0, %v1455_v4, -inf  ;;  %v1488_v28 = vunpack.c.h.bf16 %v2220_v6  ;;  %v385_v37 = vsel %vm366_vm0, %v1456_v22, -inf  ;;  %v2300_v46 = vld [vmem:[%s2193_s30 + $0x88] sm:$0xff]   ;;  %p1922_p0 = scmp.ne.s32.totalorder %s3552_s3, %s1921_s18  ;;  %s2015_s12 = smov [#allocation7]  }
  0x60   : > { %v2226_v8 = vld [vmem:[%s2193_s30 + $0xa0] sm:$0xff]   ;;  %v1503_v10 = vunpack.c.l.bf16 %v2223_v7  ;;  %v370_v21 = vsel %vm366_vm0, %v1471_v5, -inf  ;;  %v369_v23 = vmax.f32 %v367_v17, %v368_v20  ;;  %v1504_v29 = vunpack.c.h.bf16 %v2223_v7  ;;  %v2303_v47 = vld [vmem:[%s2193_s30 + $0xa8] sm:$0xff]   ;;  %s1925_s20 = sshll.u32 %s2015_s12, 4  ;;  %s1926_s20 = int_to_ptr.vmem [resolvable:$false] %s1925_s20 }
  0x61   : > { %v1519_v11 = vunpack.c.l.bf16 %v2226_v8  ;;  %v2232_v12 = vld [vmem:[%s2193_s30 + $0xc0] sm:$0xff]   ;;  %v372_v24 = vsel %vm366_vm0, %v1487_v9, -inf  ;;  %v1520_v33 = vunpack.c.h.bf16 %v2226_v8  ;;  %v387_v38 = vsel %vm366_vm0, %v1472_v27, -inf  ;;  %v2316_v52 = vld [vmem:[%s2193_s30 + $0xc8] sm:$0xff]   ;;  %p1923_p11 = pnand %p1922_p0, %p3875_p3  ;;  %s1927_s5 = scalar_lea.vmem %s1926_s20, 4096 }
  0x62   : > { %v2235_v13 = vld [vmem:[%s2193_s30 + $0xe0] sm:$0xff]   ;;  %v1535_v15 = vunpack.c.l.bf16 %v2232_v12  ;;  %v374_v25 = vsel %vm366_vm0, %v1503_v10, -inf  ;;  %v371_v30 = vmax.f32 %v369_v23, %v370_v21  ;;  %v1536_v42 = vunpack.c.h.bf16 %v2232_v12  ;;  %v2319_v53 = vld [vmem:[%s2193_s30 + $0xe8] sm:$0xff]   ;;  %p1928_p7 = scmp.lt.s32.totalorder %s3552_s3, %s1926_s20  ;;  %p1929_p10 = scmp.lt.s32.totalorder %s1927_s5, %s1921_s18 }
  0x63   : > { %v2238_v14 = vld [vmem:[%s2193_s30 + $0x100] sm:$0xff]   ;;  %v1551_v16 = vunpack.c.l.bf16 %v2235_v13  ;;  %v376_v26 = vsel %vm366_vm0, %v1519_v11, -inf  ;;  %v1552_v43 = vunpack.c.h.bf16 %v2235_v13  ;;  %v386_v44 = vmax.f32 %v384_v36, %v385_v37  ;;  %v2324_v58 = vld [vmem:[%s2193_s30 + $0x108] sm:$0xff]   ;;  %p1924_p13 = pneg %p1923_p11 }
  0x64   : > { %v1567_v19 = vunpack.c.l.bf16 %v2238_v14  ;;  %v378_v31 = vsel %vm366_vm0, %v1535_v15, -inf  ;;  %v373_v41 = vmax.f32 %v371_v30, %v372_v24  ;;  %v1568_v48 = vunpack.c.h.bf16 %v2238_v14  ;;  %v2436_v8 = vld [vmem:[%s2201_s15 + $0x1] ss:$0 sm:$0xff]  ;;  %p1930_p12 = por %p1929_p10, %p1928_p7 }
  0x65   : > { %v380_v32 = vsel %vm366_vm0, %v1551_v16, -inf  ;;  %v389_v49 = vsel %vm366_vm0, %v1488_v28, -inf  ;;  %v391_v50 = vsel %vm366_vm0, %v1504_v29, -inf  ;;  %v393_v51 = vsel %vm366_vm0, %v1520_v33, -inf }
  0x66   : > { %v382_v35 = vsel %vm366_vm0, %v1567_v19, -inf  ;;  %v375_v54 = vmax.f32 %v373_v41, %v374_v25  ;;  %v388_v55 = vmax.f32 %v386_v44, %v387_v38  ;;  %v3614_v59 = vunpack.c.l.bf16 %v2292_v40  ;;  %p1931_p9 = pnand %p1930_p12, %p1924_p13 }
  0x67   : > { %v3613_v60 = vunpack.c.l.bf16 %v2297_v45  ;;  %v3611_v61 = vunpack.c.l.bf16 %v2300_v46  ;;  %v3609_v62 = vunpack.c.l.bf16 %v2303_v47  ;;  %v3608_v20 = vunpack.c.l.bf16 %v2316_v52 }
  0x68   : > { %v377_v63 = vmax.f32 %v375_v54, %v376_v26  ;;  %v390_v17 = vmax.f32 %v388_v55, %v389_v49  ;;  %v3610_v21 = vunpack.c.l.bf16 %v2319_v53  ;;  %v3612_v23 = vunpack.c.l.bf16 %v2324_v58 }
  0x69   : > { %v401_v24 = vsel %vm366_vm0, %v3616_v56, -inf  ;;  %v402_v25 = vsel %vm366_vm0, %v3615_v57, -inf  ;;  %v404_v30 = vsel %vm366_vm0, %v3614_v59, -inf  ;;  %v395_v37 = vsel %vm366_vm0, %v1536_v42, -inf }
  0x6a   : > { %v379_v26 = vmax.f32 %v377_v63, %v378_v31  ;;  %v392_v36 = vmax.f32 %v390_v17, %v391_v50  ;;  %v403_v38 = vmax.f32 %v401_v24, %v402_v25  ;;  %v397_v41 = vsel %vm366_vm0, %v1552_v43, -inf }
  0x6b   : > { %v399_v44 = vsel %vm366_vm0, %v1568_v48, -inf  ;;  %v406_v49 = vsel %vm366_vm0, %v3613_v60, -inf  ;;  %v408_v31 = vsel %vm366_vm0, %v3611_v61, -inf  ;;  %v2360_v63 = vsel %vm366_vm0, %v3609_v62, -inf }
  0x6c   : > { %v381_v50 = vmax.f32 %v379_v26, %v380_v32  ;;  %v394_v54 = vmax.f32 %v392_v36, %v393_v51  ;;  %v405_v55 = vmax.f32 %v403_v38, %v404_v30  ;;  %v2365_v17 = vsel %vm366_vm0, %v3608_v20, -inf }
  0x6d   : > { %v2370_v24 = vsel %vm366_vm0, %v3610_v21, -inf  ;;  %v2375_v32 = vsel %vm366_vm0, %v3612_v23, -inf  ;;  %v3622_v51 = vunpack.c.h.bf16 %v2274_v34  ;;  %v3621_v30 = vunpack.c.h.bf16 %v2289_v39 }
  0x6e   : > { %v383_v25 = vmax.f32 %v381_v50, %v382_v35  ;;  %v3620_v26 = vunpack.c.h.bf16 %v2292_v40  ;;  %v3619_v36 = vunpack.c.h.bf16 %v2297_v45  ;;  %v396_v38 = vmax.f32 %v394_v54, %v395_v37 }
  0x6f   : > { %v407_v20 = vmax.f32 %v405_v55, %v406_v49  ;;  %v3618_v57 = vunpack.c.h.bf16 %v2316_v52  ;;  %v419_v7 = vsel %vm366_vm0, %v3621_v30, -inf }
  0x70   : > { %v503_v61 = vsub.f32 %v1439_v3, %v383_v25  ;;  %v511_v23 = vsub.f32 %v1455_v4, %v383_v25  ;;  %v519_v35 = vsub.f32 %v1471_v5, %v383_v25  ;;  %v527_v50 = vsub.f32 %v1487_v9, %v383_v25 }
  0x71   : > { %v535_v37 = vsub.f32 %v1503_v10, %v383_v25  ;;  %v543_v49 = vsub.f32 %v1519_v11, %v383_v25  ;;  %v551_v54 = vsub.f32 %v1535_v15, %v383_v25  ;;  %v559_v3 = vsub.f32 %v1551_v16, %v383_v25 }
  0x72   : > { %v567_v4 = vsub.f32 %v1567_v19, %v383_v25  ;;  %v575_v55 = vmul.f32 1.442695, %v503_v61  ;;  %v591_v5 = vmul.f32 1.442695, %v511_v23  ;;  %v607_v60 = vmul.f32 1.442695, %v519_v35 }
  0x73   : > { %v623_v59 = vmul.f32 1.442695, %v527_v50  ;;  %v398_v9 = vmax.f32 %v396_v38, %v397_v41  ;;  %v3617_v10 = vunpack.c.h.bf16 %v2319_v53  ;;  %v639_v11 = vmul.f32 1.442695, %v535_v37 }
  0x74   : > { %1692 = vpow2.f32 %v575_v55  ;;  %v655_v56 = vmul.f32 1.442695, %v543_v49  ;;  %v671_v21 = vmul.f32 1.442695, %v551_v54  ;;  %v687_v16 = vmul.f32 1.442695, %v559_v3 }
  0x75   : > { %1694 = vpow2.f32 %v591_v5  ;;  %v400_v62 = vmax.f32 %v398_v9, %v399_v44  ;;  %v703_v19 = vmul.f32 1.442695, %v567_v4  ;;  %v2404_v61 = vmax.f32 %v407_v20, %v408_v31  ;;  %v2466_v49 = vld [vmem:[%s2201_s15 + $0x3] ss:$0 sm:$0xff] }
  0x76   : > { %1696 = vpow2.f32 %v607_v60  ;;  %v2409_v23 = vsel %vm366_vm0, %v3622_v51, -inf  ;;  %v421_v13 = vsel %vm366_vm0, %v3620_v26, -inf  ;;  %v2444_v14 = vsel %vm366_vm0, %v3619_v36, -inf }
  0x77   : > { %1698 = vpow2.f32 %v623_v59  ;;  %v504_v41 = vsub.f32 %v1440_v18, %v400_v62  ;;  %v512_v25 = vsub.f32 %v1456_v22, %v400_v62  ;;  %v520_v60 = vsub.f32 %v1472_v27, %v400_v62  ;;  %v2430_v18 = vld [vmem:[%s2201_s15] ss:$0 sm:$0xff] }
  0x78   : > { %1700 = vpow2.f32 %v639_v11  ;;  %v528_v20 = vsub.f32 %v1488_v28, %v400_v62  ;;  %v536_v44 = vsub.f32 %v1504_v29, %v400_v62  ;;  %v544_v59 = vsub.f32 %v1520_v33, %v400_v62 }
  0x79   : > { %1702 = vpow2.f32 %v655_v56  ;;  %v552_v0 = vsub.f32 %v1536_v42, %v400_v62  ;;  %v560_v1 = vsub.f32 %v1552_v43, %v400_v62  ;;  %v568_v2 = vsub.f32 %v1568_v48, %v400_v62  ;;  %v2449_v56 = vld [vmem:[%s2201_s15 + $0x2] ss:$0 sm:$0xff] }
  0x7a   : > { %1704 = vpow2.f32 %v671_v21  ;;  %v577_v6 = vmul.f32 1.442695, %v504_v41  ;;  %v593_v22 = vmul.f32 1.442695, %v512_v25  ;;  %v609_v12 = vmul.f32 1.442695, %v520_v60 }
  0x7b   : > { %1706 = vpow2.f32 %v687_v16  ;;  %v625_v27 = vmul.f32 1.442695, %v528_v20  ;;  %v641_v28 = vmul.f32 1.442695, %v536_v44  ;;  %v657_v29 = vmul.f32 1.442695, %v544_v59 }
  0x7c   : > { %1708 = vpow2.f32 %v703_v19  ;;  %v673_v33 = vmul.f32 1.442695, %v552_v0  ;;  %v689_v42 = vmul.f32 1.442695, %v560_v1  ;;  %v705_v43 = vmul.f32 1.442695, %v568_v2 }
  0x7d   : > { %1710 = vpow2.f32 %v577_v6  ;;  %v411_v62 = vmax.f32 %v2404_v61, %v2360_v63  ;;  %v420_v21 = vmax.f32 %v2409_v23, %v419_v7  ;;  %v3702_v31 = vunpack.c.h.bf16 %v2300_v46  ;;  %v2491_v61 = vld [vmem:[%s2201_s15 + $0x4] ss:$0 sm:$0xff]  ;;  %v2500_v20 = vld [vmem:[%s2201_s15 + $0x5] ss:$0 sm:$0xff]  ;;  %v2505_v0 = vld [vmem:[%s2201_s15 + $0x6] ss:$0 sm:$0xff] }
  0x7e   : > { %v2446_v48 = vpop.eup %1692  ;;  %1712 = vpow2.f32 %v593_v22  ;;  %v3703_v63 = vunpack.c.h.bf16 %v2303_v47  ;;  %v2482_v5 = vsel %vm366_vm0, %v3618_v57, -inf  ;;  %v2511_v2 = vsel %vm366_vm0, %v3617_v10, -inf }
  0x7f   : > { %v2457_v38 = vsel %vm366_vm0, %v3702_v31, -inf  ;;  %v2459_v35 = vpop.eup %1694  ;;  %v719_v50 = vsel %vm366_vm0, %v2446_v48, 0.0  ;;  %v868_v37 = vmul.f32 %v2446_v48, %v2430_v18  ;;  %1714 = vpow2.f32 %v609_v12 }
  0x80   : > { %v2471_v54 = vsel %vm366_vm0, %v3703_v63, -inf  ;;  %v2473_v3 = vpop.eup %1696  ;;  %v720_v4 = vsel %vm366_vm0, %v2459_v35, 0.0  ;;  %v881_v55 = vmul.f32 %v2459_v35, %v2436_v8  ;;  %1716 = vpow2.f32 %v625_v27  ;;  %v2520_v27 = vld [vmem:[%s2201_s15 + $0x7] ss:$0 sm:$0xff] }
  0x81   : > { %v2484_v9 = vpop.eup %1698  ;;  %v721_v11 = vadd.f32 %v720_v4, %v719_v50  ;;  %v722_v16 = vsel %vm366_vm0, %v2473_v3, 0.0  ;;  %v902_v19 = vmul.f32 %v2473_v3, %v2449_v56  ;;  %1718 = vpow2.f32 %v641_v28 }
  0x82   : > { %v2493_v23 = vpop.eup %1700  ;;  %v724_v41 = vsel %vm366_vm0, %v2484_v9, 0.0  ;;  %v889_v25 = vadd.f32 %v881_v55, %v868_v37  ;;  %v923_v60 = vmul.f32 %v2484_v9, %v2466_v49  ;;  %1720 = vpow2.f32 %v657_v29 }
  0x83   : > { %v2502_v44 = vpop.eup %1702  ;;  %v723_v59 = vadd.f32 %v722_v16, %v721_v11  ;;  %1722 = vpow2.f32 %v673_v33  ;;  %v413_v1 = vmax.f32 %v411_v62, %v2365_v17  ;;  %v726_v22 = vsel %vm366_vm0, %v2493_v23, 0.0 }
  0x84   : > { %v2513_v6 = vpop.eup %1704  ;;  %v910_v7 = vadd.f32 %v902_v19, %v889_v25  ;;  %v944_v12 = vmul.f32 %v2493_v23, %v2491_v61  ;;  %1724 = vpow2.f32 %v689_v42  ;;  %v728_v29 = vsel %vm366_vm0, %v2502_v44, 0.0 }
  0x85   : > { %3704 = vst [vmem:[#allocation11_spill] sm:$0xff] %v2513_v6  ;;  %v2522_v28 = vpop.eup %1706  ;;  %v725_v17 = vadd.f32 %v724_v41, %v723_v59  ;;  %v965_v33 = vmul.f32 %v2502_v44, %v2500_v20  ;;  %v422_v62 = vmax.f32 %v420_v21, %v421_v13  ;;  %v730_v50 = vsel %vm366_vm0, %v2513_v6, 0.0  ;;  %v2552_v59 = vld [vmem:[%s2201_s15 + $0x8] ss:$0 sm:$0xff] }
  0x86   : > { %3705 = vst [vmem:[#allocation12_spill] sm:$0xff] %v2522_v28  ;;  %v2528_v31 = vpop.eup %1708  ;;  %v931_v37 = vadd.f32 %v923_v60, %v910_v7  ;;  %v986_v42 = vmul.f32 %v2513_v6, %v2505_v0  ;;  %1726 = vpow2.f32 %v705_v43  ;;  %v732_v55 = vsel %vm366_vm0, %v2522_v28, 0.0 }
  0x87   : > { %3706 = vst [vmem:[#allocation13_spill] sm:$0xff] %v2528_v31  ;;  %v2534_v63 = vpop.eup %1710  ;;  %v727_v4 = vadd.f32 %v726_v22, %v725_v17  ;;  %v1007_v13 = vmul.f32 %v2522_v28, %v2520_v27  ;;  %v415_v21 = vmax.f32 %v413_v1, %v2370_v24  ;;  %v734_v16 = vsel %vm366_vm0, %v2528_v31, 0.0 }
  0x88   : > { %3707 = vst [vmem:[#allocation14_spill] sm:$0xff] %v2534_v63  ;;  %v2541_v11 = vpop.eup %1712  ;;  %v952_v19 = vadd.f32 %v944_v12, %v931_v37  ;;  %v736_v43 = vsel %vm366_vm0, %v2534_v63, 0.0  ;;  %v869_v41 = vmul.f32 %v2534_v63, %v2430_v18  ;;  %v424_v22 = vmax.f32 %v422_v62, %v2444_v14 }
  0x89   : > { %3708 = vst [vmem:[#allocation15_spill] sm:$0xff] %v2541_v11  ;;  %v2549_v25 = vpop.eup %1714  ;;  %v729_v60 = vadd.f32 %v728_v29, %v727_v4  ;;  %v737_v24 = vsel %vm366_vm0, %v2541_v11, 0.0  ;;  %v882_v1 = vmul.f32 %v2541_v11, %v2436_v8 }
  0x8a   : > { %3709 = vst [vmem:[#allocation16_spill] sm:$0xff] %v2549_v25  ;;  %v2559_v7 = vpop.eup %1716  ;;  %v973_v12 = vadd.f32 %v965_v33, %v952_v19  ;;  %v738_v17 = vadd.f32 %v737_v24, %v736_v43  ;;  %v739_v37 = vsel %vm366_vm0, %v2549_v25, 0.0  ;;  %v903_v29 = vmul.f32 %v2549_v25, %v2449_v56 }
  0x8b   : > { %3710 = vst [vmem:[#allocation17_spill] sm:$0xff] %v2559_v7  ;;  %v2565_v4 = vpop.eup %1718  ;;  %v731_v10 = vadd.f32 %v730_v50, %v729_v60  ;;  %v741_v57 = vsel %vm366_vm0, %v2559_v7, 0.0  ;;  %v890_v36 = vadd.f32 %v882_v1, %v869_v41  ;;  %v924_v14 = vmul.f32 %v2559_v7, %v2466_v49 }
  0x8c   : > { %3711 = vst [vmem:[#allocation18_spill] sm:$0xff] %v2565_v4  ;;  %v2571_v62 = vpop.eup %1720  ;;  %v994_v33 = vadd.f32 %v986_v42, %v973_v12  ;;  %v1028_v19 = vmul.f32 %v2528_v31, %v2552_v59  ;;  %v740_v43 = vadd.f32 %v739_v37, %v738_v17  ;;  %v417_v24 = vmax.f32 %v415_v21, %v2375_v32 }
  0x8d   : > { %3712 = vst [vmem:[#allocation19_spill] sm:$0xff] %v2571_v62  ;;  %v2576_v26 = vpop.eup %1722  ;;  %v733_v30 = vadd.f32 %v732_v55, %v731_v10  ;;  %v743_v50 = vsel %vm366_vm0, %v2565_v4, 0.0  ;;  %v911_v60 = vadd.f32 %v903_v29, %v890_v36  ;;  %v945_v41 = vmul.f32 %v2565_v4, %v2491_v61 }
  0x8e   : > { %3713 = vst [vmem:[#allocation20_spill] sm:$0xff] %v2576_v26  ;;  %v2582_v1 = vpop.eup %1724  ;;  %v1015_v51 = vadd.f32 %v1007_v13, %v994_v33  ;;  %v742_v42 = vadd.f32 %v741_v57, %v740_v43  ;;  %v745_v12 = vsel %vm366_vm0, %v2571_v62, 0.0  ;;  %v426_v17 = vmax.f32 %v424_v22, %v2457_v38 }
  0x8f   : > { %3714 = vst [vmem:[#allocation21_spill] sm:$0xff] %v2582_v1  ;;  %v735_v32 = vadd.f32 %v734_v16, %v733_v30  ;;  %v747_v10 = vsel %vm366_vm0, %v2576_v26, 0.0  ;;  %v932_v55 = vadd.f32 %v924_v14, %v911_v60  ;;  %v966_v36 = vmul.f32 %v2571_v62, %v2500_v20 }
  0x90   : > { %v2591_v21 = vpop.eup %1726  ;;  %v744_v37 = vadd.f32 %v743_v50, %v742_v42  ;;  %v749_v13 = vsel %vm366_vm0, %v2582_v1, 0.0  ;;  %v987_v57 = vmul.f32 %v2576_v26, %v2505_v0  ;;  %v1008_v38 = vmul.f32 %v2582_v1, %v2520_v27 }
  0x91   : > { %3715 = vst [vmem:[#allocation22_spill] sm:$0xff] %v2591_v21  ;;  %1728 = vrcp.f32 %v735_v32  ;;  %v953_v30 = vadd.f32 %v945_v41, %v932_v55  ;;  %v3716_v16 = vunpack.c.l.bf16 %v2274_v34  ;;  %v3717_v29 = vunpack.c.l.bf16 %v2289_v39 }
  0x92   : > { %v1036_v33 = vadd.f32 %v1028_v19, %v1015_v51  ;;  %v746_v43 = vadd.f32 %v745_v12, %v744_v37  ;;  %v3718_v50 = vunpack.c.l.bf16 %v2292_v40  ;;  %v3719_v42 = vunpack.c.l.bf16 %v2297_v45 }
  0x93   : > { %v505_v22 = vsub.f32 %v3716_v16, %v417_v24  ;;  %v513_v14 = vsub.f32 %v3717_v29, %v417_v24  ;;  %v751_v26 = vsel %vm366_vm0, %v2591_v21, 0.0  ;;  %v974_v32 = vadd.f32 %v966_v36, %v953_v30 }
  0x94   : > { %v521_v60 = vsub.f32 %v3718_v50, %v417_v24  ;;  %v529_v15 = vsub.f32 %v3719_v42, %v417_v24  ;;  %v3720_v41 = vunpack.c.l.bf16 %v2300_v46  ;;  %v3721_v16 = vunpack.c.l.bf16 %v2303_v47 }
  0x95   : > { %v748_v51 = vadd.f32 %v747_v10, %v746_v43  ;;  %v3722_v19 = vunpack.c.l.bf16 %v2316_v52  ;;  %v579_v37 = vmul.f32 1.442695, %v505_v22  ;;  %v595_v50 = vmul.f32 1.442695, %v513_v14  ;;  %v2625_v22 = vld [vmem:[%s2193_s30 + $0x30] sm:$0xff]  }
  0x96   : > { %v537_v55 = vsub.f32 %v3720_v41, %v417_v24  ;;  %v545_v29 = vsub.f32 %v3721_v16, %v417_v24  ;;  %v995_v42 = vadd.f32 %v987_v57, %v974_v32  ;;  %v3723_v1 = vunpack.c.l.bf16 %v2319_v53  ;;  %v2622_v16 = vld [vmem:[%s2193_s30 + $0x10] sm:$0xff]  }
  0x97   : > { %v553_v12 = vsub.f32 %v3722_v19, %v417_v24  ;;  %v611_v4 = vmul.f32 1.442695, %v521_v60  ;;  %v627_v36 = vmul.f32 1.442695, %v529_v15  ;;  %v750_v30 = vadd.f32 %v749_v13, %v748_v51  ;;  %v2630_v32 = vld [vmem:[%s2193_s30 + $0x50] sm:$0xff]  }
  0x98   : > { %v561_v62 = vsub.f32 %v3723_v1, %v417_v24  ;;  %v1029_v41 = vmul.f32 %v2591_v21, %v2552_v59  ;;  %v3724_v10 = vunpack.c.l.bf16 %v2324_v58  ;;  %1730 = vpow2.f32 %v579_v37  ;;  %v2645_v19 = vld [vmem:[%s2193_s30 + $0xb0] sm:$0xff]  }
  0x99   : > { %v1016_v57 = vadd.f32 %v1008_v38, %v995_v42  ;;  %1732 = vpow2.f32 %v595_v50  ;;  %v643_v1 = vmul.f32 1.442695, %v537_v55  ;;  %v659_v14 = vmul.f32 1.442695, %v545_v29  ;;  %v2638_v29 = vld [vmem:[%s2193_s30 + $0x90] sm:$0xff]  }
  0x9a   : > { %v569_v43 = vsub.f32 %v3724_v10, %v417_v24  ;;  %v752_v15 = vadd.f32 %v751_v26, %v750_v30  ;;  %1734 = vpow2.f32 %v611_v4  ;;  %v675_v13 = vmul.f32 1.442695, %v553_v12  ;;  %v2633_v24 = vld [vmem:[%s2193_s30 + $0x70] sm:$0xff]  }
  0x9b   : > { %v428_v60 = vmax.f32 %v426_v17, %v2471_v54  ;;  %1736 = vpow2.f32 %v627_v36  ;;  %v691_v51 = vmul.f32 1.442695, %v561_v62  ;;  %v3630_v38 = vunpack.c.l.bf16 %v2622_v16  ;;  %v2647_v12 = vpop.eup %1728  ;;  %v2652_v42 = vld [vmem:[%s2193_s30 + $0xd0] sm:$0xff]  }
  0x9c   : > { %v3628_v55 = vunpack.c.l.bf16 %v2625_v22  ;;  %1738 = vrcp.f32 %v752_v15  ;;  %v707_v26 = vmul.f32 1.442695, %v569_v43  ;;  %v3725_v54 = vunpack.c.h.bf16 %v2324_v58  ;;  %3726 = vst [vmem:[#allocation23_spill] sm:$0xff] %v2647_v12  ;;  %v2655_v36 = vld [vmem:[%s2193_s30 + $0xf0] sm:$0xff]  }
  0x9d   : > { %v430_v4 = vmax.f32 %v428_v60, %v2482_v5  ;;  %v1037_v62 = vadd.f32 %v1029_v41, %v1016_v57  ;;  %1740 = vpow2.f32 %v643_v1  ;;  %v3627_v37 = vunpack.c.l.bf16 %v2630_v32  ;;  %v2661_v43 = vld [vmem:[%s2193_s30 + $0x110] sm:$0xff]  }
  0x9e   : > { %v433_v17 = vsel %vm366_vm0, %v3725_v54, -inf  ;;  %v3629_v50 = vunpack.c.l.bf16 %v2633_v24  ;;  %v1044_v5 = vmul.f32 %v2647_v12, %v1036_v33  ;;  %1742 = vpow2.f32 %v659_v14 }
  0x9f   : > { %v432_v30 = vmax.f32 %v430_v4, %v2511_v2  ;;  %v3631_v10 = vunpack.c.l.bf16 %v2638_v29  ;;  %1744 = vpow2.f32 %v675_v13  ;;  %v2667_v57 = vsel %vm366_vm0, %v3630_v38, -inf }
  0xa0   : > { %v2672_v1 = vsel %vm366_vm0, %v3628_v55, -inf  ;;  %1052 = vst.msk [vmem:[%s2676_s19] sm:$0xff] %vm366_vm0, %v1044_v5  ;;  %1746 = vpow2.f32 %v691_v51  ;;  %v2688_v60 = vsel %vm366_vm0, %v3627_v37, -inf  ;;  %v3728_v51 = vunpack.c.h.bf16 %v2274_v34 }
  0xa1   : > { %v434_v2 = vmax.f32 %v432_v30, %v433_v17  ;;  %1748 = vpow2.f32 %v707_v26  ;;  %v3729_v17 = vunpack.c.h.bf16 %v2289_v39  ;;  %v2699_v26 = vsel %vm366_vm0, %v3629_v50, -inf }
  0xa2   : > { %v2690_v4 = vpop.eup %1730  ;;  %v2704_v30 = vsel %vm366_vm0, %v3631_v10, -inf  ;;  %v3731_v39 = vunpack.c.h.bf16 %v2292_v40  ;;  %v3734_v14 = vunpack.c.h.bf16 %v2300_v46  ;;  %v3735_v41 = vunpack.c.h.bf16 %v2303_v47 }
  0xa3   : > { %3727 = vst [vmem:[#allocation24_spill] sm:$0xff] %v2690_v4  ;;  %v506_v54 = vsub.f32 %v3728_v51, %v434_v2  ;;  %v514_v5 = vsub.f32 %v3729_v17, %v434_v2  ;;  %v2706_v37 = vpop.eup %1732  ;;  %v753_v55 = vsel %vm366_vm0, %v2690_v4, 0.0  ;;  %v870_v34 = vmul.f32 %v2690_v4, %v2430_v18 }
  0xa4   : > { %3730 = vst [vmem:[#allocation25_spill] sm:$0xff] %v2706_v37  ;;  %v522_v51 = vsub.f32 %v3731_v39, %v434_v2  ;;  %v3732_v17 = vunpack.c.h.bf16 %v2297_v45  ;;  %v2716_v38 = vpop.eup %1734  ;;  %v754_v10 = vsel %vm366_vm0, %v2706_v37, 0.0  ;;  %v883_v15 = vmul.f32 %v2706_v37, %v2436_v8 }
  0xa5   : > { %3733 = vst [vmem:[#allocation26_spill] sm:$0xff] %v2716_v38  ;;  %v538_v33 = vsub.f32 %v3734_v14, %v434_v2  ;;  %v546_v13 = vsub.f32 %v3735_v41, %v434_v2  ;;  %v2726_v21 = vpop.eup %1736  ;;  %v755_v40 = vadd.f32 %v754_v10, %v753_v55  ;;  %v756_v45 = vsel %vm366_vm0, %v2716_v38, 0.0 }
  0xa6   : > { %v530_v50 = vsub.f32 %v3732_v17, %v434_v2  ;;  %3736 = vst [vmem:[#allocation27_spill] sm:$0xff] %v2726_v21  ;;  %v904_v39 = vmul.f32 %v2716_v38, %v2449_v56  ;;  %v3737_v17 = vunpack.c.h.bf16 %v2316_v52  ;;  %v2734_v4 = vpop.eup %1738  ;;  %v758_v46 = vsel %vm366_vm0, %v2726_v21, 0.0 }
  0xa7   : > { %3738 = vst [vmem:[#allocation28_spill] sm:$0xff] %v2734_v4  ;;  %v891_v47 = vadd.f32 %v883_v15, %v870_v34  ;;  %v925_v41 = vmul.f32 %v2726_v21, %v2466_v49  ;;  %v581_v55 = vmul.f32 1.442695, %v506_v54  ;;  %v2740_v10 = vpop.eup %1740  ;;  %v1045_v14 = vmul.f32 %v2734_v4, %v1037_v62 }
  0xa8   : > { %v554_v12 = vsub.f32 %v3737_v17, %v434_v2  ;;  %3739 = vst [vmem:[#allocation29_spill] sm:$0xff] %v2740_v10  ;;  %v757_v37 = vadd.f32 %v756_v45, %v755_v40  ;;  %v597_v38 = vmul.f32 1.442695, %v514_v5  ;;  %v613_v7 = vmul.f32 1.442695, %v522_v51  ;;  %v2743_v52 = vpop.eup %1742 }
  0xa9   : > { %3740 = vst [vmem:[#allocation30_spill] sm:$0xff] %v2743_v52  ;;  %v760_v17 = vsel %vm366_vm0, %v2740_v10, 0.0  ;;  %v912_v25 = vadd.f32 %v904_v39, %v891_v47  ;;  %v946_v15 = vmul.f32 %v2740_v10, %v2491_v61  ;;  %1750 = vpow2.f32 %v581_v55  ;;  %v2749_v34 = vpop.eup %1744  ;;  %1053 = vst.msk [vmem:[%s2676_s19 + $0x8] sm:$0xff] %vm366_vm0, %v1045_v14 }
  0xaa   : > { %3741 = vst [vmem:[#allocation31_spill] sm:$0xff] %v2749_v34  ;;  %v759_v54 = vadd.f32 %v758_v46, %v757_v37  ;;  %v3742_v62 = vunpack.c.h.bf16 %v2319_v53  ;;  %v3743_v5 = vunpack.c.h.bf16 %v2324_v58  ;;  %1752 = vpow2.f32 %v597_v38  ;;  %v2757_v45 = vpop.eup %1746 }
  0xab   : > { %3744 = vst [vmem:[#allocation32_spill] sm:$0xff] %v2757_v45  ;;  %v762_v39 = vsel %vm366_vm0, %v2743_v52, 0.0  ;;  %v933_v47 = vadd.f32 %v925_v41, %v912_v25  ;;  %v967_v55 = vmul.f32 %v2743_v52, %v2500_v20  ;;  %1754 = vpow2.f32 %v613_v7  ;;  %v2763_v4 = vpop.eup %1748 }
  0xac   : > { %v562_v40 = vsub.f32 %v3742_v62, %v434_v2  ;;  %v570_v51 = vsub.f32 %v3743_v5, %v434_v2  ;;  %3745 = vst [vmem:[#allocation33_spill] sm:$0xff] %v2763_v4  ;;  %v761_v37 = vadd.f32 %v760_v17, %v759_v54  ;;  %v764_v53 = vsel %vm366_vm0, %v2749_v34, 0.0 }
  0xad   : > { %v988_v58 = vmul.f32 %v2749_v34, %v2505_v0  ;;  %v629_v38 = vmul.f32 1.442695, %v530_v50  ;;  %v766_v2 = vsel %vm366_vm0, %v2757_v45, 0.0  ;;  %v954_v46 = vadd.f32 %v946_v15, %v933_v47 }
  0xae   : > { %v1009_v25 = vmul.f32 %v2757_v45, %v2520_v27  ;;  %v645_v41 = vmul.f32 1.442695, %v538_v33  ;;  %v763_v14 = vadd.f32 %v762_v39, %v761_v37  ;;  %v661_v7 = vmul.f32 1.442695, %v546_v13 }
  0xaf   : > { %1756 = vpow2.f32 %v629_v38  ;;  %v677_v62 = vmul.f32 1.442695, %v554_v12  ;;  %v975_v17 = vadd.f32 %v967_v55, %v954_v46  ;;  %v693_v54 = vmul.f32 1.442695, %v562_v40 }
  0xb0   : > { %1758 = vpow2.f32 %v645_v41  ;;  %v709_v5 = vmul.f32 1.442695, %v570_v51  ;;  %v765_v52 = vadd.f32 %v764_v53, %v763_v14  ;;  %v3746_v50 = vmax.f32 %v2667_v57, %v2672_v1 }
  0xb1   : > { %1760 = vpow2.f32 %v661_v7  ;;  %v3747_v15 = vunpack.c.l.bf16 %v2645_v19  ;;  %v768_v33 = vsel %vm366_vm0, %v2763_v4, 0.0  ;;  %v996_v13 = vadd.f32 %v988_v58, %v975_v17 }
  0xb2   : > { %v439_v34 = vmax.f32 %v3746_v50, %v2688_v60  ;;  %v1030_v12 = vmul.f32 %v2763_v4, %v2552_v59  ;;  %1762 = vpow2.f32 %v677_v62  ;;  %v767_v40 = vadd.f32 %v766_v2, %v765_v52 }
  0xb3   : > { %v444_v47 = vsel %vm366_vm0, %v3747_v15, -inf  ;;  %1764 = vpow2.f32 %v693_v54  ;;  %v3748_v39 = vunpack.c.l.bf16 %v2652_v42  ;;  %v2788_v1 = vpop.eup %1750  ;;  %v1017_v60 = vadd.f32 %v1009_v25, %v996_v13 }
  0xb4   : > { %v441_v51 = vmax.f32 %v439_v34, %v2699_v26  ;;  %3749 = vst [vmem:[#allocation34_spill] sm:$0xff] %v2788_v1  ;;  %1766 = vpow2.f32 %v709_v5  ;;  %v3750_v55 = vunpack.c.l.bf16 %v2655_v36  ;;  %v3751_v53 = vunpack.c.l.bf16 %v2661_v43  ;;  %v2796_v52 = vpop.eup %1752 }
  0xb5   : > { %v446_v57 = vsel %vm366_vm0, %v3748_v39, -inf  ;;  %3752 = vst [vmem:[#allocation35_spill] sm:$0xff] %v2796_v52  ;;  %v769_v38 = vadd.f32 %v768_v33, %v767_v40  ;;  %v770_v26 = vsel %vm366_vm0, %v2788_v1, 0.0  ;;  %v871_v34 = vmul.f32 %v2788_v1, %v2430_v18  ;;  %v2803_v46 = vpop.eup %1754 }
  0xb6   : > { %v448_v37 = vsel %vm366_vm0, %v3750_v55, -inf  ;;  %v450_v58 = vsel %vm366_vm0, %v3751_v53, -inf  ;;  %v443_v2 = vmax.f32 %v441_v51, %v2704_v30  ;;  %3753 = vst [vmem:[#allocation36_spill] sm:$0xff] %v2803_v46  ;;  %v771_v25 = vsel %vm366_vm0, %v2796_v52, 0.0 }
  0xb7   : > { %v884_v41 = vmul.f32 %v2796_v52, %v2436_v8  ;;  %v3642_v14 = vunpack.c.h.bf16 %v2622_v16  ;;  %v3643_v7 = vunpack.c.h.bf16 %v2625_v22  ;;  %1768 = vrcp.f32 %v769_v38 }
  0xb8   : > { %v772_v62 = vadd.f32 %v771_v25, %v770_v26  ;;  %v773_v17 = vsel %vm366_vm0, %v2803_v46, 0.0  ;;  %v905_v30 = vmul.f32 %v2803_v46, %v2449_v56  ;;  %v1038_v54 = vadd.f32 %v1030_v12, %v1017_v60 }
  0xb9   : > { %v892_v5 = vadd.f32 %v884_v41, %v871_v34  ;;  %v445_v50 = vmax.f32 %v443_v2, %v444_v47  ;;  %v2816_v33 = vpop.eup %1756  ;;  %v452_v25 = vsel %vm366_vm0, %v3642_v14, -inf  ;;  %v3768_v46 = vunpack.c.l.bf16 %v2655_v36 }
  0xba   : > { %3754 = vst [vmem:[#allocation37_spill] sm:$0xff] %v2816_v33  ;;  %v774_v13 = vadd.f32 %v773_v17, %v772_v62  ;;  %v2821_v55 = vpop.eup %1758  ;;  %v775_v53 = vsel %vm366_vm0, %v2816_v33, 0.0  ;;  %v926_v47 = vmul.f32 %v2816_v33, %v2466_v49  ;;  %v3791_v21 = vunpack.c.h.bf16 %v2630_v32 }
  0xbb   : > { %3755 = vst [vmem:[#allocation38_spill] sm:$0xff] %v2821_v55  ;;  %v913_v38 = vadd.f32 %v905_v30, %v892_v5  ;;  %v447_v12 = vmax.f32 %v445_v50, %v446_v57  ;;  %v2827_v60 = vpop.eup %1760  ;;  %v777_v34 = vsel %vm366_vm0, %v2821_v55, 0.0  ;;  %v947_v2 = vmul.f32 %v2821_v55, %v2491_v61 }
  0xbc   : > { %3756 = vst [vmem:[#allocation39_spill] sm:$0xff] %v2827_v60  ;;  %v776_v26 = vadd.f32 %v775_v53, %v774_v13  ;;  %v2834_v41 = vpop.eup %1762  ;;  %v779_v62 = vsel %vm366_vm0, %v2827_v60, 0.0  ;;  %v968_v57 = vmul.f32 %v2827_v60, %v2500_v20  ;;  %v3795_v63 = vunpack.c.h.bf16 %v2652_v42 }
  0xbd   : > { %3757 = vst [vmem:[#allocation40_spill] sm:$0xff] %v2834_v41  ;;  %v934_v17 = vadd.f32 %v926_v47, %v913_v38  ;;  %v449_v30 = vmax.f32 %v447_v12, %v448_v37  ;;  %v2840_v5 = vpop.eup %1764  ;;  %v781_v13 = vsel %vm366_vm0, %v2834_v41, 0.0  ;;  %v989_v38 = vmul.f32 %v2834_v41, %v2505_v0 }
  0xbe   : > { %3758 = vst [vmem:[#allocation41_spill] sm:$0xff] %v2840_v5  ;;  %v778_v50 = vadd.f32 %v777_v34, %v776_v26  ;;  %v2848_v39 = vpop.eup %1766  ;;  %v453_v37 = vsel %vm366_vm0, %v3643_v7, -inf  ;;  %v783_v26 = vsel %vm366_vm0, %v2840_v5, 0.0  ;;  %v1010_v14 = vmul.f32 %v2840_v5, %v2520_v27 }
  0xbf   : > { %3759 = vst [vmem:[#allocation42_spill] sm:$0xff] %v2848_v39  ;;  %v955_v51 = vadd.f32 %v947_v2, %v934_v17  ;;  %v451_v47 = vmax.f32 %v449_v30, %v450_v58  ;;  %v785_v34 = vsel %vm366_vm0, %v2848_v39, 0.0  ;;  %v3760_v2 = vunpack.c.l.bf16 %v2622_v16 }
  0xc0   : > { %v780_v12 = vadd.f32 %v779_v62, %v778_v50  ;;  %v3761_v58 = vunpack.c.l.bf16 %v2625_v22  ;;  %v3762_v7 = vunpack.c.l.bf16 %v2630_v32  ;;  %v1031_v15 = vmul.f32 %v2848_v39, %v2552_v59 }
  0xc1   : > { %v976_v53 = vadd.f32 %v968_v57, %v955_v51  ;;  %v507_v17 = vsub.f32 %v3760_v2, %v451_v47  ;;  %v2867_v50 = vpop.eup %1768  ;;  %v3764_v41 = vunpack.c.l.bf16 %v2633_v24  ;;  %v3765_v51 = vunpack.c.l.bf16 %v2638_v29 }
  0xc2   : > { %v515_v30 = vsub.f32 %v3761_v58, %v451_v47  ;;  %v523_v62 = vsub.f32 %v3762_v7, %v451_v47  ;;  %3763 = vst [vmem:[#allocation43_spill] sm:$0xff] %v2867_v50  ;;  %v782_v40 = vadd.f32 %v781_v13, %v780_v12  ;;  %v1046_v2 = vmul.f32 %v2867_v50, %v1038_v54 }
  0xc3   : > { %v531_v5 = vsub.f32 %v3764_v41, %v451_v47  ;;  %v539_v57 = vsub.f32 %v3765_v51, %v451_v47  ;;  %v997_v60 = vadd.f32 %v989_v38, %v976_v53  ;;  %v3766_v58 = vunpack.c.l.bf16 %v2645_v19 }
  0xc4   : > { %v3767_v7 = vunpack.c.l.bf16 %v2652_v42  ;;  %v784_v13 = vadd.f32 %v783_v26, %v782_v40  ;;  %v583_v12 = vmul.f32 1.442695, %v507_v17  ;;  %v599_v4 = vmul.f32 1.442695, %v515_v30  ;;  %1054 = vst.msk [vmem:[%s2676_s19 + $0x10] sm:$0xff] %vm366_vm0, %v1046_v2  ;;  %v2888_v26 = vld [vmem:[%s2193_s30 + $0x18] sm:$0xff]  }
  0xc5   : > { %v547_v55 = vsub.f32 %v3766_v58, %v451_v47  ;;  %v454_v39 = vmax.f32 %v452_v25, %v453_v37  ;;  %v1018_v41 = vadd.f32 %v1010_v14, %v997_v60  ;;  %v563_v51 = vsub.f32 %v3768_v46, %v451_v47  ;;  %v2897_v17 = vld [vmem:[%s2193_s30 + $0x38] sm:$0xff]  }
  0xc6   : > { %v555_v33 = vsub.f32 %v3767_v7, %v451_v47  ;;  %v3769_v54 = vunpack.c.l.bf16 %v2661_v43  ;;  %v615_v38 = vmul.f32 1.442695, %v523_v62  ;;  %v786_v58 = vadd.f32 %v785_v34, %v784_v13  ;;  %v2900_v30 = vld [vmem:[%s2193_s30 + $0x58] sm:$0xff]  }
  0xc7   : > { %1770 = vpow2.f32 %v583_v12  ;;  %v631_v50 = vmul.f32 1.442695, %v531_v5  ;;  %v3653_v40 = vunpack.c.h.bf16 %v2661_v43  ;;  %v647_v25 = vmul.f32 1.442695, %v539_v57  ;;  %v2903_v62 = vld [vmem:[%s2193_s30 + $0x78] sm:$0xff]  }
  0xc8   : > { %v571_v53 = vsub.f32 %v3769_v54, %v451_v47  ;;  %1772 = vpow2.f32 %v599_v4  ;;  %v663_v14 = vmul.f32 1.442695, %v547_v55  ;;  %v679_v60 = vmul.f32 1.442695, %v555_v33  ;;  %v2913_v12 = vld [vmem:[%s2193_s30 + $0x98] sm:$0xff]  }
  0xc9   : > { %1774 = vrcp.f32 %v786_v58  ;;  %v1039_v46 = vadd.f32 %v1031_v15, %v1018_v41  ;;  %v3770_v37 = vunpack.c.h.bf16 %v2630_v32  ;;  %v3771_v34 = vunpack.c.h.bf16 %v2633_v24 }
  0xca   : > { %1776 = vpow2.f32 %v615_v38  ;;  %v695_v4 = vmul.f32 1.442695, %v563_v51  ;;  %v711_v55 = vmul.f32 1.442695, %v571_v53  ;;  %v3772_v15 = vunpack.c.h.bf16 %v2638_v29  ;;  %v2918_v51 = vld [vmem:[%s2193_s30 + $0xb8] sm:$0xff]  }
  0xcb   : > { %v455_v47 = vsel %vm366_vm0, %v3770_v37, -inf  ;;  %v457_v5 = vsel %vm366_vm0, %v3771_v34, -inf  ;;  %1778 = vpow2.f32 %v631_v50  ;;  %v3773_v2 = vunpack.c.h.bf16 %v2645_v19 }
  0xcc   : > { %v456_v33 = vmax.f32 %v454_v39, %v455_v47  ;;  %v459_v57 = vsel %vm366_vm0, %v3772_v15, -inf  ;;  %v3654_v13 = vunpack.c.l.bf16 %v2888_v26  ;;  %1780 = vpow2.f32 %v647_v25 }
  0xcd   : > { %v461_v7 = vsel %vm366_vm0, %v3773_v2, -inf  ;;  %v3655_v41 = vunpack.c.l.bf16 %v2897_v17  ;;  %v3656_v50 = vunpack.c.l.bf16 %v2900_v30  ;;  %1782 = vpow2.f32 %v663_v14  ;;  %v2935_v14 = vld [vmem:[%s2193_s30 + $0xf8] sm:$0xff]  }
  0xce   : > { %v458_v39 = vmax.f32 %v456_v33, %v457_v5  ;;  %v3774_v54 = vunpack.c.h.bf16 %v2652_v42  ;;  %v3775_v38 = vunpack.c.h.bf16 %v2655_v36  ;;  %v3657_v37 = vunpack.c.l.bf16 %v2903_v62  ;;  %v2932_v5 = vld [vmem:[%s2193_s30 + $0xd8] sm:$0xff]  }
  0xcf   : > { %1784 = vpow2.f32 %v679_v60  ;;  %v467_v47 = vsel %vm366_vm0, %v3653_v40, -inf  ;;  %v3662_v34 = vunpack.c.l.bf16 %v2913_v12  ;;  %v2938_v33 = vld [vmem:[%s2193_s30 + $0x118] sm:$0xff]   ;;  %v469_v60 = vsel %vm366_vm0, %v3654_v13, -inf }
  0xd0   : > { %v463_v53 = vsel %vm366_vm0, %v3774_v54, -inf  ;;  %v465_v58 = vsel %vm366_vm0, %v3775_v38, -inf  ;;  %v460_v25 = vmax.f32 %v458_v39, %v459_v57  ;;  %1786 = vpow2.f32 %v695_v4 }
  0xd1   : > { %v470_v57 = vsel %vm366_vm0, %v3655_v41, -inf  ;;  %1788 = vpow2.f32 %v711_v55  ;;  %v472_v54 = vsel %vm366_vm0, %v3656_v50, -inf  ;;  %v2950_v38 = vpop.eup %1770  ;;  %v474_v13 = vsel %vm366_vm0, %v3657_v37, -inf }
  0xd2   : > { %v462_v2 = vmax.f32 %v460_v25, %v461_v7  ;;  %v471_v39 = vmax.f32 %v469_v60, %v470_v57  ;;  %3776 = vst [vmem:[#allocation44_spill] sm:$0xff] %v2950_v38  ;;  %v2958_v41 = vpop.eup %1772  ;;  %v787_v55 = vsel %vm366_vm0, %v2950_v38, 0.0  ;;  %v872_v7 = vmul.f32 %v2950_v38, %v2430_v18 }
  0xd3   : > { %3777 = vst [vmem:[#allocation45_spill] sm:$0xff] %v2958_v41  ;;  %v2964_v57 = vpop.eup %1774  ;;  %v788_v50 = vsel %vm366_vm0, %v2958_v41, 0.0  ;;  %v885_v15 = vmul.f32 %v2958_v41, %v2436_v8  ;;  %v476_v37 = vsel %vm366_vm0, %v3662_v34, -inf  ;;  %v3779_v40 = vunpack.c.l.bf16 %v2918_v51 }
  0xd4   : > { %v464_v25 = vmax.f32 %v462_v2, %v463_v53  ;;  %v473_v60 = vmax.f32 %v471_v39, %v472_v54  ;;  %3778 = vst [vmem:[#allocation46_spill] sm:$0xff] %v2964_v57  ;;  %v2978_v53 = vpop.eup %1776  ;;  %v1047_v2 = vmul.f32 %v2964_v57, %v1039_v46  ;;  %v789_v39 = vadd.f32 %v788_v50, %v787_v55 }
  0xd5   : > { %v2976_v4 = vsel %vm366_vm0, %v3779_v40, -inf  ;;  %3780 = vst [vmem:[#allocation47_spill] sm:$0xff] %v2978_v53  ;;  %v2981_v45 = vpop.eup %1778  ;;  %v790_v41 = vsel %vm366_vm0, %v2978_v53, 0.0  ;;  %v893_v52 = vadd.f32 %v885_v15, %v872_v7  ;;  %v906_v34 = vmul.f32 %v2978_v53, %v2449_v56 }
  0xd6   : > { %v466_v54 = vmax.f32 %v464_v25, %v465_v58  ;;  %v475_v38 = vmax.f32 %v473_v60, %v474_v13  ;;  %3781 = vst [vmem:[#allocation48_spill] sm:$0xff] %v2981_v45  ;;  %v3782_v1 = vunpack.c.l.bf16 %v2932_v5  ;;  %v2990_v10 = vpop.eup %1780  ;;  %1055 = vst.msk [vmem:[%s2676_s19 + $0x18] sm:$0xff] %vm366_vm0, %v1047_v2  ;;  %v791_v46 = vadd.f32 %v790_v41, %v789_v39 }
  0xd7   : > { %3783 = vst [vmem:[#allocation49_spill] sm:$0xff] %v2990_v10  ;;  %v792_v13 = vsel %vm366_vm0, %v2981_v45, 0.0  ;;  %v927_v50 = vmul.f32 %v2981_v45, %v2466_v49  ;;  %v2998_v15 = vpop.eup %1782  ;;  %v794_v55 = vsel %vm366_vm0, %v2990_v10, 0.0  ;;  %v914_v7 = vadd.f32 %v906_v34, %v893_v52 }
  0xd8   : > { %v480_v40 = vsel %vm366_vm0, %v3782_v1, -inf  ;;  %v468_v58 = vmax.f32 %v466_v54, %v467_v47  ;;  %3784 = vst [vmem:[#allocation50_spill] sm:$0xff] %v2998_v15  ;;  %v948_v1 = vmul.f32 %v2990_v10, %v2491_v61  ;;  %v3785_v25 = vunpack.c.l.bf16 %v2935_v14 }
  0xd9   : > { %v3009_v60 = vpop.eup %1784  ;;  %v793_v2 = vadd.f32 %v792_v13, %v791_v46  ;;  %v796_v47 = vsel %vm366_vm0, %v2998_v15, 0.0  ;;  %v477_v39 = vmax.f32 %v475_v38, %v476_v37  ;;  %v3787_v54 = vunpack.c.l.bf16 %v2938_v33 }
  0xda   : > { %v3007_v41 = vsel %vm366_vm0, %v3785_v25, -inf  ;;  %3786 = vst [vmem:[#allocation51_spill] sm:$0xff] %v3009_v60  ;;  %v3016_v52 = vpop.eup %1786  ;;  %v798_v34 = vsel %vm366_vm0, %v3009_v60, 0.0  ;;  %v935_v10 = vadd.f32 %v927_v50, %v914_v7  ;;  %v969_v25 = vmul.f32 %v2998_v15, %v2500_v20 }
  0xdb   : > { %v484_v57 = vsel %vm366_vm0, %v3787_v54, -inf  ;;  %3788 = vst [vmem:[#allocation52_spill] sm:$0xff] %v3016_v52  ;;  %v3789_v45 = vunpack.c.h.bf16 %v2622_v16  ;;  %v3024_v13 = vpop.eup %1788  ;;  %v795_v53 = vadd.f32 %v794_v55, %v793_v2  ;;  %v990_v37 = vmul.f32 %v3009_v60, %v2505_v0 }
  0xdc   : > { %v3790_v38 = vunpack.c.h.bf16 %v2625_v22  ;;  %v524_v11 = vsub.f32 %v3791_v21, %v468_v58  ;;  %v800_v50 = vsel %vm366_vm0, %v3016_v52, 0.0  ;;  %v956_v7 = vadd.f32 %v948_v1, %v935_v10 }
  0xdd   : > { %v508_v46 = vsub.f32 %v3789_v45, %v468_v58  ;;  %v1011_v16 = vmul.f32 %v3016_v52, %v2520_v27  ;;  %v3792_v45 = vunpack.c.h.bf16 %v2633_v24  ;;  %v797_v55 = vadd.f32 %v796_v47, %v795_v53 }
  0xde   : > { %v516_v54 = vsub.f32 %v3790_v38, %v468_v58  ;;  %v802_v2 = vsel %vm366_vm0, %v3024_v13, 0.0  ;;  %v3793_v22 = vunpack.c.h.bf16 %v2638_v29  ;;  %v3794_v32 = vunpack.c.h.bf16 %v2645_v19 }
  0xdf   : > { %v532_v15 = vsub.f32 %v3792_v45, %v468_v58  ;;  %v977_v60 = vadd.f32 %v969_v25, %v956_v7  ;;  %v556_v10 = vsub.f32 %v3795_v63, %v468_v58  ;;  %v3796_v1 = vunpack.c.h.bf16 %v2655_v36 }
  0xe0   : > { %v540_v38 = vsub.f32 %v3793_v22, %v468_v58  ;;  %v548_v21 = vsub.f32 %v3794_v32, %v468_v58  ;;  %v585_v31 = vmul.f32 1.442695, %v508_v46  ;;  %v799_v24 = vadd.f32 %v798_v34, %v797_v55 }
  0xe1   : > { %v564_v52 = vsub.f32 %v3796_v1, %v468_v58  ;;  %v601_v45 = vmul.f32 1.442695, %v516_v54  ;;  %v617_v53 = vmul.f32 1.442695, %v524_v11  ;;  %v633_v47 = vmul.f32 1.442695, %v532_v15 }
  0xe2   : > { %v998_v28 = vadd.f32 %v990_v37, %v977_v60  ;;  %v3797_v6 = vunpack.c.h.bf16 %v2661_v43  ;;  %1790 = vpow2.f32 %v585_v31  ;;  %v649_v22 = vmul.f32 1.442695, %v540_v38 }
  0xe3   : > { %v801_v19 = vadd.f32 %v800_v50, %v799_v24  ;;  %v1032_v25 = vmul.f32 %v3024_v13, %v2552_v59  ;;  %1792 = vpow2.f32 %v601_v45  ;;  %v3683_v63 = vunpack.c.h.bf16 %v2888_v26 }
  0xe4   : > { %v572_v29 = vsub.f32 %v3797_v6, %v468_v58  ;;  %v1019_v42 = vadd.f32 %v1011_v16, %v998_v28  ;;  %1794 = vpow2.f32 %v617_v53  ;;  %v665_v36 = vmul.f32 1.442695, %v548_v21 }
  0xe5   : > { %v479_v34 = vmax.f32 %v477_v39, %v2976_v4  ;;  %v803_v11 = vadd.f32 %v802_v2, %v801_v19  ;;  %1796 = vpow2.f32 %v633_v47  ;;  %v681_v15 = vmul.f32 1.442695, %v556_v10 }
  0xe6   : > { %v3682_v43 = vunpack.c.h.bf16 %v2897_v17  ;;  %1798 = vpow2.f32 %v649_v22  ;;  %v697_v6 = vmul.f32 1.442695, %v564_v52  ;;  %v713_v31 = vmul.f32 1.442695, %v572_v29 }
  0xe7   : > { %v481_v58 = vmax.f32 %v479_v34, %v480_v40  ;;  %1800 = vrcp.f32 %v803_v11  ;;  %v1040_v60 = vadd.f32 %v1032_v25, %v1019_v42  ;;  %v3681_v46 = vunpack.c.h.bf16 %v2900_v30 }
  0xe8   : > { %v3680_v37 = vunpack.c.h.bf16 %v2903_v62  ;;  %1802 = vpow2.f32 %v665_v36  ;;  %v3679_v4 = vunpack.c.h.bf16 %v2913_v12  ;;  %v3678_v39 = vunpack.c.h.bf16 %v2918_v51 }
  0xe9   : > { %v483_v28 = vmax.f32 %v481_v58, %v3007_v41  ;;  %1804 = vpow2.f32 %v681_v15  ;;  %v3685_v54 = vunpack.c.h.bf16 %v2932_v5  ;;  %v3064_v40 = vsel %vm366_vm0, %v3683_v63, -inf }
  0xea   : > { %v3069_v52 = vsel %vm366_vm0, %v3682_v43, -inf  ;;  %1806 = vpow2.f32 %v697_v6  ;;  %v3684_v41 = vunpack.c.h.bf16 %v2935_v14  ;;  %v3078_v55 = vsel %vm366_vm0, %v3681_v46, -inf }
  0xeb   : > { %v485_v50 = vmax.f32 %v483_v28, %v484_v57  ;;  %1808 = vpow2.f32 %v713_v31  ;;  %v488_v16 = vmax.f32 %v3064_v40, %v3069_v52  ;;  %v3083_v2 = vsel %vm366_vm0, %v3680_v37, -inf }
  0xec   : > { %v3085_v38 = vpop.eup %1790  ;;  %v3798_v57 = vunpack.c.l.bf16 %v2888_v26  ;;  %v3799_v21 = vunpack.c.l.bf16 %v2897_v17  ;;  %v3094_v1 = vsel %vm366_vm0, %v3679_v4, -inf  ;;  %v3099_v24 = vsel %vm366_vm0, %v3678_v39, -inf }
  0xed   : > { %v3101_v45 = vpop.eup %1792  ;;  %v804_v53 = vsel %vm366_vm0, %v3085_v38, 0.0  ;;  %v873_v47 = vmul.f32 %v3085_v38, %v2430_v18  ;;  %v3800_v29 = vunpack.c.l.bf16 %v2900_v30  ;;  %v3801_v19 = vunpack.c.l.bf16 %v2903_v62 }
  0xee   : > { %v509_v32 = vsub.f32 %v3798_v57, %v485_v50  ;;  %v517_v10 = vsub.f32 %v3799_v21, %v485_v50  ;;  %v3111_v42 = vpop.eup %1794  ;;  %v805_v36 = vsel %vm366_vm0, %v3101_v45, 0.0  ;;  %v886_v34 = vmul.f32 %v3101_v45, %v2436_v8 }
  0xef   : > { %v525_v22 = vsub.f32 %v3800_v29, %v485_v50  ;;  %v533_v25 = vsub.f32 %v3801_v19, %v485_v50  ;;  %v3802_v11 = vunpack.c.l.bf16 %v2913_v12  ;;  %v3803_v6 = vunpack.c.l.bf16 %v2918_v51  ;;  %v3121_v31 = vpop.eup %1796 }
  0xf0   : > { %v806_v58 = vadd.f32 %v805_v36, %v804_v53  ;;  %v807_v28 = vsel %vm366_vm0, %v3111_v42, 0.0  ;;  %v907_v57 = vmul.f32 %v3111_v42, %v2449_v56  ;;  %v3804_v21 = vunpack.c.l.bf16 %v2932_v5  ;;  %v3129_v19 = vpop.eup %1798 }
  0xf1   : > { %v541_v15 = vsub.f32 %v3802_v11, %v485_v50  ;;  %v549_v18 = vsub.f32 %v3803_v6, %v485_v50  ;;  %v809_v8 = vsel %vm366_vm0, %v3121_v31, 0.0  ;;  %v894_v11 = vadd.f32 %v886_v34, %v873_v47  ;;  %v3135_v53 = vpop.eup %1800 }
  0xf2   : > { %v557_v29 = vsub.f32 %v3804_v21, %v485_v50  ;;  %v928_v6 = vmul.f32 %v3121_v31, %v2466_v49  ;;  %v587_v39 = vmul.f32 1.442695, %v509_v32  ;;  %3805 = vst [vmem:[#allocation53_spill] sm:$0xff] %v3135_v53  ;;  %v808_v36 = vadd.f32 %v807_v28, %v806_v58  ;;  %v3141_v37 = vpop.eup %1802 }
  0xf3   : > { %v811_v56 = vsel %vm366_vm0, %v3129_v19, 0.0  ;;  %v949_v21 = vmul.f32 %v3129_v19, %v2491_v61  ;;  %v603_v4 = vmul.f32 1.442695, %v517_v10  ;;  %v1048_v46 = vmul.f32 %v3135_v53, %v1040_v60  ;;  %v3144_v49 = vpop.eup %1804 }
  0xf4   : > { %v915_v47 = vadd.f32 %v907_v57, %v894_v11  ;;  %1810 = vpow2.f32 %v587_v39  ;;  %v619_v34 = vmul.f32 1.442695, %v525_v22  ;;  %3806 = vst [vmem:[#allocation54_spill] sm:$0xff] %v3144_v49  ;;  %v810_v32 = vadd.f32 %v809_v8, %v808_v36  ;;  %v3150_v7 = vpop.eup %1806 }
  0xf5   : > { %v3807_v43 = vunpack.c.l.bf16 %v2935_v14  ;;  %v3808_v28 = vunpack.c.l.bf16 %v2938_v33  ;;  %1812 = vpow2.f32 %v603_v4  ;;  %3809 = vst [vmem:[#allocation55_spill] sm:$0xff] %v3150_v7  ;;  %1056 = vst.msk [vmem:[%s2676_s19 + $0x20] sm:$0xff] %vm366_vm0, %v1048_v46  ;;  %v813_v61 = vsel %vm366_vm0, %v3141_v37, 0.0  ;;  %v3158_v10 = vpop.eup %1808 }
  0xf6   : > { %v936_v60 = vadd.f32 %v928_v6, %v915_v47  ;;  %v970_v39 = vmul.f32 %v3141_v37, %v2500_v20  ;;  %1814 = vpow2.f32 %v619_v34  ;;  %3810 = vst [vmem:[#allocation56_spill] sm:$0xff] %v3158_v10  ;;  %v991_v4 = vmul.f32 %v3144_v49, %v2505_v0 }
  0xf7   : > { %v565_v58 = vsub.f32 %v3807_v43, %v485_v50  ;;  %v573_v63 = vsub.f32 %v3808_v28, %v485_v50  ;;  %v812_v43 = vadd.f32 %v811_v56, %v810_v32  ;;  %v815_v50 = vsel %vm366_vm0, %v3144_v49, 0.0  ;;  %v3169_v56 = vld [vmem:[%s2201_s15 + $0x10] ss:$0 sm:$0xff] }
  0xf8   : > { %v635_v46 = vmul.f32 1.442695, %v533_v25  ;;  %v817_v22 = vsel %vm366_vm0, %v3150_v7, 0.0  ;;  %v957_v57 = vadd.f32 %v949_v21, %v936_v60  ;;  %v1012_v8 = vmul.f32 %v3150_v7, %v2520_v27  ;;  %v3172_v25 = vld [vmem:[%s2201_s15 + $0x11] ss:$0 sm:$0xff] }
  0xf9   : > { %v651_v20 = vmul.f32 1.442695, %v541_v15  ;;  %v814_v11 = vadd.f32 %v813_v61, %v812_v43  ;;  %v667_v6 = vmul.f32 1.442695, %v549_v18  ;;  %v683_v36 = vmul.f32 1.442695, %v557_v29 }
  0xfa   : > { %1816 = vpow2.f32 %v635_v46  ;;  %v978_v47 = vadd.f32 %v970_v39, %v957_v57  ;;  %v699_v34 = vmul.f32 1.442695, %v565_v58  ;;  %v715_v0 = vmul.f32 1.442695, %v573_v63  ;;  %v3182_v18 = vld [vmem:[%s2201_s15 + $0x12] ss:$0 sm:$0xff] }
  0xfb   : > { %1818 = vpow2.f32 %v651_v20  ;;  %v816_v32 = vadd.f32 %v815_v50, %v814_v11  ;;  %v490_v27 = vmax.f32 %v488_v16, %v3078_v55  ;;  %v497_v15 = vsel %vm366_vm0, %v3685_v54, -inf  ;;  %v3192_v16 = vld [vmem:[%s2201_s15 + $0x13] ss:$0 sm:$0xff]  ;;  %v3205_v39 = vld [vmem:[%s2201_s15] ss:$0 sm:$0xff] }
  0xfc   : > { %1820 = vpow2.f32 %v667_v6  ;;  %v819_v29 = vsel %vm366_vm0, %v3158_v10, 0.0  ;;  %v999_v21 = vadd.f32 %v991_v4, %v978_v47  ;;  %v1066_v63 = vmul.f32 %v2446_v48, %v3169_v56  ;;  %v3227_v11 = vld [vmem:[%s2201_s15 + $0x2] ss:$0 sm:$0xff] }
  0xfd   : > { %1822 = vpow2.f32 %v683_v36  ;;  %v818_v58 = vadd.f32 %v817_v22, %v816_v32  ;;  %v492_v40 = vmax.f32 %v490_v27, %v3083_v2  ;;  %v1079_v52 = vmul.f32 %v2459_v35, %v3172_v25 }
  0xfe   : > { %1824 = vpow2.f32 %v699_v34  ;;  %v3194_v55 = vpop.eup %1810  ;;  %v1020_v28 = vadd.f32 %v1012_v8, %v999_v21  ;;  %v1033_v61 = vmul.f32 %v3158_v10, %v2552_v59  ;;  %v1100_v48 = vmul.f32 %v2473_v3, %v3182_v18  ;;  %v3215_v3 = vld [vmem:[%s2201_s15 + $0x1] ss:$0 sm:$0xff]  ;;  %v3222_v8 = vld [vmem:[%s2201_s15 + $0x14] ss:$0 sm:$0xff]  ;;  %v3291_v10 = vld [vmem:[%s2201_s15 + $0x6] ss:$0 sm:$0xff] }
  0xff   : > { %1826 = vpow2.f32 %v715_v0  ;;  %v3200_v60 = vpop.eup %1812  ;;  %v820_v2 = vadd.f32 %v819_v29, %v818_v58  ;;  %v821_v35 = vsel %vm366_vm0, %v3194_v55, 0.0  ;;  %v874_v43 = vmul.f32 %v3205_v39, %v3194_v55  ;;  %v3243_v58 = vld [vmem:[%s2201_s15 + $0x15] ss:$0 sm:$0xff] }
 0x100   : > { %v494_v50 = vmax.f32 %v492_v40, %v3094_v1  ;;  %v3210_v4 = vpop.eup %1814  ;;  %v822_v59 = vsel %vm366_vm0, %v3200_v60, 0.0  ;;  %v887_v46 = vmul.f32 %v3215_v3, %v3200_v60  ;;  %v1087_v22 = vadd.f32 %v1079_v52, %v1066_v63 }
 0x101   : > { %v1121_v57 = vmul.f32 %v2484_v9, %v3192_v16  ;;  %1828 = vrcp.f32 %v820_v2  ;;  %v823_v20 = vadd.f32 %v822_v59, %v821_v35  ;;  %v824_v1 = vsel %vm366_vm0, %v3210_v4, 0.0  ;;  %v3255_v2 = vld [vmem:[%s2201_s15 + $0x16] ss:$0 sm:$0xff]  ;;  %v3258_v35 = vld [vmem:[%s2201_s15 + $0x17] ss:$0 sm:$0xff] }
 0x102   : > { %v908_v6 = vmul.f32 %v3227_v11, %v3210_v4  ;;  %v895_v36 = vadd.f32 %v887_v46, %v874_v43  ;;  %v496_v47 = vmax.f32 %v494_v50, %v3099_v24  ;;  %v499_v9 = vsel %vm366_vm0, %v3684_v41, -inf  ;;  %v3265_v59 = vld [vmem:[%s2201_s15 + $0x4] ss:$0 sm:$0xff]  ;;  %v3817_v41 = vld [vmem:[#allocation12_spill] sm:$0xff] }
 0x103   : > { %v1108_v34 = vadd.f32 %v1100_v48, %v1087_v22  ;;  %v1041_v32 = vadd.f32 %v1033_v61, %v1020_v28  ;;  %v825_v27 = vadd.f32 %v824_v1, %v823_v20  ;;  %v3811_v29 = vunpack.c.h.bf16 %v2938_v33  ;;  %v3250_v48 = vld [vmem:[%s2201_s15 + $0x3] ss:$0 sm:$0xff] }
 0x104   : > { %v3235_v0 = vpop.eup %1816  ;;  %v1142_v63 = vmul.f32 %v2493_v23, %v3222_v8  ;;  %v916_v52 = vadd.f32 %v908_v6, %v895_v36  ;;  %v498_v61 = vmax.f32 %v496_v47, %v497_v15  ;;  %v3274_v6 = vld [vmem:[%s2201_s15 + $0x5] ss:$0 sm:$0xff]  ;;  %v1205_v54 = vmul.f32 %v3817_v41, %v3258_v35 }
 0x105   : > { %v501_v21 = vsel %vm366_vm0, %v3811_v29, -inf  ;;  %v3245_v24 = vpop.eup %1818  ;;  %v826_v40 = vsel %vm366_vm0, %v3235_v0, 0.0  ;;  %v929_v28 = vmul.f32 %v3250_v48, %v3235_v0  ;;  %v1129_v22 = vadd.f32 %v1121_v57, %v1108_v34  ;;  %v3816_v57 = vld [vmem:[#allocation11_spill] sm:$0xff] }
 0x106   : > { %3812 = vst [vmem:[#allocation57_spill] sm:$0xff] %v3245_v24  ;;  %v3260_v23 = vpop.eup %1820  ;;  %v827_v43 = vadd.f32 %v826_v40, %v825_v27  ;;  %v828_v50 = vsel %vm366_vm0, %v3245_v24, 0.0  ;;  %v950_v46 = vmul.f32 %v3265_v59, %v3245_v24  ;;  %v500_v47 = vmax.f32 %v498_v61, %v499_v9 }
 0x107   : > { %3813 = vst [vmem:[#allocation58_spill] sm:$0xff] %v3260_v23  ;;  %v3269_v20 = vpop.eup %1822  ;;  %v830_v15 = vsel %vm366_vm0, %v3260_v23, 0.0  ;;  %v937_v1 = vadd.f32 %v929_v28, %v916_v52  ;;  %v971_v36 = vmul.f32 %v3274_v6, %v3260_v23  ;;  %v1163_v40 = vmul.f32 %v2502_v44, %v3243_v58 }
 0x108   : > { %3814 = vst [vmem:[#allocation59_spill] sm:$0xff] %v3269_v20  ;;  %v3278_v27 = vpop.eup %1824  ;;  %v829_v29 = vadd.f32 %v828_v50, %v827_v43  ;;  %v1184_v34 = vmul.f32 %v3816_v57, %v3255_v2  ;;  %v832_v28 = vsel %vm366_vm0, %v3269_v20, 0.0  ;;  %v992_v9 = vmul.f32 %v3291_v10, %v3269_v20  ;;  %v3298_v50 = vld [vmem:[%s2201_s15 + $0x7] ss:$0 sm:$0xff] }
 0x109   : > { %3815 = vst [vmem:[#allocation60_spill] sm:$0xff] %v3278_v27  ;;  %v3286_v52 = vpop.eup %1826  ;;  %v958_v53 = vadd.f32 %v950_v46, %v937_v1  ;;  %v502_v61 = vmax.f32 %v500_v47, %v501_v21  ;;  %v834_v44 = vsel %vm366_vm0, %v3278_v27, 0.0  ;;  %v1013_v41 = vmul.f32 %v3298_v50, %v3278_v27 }
 0x10a   : > { %v831_v43 = vadd.f32 %v830_v15, %v829_v29  ;;  %v1150_v57 = vadd.f32 %v1142_v63, %v1129_v22  ;;  %v3818_v23 = vunpack.c.h.bf16 %v2888_v26  ;;  %v3819_v1 = vunpack.c.h.bf16 %v2897_v17 }
 0x10b   : > { %v979_v7 = vadd.f32 %v971_v36, %v958_v53  ;;  %v3820_v21 = vunpack.c.h.bf16 %v2900_v30  ;;  %v3308_v47 = vpop.eup %1828  ;;  %v836_v20 = vsel %vm366_vm0, %v3286_v52, 0.0  ;;  %v3821_v63 = vunpack.c.h.bf16 %v2903_v62 }
 0x10c   : > { %v510_v46 = vsub.f32 %v3818_v23, %v502_v61  ;;  %v518_v49 = vsub.f32 %v3819_v1, %v502_v61  ;;  %v833_v29 = vadd.f32 %v832_v28, %v831_v43  ;;  %v3822_v26 = vunpack.c.h.bf16 %v2913_v12 }
 0x10d   : > { %v526_v15 = vsub.f32 %v3820_v21, %v502_v61  ;;  %v534_v53 = vsub.f32 %v3821_v63, %v502_v61  ;;  %v1049_v17 = vmul.f32 %v3308_v47, %v1041_v32  ;;  %v1000_v22 = vadd.f32 %v992_v9, %v979_v7  ;;  %v3324_v63 = vld [vmem:[%s2201_s15 + $0x8] ss:$0 sm:$0xff]  ;;  %v3331_v9 = vld [vmem:[%s2201_s15 + $0x18] ss:$0 sm:$0xff] }
 0x10e   : > { %v542_v23 = vsub.f32 %v3822_v26, %v502_v61  ;;  %v3823_v30 = vunpack.c.h.bf16 %v2918_v51  ;;  %v3824_v1 = vunpack.c.h.bf16 %v2932_v5  ;;  %v835_v28 = vadd.f32 %v834_v44, %v833_v29  ;;  %v3827_v26 = vld [vmem:[#allocation13_spill] sm:$0xff] }
 0x10f   : > { %v589_v43 = vmul.f32 1.442695, %v510_v46  ;;  %v605_v27 = vmul.f32 1.442695, %v518_v49  ;;  %v1171_v24 = vadd.f32 %v1163_v40, %v1150_v57  ;;  %1057 = vst.msk [vmem:[%s2676_s19 + $0x28] sm:$0xff] %vm366_vm0, %v1049_v17  ;;  %v1021_v62 = vadd.f32 %v1013_v41, %v1000_v22 }
 0x110   : > { %v550_v36 = vsub.f32 %v3823_v30, %v502_v61  ;;  %v558_v21 = vsub.f32 %v3824_v1, %v502_v61  ;;  %v1034_v12 = vmul.f32 %v3324_v63, %v3286_v52  ;;  %v3825_v7 = vunpack.c.h.bf16 %v2935_v14  ;;  %v3828_v14 = vld [vmem:[#allocation14_spill] sm:$0xff] }
 0x111   : > { %v621_v51 = vmul.f32 1.442695, %v526_v15  ;;  %v837_v5 = vadd.f32 %v836_v20, %v835_v28  ;;  %v3826_v44 = vunpack.c.h.bf16 %v2938_v33  ;;  %1830 = vpow2.f32 %v589_v43  ;;  %v3829_v20 = vld [vmem:[#allocation15_spill] sm:$0xff]  ;;  %v3832_v1 = vld [vmem:[#allocation18_spill] sm:$0xff] }
 0x112   : > { %v566_v32 = vsub.f32 %v3825_v7, %v502_v61  ;;  %v637_v49 = vmul.f32 1.442695, %v534_v53  ;;  %1832 = vpow2.f32 %v605_v27  ;;  %v653_v40 = vmul.f32 1.442695, %v542_v23  ;;  %v3833_v43 = vld [vmem:[#allocation19_spill] sm:$0xff] }
 0x113   : > { %v574_v46 = vsub.f32 %v3826_v44, %v502_v61  ;;  %v669_v41 = vmul.f32 1.442695, %v550_v36  ;;  %v685_v57 = vmul.f32 1.442695, %v558_v21  ;;  %1834 = vrcp.f32 %v837_v5  ;;  %v3830_v61 = vld [vmem:[#allocation16_spill] sm:$0xff]  ;;  %v3836_v5 = vld [vmem:[#allocation26_spill] sm:$0xff] }
 0x114   : > { %v1192_v29 = vadd.f32 %v1184_v34, %v1171_v24  ;;  %v1226_v17 = vmul.f32 %v3827_v26, %v3331_v9  ;;  %v1067_v15 = vmul.f32 %v3828_v14, %v3169_v56  ;;  %v1042_v22 = vadd.f32 %v1034_v12, %v1021_v62  ;;  %v3831_v34 = vld [vmem:[#allocation17_spill] sm:$0xff]  ;;  %v3834_v12 = vld [vmem:[#allocation24_spill] sm:$0xff]  ;;  %v3840_v14 = vld [vmem:[#allocation22_spill] sm:$0xff] }
 0x115   : > { %1836 = vpow2.f32 %v621_v51  ;;  %v1080_v33 = vmul.f32 %v3829_v20, %v3172_v25  ;;  %v1101_v53 = vmul.f32 %v3830_v61, %v3182_v18  ;;  %v701_v27 = vmul.f32 1.442695, %v566_v32  ;;  %v3841_v20 = vld [vmem:[#allocation27_spill] sm:$0xff] }
 0x116   : > { %1838 = vpow2.f32 %v637_v49  ;;  %v717_v23 = vmul.f32 1.442695, %v574_v46  ;;  %v1213_v30 = vadd.f32 %v1205_v54, %v1192_v29  ;;  %v1122_v36 = vmul.f32 %v3831_v34, %v3192_v16  ;;  %v3835_v54 = vld [vmem:[#allocation25_spill] sm:$0xff]  ;;  %v3837_v46 = vld [vmem:[#allocation23_spill] sm:$0xff] }
 0x117   : > { %1840 = vpow2.f32 %v653_v40  ;;  %v1088_v24 = vadd.f32 %v1080_v33, %v1067_v15  ;;  %v1143_v21 = vmul.f32 %v3832_v1, %v3222_v8  ;;  %v1164_v62 = vmul.f32 %v3833_v43, %v3243_v58  ;;  %v3838_v40 = vld [vmem:[#allocation20_spill] sm:$0xff]  ;;  %v3839_v29 = vld [vmem:[#allocation21_spill] sm:$0xff]  ;;  %v3844_v34 = vld [vmem:[#allocation31_spill] sm:$0xff] }
 0x118   : > { %1842 = vpow2.f32 %v669_v41  ;;  %v1234_v28 = vadd.f32 %v1226_v17, %v1213_v30  ;;  %v1068_v7 = vmul.f32 %v3834_v12, %v3169_v56  ;;  %v1081_v51 = vmul.f32 %v3835_v54, %v3172_v25  ;;  %v3843_v30 = vld [vmem:[#allocation30_spill] sm:$0xff] }
 0x119   : > { %1844 = vpow2.f32 %v685_v57  ;;  %v1109_v32 = vadd.f32 %v1101_v53, %v1088_v24  ;;  %v1102_v44 = vmul.f32 %v3836_v5, %v3182_v18  ;;  %v1185_v41 = vmul.f32 %v3838_v40, %v3255_v2  ;;  %v3842_v53 = vld [vmem:[#allocation29_spill] sm:$0xff] }
 0x11a   : > { %1846 = vpow2.f32 %v701_v27  ;;  %v1242_v49 = vmul.f32 %v3837_v46, %v1234_v28  ;;  %v1206_v26 = vmul.f32 %v3839_v29, %v3258_v35  ;;  %v1227_v57 = vmul.f32 %v3840_v14, %v3331_v9  ;;  %v3846_v46 = vld [vmem:[#allocation35_spill] sm:$0xff] }
 0x11b   : > { %v1130_v17 = vadd.f32 %v1122_v36, %v1109_v32  ;;  %v1089_v15 = vadd.f32 %v1081_v51, %v1068_v7  ;;  %v1123_v33 = vmul.f32 %v3841_v20, %v3192_v16  ;;  %v3364_v61 = vpop.eup %1830  ;;  %1848 = vpow2.f32 %v717_v23  ;;  %v3845_v51 = vld [vmem:[#allocation34_spill] sm:$0xff]  ;;  %v3847_v20 = vld [vmem:[#allocation32_spill] sm:$0xff] }
 0x11c   : > { %1422 = vst.msk [vmem:[%s2676_s19 + $0x40] sm:$0xff] %vm366_vm0, %v1242_v49  ;;  %v1144_v27 = vmul.f32 %v3842_v53, %v3222_v8  ;;  %v1165_v24 = vmul.f32 %v3843_v30, %v3243_v58  ;;  %v1186_v36 = vmul.f32 %v3844_v34, %v3255_v2  ;;  %v3374_v1 = vpop.eup %1832  ;;  %v838_v28 = vsel %vm366_vm0, %v3364_v61, 0.0 }
 0x11d   : > { %v875_v43 = vmul.f32 %v3205_v39, %v3364_v61  ;;  %v1151_v23 = vadd.f32 %v1143_v21, %v1130_v17  ;;  %v1110_v12 = vadd.f32 %v1102_v44, %v1089_v15  ;;  %v3380_v7 = vpop.eup %1834  ;;  %v839_v32 = vsel %vm366_vm0, %v3374_v1, 0.0 }
 0x11e   : > { %v888_v54 = vmul.f32 %v3215_v3, %v3374_v1  ;;  %v1069_v5 = vmul.f32 %v3845_v51, %v3169_v56  ;;  %v1082_v49 = vmul.f32 %v3846_v46, %v3172_v25  ;;  %v1050_v39 = vmul.f32 %v3380_v7, %v1042_v22 }
 0x11f   : > { %v3390_v40 = vpop.eup %1836  ;;  %v840_v21 = vadd.f32 %v839_v32, %v838_v28  ;;  %v1172_v44 = vadd.f32 %v1164_v62, %v1151_v23  ;;  %v1131_v29 = vadd.f32 %v1123_v33, %v1110_v12  ;;  %v1207_v53 = vmul.f32 %v3847_v20, %v3258_v35 }
 0x120   : > { %v3393_v17 = vpop.eup %1838  ;;  %v841_v14 = vsel %vm366_vm0, %v3390_v40, 0.0  ;;  %v896_v15 = vadd.f32 %v888_v54, %v875_v43  ;;  %v909_v3 = vmul.f32 %v3227_v11, %v3390_v40  ;;  %1058 = vst.msk [vmem:[%s2676_s19 + $0x30] sm:$0xff] %vm366_vm0, %v1050_v39  ;;  %v1090_v46 = vadd.f32 %v1082_v49, %v1069_v5  ;;  %v3848_v39 = vld [vmem:[#allocation36_spill] sm:$0xff] }
 0x121   : > { %v3401_v30 = vpop.eup %1840  ;;  %v842_v22 = vadd.f32 %v841_v14, %v840_v21  ;;  %v843_v62 = vsel %vm366_vm0, %v3393_v17, 0.0  ;;  %v930_v33 = vmul.f32 %v3250_v48, %v3393_v17  ;;  %v1193_v34 = vadd.f32 %v1185_v41, %v1172_v44 }
 0x122   : > { %v3409_v28 = vpop.eup %1842  ;;  %v845_v11 = vsel %vm366_vm0, %v3401_v30, 0.0  ;;  %v917_v43 = vadd.f32 %v909_v3, %v896_v15  ;;  %v951_v23 = vmul.f32 %v3265_v59, %v3401_v30  ;;  %v1152_v12 = vadd.f32 %v1144_v27, %v1131_v29 }
 0x123   : > { %v3415_v32 = vpop.eup %1844  ;;  %v844_v54 = vadd.f32 %v843_v62, %v842_v22  ;;  %v1214_v51 = vadd.f32 %v1206_v26, %v1193_v34  ;;  %v1103_v21 = vmul.f32 %v3848_v39, %v3182_v18  ;;  %v847_v41 = vsel %vm366_vm0, %v3409_v28, 0.0  ;;  %v3849_v26 = vld [vmem:[#allocation33_spill] sm:$0xff]  ;;  %v3850_v62 = vld [vmem:[#allocation28_spill] sm:$0xff] }
 0x124   : > { %v3419_v48 = vpop.eup %1846  ;;  %v938_v44 = vadd.f32 %v930_v33, %v917_v43  ;;  %v972_v14 = vmul.f32 %v3274_v6, %v3409_v28  ;;  %v1173_v15 = vadd.f32 %v1165_v24, %v1152_v12  ;;  %v849_v27 = vsel %vm366_vm0, %v3415_v32, 0.0 }
 0x125   : > { %v846_v59 = vadd.f32 %v845_v11, %v844_v54  ;;  %v1235_v29 = vadd.f32 %v1227_v57, %v1214_v51  ;;  %v1228_v5 = vmul.f32 %v3849_v26, %v3331_v9  ;;  %v3429_v49 = vpop.eup %1848  ;;  %v851_v3 = vsel %vm366_vm0, %v3419_v48, 0.0  ;;  %v3851_v57 = vld [vmem:[#allocation37_spill] sm:$0xff]  ;;  %v3852_v51 = vld [vmem:[#allocation38_spill] sm:$0xff] }
 0x126   : > { %v959_v20 = vadd.f32 %v951_v23, %v938_v44  ;;  %v993_v22 = vmul.f32 %v3291_v10, %v3415_v32  ;;  %v1194_v6 = vadd.f32 %v1186_v36, %v1173_v15  ;;  %v1111_v34 = vadd.f32 %v1103_v21, %v1090_v46  ;;  %v3853_v46 = vld [vmem:[#allocation39_spill] sm:$0xff] }
 0x127   : > { %v848_v24 = vadd.f32 %v847_v41, %v846_v59  ;;  %v1243_v33 = vmul.f32 %v3850_v62, %v1235_v29  ;;  %v1124_v11 = vmul.f32 %v3851_v57, %v3192_v16  ;;  %v1014_v12 = vmul.f32 %v3298_v50, %v3419_v48  ;;  %v3856_v29 = vld [vmem:[#allocation45_spill] sm:$0xff]  ;;  %v3858_v62 = vld [vmem:[#allocation43_spill] sm:$0xff] }
 0x128   : > { %v980_v43 = vadd.f32 %v972_v14, %v959_v20  ;;  %v1215_v54 = vadd.f32 %v1207_v53, %v1194_v6  ;;  %v1145_v39 = vmul.f32 %v3852_v51, %v3222_v8  ;;  %v853_v10 = vsel %vm366_vm0, %v3429_v49, 0.0  ;;  %v3854_v14 = vld [vmem:[#allocation40_spill] sm:$0xff]  ;;  %v3857_v20 = vld [vmem:[#allocation47_spill] sm:$0xff]  ;;  %v3861_v51 = vld [vmem:[#allocation42_spill] sm:$0xff] }
 0x129   : > { %v850_v23 = vadd.f32 %v849_v27, %v848_v24  ;;  %1423 = vst.msk [vmem:[%s2676_s19 + $0x48] sm:$0xff] %vm366_vm0, %v1243_v33  ;;  %v1132_v36 = vadd.f32 %v1124_v11, %v1111_v34  ;;  %v1166_v21 = vmul.f32 %v3853_v46, %v3243_v58  ;;  %v1187_v50 = vmul.f32 %v3854_v14, %v3255_v2  ;;  %v3855_v53 = vld [vmem:[#allocation44_spill] sm:$0xff]  ;;  %v3859_v33 = vld [vmem:[#allocation41_spill] sm:$0xff] }
 0x12a   : > { %v1001_v41 = vadd.f32 %v993_v22, %v980_v43  ;;  %v1236_v44 = vadd.f32 %v1228_v5, %v1215_v54  ;;  %v1070_v15 = vmul.f32 %v3855_v53, %v3169_v56  ;;  %v1083_v26 = vmul.f32 %v3856_v29, %v3172_v25  ;;  %v3863_v53 = vld [vmem:[#allocation50_spill] sm:$0xff] }
 0x12b   : > { %v852_v59 = vadd.f32 %v851_v3, %v850_v23  ;;  %v1153_v27 = vadd.f32 %v1145_v39, %v1132_v36  ;;  %v1104_v6 = vmul.f32 %v3857_v20, %v3182_v18  ;;  %v1035_v22 = vmul.f32 %v3324_v63, %v3429_v49  ;;  %v3860_v3 = vld [vmem:[#allocation48_spill] sm:$0xff] }
 0x12c   : > { %v1022_v24 = vadd.f32 %v1014_v12, %v1001_v41  ;;  %v1244_v5 = vmul.f32 %v3858_v62, %v1236_v44  ;;  %v1208_v34 = vmul.f32 %v3859_v33, %v3258_v35  ;;  %v1091_v43 = vadd.f32 %v1083_v26, %v1070_v15  ;;  %v3862_v12 = vld [vmem:[#allocation49_spill] sm:$0xff] }
 0x12d   : > { %v854_v57 = vadd.f32 %v853_v10, %v852_v59  ;;  %v1174_v11 = vadd.f32 %v1166_v21, %v1153_v27  ;;  %v1125_v54 = vmul.f32 %v3860_v3, %v3192_v16  ;;  %v1229_v39 = vmul.f32 %v3861_v51, %v3331_v9  ;;  %v3864_v59 = vld [vmem:[#allocation51_spill] sm:$0xff] }
 0x12e   : > { %1424 = vst.msk [vmem:[%s2676_s19 + $0x50] sm:$0xff] %vm366_vm0, %v1244_v5  ;;  %v1146_v23 = vmul.f32 %v3862_v12, %v3222_v8  ;;  %v1112_v36 = vadd.f32 %v1104_v6, %v1091_v43  ;;  %v1071_v46 = vmul.f32 %v3085_v38, %v3169_v56  ;;  %v1084_v10 = vmul.f32 %v3101_v45, %v3172_v25  ;;  %v3865_v6 = vld [vmem:[#allocation52_spill] sm:$0xff]  ;;  %v3869_v12 = vld [vmem:[#allocation58_spill] sm:$0xff] }
 0x12f   : > { %1850 = vrcp.f32 %v854_v57  ;;  %v1195_v63 = vadd.f32 %v1187_v50, %v1174_v11  ;;  %v1105_v21 = vmul.f32 %v3111_v42, %v3182_v18  ;;  %v1043_v41 = vadd.f32 %v1035_v22, %v1022_v24  ;;  %v3867_v11 = vld [vmem:[#allocation57_spill] sm:$0xff] }
 0x130   : > { %v1133_v14 = vadd.f32 %v1125_v54, %v1112_v36  ;;  %v1167_v15 = vmul.f32 %v3863_v53, %v3243_v58  ;;  %v1188_v27 = vmul.f32 %v3864_v59, %v3255_v2  ;;  %v1092_v50 = vadd.f32 %v1084_v10, %v1071_v46 }
 0x131   : > { %v1216_v44 = vadd.f32 %v1208_v34, %v1195_v63  ;;  %v1126_v29 = vmul.f32 %v3121_v31, %v3192_v16  ;;  %v1072_v38 = vmul.f32 %v3194_v55, %v3169_v56  ;;  %v1085_v42 = vmul.f32 %v3200_v60, %v3172_v25  ;;  %v3866_v55 = vld [vmem:[#allocation46_spill] sm:$0xff] }
 0x132   : > { %v1154_v26 = vadd.f32 %v1146_v23, %v1133_v14  ;;  %v1106_v20 = vmul.f32 %v3210_v4, %v3182_v18  ;;  %v1209_v24 = vmul.f32 %v3865_v6, %v3258_v35  ;;  %v1230_v22 = vmul.f32 %v3024_v13, %v3331_v9 }
 0x133   : > { %v1237_v45 = vadd.f32 %v1229_v39, %v1216_v44  ;;  %v1113_v62 = vadd.f32 %v1105_v21, %v1092_v50  ;;  %v1147_v31 = vmul.f32 %v3129_v19, %v3222_v8  ;;  %v1093_v34 = vadd.f32 %v1085_v42, %v1072_v38  ;;  %v3868_v39 = vld [vmem:[#allocation54_spill] sm:$0xff]  ;;  %v3874_v50 = vld [vmem:[#allocation53_spill] sm:$0xff] }
 0x134   : > { %v1175_v33 = vadd.f32 %v1167_v15, %v1154_v26  ;;  %v1127_v60 = vmul.f32 %v3235_v0, %v3192_v16  ;;  %v1168_v4 = vmul.f32 %v3141_v37, %v3243_v58  ;;  %v1148_v43 = vmul.f32 %v3867_v11, %v3222_v8 }
 0x135   : > { %v1245_v5 = vmul.f32 %v3866_v55, %v1237_v45  ;;  %v1134_v57 = vadd.f32 %v1126_v29, %v1113_v62  ;;  %v1073_v13 = vmul.f32 %v3364_v61, %v3169_v56  ;;  %v1114_v3 = vadd.f32 %v1106_v20, %v1093_v34 }
 0x136   : > { %v1196_v19 = vadd.f32 %v1188_v27, %v1175_v33  ;;  %v1086_v54 = vmul.f32 %v3374_v1, %v3172_v25  ;;  %v1107_v0 = vmul.f32 %v3390_v40, %v3182_v18  ;;  %v1189_v37 = vmul.f32 %v3868_v39, %v3255_v2  ;;  %v3870_v1 = vld [vmem:[#allocation55_spill] sm:$0xff] }
 0x137   : > { %1425 = vst.msk [vmem:[%s2676_s19 + $0x58] sm:$0xff] %vm366_vm0, %v1245_v5  ;;  %v1155_v51 = vadd.f32 %v1147_v31, %v1134_v57  ;;  %v1169_v23 = vmul.f32 %v3869_v12, %v3243_v58  ;;  %v1135_v61 = vadd.f32 %v1127_v60, %v1114_v3  ;;  %v1128_v46 = vmul.f32 %v3393_v17, %v3192_v16  ;;  %v3871_v40 = vld [vmem:[#allocation59_spill] sm:$0xff]  ;;  %v3872_v16 = vld [vmem:[#allocation56_spill] sm:$0xff] }
 0x138   : > { %v1217_v56 = vadd.f32 %v1209_v24, %v1196_v19  ;;  %v1094_v36 = vadd.f32 %v1086_v54, %v1073_v13  ;;  %v1210_v18 = vmul.f32 %v3870_v1, %v3258_v35  ;;  %v1190_v21 = vmul.f32 %v3871_v40, %v3255_v2 }
 0x139   : > { %v1851_v63 = vpop.eup %1850  ;;  %v1176_v25 = vadd.f32 %v1168_v4, %v1155_v51  ;;  %v1156_v14 = vadd.f32 %v1148_v43, %v1135_v61  ;;  %v1149_v15 = vmul.f32 %v3401_v30, %v3222_v8  ;;  %v1231_v17 = vmul.f32 %v3872_v16, %v3331_v9 }
 0x13a   : > { %v1051_v10 = vmul.f32 %v1851_v63, %v1043_v41  ;;  %v1238_v44 = vadd.f32 %v1230_v22, %v1217_v56  ;;  %v1115_v53 = vadd.f32 %v1107_v0, %v1094_v36  ;;  %v3873_v41 = vld [vmem:[#allocation60_spill] sm:$0xff]  ;;  %v1170_v26 = vmul.f32 %v3409_v28, %v3243_v58 }
 0x13b   : > { %v1197_v59 = vadd.f32 %v1189_v37, %v1176_v25  ;;  %v1211_v27 = vmul.f32 %v3873_v41, %v3258_v35  ;;  %v1177_v38 = vadd.f32 %v1169_v23, %v1156_v14  ;;  %v1232_v30 = vmul.f32 %v3286_v52, %v3331_v9 }
 0x13c   : > { %1059 = vst.msk [vmem:[%s2676_s19 + $0x38] sm:$0xff] %vm366_vm0, %v1051_v10  ;;  %v1246_v29 = vmul.f32 %v3874_v50, %v1238_v44  ;;  %v1136_v45 = vadd.f32 %v1128_v46, %v1115_v53  ;;  %v1191_v6 = vmul.f32 %v3415_v32, %v3255_v2  ;;  %v1212_v58 = vmul.f32 %v3419_v48, %v3258_v35 }
 0x13d   : > { %v1218_v42 = vadd.f32 %v1210_v18, %v1197_v59  ;;  %v1198_v8 = vadd.f32 %v1190_v21, %v1177_v38  ;;  %v1233_v52 = vmul.f32 %v3429_v49, %v3331_v9 }
 0x13e   : > { %1426 = vst.msk [vmem:[%s2676_s19 + $0x60] sm:$0xff] %vm366_vm0, %v1246_v29  ;;  %v1157_v20 = vadd.f32 %v1149_v15, %v1136_v45 }
 0x13f   : > { %v1239_v24 = vadd.f32 %v1231_v17, %v1218_v42  ;;  %v1219_v22 = vadd.f32 %v1211_v27, %v1198_v8 }
 0x140   : > { %v1178_v62 = vadd.f32 %v1170_v26, %v1157_v20 }
 0x141   : > { %v1247_v28 = vmul.f32 %v3308_v47, %v1239_v24  ;;  %v1240_v31 = vadd.f32 %v1232_v30, %v1219_v22 }
 0x142   : > { %v1199_v55 = vadd.f32 %v1191_v6, %v1178_v62 }
 0x143   : > { %1427 = vst.msk [vmem:[%s2676_s19 + $0x68] sm:$0xff] %vm366_vm0, %v1247_v28  ;;  %v1248_v2 = vmul.f32 %v3380_v7, %v1240_v31 }
 0x144   : > { %v1220_v32 = vadd.f32 %v1212_v58, %v1199_v55 }
 0x145   : > { %1428 = vst.msk [vmem:[%s2676_s19 + $0x70] sm:$0xff] %vm366_vm0, %v1248_v2 }
 0x146   : > { %v1241_v5 = vadd.f32 %v1233_v52, %v1220_v32 }
 0x148   : > { %v1249_v35 = vmul.f32 %v1851_v63, %v1241_v5 }
 0x14a   : > { %1429 = vst.msk [vmem:[%s2676_s19 + $0x78] sm:$0xff] %vm366_vm0, %v1249_v35 }
 0x14b   : > { %1934 = shalt.err (!%p1931_p9)
}
 0x14c   : > { %s1935_s27 = scalar_lea.hbm %s3550_s8, 2048  ;;  %s1939_s25 = scalar_lea.hbm %s3605_s2, 4096 }
 0x14d   : > { %p1936_p1 = scmp.ne.s32.totalorder %s3550_s8, %s1935_s27  ;;  %p1940_p4 = scmp.lt.u32.totalorder %s3550_s8, %s3605_s2 }
 0x14e   : > { %p1941_p6 = scmp.lt.u32.totalorder %s1939_s25, %s1935_s27  ;;  %p1943_p0 = scmp.lt.u32.totalorder %s1935_s27, %s3550_s8 }
 0x14f   : > { %p1937_p5 = pnand %p1936_p1, %p3875_p3 }
 0x150   : > { %p1942_p8 = por %p1941_p6, %p1940_p4 }
 0x151   : > { %p1938_p2 = pneg %p1937_p5 }
 0x152   : > { %p1944_p11 = por %p1943_p0, %p1942_p8 }
 0x154   : > { %p1945_p13 = pnand %p1944_p11, %p1938_p2 }
 0x156   : > { %1948 = shalt.err (!%p1945_p13)
}
 0x157   : > { %s2016_s21 = smov 128   ;;  %s2017_s19 = smov 8  }
 0x158   : > { %1623 = dma.vmem_to_hbm [thread:$0]  (%p3875_p3), %s3552_s3, 2048, %s3550_s8, %s1260_s16, %s2016_s21, %s2016_s21, %s2017_s19  }
 0x159 PF: > { %s1289_s26 = sand.u32 1, %s1987_s9   ;;  %p3876_p7 = scmp.ne.s32.totalorder %s3697_s24, 0 }
 0x15a   : > { %p3877_p10 = scmp.ge.s32.totalorder %s2007_s14, 2  ;;  %s1290_s4 = scalar_lea.sflag [#allocation4], %s1289_s26 }
 0x15c   : > { %p1633_p12 = pnand %p3877_p10, %p3876_p7 }
 0x15e   : > { %1982 = dma.done.wait (!%p1633_p12), %s1290_s4, 2048  }
 0x15f   : > { %1984 = vsyncadd (!%p1633_p12), %s1290_s4, 4294965248  ;;  %s21_s14 = sadd.s32 1, %s2007_s14   ;;  %s3878_s9 = smov %s1991_s10 }
 0x160   : > { %p18_p9 = scmp.ge.s32.totalorder %s21_s14, 4   ;;  %s3879_s10 = smov %s1995_s11 }
 0x161   : > { %s3880_s11 = smov %s2089_s23  ;;  %s3881_s12 = smov %s2003_s13 }
 0x162   : > { %s3882_s13 = smov %s3884_s17  ;;  %20 = sbr.rel (!%p18_p9) target bundleno = 8 (0x8), region = 88 }
 0x169   :  { %1295 = vsyncpa [#allocation3], 1 }
 0x16a   :  { %1297 = vsyncpa [#allocation3 + $0x1], 1 }
 0x16b   :  { %1298 = vsyncpa [#allocation6], 1 }
 0x16c   :  { %1300 = vsyncpa [#allocation6 + $0x1], 1 }
 0x16d   :  { %1301 = vsyncpa [#allocation4], 1 }
 0x16e   :  { %1303 = vsyncpa [#allocation4 + $0x1], 1 }

</bundles_post_ra>
